<compile_context>
chip_gen: v7x
topology: tpu7x:2x2x1
jax: 0.10.0
libtpu: 0.0.40
codegen_flags: <defaults>
</compile_context>

<pallas_src>
import numpy as np

import jax
import jax.numpy as jnp
from jax.experimental import pallas as pl
from jax.experimental.pallas import tpu as pltpu


def _elu(x):
    # ELU(alpha=1).  exp() only sees non-positive values -> no inf on the dead branch.
    return jnp.where(x > 0, x, jnp.exp(jnp.minimum(x, 0.0)) - 1.0)


def _const_index_map(rank):
    zeros = (0,) * rank
    return lambda n: zeros


def _make_dirnet_kernel(conv_metas, dense_metas, B, n_pad, out_dims):
    """Builds the fused kernel body.  All arguments are static Python data."""
    num_conv = len(conv_metas)
    L = num_conv + len(dense_metas)
    Co, HWd = out_dims                     # final channels, final spatial Ho*Wo

    def kernel(*refs):
        p_ref = refs[0]                    # (B, H0*W0, K0*K0*C0) bf16 (layer-1 im2col)
        w_refs = refs[1:1 + L]             # bf16 weights (per-layer layouts, see wrapper)
        b_refs = refs[1 + L:1 + 2 * L]     # f32 biases
        o_ref = refs[1 + 2 * L]            # (B, Co, Ho*Wo) f32  -> NCHW directly
        scratch = refs[2 + 2 * L:]
        pad_refs = scratch[:n_pad]         # bf16 zero-halo activation buffers
        acc_ref = scratch[n_pad]           # (B*maxHW, Cmax) f32 conv accumulator
        dact_ref = scratch[n_pad + 1]      # (B*HWd, Cdense) bf16 dense-head input

        zeroed = set()                     # pad buffers zeroed so far THIS grid step

        # ----------------- conv layers (3x3, tap-accumulated matmuls) -------------
        for li, m in enumerate(conv_metas):
            K, H, W = m["K"], m["H"], m["W"]
            Cin, Cout = m["Cin"], m["Cout"]
            rows = B * H * W

            if li == 0:
                # layer 1: pre-im2col'd input -> single (B*H*W, K*K*Cin) matmul
                lhs = p_ref[...].reshape(rows, K * K * Cin)
                acc_ref[0:rows, 0:Cout] = jnp.dot(
                    lhs, w_refs[li][...], preferred_element_type=jnp.float32)
            else:
                pref = pad_refs[m["pad_idx"]]            # (B, H+2p, W+2p, Cin) bf16
                for t in range(K * K):
                    ky, kx = divmod(t, K)
                    lhs_t = pref[:, ky:ky + H, kx:kx + W, :].reshape(rows, Cin)
                    contrib = jnp.dot(lhs_t, w_refs[li][t],
                                      preferred_element_type=jnp.float32)
                    if t == 0:
                        acc_ref[0:rows, 0:Cout] = contrib
                    else:
                        acc_ref[0:rows, 0:Cout] = acc_ref[0:rows, 0:Cout] + contrib

            # ---- bias -> ELU -> pool, then stage for the next layer ---------------
            bias = b_refs[li][...]                       # (1, Cout) f32
            ph, pw = m["pool"]
            hh, ww = H // ph, W // pw
            nxt = conv_metas[li + 1] if li + 1 < num_conv else None
            if nxt is not None:
                npad = nxt["K"] // 2
                dref = pad_refs[nxt["pad_idx"]]
                if nxt["pad_idx"] not in zeroed:         # zero the halo once per step
                    dref[...] = jnp.zeros_like(dref)
                    zeroed.add(nxt["pad_idx"])
            HWin = H * W
            for b in range(B):
                y = acc_ref[b * HWin:(b + 1) * HWin, 0:Cout] + bias
                if m["elu"]:
                    y = _elu(y)
                if ph > 1 or pw > 1:
                    y = (y.reshape(hh, ph, ww, pw, Cout).sum(axis=(1, 3))
                         * (1.0 / (ph * pw)))            # (hh, ww, Cout)
                    if nxt is not None:
                        dref[b, npad:npad + hh, npad:npad + ww, :] = \
                            y.astype(jnp.bfloat16)
                    else:
                        dact_ref[b * hh * ww:(b + 1) * hh * ww, :] = \
                            y.reshape(hh * ww, Cout).astype(jnp.bfloat16)
                else:
                    if nxt is not None:
                        dref[b, npad:npad + hh, npad:npad + ww, :] = \
                            y.reshape(hh, ww, Cout).astype(jnp.bfloat16)
                    else:
                        dact_ref[b * hh * ww:(b + 1) * hh * ww, :] = \
                            y.astype(jnp.bfloat16)

        # ----------------- dense (1x1) layers, batched over B*Ho*Wo rows ----------
        act = dact_ref[...]                               # (B*HWd, C) bf16
        for dj, m in enumerate(dense_metas[:-1]):
            li = num_conv + dj
            z = jnp.dot(act, w_refs[li][...], preferred_element_type=jnp.float32)
            z = z + b_refs[li][...]
            if m["elu"]:
                z = _elu(z)
            act = z.astype(jnp.bfloat16)

        # final 1x1 layer computed transposed -> lane-dense NCHW write
        m = dense_metas[-1]
        li = L - 1
        wT = w_refs[li][...]                              # (Co, Cin) bf16
        bT = b_refs[li][...]                              # (Co, 1)  f32
        for b in range(B):
            act_b = act[b * HWd:(b + 1) * HWd, :]         # (HWd, Cin) bf16
            out_t = jax.lax.dot_general(
                wT, act_b, (((1,), (1,)), ((), ())),
                preferred_element_type=jnp.float32) + bT  # (Co, HWd)
            if m["elu"]:
                out_t = _elu(out_t)
            o_ref[b] = out_t.astype(o_ref.dtype)

    return kernel


def dirnet_forward(params, fixed_nchw, moving_nchw=None, batch_block=8):
    """fixed/moving: (N, 1, H, W) NCHW like the PyTorch module.  Returns NCHW."""
    x = fixed_nchw
    if moving_nchw is not None:
        x = jnp.concatenate([fixed_nchw, moving_nchw], axis=1)       # channel cat
    x = jnp.transpose(x, (0, 2, 3, 1)).astype(jnp.float32)           # NCHW -> NHWC
    N, H0, W0, C0 = x.shape

    # ---- batch block: several images per grid step; keep >=2 steps for v7x's 2 TCs
    B = max(1, min(int(batch_block), N))
    if N >= 2:
        B = min(B, (N + 1) // 2)
    N_pad = ((N + B - 1) // B) * B
    if N_pad != N:
        x = jnp.pad(x, ((0, N_pad - N), (0, 0), (0, 0), (0, 0)))
    grid = (N_pad // B,)

    # ---- static per-layer metadata + repacked (bf16) weights ----------------------
    conv_metas, dense_metas = [], []
    w_list, b_list = [], []
    pad_shapes = []
    h, w_sp, c = H0, W0, C0
    n_layers = len(params)
    for li, (wgt, bias, apply_elu, pool) in enumerate(params):
        K = int(wgt.shape[0])
        Cin, Cout = int(wgt.shape[2]), int(wgt.shape[3])
        assert Cin == c and K % 2 == 1
        meta = dict(K=K, H=h, W=w_sp, Cin=Cin, Cout=Cout,
                    elu=bool(apply_elu), pool=(int(pool[0]), int(pool[1])))
        wgt = jnp.asarray(wgt, jnp.float32)
        bias = jnp.asarray(bias, jnp.float32)
        if K > 1:
            assert not dense_metas, "conv (K>1) layers must precede 1x1 layers"
            if li == 0:
                w_list.append(wgt.reshape(K * K * Cin, Cout).astype(jnp.bfloat16))
            else:
                ps = (B, h + K - 1, w_sp + K - 1, Cin)
                if ps not in pad_shapes:
                    pad_shapes.append(ps)
                meta["pad_idx"] = pad_shapes.index(ps)
                w_list.append(wgt.reshape(K * K, Cin, Cout).astype(jnp.bfloat16))
            b_list.append(bias.reshape(1, Cout))
            conv_metas.append(meta)
        else:
            assert meta["pool"] == (1, 1), "1x1 layers must not pool"
            if li == n_layers - 1:                         # final layer: transposed
                w_list.append(wgt.reshape(Cin, Cout).T.astype(jnp.bfloat16))
                b_list.append(bias.reshape(Cout, 1))
            else:
                w_list.append(wgt.reshape(Cin, Cout).astype(jnp.bfloat16))
                b_list.append(bias.reshape(1, Cout))
            dense_metas.append(meta)
        ph, pw = meta["pool"]
        h, w_sp, c = h // ph, w_sp // pw, Cout
    assert conv_metas and dense_metas, "expect conv layers followed by 1x1 layers"
    Ho, Wo, Co = h, w_sp, c

    # ---- layer-1 im2col in the wrapper (tiny at these sizes) ----------------------
    # TODO(synk): at realistic H,W do this in-kernel via the halo/tap path instead.
    K0 = conv_metas[0]["K"]
    if K0 > 1:
        p = K0 // 2
        xp = jnp.pad(x, ((0, 0), (p, p), (p, p), (0, 0)))
        cols = [xp[:, ky:ky + H0, kx:kx + W0, :]
                for ky in range(K0) for kx in range(K0)]
        patches = jnp.concatenate(cols, axis=-1)
    else:
        patches = x
    Cpatch = K0 * K0 * C0
    patches = patches.reshape(N_pad, H0 * W0, Cpatch).astype(jnp.bfloat16)

    kernel = _make_dirnet_kernel(conv_metas, dense_metas, B, len(pad_shapes),
                                 (Co, Ho * Wo))

    max_hw = max(m["H"] * m["W"] for m in conv_metas)
    max_co = max(m["Cout"] for m in conv_metas)
    dense_cin = dense_metas[0]["Cin"]

    in_specs = [pl.BlockSpec((B, H0 * W0, Cpatch), lambda n: (n, 0, 0))]
    in_specs += [pl.BlockSpec(wl.shape, _const_index_map(wl.ndim)) for wl in w_list]
    in_specs += [pl.BlockSpec(bl.shape, _const_index_map(bl.ndim)) for bl in b_list]

    out = pl.pallas_call(
        kernel,
        out_shape=jax.ShapeDtypeStruct((N_pad, Co, Ho * Wo), jnp.float32),
        grid=grid,
        in_specs=in_specs,
        out_specs=pl.BlockSpec((B, Co, Ho * Wo), lambda n: (n, 0, 0)),
        scratch_shapes=([pltpu.VMEM(s, jnp.bfloat16) for s in pad_shapes]
                        + [pltpu.VMEM((B * max_hw, max_co), jnp.float32),
                           pltpu.VMEM((B * Ho * Wo, dense_cin), jnp.bfloat16)]),
        compiler_params=pltpu.CompilerParams(
            dimension_semantics=("parallel",)),
    )(patches, *w_list, *b_list)

    # lane-dense (N, Co, Ho*Wo) -> NCHW via a pure reshape (no transpose)
    return out[:N].reshape(N, Co, Ho, Wo)


def dirnet_reference(params, fixed_nchw, moving_nchw=None):
    """Pure-JAX (XLA) reference of the same forward pass, f32 throughout."""
    x = fixed_nchw
    if moving_nchw is not None:
        x = jnp.concatenate([fixed_nchw, moving_nchw], axis=1)
    x = jnp.transpose(x, (0, 2, 3, 1)).astype(jnp.float32)
    for (w, b, apply_elu, pool) in params:
        K = int(w.shape[0])
        x = jax.lax.conv_general_dilated(
            x, w.astype(jnp.float32), window_strides=(1, 1),
            padding=[(K // 2, K // 2)] * 2,
            dimension_numbers=("NHWC", "HWIO", "NHWC"),
            precision=jax.lax.Precision.HIGHEST)
        x = x + b.astype(jnp.float32)
        if apply_elu:
            x = _elu(x)
        ph, pw = int(pool[0]), int(pool[1])
        if ph > 1 or pw > 1:
            Nb, Hh, Ww, Cc = x.shape
            x = x.reshape(Nb, Hh // ph, ph, Ww // pw, pw, Cc).mean(axis=(2, 4))
    return jnp.transpose(x, (0, 3, 1, 2))


def init_dirnet_params(key, grid_spacing=4, kernel_size=3, kernels=32,
                       num_conv_layers=5, num_dense_layers=2, ndim=2):
    """Deterministic synthetic parameters matching DIRNet's layer shapes.

    Returns a list of (weight(K,K,Cin,Cout), bias(Cout,), apply_elu, pool(h,w)).
    """
    assert ndim == 2, "this script implements the 2-D variant"
    gs = np.asarray((grid_spacing,) * ndim)
    num_ds = np.log2(gs)
    assert np.all(num_ds == np.round(num_ds)), "Grid spacing should be factors of 2."
    num_ds = num_ds.astype(int)

    params = []
    in_ch = 2
    for i in range(num_conv_layers):
        factors = (i < num_ds).astype(int) + 1            # per-dim 1 or 2
        pool = tuple(int(f) for f in factors) if np.any(factors > 1) else (1, 1)
        key, kw, kb = jax.random.split(key, 3)
        fan_in = in_ch * kernel_size * kernel_size
        w = jax.random.normal(kw, (kernel_size, kernel_size, in_ch, kernels),
                              jnp.float32) / np.sqrt(fan_in)
        b = jax.random.normal(kb, (kernels,), jnp.float32) * 0.01
        params.append((w, b, True, pool))
        in_ch = kernels

    for _ in range(num_dense_layers):
        key, kw, kb = jax.random.split(key, 3)
        w = jax.random.normal(kw, (1, 1, kernels, kernels),
                              jnp.float32) / np.sqrt(kernels)
        b = jax.random.normal(kb, (kernels,), jnp.float32) * 0.01
        params.append((w, b, True, (1, 1)))

    # Final layer: zero weight & bias, no activation (as in DIRNet.__init__).
    params.append((jnp.zeros((1, 1, kernels, ndim), jnp.float32),
                   jnp.zeros((ndim,), jnp.float32), False, (1, 1)))
    return params


if __name__ == "__main__":
    key = jax.random.PRNGKey(0)
    k_params, k_fixed, k_moving, k_final, k_big = jax.random.split(key, 5)

    N, H, W = 2, 16, 16
    grid_spacing = 4
    fixed = jax.random.normal(k_fixed, (N, 1, H, W), jnp.float32)
    moving = jax.random.normal(k_moving, (N, 1, H, W), jnp.float32)

    params = init_dirnet_params(k_params, grid_spacing=grid_spacing)

    # --- 1) real DIRNet params (zero final layer): shape + exact-zero output -------
    fwd = jax.jit(lambda f, m: dirnet_forward(params, f, m))
    out = jax.block_until_ready(fwd(fixed, moving))
    expected = (N, 2, H // grid_spacing, W // grid_spacing)
    assert out.shape == expected, (out.shape, expected)
    assert bool(jnp.all(out == 0.0))

    # --- 2) numerics vs. pure-JAX reference with a NON-zero final layer ------------
    kernels, ndim = int(params[-1][0].shape[2]), int(params[-1][0].shape[3])
    kw_, kb_ = jax.random.split(k_final)
    w_nz = jax.random.normal(kw_, (1, 1, kernels, ndim), jnp.float32) / np.sqrt(kernels)
    b_nz = jax.random.normal(kb_, (ndim,), jnp.float32) * 0.01
    params_nz = params[:-1] + [(w_nz, b_nz, False, (1, 1))]

    out_nz = jax.block_until_ready(
        jax.jit(lambda f, m: dirnet_forward(params_nz, f, m))(fixed, moving))
    ref_nz = jax.block_until_ready(dirnet_reference(params_nz, fixed, moving))
    diff = float(jnp.max(jnp.abs(out_nz - ref_nz)))
    scale = float(jnp.max(jnp.abs(ref_nz)))
    assert diff <= 0.08 * scale + 0.02, (diff, scale)     # bf16-matmul tolerance

    # --- 3) batched path (B>1 per grid step, ragged N zero-padded) -----------------
    N2 = 5
    kf2, km2 = jax.random.split(k_big)
    fixed2 = jax.random.normal(kf2, (N2, 1, H, W), jnp.float32)
    moving2 = jax.random.normal(km2, (N2, 1, H, W), jnp.float32)
    out_b = jax.block_until_ready(
        jax.jit(lambda f, m: dirnet_forward(params_nz, f, m))(fixed2, moving2))
    ref_b = jax.block_until_ready(dirnet_reference(params_nz, fixed2, moving2))
    diff_b = float(jnp.max(jnp.abs(out_b - ref_b)))
    scale_b = float(jnp.max(jnp.abs(ref_b)))
    assert out_b.shape == (N2, 2, H // grid_spacing, W // grid_spacing)
    assert diff_b <= 0.08 * scale_b + 0.02, (diff_b, scale_b)

    print("KERNEL_OK")
</pallas_src>

<mosaic_0001>
module attributes {stable_mosaic.version = 11 : i64} {
  func.func @kernel(%arg0: i32, %arg1: memref<1x256x18xbf16, #tpu.memory_space<vmem>>, %arg2: memref<18x32xbf16, #tpu.memory_space<vmem>>, %arg3: memref<9x32x32xbf16, #tpu.memory_space<vmem>>, %arg4: memref<9x32x32xbf16, #tpu.memory_space<vmem>>, %arg5: memref<9x32x32xbf16, #tpu.memory_space<vmem>>, %arg6: memref<9x32x32xbf16, #tpu.memory_space<vmem>>, %arg7: memref<32x32xbf16, #tpu.memory_space<vmem>>, %arg8: memref<32x32xbf16, #tpu.memory_space<vmem>>, %arg9: memref<2x32xbf16, #tpu.memory_space<vmem>>, %arg10: memref<1x32xf32, #tpu.memory_space<vmem>>, %arg11: memref<1x32xf32, #tpu.memory_space<vmem>>, %arg12: memref<1x32xf32, #tpu.memory_space<vmem>>, %arg13: memref<1x32xf32, #tpu.memory_space<vmem>>, %arg14: memref<1x32xf32, #tpu.memory_space<vmem>>, %arg15: memref<1x32xf32, #tpu.memory_space<vmem>>, %arg16: memref<1x32xf32, #tpu.memory_space<vmem>>, %arg17: memref<2x1xf32, #tpu.memory_space<vmem>>, %arg18: memref<1x2x16xf32, #tpu.memory_space<vmem>>, %arg19: memref<1x10x10x32xbf16, #tpu.memory_space<vmem>>, %arg20: memref<1x6x6x32xbf16, #tpu.memory_space<vmem>>, %arg21: memref<256x32xf32, #tpu.memory_space<vmem>>, %arg22: memref<16x32xbf16, #tpu.memory_space<vmem>>) attributes {dimension_semantics = [#tpu.dimension_semantics<parallel>], iteration_bounds = array<i64: 2>, scalar_prefetch = 0 : i64, scratch_operands = 4 : i64, tpu.core_type = #tpu.core_type<tc>, window_params = [{transform_indices = @transform_0, window_bounds = array<i64: 1, 256, 18>}, {pipeline_mode = #tpu.pipeline_mode<synchronous>, transform_indices = @transform_1, window_bounds = array<i64: 18, 32>}, {pipeline_mode = #tpu.pipeline_mode<synchronous>, transform_indices = @transform_2, window_bounds = array<i64: 9, 32, 32>}, {pipeline_mode = #tpu.pipeline_mode<synchronous>, transform_indices = @transform_3, window_bounds = array<i64: 9, 32, 32>}, {pipeline_mode = #tpu.pipeline_mode<synchronous>, transform_indices = @transform_4, window_bounds = array<i64: 9, 32, 32>}, {pipeline_mode = #tpu.pipeline_mode<synchronous>, transform_indices = @transform_5, window_bounds = array<i64: 9, 32, 32>}, {pipeline_mode = #tpu.pipeline_mode<synchronous>, transform_indices = @transform_6, window_bounds = array<i64: 32, 32>}, {pipeline_mode = #tpu.pipeline_mode<synchronous>, transform_indices = @transform_7, window_bounds = array<i64: 32, 32>}, {pipeline_mode = #tpu.pipeline_mode<synchronous>, transform_indices = @transform_8, window_bounds = array<i64: 2, 32>}, {pipeline_mode = #tpu.pipeline_mode<synchronous>, transform_indices = @transform_9, window_bounds = array<i64: 1, 32>}, {pipeline_mode = #tpu.pipeline_mode<synchronous>, transform_indices = @transform_10, window_bounds = array<i64: 1, 32>}, {pipeline_mode = #tpu.pipeline_mode<synchronous>, transform_indices = @transform_11, window_bounds = array<i64: 1, 32>}, {pipeline_mode = #tpu.pipeline_mode<synchronous>, transform_indices = @transform_12, window_bounds = array<i64: 1, 32>}, {pipeline_mode = #tpu.pipeline_mode<synchronous>, transform_indices = @transform_13, window_bounds = array<i64: 1, 32>}, {pipeline_mode = #tpu.pipeline_mode<synchronous>, transform_indices = @transform_14, window_bounds = array<i64: 1, 32>}, {pipeline_mode = #tpu.pipeline_mode<synchronous>, transform_indices = @transform_15, window_bounds = array<i64: 1, 32>}, {pipeline_mode = #tpu.pipeline_mode<synchronous>, transform_indices = @transform_16, window_bounds = array<i64: 2, 1>}, {transform_indices = @transform_17, window_bounds = array<i64: 1, 2, 16>}]} {
    %c0 = arith.constant 0 : index
    %c0_0 = arith.constant 0 : index
    %c0_1 = arith.constant 0 : index
    %0 = vector.load %arg1[%c0, %c0_0, %c0_1] : memref<1x256x18xbf16, #tpu.memory_space<vmem>>, vector<1x256x18xbf16>
    %1 = vector.shape_cast %0 : vector<1x256x18xbf16> to vector<256x18xbf16>
    %c0_2 = arith.constant 0 : index
    %c0_3 = arith.constant 0 : index
    %2 = vector.load %arg2[%c0_2, %c0_3] : memref<18x32xbf16, #tpu.memory_space<vmem>>, vector<18x32xbf16>
    %cst = arith.constant dense<0.000000e+00> : vector<256x32xf32>
    %3 = tpu.matmul %1, %2, %cst {dimension_numbers = #tpu.dot_dimension_numbers<[1], [0], [0], [1], [0, 0, 1, 1], [], []>} : vector<256x18xbf16>, vector<18x32xbf16>, vector<256x32xf32> -> vector<256x32xf32>
    %c0_4 = arith.constant 0 : index
    %c0_5 = arith.constant 0 : index
    %4 = vector.load %arg21[%c0_4, %c0_5] : memref<256x32xf32, #tpu.memory_space<vmem>>, vector<256x32xf32>
    tpu.vector_store %arg21[%c0_4, %c0_5], %3 {strides = array<i32>} : memref<256x32xf32, #tpu.memory_space<vmem>>, vector<256x32xf32>,
    %c0_6 = arith.constant 0 : index
    %c0_7 = arith.constant 0 : index
    %5 = vector.load %arg10[%c0_6, %c0_7] : memref<1x32xf32, #tpu.memory_space<vmem>>, vector<1x32xf32>
    %cst_8 = arith.constant 0.000000e+00 : bf16
    %6 = vector.broadcast %cst_8 : bf16 to vector<1x10x10x32xbf16>
    %c0_9 = arith.constant 0 : index
    %c0_10 = arith.constant 0 : index
    %c0_11 = arith.constant 0 : index
    %c0_12 = arith.constant 0 : index
    %7 = vector.load %arg19[%c0_9, %c0_10, %c0_11, %c0_12] : memref<1x10x10x32xbf16, #tpu.memory_space<vmem>>, vector<1x10x10x32xbf16>
    tpu.vector_store %arg19[%c0_9, %c0_10, %c0_11, %c0_12], %6 {strides = array<i32>} : memref<1x10x10x32xbf16, #tpu.memory_space<vmem>>, vector<1x10x10x32xbf16>,
    %c0_13 = arith.constant 0 : index
    %c0_14 = arith.constant 0 : index
    %8 = vector.load %arg21[%c0_13, %c0_14] : memref<256x32xf32, #tpu.memory_space<vmem>>, vector<256x32xf32>
    %9 = vector.broadcast %5 : vector<1x32xf32> to vector<256x32xf32>
    %10 = arith.addf %8, %9 : vector<256x32xf32>
    %cst_15 = arith.constant 0.000000e+00 : f32
    %11 = vector.broadcast %cst_15 : f32 to vector<256x32xf32>
    %12 = arith.cmpf ogt, %10, %11 : vector<256x32xf32>
    %cst_16 = arith.constant 0.000000e+00 : f32
    %13 = vector.broadcast %cst_16 : f32 to vector<256x32xf32>
    %14 = arith.minimumf %10, %13 : vector<256x32xf32>
    %15 = math.exp %14 : vector<256x32xf32>
    %cst_17 = arith.constant 1.000000e+00 : f32
    %16 = vector.broadcast %cst_17 : f32 to vector<256x32xf32>
    %17 = arith.subf %15, %16 : vector<256x32xf32>
    %18 = arith.select %12, %10, %17 : vector<256x32xi1>, vector<256x32xf32>
    %19 = vector.shape_cast %18 : vector<256x32xf32> to vector<8x2x8x2x32xf32>
    %cst_18 = arith.constant dense<0.000000e+00> : vector<8x8x32xf32>
    %20 = vector.multi_reduction <add>, %19, %cst_18 [1, 3] : vector<8x2x8x2x32xf32> to vector<8x8x32xf32>
    %cst_19 = arith.constant 2.500000e-01 : f32
    %21 = vector.broadcast %cst_19 : f32 to vector<8x8x32xf32>
    %22 = arith.mulf %20, %21 : vector<8x8x32xf32>
    %23 = arith.truncf %22 : vector<8x8x32xf32> to vector<8x8x32xbf16>
    %c0_20 = arith.constant 0 : index
    %c1 = arith.constant 1 : index
    %c1_21 = arith.constant 1 : index
    %c0_22 = arith.constant 0 : index
    %24 = vector.load %arg19[%c0_20, %c1, %c1_21, %c0_22] : memref<1x10x10x32xbf16, #tpu.memory_space<vmem>>, vector<1x8x8x32xbf16>
    %25 = vector.shape_cast %24 : vector<1x8x8x32xbf16> to vector<8x8x32xbf16>
    %26 = vector.shape_cast %23 : vector<8x8x32xbf16> to vector<1x8x8x32xbf16>
    tpu.vector_store %arg19[%c0_20, %c1, %c1_21, %c0_22], %26 {strides = array<i32>} : memref<1x10x10x32xbf16, #tpu.memory_space<vmem>>, vector<1x8x8x32xbf16>,
    %c0_23 = arith.constant 0 : index
    %c0_24 = arith.constant 0 : index
    %c0_25 = arith.constant 0 : index
    %c0_26 = arith.constant 0 : index
    %27 = vector.load %arg19[%c0_23, %c0_24, %c0_25, %c0_26] : memref<1x10x10x32xbf16, #tpu.memory_space<vmem>>, vector<1x8x8x32xbf16>
    %28 = vector.shape_cast %27 : vector<1x8x8x32xbf16> to vector<64x32xbf16>
    %c0_27 = arith.constant 0 : index
    %c0_28 = arith.constant 0 : index
    %c0_29 = arith.constant 0 : index
    %29 = vector.load %arg3[%c0_27, %c0_28, %c0_29] : memref<9x32x32xbf16, #tpu.memory_space<vmem>>, vector<1x32x32xbf16>
    %30 = vector.shape_cast %29 : vector<1x32x32xbf16> to vector<32x32xbf16>
    %cst_30 = arith.constant dense<0.000000e+00> : vector<64x32xf32>
    %31 = tpu.matmul %28, %30, %cst_30 {dimension_numbers = #tpu.dot_dimension_numbers<[1], [0], [0], [1], [0, 0, 1, 1], [], []>} : vector<64x32xbf16>, vector<32x32xbf16>, vector<64x32xf32> -> vector<64x32xf32>
    %c0_31 = arith.constant 0 : index
    %c0_32 = arith.constant 0 : index
    %32 = vector.load %arg21[%c0_31, %c0_32] : memref<256x32xf32, #tpu.memory_space<vmem>>, vector<64x32xf32>
    tpu.vector_store %arg21[%c0_31, %c0_32], %31 {strides = array<i32>} : memref<256x32xf32, #tpu.memory_space<vmem>>, vector<64x32xf32>,
    %c0_33 = arith.constant 0 : index
    %c0_34 = arith.constant 0 : index
    %c1_35 = arith.constant 1 : index
    %c0_36 = arith.constant 0 : index
    %33 = vector.load %arg19[%c0_33, %c0_34, %c1_35, %c0_36] : memref<1x10x10x32xbf16, #tpu.memory_space<vmem>>, vector<1x8x8x32xbf16>
    %34 = vector.shape_cast %33 : vector<1x8x8x32xbf16> to vector<64x32xbf16>
    %c1_37 = arith.constant 1 : index
    %c0_38 = arith.constant 0 : index
    %c0_39 = arith.constant 0 : index
    %35 = vector.load %arg3[%c1_37, %c0_38, %c0_39] : memref<9x32x32xbf16, #tpu.memory_space<vmem>>, vector<1x32x32xbf16>
    %36 = vector.shape_cast %35 : vector<1x32x32xbf16> to vector<32x32xbf16>
    %cst_40 = arith.constant dense<0.000000e+00> : vector<64x32xf32>
    %37 = tpu.matmul %34, %36, %cst_40 {dimension_numbers = #tpu.dot_dimension_numbers<[1], [0], [0], [1], [0, 0, 1, 1], [], []>} : vector<64x32xbf16>, vector<32x32xbf16>, vector<64x32xf32> -> vector<64x32xf32>
    %c0_41 = arith.constant 0 : index
    %c0_42 = arith.constant 0 : index
    %38 = vector.load %arg21[%c0_41, %c0_42] : memref<256x32xf32, #tpu.memory_space<vmem>>, vector<64x32xf32>
    %39 = arith.addf %38, %37 : vector<64x32xf32>
    %c0_43 = arith.constant 0 : index
    %c0_44 = arith.constant 0 : index
    %40 = vector.load %arg21[%c0_43, %c0_44] : memref<256x32xf32, #tpu.memory_space<vmem>>, vector<64x32xf32>
    tpu.vector_store %arg21[%c0_43, %c0_44], %39 {strides = array<i32>} : memref<256x32xf32, #tpu.memory_space<vmem>>, vector<64x32xf32>,
    %c0_45 = arith.constant 0 : index
    %c0_46 = arith.constant 0 : index
    %c2 = arith.constant 2 : index
    %c0_47 = arith.constant 0 : index
    %41 = vector.load %arg19[%c0_45, %c0_46, %c2, %c0_47] : memref<1x10x10x32xbf16, #tpu.memory_space<vmem>>, vector<1x8x8x32xbf16>
    %42 = vector.shape_cast %41 : vector<1x8x8x32xbf16> to vector<64x32xbf16>
    %c2_48 = arith.constant 2 : index
    %c0_49 = arith.constant 0 : index
    %c0_50 = arith.constant 0 : index
    %43 = vector.load %arg3[%c2_48, %c0_49, %c0_50] : memref<9x32x32xbf16, #tpu.memory_space<vmem>>, vector<1x32x32xbf16>
    %44 = vector.shape_cast %43 : vector<1x32x32xbf16> to vector<32x32xbf16>
    %cst_51 = arith.constant dense<0.000000e+00> : vector<64x32xf32>
    %45 = tpu.matmul %42, %44, %cst_51 {dimension_numbers = #tpu.dot_dimension_numbers<[1], [0], [0], [1], [0, 0, 1, 1], [], []>} : vector<64x32xbf16>, vector<32x32xbf16>, vector<64x32xf32> -> vector<64x32xf32>
    %c0_52 = arith.constant 0 : index
    %c0_53 = arith.constant 0 : index
    %46 = vector.load %arg21[%c0_52, %c0_53] : memref<256x32xf32, #tpu.memory_space<vmem>>, vector<64x32xf32>
    %47 = arith.addf %46, %45 : vector<64x32xf32>
    %c0_54 = arith.constant 0 : index
    %c0_55 = arith.constant 0 : index
    %48 = vector.load %arg21[%c0_54, %c0_55] : memref<256x32xf32, #tpu.memory_space<vmem>>, vector<64x32xf32>
    tpu.vector_store %arg21[%c0_54, %c0_55], %47 {strides = array<i32>} : memref<256x32xf32, #tpu.memory_space<vmem>>, vector<64x32xf32>,
    %c0_56 = arith.constant 0 : index
    %c1_57 = arith.constant 1 : index
    %c0_58 = arith.constant 0 : index
    %c0_59 = arith.constant 0 : index
    %49 = vector.load %arg19[%c0_56, %c1_57, %c0_58, %c0_59] : memref<1x10x10x32xbf16, #tpu.memory_space<vmem>>, vector<1x8x8x32xbf16>
    %50 = vector.shape_cast %49 : vector<1x8x8x32xbf16> to vector<64x32xbf16>
    %c3 = arith.constant 3 : index
    %c0_60 = arith.constant 0 : index
    %c0_61 = arith.constant 0 : index
    %51 = vector.load %arg3[%c3, %c0_60, %c0_61] : memref<9x32x32xbf16, #tpu.memory_space<vmem>>, vector<1x32x32xbf16>
    %52 = vector.shape_cast %51 : vector<1x32x32xbf16> to vector<32x32xbf16>
    %cst_62 = arith.constant dense<0.000000e+00> : vector<64x32xf32>
    %53 = tpu.matmul %50, %52, %cst_62 {dimension_numbers = #tpu.dot_dimension_numbers<[1], [0], [0], [1], [0, 0, 1, 1], [], []>} : vector<64x32xbf16>, vector<32x32xbf16>, vector<64x32xf32> -> vector<64x32xf32>
    %c0_63 = arith.constant 0 : index
    %c0_64 = arith.constant 0 : index
    %54 = vector.load %arg21[%c0_63, %c0_64] : memref<256x32xf32, #tpu.memory_space<vmem>>, vector<64x32xf32>
    %55 = arith.addf %54, %53 : vector<64x32xf32>
    %c0_65 = arith.constant 0 : index
    %c0_66 = arith.constant 0 : index
    %56 = vector.load %arg21[%c0_65, %c0_66] : memref<256x32xf32, #tpu.memory_space<vmem>>, vector<64x32xf32>
    tpu.vector_store %arg21[%c0_65, %c0_66], %55 {strides = array<i32>} : memref<256x32xf32, #tpu.memory_space<vmem>>, vector<64x32xf32>,
    %c0_67 = arith.constant 0 : index
    %c1_68 = arith.constant 1 : index
    %c1_69 = arith.constant 1 : index
    %c0_70 = arith.constant 0 : index
    %57 = vector.load %arg19[%c0_67, %c1_68, %c1_69, %c0_70] : memref<1x10x10x32xbf16, #tpu.memory_space<vmem>>, vector<1x8x8x32xbf16>
    %58 = vector.shape_cast %57 : vector<1x8x8x32xbf16> to vector<64x32xbf16>
    %c4 = arith.constant 4 : index
    %c0_71 = arith.constant 0 : index
    %c0_72 = arith.constant 0 : index
    %59 = vector.load %arg3[%c4, %c0_71, %c0_72] : memref<9x32x32xbf16, #tpu.memory_space<vmem>>, vector<1x32x32xbf16>
    %60 = vector.shape_cast %59 : vector<1x32x32xbf16> to vector<32x32xbf16>
    %cst_73 = arith.constant dense<0.000000e+00> : vector<64x32xf32>
    %61 = tpu.matmul %58, %60, %cst_73 {dimension_numbers = #tpu.dot_dimension_numbers<[1], [0], [0], [1], [0, 0, 1, 1], [], []>} : vector<64x32xbf16>, vector<32x32xbf16>, vector<64x32xf32> -> vector<64x32xf32>
    %c0_74 = arith.constant 0 : index
    %c0_75 = arith.constant 0 : index
    %62 = vector.load %arg21[%c0_74, %c0_75] : memref<256x32xf32, #tpu.memory_space<vmem>>, vector<64x32xf32>
    %63 = arith.addf %62, %61 : vector<64x32xf32>
    %c0_76 = arith.constant 0 : index
    %c0_77 = arith.constant 0 : index
    %64 = vector.load %arg21[%c0_76, %c0_77] : memref<256x32xf32, #tpu.memory_space<vmem>>, vector<64x32xf32>
    tpu.vector_store %arg21[%c0_76, %c0_77], %63 {strides = array<i32>} : memref<256x32xf32, #tpu.memory_space<vmem>>, vector<64x32xf32>,
    %c0_78 = arith.constant 0 : index
    %c1_79 = arith.constant 1 : index
    %c2_80 = arith.constant 2 : index
    %c0_81 = arith.constant 0 : index
    %65 = vector.load %arg19[%c0_78, %c1_79, %c2_80, %c0_81] : memref<1x10x10x32xbf16, #tpu.memory_space<vmem>>, vector<1x8x8x32xbf16>
    %66 = vector.shape_cast %65 : vector<1x8x8x32xbf16> to vector<64x32xbf16>
    %c5 = arith.constant 5 : index
    %c0_82 = arith.constant 0 : index
    %c0_83 = arith.constant 0 : index
    %67 = vector.load %arg3[%c5, %c0_82, %c0_83] : memref<9x32x32xbf16, #tpu.memory_space<vmem>>, vector<1x32x32xbf16>
    %68 = vector.shape_cast %67 : vector<1x32x32xbf16> to vector<32x32xbf16>
    %cst_84 = arith.constant dense<0.000000e+00> : vector<64x32xf32>
    %69 = tpu.matmul %66, %68, %cst_84 {dimension_numbers = #tpu.dot_dimension_numbers<[1], [0], [0], [1], [0, 0, 1, 1], [], []>} : vector<64x32xbf16>, vector<32x32xbf16>, vector<64x32xf32> -> vector<64x32xf32>
    %c0_85 = arith.constant 0 : index
    %c0_86 = arith.constant 0 : index
    %70 = vector.load %arg21[%c0_85, %c0_86] : memref<256x32xf32, #tpu.memory_space<vmem>>, vector<64x32xf32>
    %71 = arith.addf %70, %69 : vector<64x32xf32>
    %c0_87 = arith.constant 0 : index
    %c0_88 = arith.constant 0 : index
    %72 = vector.load %arg21[%c0_87, %c0_88] : memref<256x32xf32, #tpu.memory_space<vmem>>, vector<64x32xf32>
    tpu.vector_store %arg21[%c0_87, %c0_88], %71 {strides = array<i32>} : memref<256x32xf32, #tpu.memory_space<vmem>>, vector<64x32xf32>,
    %c0_89 = arith.constant 0 : index
    %c2_90 = arith.constant 2 : index
    %c0_91 = arith.constant 0 : index
    %c0_92 = arith.constant 0 : index
    %73 = vector.load %arg19[%c0_89, %c2_90, %c0_91, %c0_92] : memref<1x10x10x32xbf16, #tpu.memory_space<vmem>>, vector<1x8x8x32xbf16>
    %74 = vector.shape_cast %73 : vector<1x8x8x32xbf16> to vector<64x32xbf16>
    %c6 = arith.constant 6 : index
    %c0_93 = arith.constant 0 : index
    %c0_94 = arith.constant 0 : index
    %75 = vector.load %arg3[%c6, %c0_93, %c0_94] : memref<9x32x32xbf16, #tpu.memory_space<vmem>>, vector<1x32x32xbf16>
    %76 = vector.shape_cast %75 : vector<1x32x32xbf16> to vector<32x32xbf16>
    %cst_95 = arith.constant dense<0.000000e+00> : vector<64x32xf32>
    %77 = tpu.matmul %74, %76, %cst_95 {dimension_numbers = #tpu.dot_dimension_numbers<[1], [0], [0], [1], [0, 0, 1, 1], [], []>} : vector<64x32xbf16>, vector<32x32xbf16>, vector<64x32xf32> -> vector<64x32xf32>
    %c0_96 = arith.constant 0 : index
    %c0_97 = arith.constant 0 : index
    %78 = vector.load %arg21[%c0_96, %c0_97] : memref<256x32xf32, #tpu.memory_space<vmem>>, vector<64x32xf32>
    %79 = arith.addf %78, %77 : vector<64x32xf32>
    %c0_98 = arith.constant 0 : index
    %c0_99 = arith.constant 0 : index
    %80 = vector.load %arg21[%c0_98, %c0_99] : memref<256x32xf32, #tpu.memory_space<vmem>>, vector<64x32xf32>
    tpu.vector_store %arg21[%c0_98, %c0_99], %79 {strides = array<i32>} : memref<256x32xf32, #tpu.memory_space<vmem>>, vector<64x32xf32>,
    %c0_100 = arith.constant 0 : index
    %c2_101 = arith.constant 2 : index
    %c1_102 = arith.constant 1 : index
    %c0_103 = arith.constant 0 : index
    %81 = vector.load %arg19[%c0_100, %c2_101, %c1_102, %c0_103] : memref<1x10x10x32xbf16, #tpu.memory_space<vmem>>, vector<1x8x8x32xbf16>
    %82 = vector.shape_cast %81 : vector<1x8x8x32xbf16> to vector<64x32xbf16>
    %c7 = arith.constant 7 : index
    %c0_104 = arith.constant 0 : index
    %c0_105 = arith.constant 0 : index
    %83 = vector.load %arg3[%c7, %c0_104, %c0_105] : memref<9x32x32xbf16, #tpu.memory_space<vmem>>, vector<1x32x32xbf16>
    %84 = vector.shape_cast %83 : vector<1x32x32xbf16> to vector<32x32xbf16>
    %cst_106 = arith.constant dense<0.000000e+00> : vector<64x32xf32>
    %85 = tpu.matmul %82, %84, %cst_106 {dimension_numbers = #tpu.dot_dimension_numbers<[1], [0], [0], [1], [0, 0, 1, 1], [], []>} : vector<64x32xbf16>, vector<32x32xbf16>, vector<64x32xf32> -> vector<64x32xf32>
    %c0_107 = arith.constant 0 : index
    %c0_108 = arith.constant 0 : index
    %86 = vector.load %arg21[%c0_107, %c0_108] : memref<256x32xf32, #tpu.memory_space<vmem>>, vector<64x32xf32>
    %87 = arith.addf %86, %85 : vector<64x32xf32>
    %c0_109 = arith.constant 0 : index
    %c0_110 = arith.constant 0 : index
    %88 = vector.load %arg21[%c0_109, %c0_110] : memref<256x32xf32, #tpu.memory_space<vmem>>, vector<64x32xf32>
    tpu.vector_store %arg21[%c0_109, %c0_110], %87 {strides = array<i32>} : memref<256x32xf32, #tpu.memory_space<vmem>>, vector<64x32xf32>,
    %c0_111 = arith.constant 0 : index
    %c2_112 = arith.constant 2 : index
    %c2_113 = arith.constant 2 : index
    %c0_114 = arith.constant 0 : index
    %89 = vector.load %arg19[%c0_111, %c2_112, %c2_113, %c0_114] : memref<1x10x10x32xbf16, #tpu.memory_space<vmem>>, vector<1x8x8x32xbf16>
    %90 = vector.shape_cast %89 : vector<1x8x8x32xbf16> to vector<64x32xbf16>
    %c8 = arith.constant 8 : index
    %c0_115 = arith.constant 0 : index
    %c0_116 = arith.constant 0 : index
    %91 = vector.load %arg3[%c8, %c0_115, %c0_116] : memref<9x32x32xbf16, #tpu.memory_space<vmem>>, vector<1x32x32xbf16>
    %92 = vector.shape_cast %91 : vector<1x32x32xbf16> to vector<32x32xbf16>
    %cst_117 = arith.constant dense<0.000000e+00> : vector<64x32xf32>
    %93 = tpu.matmul %90, %92, %cst_117 {dimension_numbers = #tpu.dot_dimension_numbers<[1], [0], [0], [1], [0, 0, 1, 1], [], []>} : vector<64x32xbf16>, vector<32x32xbf16>, vector<64x32xf32> -> vector<64x32xf32>
    %c0_118 = arith.constant 0 : index
    %c0_119 = arith.constant 0 : index
    %94 = vector.load %arg21[%c0_118, %c0_119] : memref<256x32xf32, #tpu.memory_space<vmem>>, vector<64x32xf32>
    %95 = arith.addf %94, %93 : vector<64x32xf32>
    %c0_120 = arith.constant 0 : index
    %c0_121 = arith.constant 0 : index
    %96 = vector.load %arg21[%c0_120, %c0_121] : memref<256x32xf32, #tpu.memory_space<vmem>>, vector<64x32xf32>
    tpu.vector_store %arg21[%c0_120, %c0_121], %95 {strides = array<i32>} : memref<256x32xf32, #tpu.memory_space<vmem>>, vector<64x32xf32>,
    %c0_122 = arith.constant 0 : index
    %c0_123 = arith.constant 0 : index
    %97 = vector.load %arg11[%c0_122, %c0_123] : memref<1x32xf32, #tpu.memory_space<vmem>>, vector<1x32xf32>
    %cst_124 = arith.constant 0.000000e+00 : bf16
    %98 = vector.broadcast %cst_124 : bf16 to vector<1x6x6x32xbf16>
    %c0_125 = arith.constant 0 : index
    %c0_126 = arith.constant 0 : index
    %c0_127 = arith.constant 0 : index
    %c0_128 = arith.constant 0 : index
    %99 = vector.load %arg20[%c0_125, %c0_126, %c0_127, %c0_128] : memref<1x6x6x32xbf16, #tpu.memory_space<vmem>>, vector<1x6x6x32xbf16>
    tpu.vector_store %arg20[%c0_125, %c0_126, %c0_127, %c0_128], %98 {strides = array<i32>} : memref<1x6x6x32xbf16, #tpu.memory_space<vmem>>, vector<1x6x6x32xbf16>,
    %c0_129 = arith.constant 0 : index
    %c0_130 = arith.constant 0 : index
    %100 = vector.load %arg21[%c0_129, %c0_130] : memref<256x32xf32, #tpu.memory_space<vmem>>, vector<64x32xf32>
    %101 = vector.broadcast %97 : vector<1x32xf32> to vector<64x32xf32>
    %102 = arith.addf %100, %101 : vector<64x32xf32>
    %cst_131 = arith.constant 0.000000e+00 : f32
    %103 = vector.broadcast %cst_131 : f32 to vector<64x32xf32>
    %104 = arith.cmpf ogt, %102, %103 : vector<64x32xf32>
    %cst_132 = arith.constant 0.000000e+00 : f32
    %105 = vector.broadcast %cst_132 : f32 to vector<64x32xf32>
    %106 = arith.minimumf %102, %105 : vector<64x32xf32>
    %107 = math.exp %106 : vector<64x32xf32>
    %cst_133 = arith.constant 1.000000e+00 : f32
    %108 = vector.broadcast %cst_133 : f32 to vector<64x32xf32>
    %109 = arith.subf %107, %108 : vector<64x32xf32>
    %110 = arith.select %104, %102, %109 : vector<64x32xi1>, vector<64x32xf32>
    %111 = vector.shape_cast %110 : vector<64x32xf32> to vector<4x2x4x2x32xf32>
    %cst_134 = arith.constant dense<0.000000e+00> : vector<4x4x32xf32>
    %112 = vector.multi_reduction <add>, %111, %cst_134 [1, 3] : vector<4x2x4x2x32xf32> to vector<4x4x32xf32>
    %cst_135 = arith.constant 2.500000e-01 : f32
    %113 = vector.broadcast %cst_135 : f32 to vector<4x4x32xf32>
    %114 = arith.mulf %112, %113 : vector<4x4x32xf32>
    %115 = arith.truncf %114 : vector<4x4x32xf32> to vector<4x4x32xbf16>
    %c0_136 = arith.constant 0 : index
    %c1_137 = arith.constant 1 : index
    %c1_138 = arith.constant 1 : index
    %c0_139 = arith.constant 0 : index
    %116 = vector.load %arg20[%c0_136, %c1_137, %c1_138, %c0_139] : memref<1x6x6x32xbf16, #tpu.memory_space<vmem>>, vector<1x4x4x32xbf16>
    %117 = vector.shape_cast %116 : vector<1x4x4x32xbf16> to vector<4x4x32xbf16>
    %118 = vector.shape_cast %115 : vector<4x4x32xbf16> to vector<1x4x4x32xbf16>
    tpu.vector_store %arg20[%c0_136, %c1_137, %c1_138, %c0_139], %118 {strides = array<i32>} : memref<1x6x6x32xbf16, #tpu.memory_space<vmem>>, vector<1x4x4x32xbf16>,
    %c0_140 = arith.constant 0 : index
    %c0_141 = arith.constant 0 : index
    %c0_142 = arith.constant 0 : index
    %c0_143 = arith.constant 0 : index
    %119 = vector.load %arg20[%c0_140, %c0_141, %c0_142, %c0_143] : memref<1x6x6x32xbf16, #tpu.memory_space<vmem>>, vector<1x4x4x32xbf16>
    %120 = vector.shape_cast %119 : vector<1x4x4x32xbf16> to vector<16x32xbf16>
    %c0_144 = arith.constant 0 : index
    %c0_145 = arith.constant 0 : index
    %c0_146 = arith.constant 0 : index
    %121 = vector.load %arg4[%c0_144, %c0_145, %c0_146] : memref<9x32x32xbf16, #tpu.memory_space<vmem>>, vector<1x32x32xbf16>
    %122 = vector.shape_cast %121 : vector<1x32x32xbf16> to vector<32x32xbf16>
    %cst_147 = arith.constant dense<0.000000e+00> : vector<16x32xf32>
    %123 = tpu.matmul %120, %122, %cst_147 {dimension_numbers = #tpu.dot_dimension_numbers<[1], [0], [0], [1], [0, 0, 1, 1], [], []>} : vector<16x32xbf16>, vector<32x32xbf16>, vector<16x32xf32> -> vector<16x32xf32>
    %c0_148 = arith.constant 0 : index
    %c0_149 = arith.constant 0 : index
    %124 = vector.load %arg21[%c0_148, %c0_149] : memref<256x32xf32, #tpu.memory_space<vmem>>, vector<16x32xf32>
    tpu.vector_store %arg21[%c0_148, %c0_149], %123 {strides = array<i32>} : memref<256x32xf32, #tpu.memory_space<vmem>>, vector<16x32xf32>,
    %c0_150 = arith.constant 0 : index
    %c0_151 = arith.constant 0 : index
    %c1_152 = arith.constant 1 : index
    %c0_153 = arith.constant 0 : index
    %125 = vector.load %arg20[%c0_150, %c0_151, %c1_152, %c0_153] : memref<1x6x6x32xbf16, #tpu.memory_space<vmem>>, vector<1x4x4x32xbf16>
    %126 = vector.shape_cast %125 : vector<1x4x4x32xbf16> to vector<16x32xbf16>
    %c1_154 = arith.constant 1 : index
    %c0_155 = arith.constant 0 : index
    %c0_156 = arith.constant 0 : index
    %127 = vector.load %arg4[%c1_154, %c0_155, %c0_156] : memref<9x32x32xbf16, #tpu.memory_space<vmem>>, vector<1x32x32xbf16>
    %128 = vector.shape_cast %127 : vector<1x32x32xbf16> to vector<32x32xbf16>
    %cst_157 = arith.constant dense<0.000000e+00> : vector<16x32xf32>
    %129 = tpu.matmul %126, %128, %cst_157 {dimension_numbers = #tpu.dot_dimension_numbers<[1], [0], [0], [1], [0, 0, 1, 1], [], []>} : vector<16x32xbf16>, vector<32x32xbf16>, vector<16x32xf32> -> vector<16x32xf32>
    %c0_158 = arith.constant 0 : index
    %c0_159 = arith.constant 0 : index
    %130 = vector.load %arg21[%c0_158, %c0_159] : memref<256x32xf32, #tpu.memory_space<vmem>>, vector<16x32xf32>
    %131 = arith.addf %130, %129 : vector<16x32xf32>
    %c0_160 = arith.constant 0 : index
    %c0_161 = arith.constant 0 : index
    %132 = vector.load %arg21[%c0_160, %c0_161] : memref<256x32xf32, #tpu.memory_space<vmem>>, vector<16x32xf32>
    tpu.vector_store %arg21[%c0_160, %c0_161], %131 {strides = array<i32>} : memref<256x32xf32, #tpu.memory_space<vmem>>, vector<16x32xf32>,
    %c0_162 = arith.constant 0 : index
    %c0_163 = arith.constant 0 : index
    %c2_164 = arith.constant 2 : index
    %c0_165 = arith.constant 0 : index
    %133 = vector.load %arg20[%c0_162, %c0_163, %c2_164, %c0_165] : memref<1x6x6x32xbf16, #tpu.memory_space<vmem>>, vector<1x4x4x32xbf16>
    %134 = vector.shape_cast %133 : vector<1x4x4x32xbf16> to vector<16x32xbf16>
    %c2_166 = arith.constant 2 : index
    %c0_167 = arith.constant 0 : index
    %c0_168 = arith.constant 0 : index
    %135 = vector.load %arg4[%c2_166, %c0_167, %c0_168] : memref<9x32x32xbf16, #tpu.memory_space<vmem>>, vector<1x32x32xbf16>
    %136 = vector.shape_cast %135 : vector<1x32x32xbf16> to vector<32x32xbf16>
    %cst_169 = arith.constant dense<0.000000e+00> : vector<16x32xf32>
    %137 = tpu.matmul %134, %136, %cst_169 {dimension_numbers = #tpu.dot_dimension_numbers<[1], [0], [0], [1], [0, 0, 1, 1], [], []>} : vector<16x32xbf16>, vector<32x32xbf16>, vector<16x32xf32> -> vector<16x32xf32>
    %c0_170 = arith.constant 0 : index
    %c0_171 = arith.constant 0 : index
    %138 = vector.load %arg21[%c0_170, %c0_171] : memref<256x32xf32, #tpu.memory_space<vmem>>, vector<16x32xf32>
    %139 = arith.addf %138, %137 : vector<16x32xf32>
    %c0_172 = arith.constant 0 : index
    %c0_173 = arith.constant 0 : index
    %140 = vector.load %arg21[%c0_172, %c0_173] : memref<256x32xf32, #tpu.memory_space<vmem>>, vector<16x32xf32>
    tpu.vector_store %arg21[%c0_172, %c0_173], %139 {strides = array<i32>} : memref<256x32xf32, #tpu.memory_space<vmem>>, vector<16x32xf32>,
    %c0_174 = arith.constant 0 : index
    %c1_175 = arith.constant 1 : index
    %c0_176 = arith.constant 0 : index
    %c0_177 = arith.constant 0 : index
    %141 = vector.load %arg20[%c0_174, %c1_175, %c0_176, %c0_177] : memref<1x6x6x32xbf16, #tpu.memory_space<vmem>>, vector<1x4x4x32xbf16>
    %142 = vector.shape_cast %141 : vector<1x4x4x32xbf16> to vector<16x32xbf16>
    %c3_178 = arith.constant 3 : index
    %c0_179 = arith.constant 0 : index
    %c0_180 = arith.constant 0 : index
    %143 = vector.load %arg4[%c3_178, %c0_179, %c0_180] : memref<9x32x32xbf16, #tpu.memory_space<vmem>>, vector<1x32x32xbf16>
    %144 = vector.shape_cast %143 : vector<1x32x32xbf16> to vector<32x32xbf16>
    %cst_181 = arith.constant dense<0.000000e+00> : vector<16x32xf32>
    %145 = tpu.matmul %142, %144, %cst_181 {dimension_numbers = #tpu.dot_dimension_numbers<[1], [0], [0], [1], [0, 0, 1, 1], [], []>} : vector<16x32xbf16>, vector<32x32xbf16>, vector<16x32xf32> -> vector<16x32xf32>
    %c0_182 = arith.constant 0 : index
    %c0_183 = arith.constant 0 : index
    %146 = vector.load %arg21[%c0_182, %c0_183] : memref<256x32xf32, #tpu.memory_space<vmem>>, vector<16x32xf32>
    %147 = arith.addf %146, %145 : vector<16x32xf32>
    %c0_184 = arith.constant 0 : index
    %c0_185 = arith.constant 0 : index
    %148 = vector.load %arg21[%c0_184, %c0_185] : memref<256x32xf32, #tpu.memory_space<vmem>>, vector<16x32xf32>
    tpu.vector_store %arg21[%c0_184, %c0_185], %147 {strides = array<i32>} : memref<256x32xf32, #tpu.memory_space<vmem>>, vector<16x32xf32>,
    %c0_186 = arith.constant 0 : index
    %c1_187 = arith.constant 1 : index
    %c1_188 = arith.constant 1 : index
    %c0_189 = arith.constant 0 : index
    %149 = vector.load %arg20[%c0_186, %c1_187, %c1_188, %c0_189] : memref<1x6x6x32xbf16, #tpu.memory_space<vmem>>, vector<1x4x4x32xbf16>
    %150 = vector.shape_cast %149 : vector<1x4x4x32xbf16> to vector<16x32xbf16>
    %c4_190 = arith.constant 4 : index
    %c0_191 = arith.constant 0 : index
    %c0_192 = arith.constant 0 : index
    %151 = vector.load %arg4[%c4_190, %c0_191, %c0_192] : memref<9x32x32xbf16, #tpu.memory_space<vmem>>, vector<1x32x32xbf16>
    %152 = vector.shape_cast %151 : vector<1x32x32xbf16> to vector<32x32xbf16>
    %cst_193 = arith.constant dense<0.000000e+00> : vector<16x32xf32>
    %153 = tpu.matmul %150, %152, %cst_193 {dimension_numbers = #tpu.dot_dimension_numbers<[1], [0], [0], [1], [0, 0, 1, 1], [], []>} : vector<16x32xbf16>, vector<32x32xbf16>, vector<16x32xf32> -> vector<16x32xf32>
    %c0_194 = arith.constant 0 : index
    %c0_195 = arith.constant 0 : index
    %154 = vector.load %arg21[%c0_194, %c0_195] : memref<256x32xf32, #tpu.memory_space<vmem>>, vector<16x32xf32>
    %155 = arith.addf %154, %153 : vector<16x32xf32>
    %c0_196 = arith.constant 0 : index
    %c0_197 = arith.constant 0 : index
    %156 = vector.load %arg21[%c0_196, %c0_197] : memref<256x32xf32, #tpu.memory_space<vmem>>, vector<16x32xf32>
    tpu.vector_store %arg21[%c0_196, %c0_197], %155 {strides = array<i32>} : memref<256x32xf32, #tpu.memory_space<vmem>>, vector<16x32xf32>,
    %c0_198 = arith.constant 0 : index
    %c1_199 = arith.constant 1 : index
    %c2_200 = arith.constant 2 : index
    %c0_201 = arith.constant 0 : index
    %157 = vector.load %arg20[%c0_198, %c1_199, %c2_200, %c0_201] : memref<1x6x6x32xbf16, #tpu.memory_space<vmem>>, vector<1x4x4x32xbf16>
    %158 = vector.shape_cast %157 : vector<1x4x4x32xbf16> to vector<16x32xbf16>
    %c5_202 = arith.constant 5 : index
    %c0_203 = arith.constant 0 : index
    %c0_204 = arith.constant 0 : index
    %159 = vector.load %arg4[%c5_202, %c0_203, %c0_204] : memref<9x32x32xbf16, #tpu.memory_space<vmem>>, vector<1x32x32xbf16>
    %160 = vector.shape_cast %159 : vector<1x32x32xbf16> to vector<32x32xbf16>
    %cst_205 = arith.constant dense<0.000000e+00> : vector<16x32xf32>
    %161 = tpu.matmul %158, %160, %cst_205 {dimension_numbers = #tpu.dot_dimension_numbers<[1], [0], [0], [1], [0, 0, 1, 1], [], []>} : vector<16x32xbf16>, vector<32x32xbf16>, vector<16x32xf32> -> vector<16x32xf32>
    %c0_206 = arith.constant 0 : index
    %c0_207 = arith.constant 0 : index
    %162 = vector.load %arg21[%c0_206, %c0_207] : memref<256x32xf32, #tpu.memory_space<vmem>>, vector<16x32xf32>
    %163 = arith.addf %162, %161 : vector<16x32xf32>
    %c0_208 = arith.constant 0 : index
    %c0_209 = arith.constant 0 : index
    %164 = vector.load %arg21[%c0_208, %c0_209] : memref<256x32xf32, #tpu.memory_space<vmem>>, vector<16x32xf32>
    tpu.vector_store %arg21[%c0_208, %c0_209], %163 {strides = array<i32>} : memref<256x32xf32, #tpu.memory_space<vmem>>, vector<16x32xf32>,
    %c0_210 = arith.constant 0 : index
    %c2_211 = arith.constant 2 : index
    %c0_212 = arith.constant 0 : index
    %c0_213 = arith.constant 0 : index
    %165 = vector.load %arg20[%c0_210, %c2_211, %c0_212, %c0_213] : memref<1x6x6x32xbf16, #tpu.memory_space<vmem>>, vector<1x4x4x32xbf16>
    %166 = vector.shape_cast %165 : vector<1x4x4x32xbf16> to vector<16x32xbf16>
    %c6_214 = arith.constant 6 : index
    %c0_215 = arith.constant 0 : index
    %c0_216 = arith.constant 0 : index
    %167 = vector.load %arg4[%c6_214, %c0_215, %c0_216] : memref<9x32x32xbf16, #tpu.memory_space<vmem>>, vector<1x32x32xbf16>
    %168 = vector.shape_cast %167 : vector<1x32x32xbf16> to vector<32x32xbf16>
    %cst_217 = arith.constant dense<0.000000e+00> : vector<16x32xf32>
    %169 = tpu.matmul %166, %168, %cst_217 {dimension_numbers = #tpu.dot_dimension_numbers<[1], [0], [0], [1], [0, 0, 1, 1], [], []>} : vector<16x32xbf16>, vector<32x32xbf16>, vector<16x32xf32> -> vector<16x32xf32>
    %c0_218 = arith.constant 0 : index
    %c0_219 = arith.constant 0 : index
    %170 = vector.load %arg21[%c0_218, %c0_219] : memref<256x32xf32, #tpu.memory_space<vmem>>, vector<16x32xf32>
    %171 = arith.addf %170, %169 : vector<16x32xf32>
    %c0_220 = arith.constant 0 : index
    %c0_221 = arith.constant 0 : index
    %172 = vector.load %arg21[%c0_220, %c0_221] : memref<256x32xf32, #tpu.memory_space<vmem>>, vector<16x32xf32>
    tpu.vector_store %arg21[%c0_220, %c0_221], %171 {strides = array<i32>} : memref<256x32xf32, #tpu.memory_space<vmem>>, vector<16x32xf32>,
    %c0_222 = arith.constant 0 : index
    %c2_223 = arith.constant 2 : index
    %c1_224 = arith.constant 1 : index
    %c0_225 = arith.constant 0 : index
    %173 = vector.load %arg20[%c0_222, %c2_223, %c1_224, %c0_225] : memref<1x6x6x32xbf16, #tpu.memory_space<vmem>>, vector<1x4x4x32xbf16>
    %174 = vector.shape_cast %173 : vector<1x4x4x32xbf16> to vector<16x32xbf16>
    %c7_226 = arith.constant 7 : index
    %c0_227 = arith.constant 0 : index
    %c0_228 = arith.constant 0 : index
    %175 = vector.load %arg4[%c7_226, %c0_227, %c0_228] : memref<9x32x32xbf16, #tpu.memory_space<vmem>>, vector<1x32x32xbf16>
    %176 = vector.shape_cast %175 : vector<1x32x32xbf16> to vector<32x32xbf16>
    %cst_229 = arith.constant dense<0.000000e+00> : vector<16x32xf32>
    %177 = tpu.matmul %174, %176, %cst_229 {dimension_numbers = #tpu.dot_dimension_numbers<[1], [0], [0], [1], [0, 0, 1, 1], [], []>} : vector<16x32xbf16>, vector<32x32xbf16>, vector<16x32xf32> -> vector<16x32xf32>
    %c0_230 = arith.constant 0 : index
    %c0_231 = arith.constant 0 : index
    %178 = vector.load %arg21[%c0_230, %c0_231] : memref<256x32xf32, #tpu.memory_space<vmem>>, vector<16x32xf32>
    %179 = arith.addf %178, %177 : vector<16x32xf32>
    %c0_232 = arith.constant 0 : index
    %c0_233 = arith.constant 0 : index
    %180 = vector.load %arg21[%c0_232, %c0_233] : memref<256x32xf32, #tpu.memory_space<vmem>>, vector<16x32xf32>
    tpu.vector_store %arg21[%c0_232, %c0_233], %179 {strides = array<i32>} : memref<256x32xf32, #tpu.memory_space<vmem>>, vector<16x32xf32>,
    %c0_234 = arith.constant 0 : index
    %c2_235 = arith.constant 2 : index
    %c2_236 = arith.constant 2 : index
    %c0_237 = arith.constant 0 : index
    %181 = vector.load %arg20[%c0_234, %c2_235, %c2_236, %c0_237] : memref<1x6x6x32xbf16, #tpu.memory_space<vmem>>, vector<1x4x4x32xbf16>
    %182 = vector.shape_cast %181 : vector<1x4x4x32xbf16> to vector<16x32xbf16>
    %c8_238 = arith.constant 8 : index
    %c0_239 = arith.constant 0 : index
    %c0_240 = arith.constant 0 : index
    %183 = vector.load %arg4[%c8_238, %c0_239, %c0_240] : memref<9x32x32xbf16, #tpu.memory_space<vmem>>, vector<1x32x32xbf16>
    %184 = vector.shape_cast %183 : vector<1x32x32xbf16> to vector<32x32xbf16>
    %cst_241 = arith.constant dense<0.000000e+00> : vector<16x32xf32>
    %185 = tpu.matmul %182, %184, %cst_241 {dimension_numbers = #tpu.dot_dimension_numbers<[1], [0], [0], [1], [0, 0, 1, 1], [], []>} : vector<16x32xbf16>, vector<32x32xbf16>, vector<16x32xf32> -> vector<16x32xf32>
    %c0_242 = arith.constant 0 : index
    %c0_243 = arith.constant 0 : index
    %186 = vector.load %arg21[%c0_242, %c0_243] : memref<256x32xf32, #tpu.memory_space<vmem>>, vector<16x32xf32>
    %187 = arith.addf %186, %185 : vector<16x32xf32>
    %c0_244 = arith.constant 0 : index
    %c0_245 = arith.constant 0 : index
    %188 = vector.load %arg21[%c0_244, %c0_245] : memref<256x32xf32, #tpu.memory_space<vmem>>, vector<16x32xf32>
    tpu.vector_store %arg21[%c0_244, %c0_245], %187 {strides = array<i32>} : memref<256x32xf32, #tpu.memory_space<vmem>>, vector<16x32xf32>,
    %c0_246 = arith.constant 0 : index
    %c0_247 = arith.constant 0 : index
    %189 = vector.load %arg12[%c0_246, %c0_247] : memref<1x32xf32, #tpu.memory_space<vmem>>, vector<1x32xf32>
    %c0_248 = arith.constant 0 : index
    %c0_249 = arith.constant 0 : index
    %190 = vector.load %arg21[%c0_248, %c0_249] : memref<256x32xf32, #tpu.memory_space<vmem>>, vector<16x32xf32>
    %191 = vector.broadcast %189 : vector<1x32xf32> to vector<16x32xf32>
    %192 = arith.addf %190, %191 : vector<16x32xf32>
    %cst_250 = arith.constant 0.000000e+00 : f32
    %193 = vector.broadcast %cst_250 : f32 to vector<16x32xf32>
    %194 = arith.cmpf ogt, %192, %193 : vector<16x32xf32>
    %cst_251 = arith.constant 0.000000e+00 : f32
    %195 = vector.broadcast %cst_251 : f32 to vector<16x32xf32>
    %196 = arith.minimumf %192, %195 : vector<16x32xf32>
    %197 = math.exp %196 : vector<16x32xf32>
    %cst_252 = arith.constant 1.000000e+00 : f32
    %198 = vector.broadcast %cst_252 : f32 to vector<16x32xf32>
    %199 = arith.subf %197, %198 : vector<16x32xf32>
    %200 = arith.select %194, %192, %199 : vector<16x32xi1>, vector<16x32xf32>
    %201 = vector.shape_cast %200 : vector<16x32xf32> to vector<4x4x32xf32>
    %202 = arith.truncf %201 : vector<4x4x32xf32> to vector<4x4x32xbf16>
    %c0_253 = arith.constant 0 : index
    %c1_254 = arith.constant 1 : index
    %c1_255 = arith.constant 1 : index
    %c0_256 = arith.constant 0 : index
    %203 = vector.load %arg20[%c0_253, %c1_254, %c1_255, %c0_256] : memref<1x6x6x32xbf16, #tpu.memory_space<vmem>>, vector<1x4x4x32xbf16>
    %204 = vector.shape_cast %203 : vector<1x4x4x32xbf16> to vector<4x4x32xbf16>
    %205 = vector.shape_cast %202 : vector<4x4x32xbf16> to vector<1x4x4x32xbf16>
    tpu.vector_store %arg20[%c0_253, %c1_254, %c1_255, %c0_256], %205 {strides = array<i32>} : memref<1x6x6x32xbf16, #tpu.memory_space<vmem>>, vector<1x4x4x32xbf16>,
    %c0_257 = arith.constant 0 : index
    %c0_258 = arith.constant 0 : index
    %c0_259 = arith.constant 0 : index
    %c0_260 = arith.constant 0 : index
    %206 = vector.load %arg20[%c0_257, %c0_258, %c0_259, %c0_260] : memref<1x6x6x32xbf16, #tpu.memory_space<vmem>>, vector<1x4x4x32xbf16>
    %207 = vector.shape_cast %206 : vector<1x4x4x32xbf16> to vector<16x32xbf16>
    %c0_261 = arith.constant 0 : index
    %c0_262 = arith.constant 0 : index
    %c0_263 = arith.constant 0 : index
    %208 = vector.load %arg5[%c0_261, %c0_262, %c0_263] : memref<9x32x32xbf16, #tpu.memory_space<vmem>>, vector<1x32x32xbf16>
    %209 = vector.shape_cast %208 : vector<1x32x32xbf16> to vector<32x32xbf16>
    %cst_264 = arith.constant dense<0.000000e+00> : vector<16x32xf32>
    %210 = tpu.matmul %207, %209, %cst_264 {dimension_numbers = #tpu.dot_dimension_numbers<[1], [0], [0], [1], [0, 0, 1, 1], [], []>} : vector<16x32xbf16>, vector<32x32xbf16>, vector<16x32xf32> -> vector<16x32xf32>
    %c0_265 = arith.constant 0 : index
    %c0_266 = arith.constant 0 : index
    %211 = vector.load %arg21[%c0_265, %c0_266] : memref<256x32xf32, #tpu.memory_space<vmem>>, vector<16x32xf32>
    tpu.vector_store %arg21[%c0_265, %c0_266], %210 {strides = array<i32>} : memref<256x32xf32, #tpu.memory_space<vmem>>, vector<16x32xf32>,
    %c0_267 = arith.constant 0 : index
    %c0_268 = arith.constant 0 : index
    %c1_269 = arith.constant 1 : index
    %c0_270 = arith.constant 0 : index
    %212 = vector.load %arg20[%c0_267, %c0_268, %c1_269, %c0_270] : memref<1x6x6x32xbf16, #tpu.memory_space<vmem>>, vector<1x4x4x32xbf16>
    %213 = vector.shape_cast %212 : vector<1x4x4x32xbf16> to vector<16x32xbf16>
    %c1_271 = arith.constant 1 : index
    %c0_272 = arith.constant 0 : index
    %c0_273 = arith.constant 0 : index
    %214 = vector.load %arg5[%c1_271, %c0_272, %c0_273] : memref<9x32x32xbf16, #tpu.memory_space<vmem>>, vector<1x32x32xbf16>
    %215 = vector.shape_cast %214 : vector<1x32x32xbf16> to vector<32x32xbf16>
    %cst_274 = arith.constant dense<0.000000e+00> : vector<16x32xf32>
    %216 = tpu.matmul %213, %215, %cst_274 {dimension_numbers = #tpu.dot_dimension_numbers<[1], [0], [0], [1], [0, 0, 1, 1], [], []>} : vector<16x32xbf16>, vector<32x32xbf16>, vector<16x32xf32> -> vector<16x32xf32>
    %c0_275 = arith.constant 0 : index
    %c0_276 = arith.constant 0 : index
    %217 = vector.load %arg21[%c0_275, %c0_276] : memref<256x32xf32, #tpu.memory_space<vmem>>, vector<16x32xf32>
    %218 = arith.addf %217, %216 : vector<16x32xf32>
    %c0_277 = arith.constant 0 : index
    %c0_278 = arith.constant 0 : index
    %219 = vector.load %arg21[%c0_277, %c0_278] : memref<256x32xf32, #tpu.memory_space<vmem>>, vector<16x32xf32>
    tpu.vector_store %arg21[%c0_277, %c0_278], %218 {strides = array<i32>} : memref<256x32xf32, #tpu.memory_space<vmem>>, vector<16x32xf32>,
    %c0_279 = arith.constant 0 : index
    %c0_280 = arith.constant 0 : index
    %c2_281 = arith.constant 2 : index
    %c0_282 = arith.constant 0 : index
    %220 = vector.load %arg20[%c0_279, %c0_280, %c2_281, %c0_282] : memref<1x6x6x32xbf16, #tpu.memory_space<vmem>>, vector<1x4x4x32xbf16>
    %221 = vector.shape_cast %220 : vector<1x4x4x32xbf16> to vector<16x32xbf16>
    %c2_283 = arith.constant 2 : index
    %c0_284 = arith.constant 0 : index
    %c0_285 = arith.constant 0 : index
    %222 = vector.load %arg5[%c2_283, %c0_284, %c0_285] : memref<9x32x32xbf16, #tpu.memory_space<vmem>>, vector<1x32x32xbf16>
    %223 = vector.shape_cast %222 : vector<1x32x32xbf16> to vector<32x32xbf16>
    %cst_286 = arith.constant dense<0.000000e+00> : vector<16x32xf32>
    %224 = tpu.matmul %221, %223, %cst_286 {dimension_numbers = #tpu.dot_dimension_numbers<[1], [0], [0], [1], [0, 0, 1, 1], [], []>} : vector<16x32xbf16>, vector<32x32xbf16>, vector<16x32xf32> -> vector<16x32xf32>
    %c0_287 = arith.constant 0 : index
    %c0_288 = arith.constant 0 : index
    %225 = vector.load %arg21[%c0_287, %c0_288] : memref<256x32xf32, #tpu.memory_space<vmem>>, vector<16x32xf32>
    %226 = arith.addf %225, %224 : vector<16x32xf32>
    %c0_289 = arith.constant 0 : index
    %c0_290 = arith.constant 0 : index
    %227 = vector.load %arg21[%c0_289, %c0_290] : memref<256x32xf32, #tpu.memory_space<vmem>>, vector<16x32xf32>
    tpu.vector_store %arg21[%c0_289, %c0_290], %226 {strides = array<i32>} : memref<256x32xf32, #tpu.memory_space<vmem>>, vector<16x32xf32>,
    %c0_291 = arith.constant 0 : index
    %c1_292 = arith.constant 1 : index
    %c0_293 = arith.constant 0 : index
    %c0_294 = arith.constant 0 : index
    %228 = vector.load %arg20[%c0_291, %c1_292, %c0_293, %c0_294] : memref<1x6x6x32xbf16, #tpu.memory_space<vmem>>, vector<1x4x4x32xbf16>
    %229 = vector.shape_cast %228 : vector<1x4x4x32xbf16> to vector<16x32xbf16>
    %c3_295 = arith.constant 3 : index
    %c0_296 = arith.constant 0 : index
    %c0_297 = arith.constant 0 : index
    %230 = vector.load %arg5[%c3_295, %c0_296, %c0_297] : memref<9x32x32xbf16, #tpu.memory_space<vmem>>, vector<1x32x32xbf16>
    %231 = vector.shape_cast %230 : vector<1x32x32xbf16> to vector<32x32xbf16>
    %cst_298 = arith.constant dense<0.000000e+00> : vector<16x32xf32>
    %232 = tpu.matmul %229, %231, %cst_298 {dimension_numbers = #tpu.dot_dimension_numbers<[1], [0], [0], [1], [0, 0, 1, 1], [], []>} : vector<16x32xbf16>, vector<32x32xbf16>, vector<16x32xf32> -> vector<16x32xf32>
    %c0_299 = arith.constant 0 : index
    %c0_300 = arith.constant 0 : index
    %233 = vector.load %arg21[%c0_299, %c0_300] : memref<256x32xf32, #tpu.memory_space<vmem>>, vector<16x32xf32>
    %234 = arith.addf %233, %232 : vector<16x32xf32>
    %c0_301 = arith.constant 0 : index
    %c0_302 = arith.constant 0 : index
    %235 = vector.load %arg21[%c0_301, %c0_302] : memref<256x32xf32, #tpu.memory_space<vmem>>, vector<16x32xf32>
    tpu.vector_store %arg21[%c0_301, %c0_302], %234 {strides = array<i32>} : memref<256x32xf32, #tpu.memory_space<vmem>>, vector<16x32xf32>,
    %c0_303 = arith.constant 0 : index
    %c1_304 = arith.constant 1 : index
    %c1_305 = arith.constant 1 : index
    %c0_306 = arith.constant 0 : index
    %236 = vector.load %arg20[%c0_303, %c1_304, %c1_305, %c0_306] : memref<1x6x6x32xbf16, #tpu.memory_space<vmem>>, vector<1x4x4x32xbf16>
    %237 = vector.shape_cast %236 : vector<1x4x4x32xbf16> to vector<16x32xbf16>
    %c4_307 = arith.constant 4 : index
    %c0_308 = arith.constant 0 : index
    %c0_309 = arith.constant 0 : index
    %238 = vector.load %arg5[%c4_307, %c0_308, %c0_309] : memref<9x32x32xbf16, #tpu.memory_space<vmem>>, vector<1x32x32xbf16>
    %239 = vector.shape_cast %238 : vector<1x32x32xbf16> to vector<32x32xbf16>
    %cst_310 = arith.constant dense<0.000000e+00> : vector<16x32xf32>
    %240 = tpu.matmul %237, %239, %cst_310 {dimension_numbers = #tpu.dot_dimension_numbers<[1], [0], [0], [1], [0, 0, 1, 1], [], []>} : vector<16x32xbf16>, vector<32x32xbf16>, vector<16x32xf32> -> vector<16x32xf32>
    %c0_311 = arith.constant 0 : index
    %c0_312 = arith.constant 0 : index
    %241 = vector.load %arg21[%c0_311, %c0_312] : memref<256x32xf32, #tpu.memory_space<vmem>>, vector<16x32xf32>
    %242 = arith.addf %241, %240 : vector<16x32xf32>
    %c0_313 = arith.constant 0 : index
    %c0_314 = arith.constant 0 : index
    %243 = vector.load %arg21[%c0_313, %c0_314] : memref<256x32xf32, #tpu.memory_space<vmem>>, vector<16x32xf32>
    tpu.vector_store %arg21[%c0_313, %c0_314], %242 {strides = array<i32>} : memref<256x32xf32, #tpu.memory_space<vmem>>, vector<16x32xf32>,
    %c0_315 = arith.constant 0 : index
    %c1_316 = arith.constant 1 : index
    %c2_317 = arith.constant 2 : index
    %c0_318 = arith.constant 0 : index
    %244 = vector.load %arg20[%c0_315, %c1_316, %c2_317, %c0_318] : memref<1x6x6x32xbf16, #tpu.memory_space<vmem>>, vector<1x4x4x32xbf16>
    %245 = vector.shape_cast %244 : vector<1x4x4x32xbf16> to vector<16x32xbf16>
    %c5_319 = arith.constant 5 : index
    %c0_320 = arith.constant 0 : index
    %c0_321 = arith.constant 0 : index
    %246 = vector.load %arg5[%c5_319, %c0_320, %c0_321] : memref<9x32x32xbf16, #tpu.memory_space<vmem>>, vector<1x32x32xbf16>
    %247 = vector.shape_cast %246 : vector<1x32x32xbf16> to vector<32x32xbf16>
    %cst_322 = arith.constant dense<0.000000e+00> : vector<16x32xf32>
    %248 = tpu.matmul %245, %247, %cst_322 {dimension_numbers = #tpu.dot_dimension_numbers<[1], [0], [0], [1], [0, 0, 1, 1], [], []>} : vector<16x32xbf16>, vector<32x32xbf16>, vector<16x32xf32> -> vector<16x32xf32>
    %c0_323 = arith.constant 0 : index
    %c0_324 = arith.constant 0 : index
    %249 = vector.load %arg21[%c0_323, %c0_324] : memref<256x32xf32, #tpu.memory_space<vmem>>, vector<16x32xf32>
    %250 = arith.addf %249, %248 : vector<16x32xf32>
    %c0_325 = arith.constant 0 : index
    %c0_326 = arith.constant 0 : index
    %251 = vector.load %arg21[%c0_325, %c0_326] : memref<256x32xf32, #tpu.memory_space<vmem>>, vector<16x32xf32>
    tpu.vector_store %arg21[%c0_325, %c0_326], %250 {strides = array<i32>} : memref<256x32xf32, #tpu.memory_space<vmem>>, vector<16x32xf32>,
    %c0_327 = arith.constant 0 : index
    %c2_328 = arith.constant 2 : index
    %c0_329 = arith.constant 0 : index
    %c0_330 = arith.constant 0 : index
    %252 = vector.load %arg20[%c0_327, %c2_328, %c0_329, %c0_330] : memref<1x6x6x32xbf16, #tpu.memory_space<vmem>>, vector<1x4x4x32xbf16>
    %253 = vector.shape_cast %252 : vector<1x4x4x32xbf16> to vector<16x32xbf16>
    %c6_331 = arith.constant 6 : index
    %c0_332 = arith.constant 0 : index
    %c0_333 = arith.constant 0 : index
    %254 = vector.load %arg5[%c6_331, %c0_332, %c0_333] : memref<9x32x32xbf16, #tpu.memory_space<vmem>>, vector<1x32x32xbf16>
    %255 = vector.shape_cast %254 : vector<1x32x32xbf16> to vector<32x32xbf16>
    %cst_334 = arith.constant dense<0.000000e+00> : vector<16x32xf32>
    %256 = tpu.matmul %253, %255, %cst_334 {dimension_numbers = #tpu.dot_dimension_numbers<[1], [0], [0], [1], [0, 0, 1, 1], [], []>} : vector<16x32xbf16>, vector<32x32xbf16>, vector<16x32xf32> -> vector<16x32xf32>
    %c0_335 = arith.constant 0 : index
    %c0_336 = arith.constant 0 : index
    %257 = vector.load %arg21[%c0_335, %c0_336] : memref<256x32xf32, #tpu.memory_space<vmem>>, vector<16x32xf32>
    %258 = arith.addf %257, %256 : vector<16x32xf32>
    %c0_337 = arith.constant 0 : index
    %c0_338 = arith.constant 0 : index
    %259 = vector.load %arg21[%c0_337, %c0_338] : memref<256x32xf32, #tpu.memory_space<vmem>>, vector<16x32xf32>
    tpu.vector_store %arg21[%c0_337, %c0_338], %258 {strides = array<i32>} : memref<256x32xf32, #tpu.memory_space<vmem>>, vector<16x32xf32>,
    %c0_339 = arith.constant 0 : index
    %c2_340 = arith.constant 2 : index
    %c1_341 = arith.constant 1 : index
    %c0_342 = arith.constant 0 : index
    %260 = vector.load %arg20[%c0_339, %c2_340, %c1_341, %c0_342] : memref<1x6x6x32xbf16, #tpu.memory_space<vmem>>, vector<1x4x4x32xbf16>
    %261 = vector.shape_cast %260 : vector<1x4x4x32xbf16> to vector<16x32xbf16>
    %c7_343 = arith.constant 7 : index
    %c0_344 = arith.constant 0 : index
    %c0_345 = arith.constant 0 : index
    %262 = vector.load %arg5[%c7_343, %c0_344, %c0_345] : memref<9x32x32xbf16, #tpu.memory_space<vmem>>, vector<1x32x32xbf16>
    %263 = vector.shape_cast %262 : vector<1x32x32xbf16> to vector<32x32xbf16>
    %cst_346 = arith.constant dense<0.000000e+00> : vector<16x32xf32>
    %264 = tpu.matmul %261, %263, %cst_346 {dimension_numbers = #tpu.dot_dimension_numbers<[1], [0], [0], [1], [0, 0, 1, 1], [], []>} : vector<16x32xbf16>, vector<32x32xbf16>, vector<16x32xf32> -> vector<16x32xf32>
    %c0_347 = arith.constant 0 : index
    %c0_348 = arith.constant 0 : index
    %265 = vector.load %arg21[%c0_347, %c0_348] : memref<256x32xf32, #tpu.memory_space<vmem>>, vector<16x32xf32>
    %266 = arith.addf %265, %264 : vector<16x32xf32>
    %c0_349 = arith.constant 0 : index
    %c0_350 = arith.constant 0 : index
    %267 = vector.load %arg21[%c0_349, %c0_350] : memref<256x32xf32, #tpu.memory_space<vmem>>, vector<16x32xf32>
    tpu.vector_store %arg21[%c0_349, %c0_350], %266 {strides = array<i32>} : memref<256x32xf32, #tpu.memory_space<vmem>>, vector<16x32xf32>,
    %c0_351 = arith.constant 0 : index
    %c2_352 = arith.constant 2 : index
    %c2_353 = arith.constant 2 : index
    %c0_354 = arith.constant 0 : index
    %268 = vector.load %arg20[%c0_351, %c2_352, %c2_353, %c0_354] : memref<1x6x6x32xbf16, #tpu.memory_space<vmem>>, vector<1x4x4x32xbf16>
    %269 = vector.shape_cast %268 : vector<1x4x4x32xbf16> to vector<16x32xbf16>
    %c8_355 = arith.constant 8 : index
    %c0_356 = arith.constant 0 : index
    %c0_357 = arith.constant 0 : index
    %270 = vector.load %arg5[%c8_355, %c0_356, %c0_357] : memref<9x32x32xbf16, #tpu.memory_space<vmem>>, vector<1x32x32xbf16>
    %271 = vector.shape_cast %270 : vector<1x32x32xbf16> to vector<32x32xbf16>
    %cst_358 = arith.constant dense<0.000000e+00> : vector<16x32xf32>
    %272 = tpu.matmul %269, %271, %cst_358 {dimension_numbers = #tpu.dot_dimension_numbers<[1], [0], [0], [1], [0, 0, 1, 1], [], []>} : vector<16x32xbf16>, vector<32x32xbf16>, vector<16x32xf32> -> vector<16x32xf32>
    %c0_359 = arith.constant 0 : index
    %c0_360 = arith.constant 0 : index
    %273 = vector.load %arg21[%c0_359, %c0_360] : memref<256x32xf32, #tpu.memory_space<vmem>>, vector<16x32xf32>
    %274 = arith.addf %273, %272 : vector<16x32xf32>
    %c0_361 = arith.constant 0 : index
    %c0_362 = arith.constant 0 : index
    %275 = vector.load %arg21[%c0_361, %c0_362] : memref<256x32xf32, #tpu.memory_space<vmem>>, vector<16x32xf32>
    tpu.vector_store %arg21[%c0_361, %c0_362], %274 {strides = array<i32>} : memref<256x32xf32, #tpu.memory_space<vmem>>, vector<16x32xf32>,
    %c0_363 = arith.constant 0 : index
    %c0_364 = arith.constant 0 : index
    %276 = vector.load %arg13[%c0_363, %c0_364] : memref<1x32xf32, #tpu.memory_space<vmem>>, vector<1x32xf32>
    %c0_365 = arith.constant 0 : index
    %c0_366 = arith.constant 0 : index
    %277 = vector.load %arg21[%c0_365, %c0_366] : memref<256x32xf32, #tpu.memory_space<vmem>>, vector<16x32xf32>
    %278 = vector.broadcast %276 : vector<1x32xf32> to vector<16x32xf32>
    %279 = arith.addf %277, %278 : vector<16x32xf32>
    %cst_367 = arith.constant 0.000000e+00 : f32
    %280 = vector.broadcast %cst_367 : f32 to vector<16x32xf32>
    %281 = arith.cmpf ogt, %279, %280 : vector<16x32xf32>
    %cst_368 = arith.constant 0.000000e+00 : f32
    %282 = vector.broadcast %cst_368 : f32 to vector<16x32xf32>
    %283 = arith.minimumf %279, %282 : vector<16x32xf32>
    %284 = math.exp %283 : vector<16x32xf32>
    %cst_369 = arith.constant 1.000000e+00 : f32
    %285 = vector.broadcast %cst_369 : f32 to vector<16x32xf32>
    %286 = arith.subf %284, %285 : vector<16x32xf32>
    %287 = arith.select %281, %279, %286 : vector<16x32xi1>, vector<16x32xf32>
    %288 = vector.shape_cast %287 : vector<16x32xf32> to vector<4x4x32xf32>
    %289 = arith.truncf %288 : vector<4x4x32xf32> to vector<4x4x32xbf16>
    %c0_370 = arith.constant 0 : index
    %c1_371 = arith.constant 1 : index
    %c1_372 = arith.constant 1 : index
    %c0_373 = arith.constant 0 : index
    %290 = vector.load %arg20[%c0_370, %c1_371, %c1_372, %c0_373] : memref<1x6x6x32xbf16, #tpu.memory_space<vmem>>, vector<1x4x4x32xbf16>
    %291 = vector.shape_cast %290 : vector<1x4x4x32xbf16> to vector<4x4x32xbf16>
    %292 = vector.shape_cast %289 : vector<4x4x32xbf16> to vector<1x4x4x32xbf16>
    tpu.vector_store %arg20[%c0_370, %c1_371, %c1_372, %c0_373], %292 {strides = array<i32>} : memref<1x6x6x32xbf16, #tpu.memory_space<vmem>>, vector<1x4x4x32xbf16>,
    %c0_374 = arith.constant 0 : index
    %c0_375 = arith.constant 0 : index
    %c0_376 = arith.constant 0 : index
    %c0_377 = arith.constant 0 : index
    %293 = vector.load %arg20[%c0_374, %c0_375, %c0_376, %c0_377] : memref<1x6x6x32xbf16, #tpu.memory_space<vmem>>, vector<1x4x4x32xbf16>
    %294 = vector.shape_cast %293 : vector<1x4x4x32xbf16> to vector<16x32xbf16>
    %c0_378 = arith.constant 0 : index
    %c0_379 = arith.constant 0 : index
    %c0_380 = arith.constant 0 : index
    %295 = vector.load %arg6[%c0_378, %c0_379, %c0_380] : memref<9x32x32xbf16, #tpu.memory_space<vmem>>, vector<1x32x32xbf16>
    %296 = vector.shape_cast %295 : vector<1x32x32xbf16> to vector<32x32xbf16>
    %cst_381 = arith.constant dense<0.000000e+00> : vector<16x32xf32>
    %297 = tpu.matmul %294, %296, %cst_381 {dimension_numbers = #tpu.dot_dimension_numbers<[1], [0], [0], [1], [0, 0, 1, 1], [], []>} : vector<16x32xbf16>, vector<32x32xbf16>, vector<16x32xf32> -> vector<16x32xf32>
    %c0_382 = arith.constant 0 : index
    %c0_383 = arith.constant 0 : index
    %298 = vector.load %arg21[%c0_382, %c0_383] : memref<256x32xf32, #tpu.memory_space<vmem>>, vector<16x32xf32>
    tpu.vector_store %arg21[%c0_382, %c0_383], %297 {strides = array<i32>} : memref<256x32xf32, #tpu.memory_space<vmem>>, vector<16x32xf32>,
    %c0_384 = arith.constant 0 : index
    %c0_385 = arith.constant 0 : index
    %c1_386 = arith.constant 1 : index
    %c0_387 = arith.constant 0 : index
    %299 = vector.load %arg20[%c0_384, %c0_385, %c1_386, %c0_387] : memref<1x6x6x32xbf16, #tpu.memory_space<vmem>>, vector<1x4x4x32xbf16>
    %300 = vector.shape_cast %299 : vector<1x4x4x32xbf16> to vector<16x32xbf16>
    %c1_388 = arith.constant 1 : index
    %c0_389 = arith.constant 0 : index
    %c0_390 = arith.constant 0 : index
    %301 = vector.load %arg6[%c1_388, %c0_389, %c0_390] : memref<9x32x32xbf16, #tpu.memory_space<vmem>>, vector<1x32x32xbf16>
    %302 = vector.shape_cast %301 : vector<1x32x32xbf16> to vector<32x32xbf16>
    %cst_391 = arith.constant dense<0.000000e+00> : vector<16x32xf32>
    %303 = tpu.matmul %300, %302, %cst_391 {dimension_numbers = #tpu.dot_dimension_numbers<[1], [0], [0], [1], [0, 0, 1, 1], [], []>} : vector<16x32xbf16>, vector<32x32xbf16>, vector<16x32xf32> -> vector<16x32xf32>
    %c0_392 = arith.constant 0 : index
    %c0_393 = arith.constant 0 : index
    %304 = vector.load %arg21[%c0_392, %c0_393] : memref<256x32xf32, #tpu.memory_space<vmem>>, vector<16x32xf32>
    %305 = arith.addf %304, %303 : vector<16x32xf32>
    %c0_394 = arith.constant 0 : index
    %c0_395 = arith.constant 0 : index
    %306 = vector.load %arg21[%c0_394, %c0_395] : memref<256x32xf32, #tpu.memory_space<vmem>>, vector<16x32xf32>
    tpu.vector_store %arg21[%c0_394, %c0_395], %305 {strides = array<i32>} : memref<256x32xf32, #tpu.memory_space<vmem>>, vector<16x32xf32>,
    %c0_396 = arith.constant 0 : index
    %c0_397 = arith.constant 0 : index
    %c2_398 = arith.constant 2 : index
    %c0_399 = arith.constant 0 : index
    %307 = vector.load %arg20[%c0_396, %c0_397, %c2_398, %c0_399] : memref<1x6x6x32xbf16, #tpu.memory_space<vmem>>, vector<1x4x4x32xbf16>
    %308 = vector.shape_cast %307 : vector<1x4x4x32xbf16> to vector<16x32xbf16>
    %c2_400 = arith.constant 2 : index
    %c0_401 = arith.constant 0 : index
    %c0_402 = arith.constant 0 : index
    %309 = vector.load %arg6[%c2_400, %c0_401, %c0_402] : memref<9x32x32xbf16, #tpu.memory_space<vmem>>, vector<1x32x32xbf16>
    %310 = vector.shape_cast %309 : vector<1x32x32xbf16> to vector<32x32xbf16>
    %cst_403 = arith.constant dense<0.000000e+00> : vector<16x32xf32>
    %311 = tpu.matmul %308, %310, %cst_403 {dimension_numbers = #tpu.dot_dimension_numbers<[1], [0], [0], [1], [0, 0, 1, 1], [], []>} : vector<16x32xbf16>, vector<32x32xbf16>, vector<16x32xf32> -> vector<16x32xf32>
    %c0_404 = arith.constant 0 : index
    %c0_405 = arith.constant 0 : index
    %312 = vector.load %arg21[%c0_404, %c0_405] : memref<256x32xf32, #tpu.memory_space<vmem>>, vector<16x32xf32>
    %313 = arith.addf %312, %311 : vector<16x32xf32>
    %c0_406 = arith.constant 0 : index
    %c0_407 = arith.constant 0 : index
    %314 = vector.load %arg21[%c0_406, %c0_407] : memref<256x32xf32, #tpu.memory_space<vmem>>, vector<16x32xf32>
    tpu.vector_store %arg21[%c0_406, %c0_407], %313 {strides = array<i32>} : memref<256x32xf32, #tpu.memory_space<vmem>>, vector<16x32xf32>,
    %c0_408 = arith.constant 0 : index
    %c1_409 = arith.constant 1 : index
    %c0_410 = arith.constant 0 : index
    %c0_411 = arith.constant 0 : index
    %315 = vector.load %arg20[%c0_408, %c1_409, %c0_410, %c0_411] : memref<1x6x6x32xbf16, #tpu.memory_space<vmem>>, vector<1x4x4x32xbf16>
    %316 = vector.shape_cast %315 : vector<1x4x4x32xbf16> to vector<16x32xbf16>
    %c3_412 = arith.constant 3 : index
    %c0_413 = arith.constant 0 : index
    %c0_414 = arith.constant 0 : index
    %317 = vector.load %arg6[%c3_412, %c0_413, %c0_414] : memref<9x32x32xbf16, #tpu.memory_space<vmem>>, vector<1x32x32xbf16>
    %318 = vector.shape_cast %317 : vector<1x32x32xbf16> to vector<32x32xbf16>
    %cst_415 = arith.constant dense<0.000000e+00> : vector<16x32xf32>
    %319 = tpu.matmul %316, %318, %cst_415 {dimension_numbers = #tpu.dot_dimension_numbers<[1], [0], [0], [1], [0, 0, 1, 1], [], []>} : vector<16x32xbf16>, vector<32x32xbf16>, vector<16x32xf32> -> vector<16x32xf32>
    %c0_416 = arith.constant 0 : index
    %c0_417 = arith.constant 0 : index
    %320 = vector.load %arg21[%c0_416, %c0_417] : memref<256x32xf32, #tpu.memory_space<vmem>>, vector<16x32xf32>
    %321 = arith.addf %320, %319 : vector<16x32xf32>
    %c0_418 = arith.constant 0 : index
    %c0_419 = arith.constant 0 : index
    %322 = vector.load %arg21[%c0_418, %c0_419] : memref<256x32xf32, #tpu.memory_space<vmem>>, vector<16x32xf32>
    tpu.vector_store %arg21[%c0_418, %c0_419], %321 {strides = array<i32>} : memref<256x32xf32, #tpu.memory_space<vmem>>, vector<16x32xf32>,
    %c0_420 = arith.constant 0 : index
    %c1_421 = arith.constant 1 : index
    %c1_422 = arith.constant 1 : index
    %c0_423 = arith.constant 0 : index
    %323 = vector.load %arg20[%c0_420, %c1_421, %c1_422, %c0_423] : memref<1x6x6x32xbf16, #tpu.memory_space<vmem>>, vector<1x4x4x32xbf16>
    %324 = vector.shape_cast %323 : vector<1x4x4x32xbf16> to vector<16x32xbf16>
    %c4_424 = arith.constant 4 : index
    %c0_425 = arith.constant 0 : index
    %c0_426 = arith.constant 0 : index
    %325 = vector.load %arg6[%c4_424, %c0_425, %c0_426] : memref<9x32x32xbf16, #tpu.memory_space<vmem>>, vector<1x32x32xbf16>
    %326 = vector.shape_cast %325 : vector<1x32x32xbf16> to vector<32x32xbf16>
    %cst_427 = arith.constant dense<0.000000e+00> : vector<16x32xf32>
    %327 = tpu.matmul %324, %326, %cst_427 {dimension_numbers = #tpu.dot_dimension_numbers<[1], [0], [0], [1], [0, 0, 1, 1], [], []>} : vector<16x32xbf16>, vector<32x32xbf16>, vector<16x32xf32> -> vector<16x32xf32>
    %c0_428 = arith.constant 0 : index
    %c0_429 = arith.constant 0 : index
    %328 = vector.load %arg21[%c0_428, %c0_429] : memref<256x32xf32, #tpu.memory_space<vmem>>, vector<16x32xf32>
    %329 = arith.addf %328, %327 : vector<16x32xf32>
    %c0_430 = arith.constant 0 : index
    %c0_431 = arith.constant 0 : index
    %330 = vector.load %arg21[%c0_430, %c0_431] : memref<256x32xf32, #tpu.memory_space<vmem>>, vector<16x32xf32>
    tpu.vector_store %arg21[%c0_430, %c0_431], %329 {strides = array<i32>} : memref<256x32xf32, #tpu.memory_space<vmem>>, vector<16x32xf32>,
    %c0_432 = arith.constant 0 : index
    %c1_433 = arith.constant 1 : index
    %c2_434 = arith.constant 2 : index
    %c0_435 = arith.constant 0 : index
    %331 = vector.load %arg20[%c0_432, %c1_433, %c2_434, %c0_435] : memref<1x6x6x32xbf16, #tpu.memory_space<vmem>>, vector<1x4x4x32xbf16>
    %332 = vector.shape_cast %331 : vector<1x4x4x32xbf16> to vector<16x32xbf16>
    %c5_436 = arith.constant 5 : index
    %c0_437 = arith.constant 0 : index
    %c0_438 = arith.constant 0 : index
    %333 = vector.load %arg6[%c5_436, %c0_437, %c0_438] : memref<9x32x32xbf16, #tpu.memory_space<vmem>>, vector<1x32x32xbf16>
    %334 = vector.shape_cast %333 : vector<1x32x32xbf16> to vector<32x32xbf16>
    %cst_439 = arith.constant dense<0.000000e+00> : vector<16x32xf32>
    %335 = tpu.matmul %332, %334, %cst_439 {dimension_numbers = #tpu.dot_dimension_numbers<[1], [0], [0], [1], [0, 0, 1, 1], [], []>} : vector<16x32xbf16>, vector<32x32xbf16>, vector<16x32xf32> -> vector<16x32xf32>
    %c0_440 = arith.constant 0 : index
    %c0_441 = arith.constant 0 : index
    %336 = vector.load %arg21[%c0_440, %c0_441] : memref<256x32xf32, #tpu.memory_space<vmem>>, vector<16x32xf32>
    %337 = arith.addf %336, %335 : vector<16x32xf32>
    %c0_442 = arith.constant 0 : index
    %c0_443 = arith.constant 0 : index
    %338 = vector.load %arg21[%c0_442, %c0_443] : memref<256x32xf32, #tpu.memory_space<vmem>>, vector<16x32xf32>
    tpu.vector_store %arg21[%c0_442, %c0_443], %337 {strides = array<i32>} : memref<256x32xf32, #tpu.memory_space<vmem>>, vector<16x32xf32>,
    %c0_444 = arith.constant 0 : index
    %c2_445 = arith.constant 2 : index
    %c0_446 = arith.constant 0 : index
    %c0_447 = arith.constant 0 : index
    %339 = vector.load %arg20[%c0_444, %c2_445, %c0_446, %c0_447] : memref<1x6x6x32xbf16, #tpu.memory_space<vmem>>, vector<1x4x4x32xbf16>
    %340 = vector.shape_cast %339 : vector<1x4x4x32xbf16> to vector<16x32xbf16>
    %c6_448 = arith.constant 6 : index
    %c0_449 = arith.constant 0 : index
    %c0_450 = arith.constant 0 : index
    %341 = vector.load %arg6[%c6_448, %c0_449, %c0_450] : memref<9x32x32xbf16, #tpu.memory_space<vmem>>, vector<1x32x32xbf16>
    %342 = vector.shape_cast %341 : vector<1x32x32xbf16> to vector<32x32xbf16>
    %cst_451 = arith.constant dense<0.000000e+00> : vector<16x32xf32>
    %343 = tpu.matmul %340, %342, %cst_451 {dimension_numbers = #tpu.dot_dimension_numbers<[1], [0], [0], [1], [0, 0, 1, 1], [], []>} : vector<16x32xbf16>, vector<32x32xbf16>, vector<16x32xf32> -> vector<16x32xf32>
    %c0_452 = arith.constant 0 : index
    %c0_453 = arith.constant 0 : index
    %344 = vector.load %arg21[%c0_452, %c0_453] : memref<256x32xf32, #tpu.memory_space<vmem>>, vector<16x32xf32>
    %345 = arith.addf %344, %343 : vector<16x32xf32>
    %c0_454 = arith.constant 0 : index
    %c0_455 = arith.constant 0 : index
    %346 = vector.load %arg21[%c0_454, %c0_455] : memref<256x32xf32, #tpu.memory_space<vmem>>, vector<16x32xf32>
    tpu.vector_store %arg21[%c0_454, %c0_455], %345 {strides = array<i32>} : memref<256x32xf32, #tpu.memory_space<vmem>>, vector<16x32xf32>,
    %c0_456 = arith.constant 0 : index
    %c2_457 = arith.constant 2 : index
    %c1_458 = arith.constant 1 : index
    %c0_459 = arith.constant 0 : index
    %347 = vector.load %arg20[%c0_456, %c2_457, %c1_458, %c0_459] : memref<1x6x6x32xbf16, #tpu.memory_space<vmem>>, vector<1x4x4x32xbf16>
    %348 = vector.shape_cast %347 : vector<1x4x4x32xbf16> to vector<16x32xbf16>
    %c7_460 = arith.constant 7 : index
    %c0_461 = arith.constant 0 : index
    %c0_462 = arith.constant 0 : index
    %349 = vector.load %arg6[%c7_460, %c0_461, %c0_462] : memref<9x32x32xbf16, #tpu.memory_space<vmem>>, vector<1x32x32xbf16>
    %350 = vector.shape_cast %349 : vector<1x32x32xbf16> to vector<32x32xbf16>
    %cst_463 = arith.constant dense<0.000000e+00> : vector<16x32xf32>
    %351 = tpu.matmul %348, %350, %cst_463 {dimension_numbers = #tpu.dot_dimension_numbers<[1], [0], [0], [1], [0, 0, 1, 1], [], []>} : vector<16x32xbf16>, vector<32x32xbf16>, vector<16x32xf32> -> vector<16x32xf32>
    %c0_464 = arith.constant 0 : index
    %c0_465 = arith.constant 0 : index
    %352 = vector.load %arg21[%c0_464, %c0_465] : memref<256x32xf32, #tpu.memory_space<vmem>>, vector<16x32xf32>
    %353 = arith.addf %352, %351 : vector<16x32xf32>
    %c0_466 = arith.constant 0 : index
    %c0_467 = arith.constant 0 : index
    %354 = vector.load %arg21[%c0_466, %c0_467] : memref<256x32xf32, #tpu.memory_space<vmem>>, vector<16x32xf32>
    tpu.vector_store %arg21[%c0_466, %c0_467], %353 {strides = array<i32>} : memref<256x32xf32, #tpu.memory_space<vmem>>, vector<16x32xf32>,
    %c0_468 = arith.constant 0 : index
    %c2_469 = arith.constant 2 : index
    %c2_470 = arith.constant 2 : index
    %c0_471 = arith.constant 0 : index
    %355 = vector.load %arg20[%c0_468, %c2_469, %c2_470, %c0_471] : memref<1x6x6x32xbf16, #tpu.memory_space<vmem>>, vector<1x4x4x32xbf16>
    %356 = vector.shape_cast %355 : vector<1x4x4x32xbf16> to vector<16x32xbf16>
    %c8_472 = arith.constant 8 : index
    %c0_473 = arith.constant 0 : index
    %c0_474 = arith.constant 0 : index
    %357 = vector.load %arg6[%c8_472, %c0_473, %c0_474] : memref<9x32x32xbf16, #tpu.memory_space<vmem>>, vector<1x32x32xbf16>
    %358 = vector.shape_cast %357 : vector<1x32x32xbf16> to vector<32x32xbf16>
    %cst_475 = arith.constant dense<0.000000e+00> : vector<16x32xf32>
    %359 = tpu.matmul %356, %358, %cst_475 {dimension_numbers = #tpu.dot_dimension_numbers<[1], [0], [0], [1], [0, 0, 1, 1], [], []>} : vector<16x32xbf16>, vector<32x32xbf16>, vector<16x32xf32> -> vector<16x32xf32>
    %c0_476 = arith.constant 0 : index
    %c0_477 = arith.constant 0 : index
    %360 = vector.load %arg21[%c0_476, %c0_477] : memref<256x32xf32, #tpu.memory_space<vmem>>, vector<16x32xf32>
    %361 = arith.addf %360, %359 : vector<16x32xf32>
    %c0_478 = arith.constant 0 : index
    %c0_479 = arith.constant 0 : index
    %362 = vector.load %arg21[%c0_478, %c0_479] : memref<256x32xf32, #tpu.memory_space<vmem>>, vector<16x32xf32>
    tpu.vector_store %arg21[%c0_478, %c0_479], %361 {strides = array<i32>} : memref<256x32xf32, #tpu.memory_space<vmem>>, vector<16x32xf32>,
    %c0_480 = arith.constant 0 : index
    %c0_481 = arith.constant 0 : index
    %363 = vector.load %arg14[%c0_480, %c0_481] : memref<1x32xf32, #tpu.memory_space<vmem>>, vector<1x32xf32>
    %c0_482 = arith.constant 0 : index
    %c0_483 = arith.constant 0 : index
    %364 = vector.load %arg21[%c0_482, %c0_483] : memref<256x32xf32, #tpu.memory_space<vmem>>, vector<16x32xf32>
    %365 = vector.broadcast %363 : vector<1x32xf32> to vector<16x32xf32>
    %366 = arith.addf %364, %365 : vector<16x32xf32>
    %cst_484 = arith.constant 0.000000e+00 : f32
    %367 = vector.broadcast %cst_484 : f32 to vector<16x32xf32>
    %368 = arith.cmpf ogt, %366, %367 : vector<16x32xf32>
    %cst_485 = arith.constant 0.000000e+00 : f32
    %369 = vector.broadcast %cst_485 : f32 to vector<16x32xf32>
    %370 = arith.minimumf %366, %369 : vector<16x32xf32>
    %371 = math.exp %370 : vector<16x32xf32>
    %cst_486 = arith.constant 1.000000e+00 : f32
    %372 = vector.broadcast %cst_486 : f32 to vector<16x32xf32>
    %373 = arith.subf %371, %372 : vector<16x32xf32>
    %374 = arith.select %368, %366, %373 : vector<16x32xi1>, vector<16x32xf32>
    %375 = arith.truncf %374 : vector<16x32xf32> to vector<16x32xbf16>
    %c0_487 = arith.constant 0 : index
    %c0_488 = arith.constant 0 : index
    %376 = vector.load %arg22[%c0_487, %c0_488] : memref<16x32xbf16, #tpu.memory_space<vmem>>, vector<16x32xbf16>
    tpu.vector_store %arg22[%c0_487, %c0_488], %375 {strides = array<i32>} : memref<16x32xbf16, #tpu.memory_space<vmem>>, vector<16x32xbf16>,
    %c0_489 = arith.constant 0 : index
    %c0_490 = arith.constant 0 : index
    %377 = vector.load %arg22[%c0_489, %c0_490] : memref<16x32xbf16, #tpu.memory_space<vmem>>, vector<16x32xbf16>
    %c0_491 = arith.constant 0 : index
    %c0_492 = arith.constant 0 : index
    %378 = vector.load %arg7[%c0_491, %c0_492] : memref<32x32xbf16, #tpu.memory_space<vmem>>, vector<32x32xbf16>
    %cst_493 = arith.constant dense<0.000000e+00> : vector<16x32xf32>
    %379 = tpu.matmul %377, %378, %cst_493 {dimension_numbers = #tpu.dot_dimension_numbers<[1], [0], [0], [1], [0, 0, 1, 1], [], []>} : vector<16x32xbf16>, vector<32x32xbf16>, vector<16x32xf32> -> vector<16x32xf32>
    %c0_494 = arith.constant 0 : index
    %c0_495 = arith.constant 0 : index
    %380 = vector.load %arg15[%c0_494, %c0_495] : memref<1x32xf32, #tpu.memory_space<vmem>>, vector<1x32xf32>
    %381 = vector.broadcast %380 : vector<1x32xf32> to vector<16x32xf32>
    %382 = arith.addf %379, %381 : vector<16x32xf32>
    %cst_496 = arith.constant 0.000000e+00 : f32
    %383 = vector.broadcast %cst_496 : f32 to vector<16x32xf32>
    %384 = arith.cmpf ogt, %382, %383 : vector<16x32xf32>
    %cst_497 = arith.constant 0.000000e+00 : f32
    %385 = vector.broadcast %cst_497 : f32 to vector<16x32xf32>
    %386 = arith.minimumf %382, %385 : vector<16x32xf32>
    %387 = math.exp %386 : vector<16x32xf32>
    %cst_498 = arith.constant 1.000000e+00 : f32
    %388 = vector.broadcast %cst_498 : f32 to vector<16x32xf32>
    %389 = arith.subf %387, %388 : vector<16x32xf32>
    %390 = arith.select %384, %382, %389 : vector<16x32xi1>, vector<16x32xf32>
    %391 = arith.truncf %390 : vector<16x32xf32> to vector<16x32xbf16>
    %c0_499 = arith.constant 0 : index
    %c0_500 = arith.constant 0 : index
    %392 = vector.load %arg8[%c0_499, %c0_500] : memref<32x32xbf16, #tpu.memory_space<vmem>>, vector<32x32xbf16>
    %cst_501 = arith.constant dense<0.000000e+00> : vector<16x32xf32>
    %393 = tpu.matmul %391, %392, %cst_501 {dimension_numbers = #tpu.dot_dimension_numbers<[1], [0], [0], [1], [0, 0, 1, 1], [], []>} : vector<16x32xbf16>, vector<32x32xbf16>, vector<16x32xf32> -> vector<16x32xf32>
    %c0_502 = arith.constant 0 : index
    %c0_503 = arith.constant 0 : index
    %394 = vector.load %arg16[%c0_502, %c0_503] : memref<1x32xf32, #tpu.memory_space<vmem>>, vector<1x32xf32>
    %395 = vector.broadcast %394 : vector<1x32xf32> to vector<16x32xf32>
    %396 = arith.addf %393, %395 : vector<16x32xf32>
    %cst_504 = arith.constant 0.000000e+00 : f32
    %397 = vector.broadcast %cst_504 : f32 to vector<16x32xf32>
    %398 = arith.cmpf ogt, %396, %397 : vector<16x32xf32>
    %cst_505 = arith.constant 0.000000e+00 : f32
    %399 = vector.broadcast %cst_505 : f32 to vector<16x32xf32>
    %400 = arith.minimumf %396, %399 : vector<16x32xf32>
    %401 = math.exp %400 : vector<16x32xf32>
    %cst_506 = arith.constant 1.000000e+00 : f32
    %402 = vector.broadcast %cst_506 : f32 to vector<16x32xf32>
    %403 = arith.subf %401, %402 : vector<16x32xf32>
    %404 = arith.select %398, %396, %403 : vector<16x32xi1>, vector<16x32xf32>
    %405 = arith.truncf %404 : vector<16x32xf32> to vector<16x32xbf16>
    %c0_507 = arith.constant 0 : index
    %c0_508 = arith.constant 0 : index
    %406 = vector.load %arg9[%c0_507, %c0_508] : memref<2x32xbf16, #tpu.memory_space<vmem>>, vector<2x32xbf16>
    %c0_509 = arith.constant 0 : index
    %c0_510 = arith.constant 0 : index
    %407 = vector.load %arg17[%c0_509, %c0_510] : memref<2x1xf32, #tpu.memory_space<vmem>>, vector<2x1xf32>
    %cst_511 = arith.constant dense<0.000000e+00> : vector<2x16xf32>
    %408 = tpu.matmul %406, %405, %cst_511 {dimension_numbers = #tpu.dot_dimension_numbers<[1], [1], [0], [0], [0, 0, 1, 0], [], []>} : vector<2x32xbf16>, vector<16x32xbf16>, vector<2x16xf32> -> vector<2x16xf32>
    %409 = vector.broadcast %407 : vector<2x1xf32> to vector<2x16xf32>
    %410 = arith.addf %408, %409 : vector<2x16xf32>
    %c0_512 = arith.constant 0 : index
    %c0_513 = arith.constant 0 : index
    %c0_514 = arith.constant 0 : index
    %411 = vector.load %arg18[%c0_512, %c0_513, %c0_514] : memref<1x2x16xf32, #tpu.memory_space<vmem>>, vector<1x2x16xf32>
    %412 = vector.shape_cast %411 : vector<1x2x16xf32> to vector<2x16xf32>
    %413 = vector.shape_cast %410 : vector<2x16xf32> to vector<1x2x16xf32>
    tpu.vector_store %arg18[%c0_512, %c0_513, %c0_514], %413 {strides = array<i32>} : memref<1x2x16xf32, #tpu.memory_space<vmem>>, vector<1x2x16xf32>,
    return
  }
  func.func @transform_0(%arg0: i32) -> (i32, i32, i32) {
    %c0_i32 = arith.constant 0 : i32
    %c0_i32_0 = arith.constant 0 : i32
    %c0_i32_1 = arith.constant 0 : i32
    return %arg0, %c0_i32, %c0_i32_0 : i32, i32, i32
  }
  func.func @transform_1(%arg0: i32) -> (i32, i32) {
    %c0_i32 = arith.constant 0 : i32
    %c0_i32_0 = arith.constant 0 : i32
    %c0_i32_1 = arith.constant 0 : i32
    return %c0_i32, %c0_i32_0 : i32, i32
  }
  func.func @transform_2(%arg0: i32) -> (i32, i32, i32) {
    %c0_i32 = arith.constant 0 : i32
    %c0_i32_0 = arith.constant 0 : i32
    %c0_i32_1 = arith.constant 0 : i32
    %c0_i32_2 = arith.constant 0 : i32
    return %c0_i32, %c0_i32_0, %c0_i32_1 : i32, i32, i32
  }
  func.func @transform_3(%arg0: i32) -> (i32, i32, i32) {
    %c0_i32 = arith.constant 0 : i32
    %c0_i32_0 = arith.constant 0 : i32
    %c0_i32_1 = arith.constant 0 : i32
    %c0_i32_2 = arith.constant 0 : i32
    return %c0_i32, %c0_i32_0, %c0_i32_1 : i32, i32, i32
  }
  func.func @transform_4(%arg0: i32) -> (i32, i32, i32) {
    %c0_i32 = arith.constant 0 : i32
    %c0_i32_0 = arith.constant 0 : i32
    %c0_i32_1 = arith.constant 0 : i32
    %c0_i32_2 = arith.constant 0 : i32
    return %c0_i32, %c0_i32_0, %c0_i32_1 : i32, i32, i32
  }
  func.func @transform_5(%arg0: i32) -> (i32, i32, i32) {
    %c0_i32 = arith.constant 0 : i32
    %c0_i32_0 = arith.constant 0 : i32
    %c0_i32_1 = arith.constant 0 : i32
    %c0_i32_2 = arith.constant 0 : i32
    return %c0_i32, %c0_i32_0, %c0_i32_1 : i32, i32, i32
  }
  func.func @transform_6(%arg0: i32) -> (i32, i32) {
    %c0_i32 = arith.constant 0 : i32
    %c0_i32_0 = arith.constant 0 : i32
    %c0_i32_1 = arith.constant 0 : i32
    return %c0_i32, %c0_i32_0 : i32, i32
  }
  func.func @transform_7(%arg0: i32) -> (i32, i32) {
    %c0_i32 = arith.constant 0 : i32
    %c0_i32_0 = arith.constant 0 : i32
    %c0_i32_1 = arith.constant 0 : i32
    return %c0_i32, %c0_i32_0 : i32, i32
  }
  func.func @transform_8(%arg0: i32) -> (i32, i32) {
    %c0_i32 = arith.constant 0 : i32
    %c0_i32_0 = arith.constant 0 : i32
    %c0_i32_1 = arith.constant 0 : i32
    return %c0_i32, %c0_i32_0 : i32, i32
  }
  func.func @transform_9(%arg0: i32) -> (i32, i32) {
    %c0_i32 = arith.constant 0 : i32
    %c0_i32_0 = arith.constant 0 : i32
    %c0_i32_1 = arith.constant 0 : i32
    return %c0_i32, %c0_i32_0 : i32, i32
  }
  func.func @transform_10(%arg0: i32) -> (i32, i32) {
    %c0_i32 = arith.constant 0 : i32
    %c0_i32_0 = arith.constant 0 : i32
    %c0_i32_1 = arith.constant 0 : i32
    return %c0_i32, %c0_i32_0 : i32, i32
  }
  func.func @transform_11(%arg0: i32) -> (i32, i32) {
    %c0_i32 = arith.constant 0 : i32
    %c0_i32_0 = arith.constant 0 : i32
    %c0_i32_1 = arith.constant 0 : i32
    return %c0_i32, %c0_i32_0 : i32, i32
  }
  func.func @transform_12(%arg0: i32) -> (i32, i32) {
    %c0_i32 = arith.constant 0 : i32
    %c0_i32_0 = arith.constant 0 : i32
    %c0_i32_1 = arith.constant 0 : i32
    return %c0_i32, %c0_i32_0 : i32, i32
  }
  func.func @transform_13(%arg0: i32) -> (i32, i32) {
    %c0_i32 = arith.constant 0 : i32
    %c0_i32_0 = arith.constant 0 : i32
    %c0_i32_1 = arith.constant 0 : i32
    return %c0_i32, %c0_i32_0 : i32, i32
  }
  func.func @transform_14(%arg0: i32) -> (i32, i32) {
    %c0_i32 = arith.constant 0 : i32
    %c0_i32_0 = arith.constant 0 : i32
    %c0_i32_1 = arith.constant 0 : i32
    return %c0_i32, %c0_i32_0 : i32, i32
  }
  func.func @transform_15(%arg0: i32) -> (i32, i32) {
    %c0_i32 = arith.constant 0 : i32
    %c0_i32_0 = arith.constant 0 : i32
    %c0_i32_1 = arith.constant 0 : i32
    return %c0_i32, %c0_i32_0 : i32, i32
  }
  func.func @transform_16(%arg0: i32) -> (i32, i32) {
    %c0_i32 = arith.constant 0 : i32
    %c0_i32_0 = arith.constant 0 : i32
    %c0_i32_1 = arith.constant 0 : i32
    return %c0_i32, %c0_i32_0 : i32, i32
  }
  func.func @transform_17(%arg0: i32) -> (i32, i32, i32) {
    %c0_i32 = arith.constant 0 : i32
    %c0_i32_0 = arith.constant 0 : i32
    %c0_i32_1 = arith.constant 0 : i32
    return %arg0, %c0_i32, %c0_i32_0 : i32, i32, i32
  }
}

</mosaic_0001>

<bundles_post_ra>
// kernel: _lambda_.1
= control target key start
LH: loop header
LB: loop body
LE: loop exit
PB: predicated region body
PF: predicated region fallthrough
CT: control target
= control target key end

     0   :  { %s11140_s24 = smov 0   ;;  %s13278_s0 = inlined_call_operand.vmem [shape: bf16[2,256,18], index: 0, kind: input, shape index: {}]   ;;  %s13279_s1 = inlined_call_operand.vmem [shape: bf16[18,32], index: 1, kind: input, shape index: {}]   ;;  %s13280_s2 = inlined_call_operand.vmem [shape: bf16[9,32,32], index: 2, kind: input, shape index: {}]   ;;  %s13281_s3 = inlined_call_operand.vmem [shape: bf16[9,32,32], index: 3, kind: input, shape index: {}]   ;;  %s13282_s4 = inlined_call_operand.vmem [shape: bf16[9,32,32], index: 4, kind: input, shape index: {}]   ;;  %s13283_s5 = inlined_call_operand.vmem [shape: bf16[9,32,32], index: 5, kind: input, shape index: {}]   ;;  %s13284_s6 = inlined_call_operand.vmem [shape: bf16[32,32], index: 6, kind: input, shape index: {}]   ;;  %s13285_s7 = inlined_call_operand.vmem [shape: bf16[32,32], index: 7, kind: input, shape index: {}]   ;;  %s13286_s8 = inlined_call_operand.vmem [shape: bf16[2,32], index: 8, kind: input, shape index: {}]   ;;  %s13287_s9 = inlined_call_operand.vmem [shape: f32[1,32], index: 9, kind: input, shape index: {}]   ;;  %s13288_s10 = inlined_call_operand.vmem [shape: f32[1,32], index: 10, kind: input, shape index: {}]   ;;  %s13289_s11 = inlined_call_operand.vmem [shape: f32[1,32], index: 11, kind: input, shape index: {}]   ;;  %s13290_s12 = inlined_call_operand.vmem [shape: f32[1,32], index: 12, kind: input, shape index: {}]   ;;  %s13291_s13 = inlined_call_operand.vmem [shape: f32[1,32], index: 13, kind: input, shape index: {}]   ;;  %s13292_s14 = inlined_call_operand.vmem [shape: f32[1,32], index: 14, kind: input, shape index: {}]   ;;  %s13293_s15 = inlined_call_operand.vmem [shape: f32[1,32], index: 15, kind: input, shape index: {}]   ;;  %s13294_s16 = inlined_call_operand.vmem [shape: f32[2,1], index: 16, kind: input, shape index: {}]   ;;  %s13295_s17 = inlined_call_operand.vmem [shape: f32[2,2,16], index: 17, kind: output, shape index: {}]  }
   0x1   :  { %13301 = sst [smem:[#allocation18_spill]] %s13278_s0 }
   0x2   :  { %13302 = sst [smem:[#allocation19_spill]] %s13279_s1 }
   0x3 LB: > { %s9504_s25 = sadd.s32 4294967295, %s11044_s24   ;;  %p9508_p0 = scmp.ge.s32.totalorder %s11044_s24, 1  ;;  %s11044_s24 = sphi %s11140_s24, %s27_s24  }
   0x4   : > { %p487_p1 = scmp.lt.s32.totalorder %s11044_s24, 3 }
   0x6   : > { %p488_p2 = pnand %p9508_p0, %p487_p1 }
   0x8   : > { %491 = sbr.rel (%p488_p2) target bundleno = 2744 (0xab8), region = 88 }
   0xf   : > { %s13303_s28 = sld [smem:[#allocation19_spill]]  ;;  %vm721_vm0 = vcmask 1040384   ;;  %p538_p3 = scmp.lt.s32.totalorder %s9504_s25, 1  ;;  %vm672_vm1 = vcmask 146432   ;;  %vm922_vm2 = vcmask 253952   ;;  %v13297_v19 = vmov 0  }
  0x10   : > { %s13304_s1 = sld [smem:[#allocation18_spill]]  ;;  %929 = vst.msk [vmem:[#allocation2 + $0x1c] sm:$0x1] %vm922_vm2, %v13297_v19  ;;  %923 = vst.msk [vmem:[#allocation2 + $0x4] sm:$0x1] %vm922_vm2, %v13297_v19  ;;  %10792 = vset.pattern.permute.xlu0 %v13297_v19  ;;  %vm886_vm3 = vcmask 261120   ;;  %v1240_v49 = vlaneseq }
  0x11   : > { %s13352_s25 = smov (!%p538_p3, %s9504_s25), 1  ;;  %925 = vst.msk [vmem:[#allocation2 + $0xc] sm:$0x1] %vm922_vm2, %v13297_v19  ;;  %927 = vst.msk [vmem:[#allocation2 + $0x14] sm:$0x1] %vm922_vm2, %v13297_v19  ;;  %vm1908_vm5 = vcmask 254976  }
  0x12   : > { %s10139_s30 = sshll.u32 %s13352_s25, 7  ;;  %931 = vst.msk [vmem:[#allocation2 + $0x24] sm:$0x1] %vm922_vm2, %v13297_v19  ;;  %933 = vst.msk [vmem:[#allocation2 + $0x2c] sm:$0x1] %vm922_vm2, %v13297_v19  ;;  %v1241_v56 = vshrl.u32 %v1240_v49, 7 }
  0x13   : > { %935 = vst.msk [vmem:[#allocation2 + $0x34] sm:$0x1] %vm922_vm2, %v13297_v19  ;;  %937 = vst.msk [vmem:[#allocation2 + $0x3c] sm:$0x1] %vm922_vm2, %v13297_v19  ;;  %v11224_v24 = vld [vmem:[%s13287_s9] ss:$0 sm:$0xff] }
  0x14   : > { %939 = vst.msk [vmem:[#allocation2 + $0x44] sm:$0x1] %vm922_vm2, %v13297_v19  ;;  %941 = vst.msk [vmem:[#allocation2 + $0x4c] sm:$0x1] %vm922_vm2, %v13297_v19  ;;  %v11047_v47 = vmov 1983009808  }
  0x15   : > { %v10793_v0 = vld [vmem:[%s13303_s28] sm:$0xff]   ;;  %v10794_v1 = vld [vmem:[%s13303_s28 + $0x8] ss:$0 sps:$4 sm:$0x11]   ;;  %v1238_v48 = vunpack.c.l.s4 %v11047_v47  ;;  %vm2869_vm14 = vcmask 1042434   ;;  %vm2871_vm15 = vcmask 1043459  }
  0x16   : > { %10397 = vmatprep.subr.bf16.mxu0 %v10793_v0  ;;  %v723_v2 = vsel %vm721_vm0, %v10794_v1, 0  ;;  %s11162_s20 = scalar_lea.vmem %s13304_s1, %s10139_s30  ;;  %s9511_s18 = sshll.u32 %s13352_s25, 1 }
  0x17   : > { %10398 = vmatpush3.bf16.msra.mxu0 %v10793_v0  ;;  %v10795_v3 = vld [vmem:[%s11162_s20] sm:$0xff]   ;;  %v10796_v4 = vld [vmem:[%s11162_s20 + $0x8] sm:$0xff]   ;;  %v10797_v5 = vld [vmem:[%s11162_s20 + $0x10] sm:$0xff]   ;;  %v1239_v55 = vunpack.c.0.s8 %v1238_v48 }
  0x18   : > { %10779 = vmatprep.subr.msk.bf16.mxu0 %vm721_vm0, %v10794_v1  ;;  %10401 = vmatprep.mubr.msk.bf16.mxu0 %vm672_vm1, %v10795_v3  ;;  %v10798_v6 = vld [vmem:[%s11162_s20 + $0x18] sm:$0xff]   ;;  %v10799_v7 = vld [vmem:[%s11162_s20 + $0x20] sm:$0xff]   ;;  %v10800_v8 = vld [vmem:[%s11162_s20 + $0x28] sm:$0xff]  }
  0x19   : > { %v10801_v9 = vld [vmem:[%s11162_s20 + $0x30] sm:$0xff]   ;;  %v10802_v10 = vld [vmem:[%s11162_s20 + $0x38] sm:$0xff]   ;;  %v10803_v11 = vld [vmem:[%s11162_s20 + $0x40] sm:$0xff]   ;;  %v11260_v0 = vsub.s32 %v1239_v55, %v1241_v56 }
  0x1a   : > { %v10804_v12 = vld [vmem:[%s11162_s20 + $0x48] sm:$0xff]   ;;  %v10805_v13 = vld [vmem:[%s11162_s20 + $0x50] sm:$0xff]   ;;  %v10806_v14 = vld [vmem:[%s11162_s20 + $0x58] sm:$0xff]  }
  0x1b   : > { %10400 = vmatpush3.bf16.msra.mxu0 %v723_v2  ;;  %v10807_v15 = vld [vmem:[%s11162_s20 + $0x60] sm:$0xff]   ;;  %v10808_v16 = vld [vmem:[%s11162_s20 + $0x68] sm:$0xff]   ;;  %v10809_v17 = vld [vmem:[%s11162_s20 + $0x70] sm:$0xff]  }
  0x1c   : > { %v10810_v18 = vld [vmem:[%s11162_s20 + $0x78] sm:$0xff]   ;;  %s546_s20 = scalar_lea.vmem %s13295_s17, %s9511_s18 }
  0x1e   : > { %10402 = vmatmul.mubr.msk.bf16.vlgmr.msra.gmra.mrb[0].mxu0 %vm672_vm1, %v10796_v4 }
  0x1f   : > { %10405 = vmatprep.mubr.msk.bf16.mxu0 %vm672_vm1, %v10797_v5 }
  0x26   : > { %10406 = vmatmul.mubr.msk.bf16.gmra.mrb[4].mxu0 %vm672_vm1, %v10798_v6 }
  0x27   : > { %10409 = vmatprep.mubr.msk.bf16.mxu0 %vm672_vm1, %v10799_v7 }
  0x2e   : > { %10410 = vmatmul.mubr.msk.bf16.gmra.mrb[8].mxu0 %vm672_vm1, %v10800_v8 }
  0x2f   : > { %10413 = vmatprep.mubr.msk.bf16.mxu0 %vm672_vm1, %v10801_v9 }
  0x36   : > { %10414 = vmatmul.mubr.msk.bf16.gmra.mrb[12].mxu0 %vm672_vm1, %v10802_v10 }
  0x37   : > { %10417 = vmatprep.mubr.msk.bf16.mxu0 %vm672_vm1, %v10803_v11 }
  0x3e   : > { %10418 = vmatmul.mubr.msk.bf16.gmra.mrb[16].mxu0 %vm672_vm1, %v10804_v12 }
  0x3f   : > { %10421 = vmatprep.mubr.msk.bf16.mxu0 %vm672_vm1, %v10805_v13 }
  0x46   : > { %10422 = vmatmul.mubr.msk.bf16.gmra.mrb[20].mxu0 %vm672_vm1, %v10806_v14 }
  0x47   : > { %10425 = vmatprep.mubr.msk.bf16.mxu0 %vm672_vm1, %v10807_v15 }
  0x4e   : > { %10426 = vmatmul.mubr.msk.bf16.gmra.mrb[24].mxu0 %vm672_vm1, %v10808_v16 }
  0x4f   : > { %10429 = vmatprep.mubr.msk.bf16.mxu0 %vm672_vm1, %v10809_v17 }
  0x56   : > { %10430 = vmatmul.mubr.msk.bf16.gmra.mrb[28].mxu0 %vm672_vm1, %v10810_v18 }
  0xf1   : > { %v10403_v20 = vpop.f32.mrb[0].mxu0 }
  0xf2   : > { %889 = vst.msk [vmem:[#allocation4 + $0x10] sm:$0xff] %vm886_vm3, %v10403_v20  ;;  %v759_v21 = vpop.f32.mrb[1].mxu0 }
  0xf3   : > { %887 = vst.msk [vmem:[#allocation4] sm:$0xff] %vm886_vm3, %v759_v21  ;;  %v10404_v22 = vpop.f32.mrb[2].mxu0 }
  0xf4   : > { %890 = vst.msk [vmem:[#allocation4 + $0x18] sm:$0xff] %vm886_vm3, %v10404_v22  ;;  %v762_v23 = vpop.f32.mrb[3].mxu0 }
  0xf5   : > { %888 = vst.msk [vmem:[#allocation4 + $0x8] sm:$0xff] %vm886_vm3, %v762_v23 }
  0xf9   : > { %v944_v25 = vld [vmem:[#allocation4 + $0x10] sm:$0xff]  ;;  %v10407_v26 = vpop.f32.mrb[4].mxu0 }
  0xfa   : > { %v11227_v27 = vadd.f32 %v11224_v24, %v944_v25  ;;  %v942_v28 = vld [vmem:[#allocation4] sm:$0xff]  ;;  %893 = vst.msk [vmem:[#allocation4 + $0x30] sm:$0xff] %vm886_vm3, %v10407_v26  ;;  %v775_v29 = vpop.f32.mrb[5].mxu0 }
  0xfb   : > { %v11231_v30 = vadd.f32 %v11224_v24, %v942_v28  ;;  %v945_v31 = vld [vmem:[#allocation4 + $0x18] sm:$0xff]  ;;  %891 = vst.msk [vmem:[#allocation4 + $0x20] sm:$0xff] %vm886_vm3, %v775_v29  ;;  %v10408_v32 = vpop.f32.mrb[6].mxu0 }
  0xfc   : > { %v1046_v33 = vmin.f32 %v11227_v27, 0.0  ;;  %v11236_v34 = vadd.f32 %v11224_v24, %v945_v31  ;;  %v943_v35 = vld [vmem:[#allocation4 + $0x8] sm:$0xff]  ;;  %894 = vst.msk [vmem:[#allocation4 + $0x38] sm:$0xff] %vm886_vm3, %v10408_v32  ;;  %v778_v36 = vpop.f32.mrb[7].mxu0  ;;  %vm1014_vm4 = vcmp.gt.f32.partialorder %v11227_v27, 0.0 }
  0xfd   : > { %v1044_v37 = vmin.f32 %v11231_v30, 0.0  ;;  %v11241_v38 = vadd.f32 %v11224_v24, %v943_v35  ;;  %892 = vst.msk [vmem:[#allocation4 + $0x28] sm:$0xff] %vm886_vm3, %v778_v36  ;;  %vm1012_vm6 = vcmp.gt.f32.partialorder %v11231_v30, 0.0 }
  0xfe   : > { %v1080_v39 = vmul.f32 1.442695, %v1046_v33  ;;  %v1047_v40 = vmin.f32 %v11236_v34, 0.0  ;;  %vm1015_vm7 = vcmp.gt.f32.partialorder %v11236_v34, 0.0 }
  0xff   : > { %v1076_v41 = vmul.f32 1.442695, %v1044_v37  ;;  %v1045_v42 = vmin.f32 %v11241_v38, 0.0  ;;  %vm1013_vm8 = vcmp.gt.f32.partialorder %v11241_v38, 0.0 }
 0x100   : > { %10917 = vpow2.f32 %v1080_v39  ;;  %v1082_v43 = vmul.f32 1.442695, %v1047_v40 }
 0x101   : > { %10919 = vpow2.f32 %v1076_v41  ;;  %v1078_v44 = vmul.f32 1.442695, %v1045_v42  ;;  %v948_v45 = vld [vmem:[#allocation4 + $0x30] sm:$0xff]  ;;  %v10411_v46 = vpop.f32.mrb[8].mxu0 }
 0x102   : > { %10921 = vpow2.f32 %v1082_v43  ;;  %897 = vst.msk [vmem:[#allocation4 + $0x50] sm:$0xff] %vm886_vm3, %v10411_v46  ;;  %v791_v50 = vpop.f32.mrb[9].mxu0  ;;  %v11248_v51 = vadd.f32 %v11224_v24, %v948_v45  ;;  %v946_v52 = vld [vmem:[#allocation4 + $0x20] sm:$0xff] }
 0x103   : > { %895 = vst.msk [vmem:[#allocation4 + $0x40] sm:$0xff] %vm886_vm3, %v791_v50  ;;  %v10412_v53 = vpop.f32.mrb[10].mxu0  ;;  %10923 = vpow2.f32 %v1078_v44  ;;  %v11254_v57 = vadd.f32 %v11224_v24, %v946_v52  ;;  %v949_v58 = vld [vmem:[#allocation4 + $0x38] sm:$0xff] }
 0x104   : > { %898 = vst.msk [vmem:[#allocation4 + $0x58] sm:$0xff] %vm886_vm3, %v10412_v53  ;;  %v794_v54 = vpop.f32.mrb[11].mxu0  ;;  %v1050_v59 = vmin.f32 %v11248_v51, 0.0  ;;  %v947_v60 = vld [vmem:[#allocation4 + $0x28] sm:$0xff]  ;;  %v11258_v61 = vadd.f32 %v11224_v24, %v949_v58  ;;  %vm1018_vm9 = vcmp.gt.f32.partialorder %v11248_v51, 0.0 }
 0x105   : > { %896 = vst.msk [vmem:[#allocation4 + $0x48] sm:$0xff] %vm886_vm3, %v794_v54  ;;  %v1048_v1 = vmin.f32 %v11254_v57, 0.0  ;;  %v11265_v6 = vadd.f32 %v11224_v24, %v947_v60  ;;  %vm1016_vm10 = vcmp.gt.f32.partialorder %v11254_v57, 0.0 }
 0x106   : > { %v1088_v5 = vmul.f32 1.442695, %v1050_v59  ;;  %v1051_v13 = vmin.f32 %v11258_v61, 0.0  ;;  %vm1019_vm11 = vcmp.gt.f32.partialorder %v11258_v61, 0.0 }
 0x107   : > { %v1084_v18 = vmul.f32 1.442695, %v1048_v1  ;;  %v1049_v22 = vmin.f32 %v11265_v6, 0.0  ;;  %vm1017_vm12 = vcmp.gt.f32.partialorder %v11265_v6, 0.0 }
 0x108   : > { %10925 = vpow2.f32 %v1088_v5  ;;  %v1090_v52 = vmul.f32 1.442695, %v1051_v13 }
 0x109   : > { %v10415_v62 = vpop.f32.mrb[12].mxu0  ;;  %10927 = vpow2.f32 %v1084_v18  ;;  %v1086_v60 = vmul.f32 1.442695, %v1049_v22 }
 0x10a   : > { %v10918_v63 = vpop.eup %10917  ;;  %901 = vst.msk [vmem:[#allocation4 + $0x70] sm:$0xff] %vm886_vm3, %v10415_v62  ;;  %v807_v2 = vpop.f32.mrb[13].mxu0  ;;  %10929 = vpow2.f32 %v1090_v52 }
 0x10b   : > { %v10920_v3 = vpop.eup %10919  ;;  %v9549_v4 = vadd.f32 -1.0, %v10918_v63  ;;  %899 = vst.msk [vmem:[#allocation4 + $0x60] sm:$0xff] %vm886_vm3, %v807_v2  ;;  %v10416_v7 = vpop.f32.mrb[14].mxu0  ;;  %10931 = vpow2.f32 %v1086_v60 }
 0x10c   : > { %v10922_v8 = vpop.eup %10921  ;;  %v9547_v9 = vadd.f32 -1.0, %v10920_v3  ;;  %902 = vst.msk [vmem:[#allocation4 + $0x78] sm:$0xff] %vm886_vm3, %v10416_v7  ;;  %v810_v10 = vpop.f32.mrb[15].mxu0 }
 0x10d   : > { %v1174_v11 = vsel %vm1014_vm4, %v11227_v27, %v9549_v4  ;;  %v9550_v12 = vadd.f32 -1.0, %v10922_v8  ;;  %900 = vst.msk [vmem:[#allocation4 + $0x68] sm:$0xff] %vm886_vm3, %v810_v10  ;;  %v10924_v14 = vpop.eup %10923 }
 0x10e   : > { %v1270_v15 = vcombine.high %v1174_v11, %v1174_v11  ;;  %v1277_v16 = vrot.slane %v1174_v11, %v11260_v0  ;;  %v1172_v17 = vsel %vm1012_vm6, %v11231_v30, %v9547_v9  ;;  %v9548_v31 = vadd.f32 -1.0, %v10924_v14  ;;  %v952_v9 = vld [vmem:[#allocation4 + $0x50] sm:$0xff] }
 0x10f   : > { %v1236_v20 = vcombine.high %v1172_v17, %v1172_v17  ;;  %v1243_v21 = vrot.slane %v1172_v17, %v11260_v0  ;;  %v1175_v27 = vsel %vm1015_vm7, %v11236_v34, %v9550_v12  ;;  %v11307_v22 = vadd.f32 %v11224_v24, %v952_v9 }
 0x110   : > { %v1284_v23 = vrot.slane %v1270_v15, %v11260_v0  ;;  %v1285_v25 = vcombine.high %v1277_v16, %v1277_v16  ;;  %v1910_v26 = vsel %vm1908_vm5, %v1277_v16, 0.0  ;;  %v1287_v42 = vcombine.high %v1175_v27, %v1175_v27 }
 0x111   : > { %v1250_v28 = vrot.slane %v1236_v20, %v11260_v0  ;;  %v1251_v29 = vcombine.high %v1243_v21, %v1243_v21  ;;  %v1909_v30 = vsel %vm1908_vm5, %v1243_v21, 0.0  ;;  %v10419_v32 = vpop.f32.mrb[16].mxu0  ;;  %v1294_v50 = vrot.slane %v1175_v27, %v11260_v0 }
 0x112   : > { %v1286_v33 = vcombine.high %v1284_v23, %v1284_v23  ;;  %v1919_v35 = vsel %vm1908_vm5, %v1285_v25, 0.0  ;;  %v1928_v36 = vsel %vm1908_vm5, %v1284_v23, 0.0  ;;  %v1911_v37 = vadd.f32 %v1910_v26, %v1909_v30  ;;  %905 = vst.msk [vmem:[#allocation4 + $0x90] sm:$0xff] %vm886_vm3, %v10419_v32  ;;  %v823_v39 = vpop.f32.mrb[17].mxu0  ;;  %v10926_v3 = vpop.eup %10925 }
 0x113   : > { %v1252_v40 = vcombine.high %v1250_v28, %v1250_v28  ;;  %v1918_v41 = vsel %vm1908_vm5, %v1251_v29, 0.0  ;;  %v1927_v34 = vsel %vm1908_vm5, %v1250_v28, 0.0  ;;  %903 = vst.msk [vmem:[#allocation4 + $0x80] sm:$0xff] %vm886_vm3, %v823_v39  ;;  %v10420_v43 = vpop.f32.mrb[18].mxu0  ;;  %v1301_v58 = vrot.slane %v1287_v42, %v11260_v0 }
 0x114   : > { %v1937_v44 = vsel %vm1908_vm5, %v1286_v33, 0.0  ;;  %v1912_v45 = vrot.slane %v1911_v37, 4  ;;  %v1920_v46 = vadd.f32 %v1919_v35, %v1918_v41  ;;  %v1929_v47 = vadd.f32 %v1928_v36, %v1927_v34  ;;  %906 = vst.msk [vmem:[#allocation4 + $0x98] sm:$0xff] %vm886_vm3, %v10420_v43  ;;  %v826_v48 = vpop.f32.mrb[19].mxu0  ;;  %v950_v33 = vld [vmem:[#allocation4 + $0x40] sm:$0xff] }
 0x115   : > { %v1936_v49 = vsel %vm1908_vm5, %v1252_v40, 0.0  ;;  %904 = vst.msk [vmem:[#allocation4 + $0x88] sm:$0xff] %vm886_vm3, %v826_v48  ;;  %v1173_v59 = vsel %vm1013_vm8, %v11241_v38, %v9548_v31  ;;  %v1302_v4 = vcombine.high %v1294_v50, %v1294_v50  ;;  %v1946_v5 = vsel %vm1908_vm5, %v1294_v50, 0.0  ;;  %v10928_v40 = vpop.eup %10927  ;;  %v953_v48 = vld [vmem:[#allocation4 + $0x58] sm:$0xff] }
 0x116   : > { %v1913_v53 = vadd.f32 %v1912_v45, %v1911_v37  ;;  %v1921_v54 = vrot.slane %v1920_v46, 4  ;;  %v1930_v55 = vrot.slane %v1929_v47, 4  ;;  %v1938_v56 = vadd.f32 %v1937_v44, %v1936_v49 }
 0x117   : > { %v1253_v7 = vcombine.high %v1173_v59, %v1173_v59  ;;  %v1260_v8 = vrot.slane %v1173_v59, %v11260_v0  ;;  %v1303_v25 = vcombine.high %v1301_v58, %v1301_v58  ;;  %v1955_v26 = vsel %vm1908_vm5, %v1302_v4, 0.0 }
 0x118   : > { %v1914_v62 = vrot.slane %v1913_v53, 2  ;;  %v1922_v63 = vadd.f32 %v1921_v54, %v1920_v46  ;;  %v1931_v1 = vadd.f32 %v1930_v55, %v1929_v47  ;;  %v1939_v2 = vrot.slane %v1938_v56, 4 }
 0x119   : > { %v10423_v10 = vpop.f32.mrb[20].mxu0  ;;  %v1267_v15 = vrot.slane %v1253_v7, %v11260_v0  ;;  %v1268_v16 = vcombine.high %v1260_v8, %v1260_v8  ;;  %v1945_v17 = vsel %vm1908_vm5, %v1260_v8, 0.0  ;;  %v1964_v29 = vsel %vm1908_vm5, %v1301_v58, 0.0 }
 0x11a   : > { %v1915_v11 = vadd.f32 %v1914_v62, %v1913_v53  ;;  %v1923_v12 = vrot.slane %v1922_v63, 2  ;;  %v1932_v13 = vrot.slane %v1931_v1, 2  ;;  %v1940_v14 = vadd.f32 %v1939_v2, %v1938_v56  ;;  %909 = vst.msk [vmem:[#allocation4 + $0xb0] sm:$0xff] %vm886_vm3, %v10423_v10  ;;  %v839_v38 = vpop.f32.mrb[21].mxu0  ;;  %v10930_v56 = vpop.eup %10929 }
 0x11b   : > { %907 = vst.msk [vmem:[#allocation4 + $0xa0] sm:$0xff] %vm886_vm3, %v839_v38  ;;  %v1947_v27 = vadd.f32 %v1946_v5, %v1945_v17  ;;  %v10424_v28 = vpop.f32.mrb[22].mxu0  ;;  %v1269_v30 = vcombine.high %v1267_v15, %v1267_v15  ;;  %v1954_v31 = vsel %vm1908_vm5, %v1268_v16, 0.0  ;;  %v9553_v32 = vadd.f32 -1.0, %v10926_v3 }
 0x11c   : > { %v1924_v18 = vadd.f32 %v1923_v12, %v1922_v63  ;;  %v1933_v20 = vadd.f32 %v1932_v13, %v1931_v1  ;;  %v1941_v21 = vrot.slane %v1940_v14, 2  ;;  %v1916_v23 = vrot.slane %v1915_v11, 1  ;;  %910 = vst.msk [vmem:[#allocation4 + $0xb8] sm:$0xff] %vm886_vm3, %v10424_v28  ;;  %v842_v55 = vpop.f32.mrb[23].mxu0 }
 0x11d   : > { %v1963_v39 = vsel %vm1908_vm5, %v1267_v15, 0.0  ;;  %v1948_v34 = vrot.slane %v1947_v27, 4  ;;  %v1956_v42 = vadd.f32 %v1955_v26, %v1954_v31  ;;  %v11316_v43 = vadd.f32 %v11224_v24, %v950_v33  ;;  %908 = vst.msk [vmem:[#allocation4 + $0xa8] sm:$0xff] %vm886_vm3, %v842_v55  ;;  %v10932_v15 = vpop.eup %10931 }
 0x11e   : > { %v1925_v35 = vrot.slane %v1924_v18, 1  ;;  %v1934_v36 = vrot.slane %v1933_v20, 1  ;;  %v1942_v37 = vadd.f32 %v1941_v21, %v1940_v14  ;;  %v1917_v41 = vadd.f32 %v1916_v23, %v1915_v11 }
 0x11f   : > { %v1973_v44 = vsel %vm1908_vm5, %v1303_v25, 0.0  ;;  %v1965_v45 = vadd.f32 %v1964_v29, %v1963_v39  ;;  %v1178_v46 = vsel %vm1018_vm9, %v11248_v51, %v9553_v32  ;;  %v1054_v47 = vmin.f32 %v11307_v22, 0.0 }
 0x120   : > { %v1926_v49 = vadd.f32 %v1925_v35, %v1924_v18  ;;  %v1935_v50 = vadd.f32 %v1934_v36, %v1933_v20  ;;  %v1943_v52 = vrot.slane %v1942_v37, 1  ;;  %v1972_v53 = vsel %vm1908_vm5, %v1269_v30, 0.0 }
 0x121   : > { %v9551_v54 = vadd.f32 -1.0, %v10928_v40  ;;  %v11324_v58 = vmul.f32 0.25, %v1917_v41  ;;  %v1949_v59 = vadd.f32 %v1948_v34, %v1947_v27  ;;  %v1957_v60 = vrot.slane %v1956_v42, 4 }
 0x122   : > { %v11327_v51 = vadd.f32 %v11224_v24, %v953_v48  ;;  %v1966_v62 = vrot.slane %v1965_v45, 4  ;;  %v1974_v63 = vadd.f32 %v1973_v44, %v1972_v53  ;;  %v1338_v1 = vcombine.high %v1178_v46, %v1178_v46 }
 0x123   : > { %v1052_v2 = vmin.f32 %v11316_v43, 0.0  ;;  %v1944_v3 = vadd.f32 %v1943_v52, %v1942_v37  ;;  %v11331_v4 = vmul.f32 0.25, %v1926_v49  ;;  %v11333_v5 = vmul.f32 0.25, %v1935_v50  ;;  %v10427_v52 = vpop.f32.mrb[24].mxu0 }
 0x124   : > { %v11335_v7 = vmul.f32 1.442695, %v1054_v47  ;;  %v1345_v8 = vrot.slane %v1178_v46, %v11260_v0  ;;  %v1352_v9 = vrot.slane %v1338_v1, %v11260_v0  ;;  %v1176_v10 = vsel %vm1016_vm10, %v11254_v57, %v9551_v54  ;;  %913 = vst.msk [vmem:[#allocation4 + $0xd0] sm:$0xff] %vm886_vm3, %v10427_v52 }
 0x125   : > { %v9554_v11 = vadd.f32 -1.0, %v10930_v56  ;;  %v10140_v12 = vpack.c.bf16 %v11324_v58, %v11324_v58  ;;  %v1950_v13 = vrot.slane %v1949_v59, 2  ;;  %v11344_v14 = vadd.f32 %v1957_v60, %v1956_v42 }
 0x126   : > { %v1304_v38 = vcombine.high %v1176_v10, %v1176_v10  ;;  %v11346_v16 = vadd.f32 %v1966_v62, %v1965_v45  ;;  %v1975_v17 = vrot.slane %v1974_v63, 4  ;;  %v1353_v18 = vcombine.high %v1345_v8, %v1345_v8 }
 0x127   : > { %v1354_v20 = vcombine.high %v1352_v9, %v1352_v9  ;;  %v11349_v21 = vmul.f32 0.25, %v1944_v3  ;;  %v10141_v57 = vpack.c.bf16 %v11331_v4, %v11331_v4  ;;  %v1311_v23 = vrot.slane %v1176_v10, %v11260_v0 }
 0x128   : > { %v1318_v25 = vrot.slane %v1304_v38, %v11260_v0  ;;  %v10142_v26 = vpack.c.bf16 %v11333_v5, %v11333_v5  ;;  %v1982_v27 = vsel %vm1908_vm5, %v1345_v8, 0.0  ;;  %v2000_v28 = vsel %vm1908_vm5, %v1352_v9, 0.0 }
 0x129   : > { %v1179_v29 = vsel %vm1019_vm11, %v11258_v61, %v9554_v11  ;;  %v1991_v30 = vsel %vm1908_vm5, %v1353_v18, 0.0  ;;  %v2009_v31 = vsel %vm1908_vm5, %v1354_v20, 0.0  ;;  %v1319_v32 = vcombine.high %v1311_v23, %v1311_v23 }
 0x12a   : > { %v1320_v33 = vcombine.high %v1318_v25, %v1318_v25  ;;  %v1981_v35 = vsel %vm1908_vm5, %v1311_v23, 0.0  ;;  %v1999_v36 = vsel %vm1908_vm5, %v1318_v25, 0.0  ;;  %v1355_v37 = vcombine.high %v1179_v29, %v1179_v29 }
 0x12b   : > { %v1362_v39 = vrot.slane %v1179_v29, %v11260_v0  ;;  %v11367_v40 = vadd.f32 %v1950_v13, %v1949_v59  ;;  %v1983_v41 = vadd.f32 %v1982_v27, %v1981_v35  ;;  %v1990_v34 = vsel %vm1908_vm5, %v1319_v32, 0.0 }
 0x12c   : > { %v9552_v42 = vadd.f32 -1.0, %v10932_v15  ;;  %v1992_v61 = vadd.f32 %v1991_v30, %v1990_v34  ;;  %v2001_v44 = vadd.f32 %v2000_v28, %v1999_v36  ;;  %v2008_v45 = vsel %vm1908_vm5, %v1320_v33, 0.0 }
 0x12d   : > { %v1369_v46 = vrot.slane %v1355_v37, %v11260_v0  ;;  %v1976_v47 = vadd.f32 %v1975_v17, %v1974_v63  ;;  %v1984_v48 = vrot.slane %v1983_v41, 4  ;;  %v2010_v49 = vadd.f32 %v2009_v31, %v2008_v45 }
 0x12e   : > { %v1370_v50 = vcombine.high %v1362_v39, %v1362_v39  ;;  %v1993_v53 = vrot.slane %v1992_v61, 4  ;;  %v2002_v54 = vrot.slane %v2001_v44, 4  ;;  %v2018_v56 = vsel %vm1908_vm5, %v1362_v39, 0.0 }
 0x12f   : > { %v1371_v55 = vcombine.high %v1369_v46, %v1369_v46  ;;  %v1985_v59 = vadd.f32 %v1984_v48, %v1983_v41  ;;  %v2011_v60 = vrot.slane %v2010_v49, 4  ;;  %v2036_v62 = vsel %vm1908_vm5, %v1369_v46, 0.0 }
 0x130   : > { %v1177_v1 = vsel %vm1017_vm12, %v11265_v6, %v9552_v42  ;;  %v1994_v63 = vadd.f32 %v1993_v53, %v1992_v61  ;;  %v2003_v3 = vadd.f32 %v2002_v54, %v2001_v44  ;;  %v2027_v8 = vsel %vm1908_vm5, %v1370_v50, 0.0 }
 0x131   : > { %v1321_v9 = vcombine.high %v1177_v1, %v1177_v1  ;;  %v1986_v10 = vrot.slane %v1985_v59, 2  ;;  %v2012_v11 = vadd.f32 %v2011_v60, %v2010_v49  ;;  %v2045_v13 = vsel %vm1908_vm5, %v1371_v55, 0.0  ;;  %v855_v49 = vpop.f32.mrb[25].mxu0 }
 0x132   : > { %v1328_v38 = vrot.slane %v1177_v1, %v11260_v0  ;;  %v1995_v15 = vrot.slane %v1994_v63, 2  ;;  %v2004_v17 = vrot.slane %v2003_v3, 2  ;;  %10933 = vpow2.f32 %v11335_v7  ;;  %911 = vst.msk [vmem:[#allocation4 + $0xc0] sm:$0xff] %vm886_vm3, %v855_v49 }
 0x133   : > { %v1335_v18 = vrot.slane %v1321_v9, %v11260_v0  ;;  %v1987_v20 = vadd.f32 %v1986_v10, %v1985_v59  ;;  %v2013_v23 = vrot.slane %v2012_v11, 2  ;;  %v11389_v7 = vunpack.c.l.b16 %v10140_v12 }
 0x134   : > { %v1336_v6 = vcombine.high %v1328_v38, %v1328_v38  ;;  %v2017_v25 = vsel %vm1908_vm5, %v1328_v38, 0.0  ;;  %v1996_v27 = vadd.f32 %v1995_v15, %v1994_v63  ;;  %v2005_v28 = vadd.f32 %v2004_v17, %v2003_v3 }
 0x135   : > { %v1337_v29 = vcombine.high %v1335_v18, %v1335_v18  ;;  %v2019_v30 = vadd.f32 %v2018_v56, %v2017_v25  ;;  %v1988_v31 = vrot.slane %v1987_v20, 1  ;;  %v2014_v32 = vadd.f32 %v2013_v23, %v2012_v11 }
 0x136   : > { %v2026_v33 = vsel %vm1908_vm5, %v1336_v6, 0.0  ;;  %v2035_v35 = vsel %vm1908_vm5, %v1335_v18, 0.0  ;;  %v1997_v36 = vrot.slane %v1996_v27, 1  ;;  %v2006_v37 = vrot.slane %v2005_v28, 1 }
 0x137   : > { %v2020_v39 = vrot.slane %v2019_v30, 4  ;;  %v2028_v41 = vadd.f32 %v2027_v8, %v2026_v33  ;;  %v1977_v34 = vrot.slane %v1976_v47, 2  ;;  %v2037_v42 = vadd.f32 %v2036_v62, %v2035_v35 }
 0x138   : > { %v2044_v61 = vsel %vm1908_vm5, %v1337_v29, 0.0  ;;  %v1989_v44 = vadd.f32 %v1988_v31, %v1987_v20  ;;  %v1998_v45 = vadd.f32 %v1997_v36, %v1996_v27  ;;  %v1952_v50 = vrot.slane %v11367_v40, 1 }
 0x139   : > { %v2021_v46 = vadd.f32 %v2020_v39, %v2019_v30  ;;  %v2029_v48 = vrot.slane %v2028_v41, 4  ;;  %v2015_v52 = vrot.slane %v2014_v32, 1  ;;  %v2038_v53 = vrot.slane %v2037_v42, 4  ;;  %v10428_v39 = vpop.f32.mrb[26].mxu0 }
 0x13a   : > { %v2046_v54 = vadd.f32 %v2045_v13, %v2044_v61  ;;  %vm1022_vm13 = vcmp.gt.f32.partialorder %v11307_v22, 0.0  ;;  %v2007_v58 = vadd.f32 %v2006_v37, %v2005_v28  ;;  %v2494_v12 = vmul.f32 0.25, %v1998_v45  ;;  %914 = vst.msk [vmem:[#allocation4 + $0xd8] sm:$0xff] %vm886_vm3, %v10428_v39 }
 0x13b   : > { %v2022_v55 = vrot.slane %v2021_v46, 2  ;;  %v2030_v56 = vadd.f32 %v2029_v48, %v2028_v41  ;;  %v1959_v59 = vrot.slane %v11344_v14, 2  ;;  %v1978_v60 = vadd.f32 %v1977_v34, %v1976_v47  ;;  %v956_v48 = vld [vmem:[#allocation4 + $0x70] sm:$0xff] }
 0x13c   : > { %v2039_v62 = vadd.f32 %v2038_v53, %v2037_v42  ;;  %v2047_v1 = vrot.slane %v2046_v54, 4  ;;  %v10934_v63 = vpop.eup %10933  ;;  %v2493_v3 = vmul.f32 0.25, %v1989_v44  ;;  %v1092_v10 = vmul.f32 1.442695, %v1052_v2 }
 0x13d   : > { %v2023_v8 = vadd.f32 %v2022_v55, %v2021_v46  ;;  %v2031_v9 = vrot.slane %v2030_v56, 2  ;;  %v1953_v11 = vadd.f32 %v1952_v50, %v11367_v40  ;;  %v2016_v13 = vadd.f32 %v2015_v52, %v2014_v32 }
 0x13e   : > { %v2040_v38 = vrot.slane %v2039_v62, 2  ;;  %v2048_v15 = vadd.f32 %v2047_v1, %v2046_v54  ;;  %v1968_v17 = vrot.slane %v11346_v16, 2  ;;  %v2495_v18 = vmul.f32 0.25, %v2007_v58  ;;  %v954_v54 = vld [vmem:[#allocation4 + $0x60] sm:$0xff] }
 0x13f   : > { %v10149_v20 = vpack.c.bf16 %v2494_v12, %v2494_v12  ;;  %v2032_v47 = vadd.f32 %v2031_v9, %v2030_v56  ;;  %v2024_v6 = vrot.slane %v2023_v8, 1  ;;  %v9557_v27 = vadd.f32 -1.0, %v10934_v63 }
 0x140   : > { %v2049_v25 = vrot.slane %v2048_v15, 2  ;;  %v1979_v28 = vrot.slane %v1978_v60, 1  ;;  %v10148_v29 = vpack.c.bf16 %v2493_v3, %v2493_v3  ;;  %v2041_v2 = vadd.f32 %v2040_v38, %v2039_v62  ;;  %v858_v38 = vpop.f32.mrb[27].mxu0 }
 0x141   : > { %10935 = vpow2.f32 %v1092_v10  ;;  %v11405_v40 = vunpack.c.l.b16 %v10141_v57  ;;  %v11408_v30 = vadd.f32 %v1959_v59, %v11344_v14  ;;  %v2489_v31 = vmul.f32 0.25, %v1953_v11  ;;  %912 = vst.msk [vmem:[#allocation4 + $0xc8] sm:$0xff] %vm886_vm3, %v858_v38  ;;  %v960_v38 = vld [vmem:[#allocation4 + $0x90] sm:$0xff] }
 0x142   : > { %v2496_v32 = vmul.f32 0.25, %v2016_v13  ;;  %v10150_v33 = vpack.c.bf16 %v2495_v18, %v2495_v18  ;;  %v2814_v35 = vunpack.c.l.b16 %v10149_v20  ;;  %v2033_v36 = vrot.slane %v2032_v47, 1 }
 0x143   : > { %v1182_v37 = vsel %vm1022_vm13, %v11307_v22, %v9557_v27  ;;  %v11416_v4 = vunpack.c.l.b16 %v10142_v26  ;;  %v2025_v57 = vadd.f32 %v2024_v6, %v2023_v8  ;;  %v2050_v41 = vadd.f32 %v2049_v25, %v2048_v15  ;;  %v951_v26 = vld [vmem:[#allocation4 + $0x48] sm:$0xff] }
 0x144   : > { %v1055_v14 = vmin.f32 %v11327_v51, 0.0  ;;  %v11421_v34 = vadd.f32 %v1968_v17, %v11346_v16  ;;  %v1980_v42 = vadd.f32 %v1979_v28, %v1978_v60  ;;  %v2813_v61 = vunpack.c.l.b16 %v10148_v29 }
 0x145   : > { %v2042_v44 = vrot.slane %v2041_v2, 1  ;;  %vm1020_vm1 = vcmp.gt.f32.partialorder %v11316_v43, 0.0  ;;  %v10144_v22 = vpack.c.bf16 %v2489_v31, %v2489_v31  ;;  %v10151_v45 = vpack.c.bf16 %v2496_v32, %v2496_v32 }
 0x146   : > { %v1406_v46 = vcombine.high %v1182_v37, %v1182_v37  ;;  %v1098_v5 = vmul.f32 1.442695, %v1055_v14  ;;  %v2815_v50 = vunpack.c.l.b16 %v10150_v33  ;;  %v2881_v52 = vsel %vm2869_vm14, %v2814_v35, %v2813_v61  ;;  %v957_v35 = vld [vmem:[#allocation4 + $0x78] sm:$0xff] }
 0x147   : > { %v2034_v53 = vadd.f32 %v2033_v36, %v2032_v47  ;;  %v2051_v16 = vrot.slane %v2050_v41, 1  ;;  %v2497_v58 = vmul.f32 0.25, %v2025_v57  ;;  %v1413_v12 = vrot.slane %v1182_v37, %v11260_v0 }
 0x148   : > { %10937 = vpow2.f32 %v1098_v5  ;;  %v11427_v55 = vmul.f32 0.25, %v1980_v42  ;;  %v2043_v56 = vadd.f32 %v2042_v44, %v2041_v2  ;;  %v11430_v59 = vadd.f32 %v11224_v24, %v951_v26 }
 0x149   : > { %v11433_v60 = vadd.f32 %v11224_v24, %v956_v48  ;;  %v11435_v62 = vunpack.c.l.b16 %v10144_v22  ;;  %v11437_v1 = vunpack.c.l.b16 %v10151_v45  ;;  %v1420_v63 = vrot.slane %v1406_v46, %v11260_v0  ;;  %v955_v46 = vld [vmem:[#allocation4 + $0x68] sm:$0xff] }
 0x14a   : > { %v11441_v3 = vadd.f32 %v11224_v24, %v954_v54  ;;  %v11444_v9 = vsel %vm2871_vm15, %v2815_v50, %v2881_v52  ;;  %v2498_v10 = vmul.f32 0.25, %v2034_v53  ;;  %v1053_v11 = vmin.f32 %v11430_v59, 0.0 }
 0x14b   : > { %v10936_v8 = vpop.eup %10935  ;;  %v1058_v13 = vmin.f32 %v11433_v60, 0.0  ;;  %v2052_v15 = vadd.f32 %v2051_v16, %v2050_v41  ;;  %v10152_v17 = vpack.c.bf16 %v2497_v58, %v2497_v58  ;;  %v1421_v18 = vcombine.high %v1413_v12, %v1413_v12 }
 0x14c   : > { %v9555_v20 = vadd.f32 -1.0, %v10936_v8  ;;  %v2499_v47 = vmul.f32 0.25, %v2043_v56  ;;  %vm1023_vm4 = vcmp.gt.f32.partialorder %v11327_v51, 0.0  ;;  %v1094_v6 = vmul.f32 1.442695, %v1053_v11 }
 0x14d   : > { %v1104_v25 = vmul.f32 1.442695, %v1058_v13  ;;  %v1422_v27 = vcombine.high %v1420_v63, %v1420_v63  ;;  %v2054_v28 = vsel %vm1908_vm5, %v1413_v12, 0.0  ;;  %v1056_v2 = vmin.f32 %v11441_v3, 0.0 }
 0x14e   : > { %v1180_v29 = vsel %vm1020_vm1, %v11316_v43, %v9555_v20  ;;  %v10153_v31 = vpack.c.bf16 %v2498_v10, %v2498_v10  ;;  %10939 = vpow2.f32 %v1094_v6  ;;  %v11456_v36 = vmul.f32 0.25, %v2052_v15  ;;  %v10431_v15 = vpop.f32.mrb[28].mxu0 }
 0x14f   : > { %v1372_v32 = vcombine.high %v1180_v29, %v1180_v29  ;;  %v1379_v33 = vrot.slane %v1180_v29, %v11260_v0  ;;  %v11458_v37 = vunpack.c.l.b16 %v10152_v17  ;;  %v2063_v39 = vsel %vm1908_vm5, %v1421_v18, 0.0  ;;  %917 = vst.msk [vmem:[#allocation4 + $0xf0] sm:$0xff] %vm886_vm3, %v10431_v15 }
 0x150   : > { %10941 = vpow2.f32 %v1104_v25  ;;  %v2072_v57 = vsel %vm1908_vm5, %v1420_v63, 0.0  ;;  %v2081_v61 = vsel %vm1908_vm5, %v1422_v27, 0.0  ;;  %v1100_v22 = vmul.f32 1.442695, %v1056_v2 }
 0x151   : > { %v1386_v41 = vrot.slane %v1372_v32, %v11260_v0  ;;  %v1387_v43 = vcombine.high %v1379_v33, %v1379_v33  ;;  %v2053_v14 = vsel %vm1908_vm5, %v1379_v33, 0.0  ;;  %v11466_v45 = vadd.f32 %v11224_v24, %v957_v35 }
 0x152   : > { %v10938_v42 = vpop.eup %10937  ;;  %v2055_v44 = vadd.f32 %v2054_v28, %v2053_v14  ;;  %v10154_v52 = vpack.c.bf16 %v2499_v47, %v2499_v47  ;;  %v11470_v58 = vunpack.c.l.b16 %v10153_v31  ;;  %v11477_v63 = vadd.f32 %v11224_v24, %v955_v46 }
 0x153   : > { %v1388_v5 = vcombine.high %v1386_v41, %v1386_v41  ;;  %v2062_v26 = vsel %vm1908_vm5, %v1387_v43, 0.0  ;;  %v2071_v48 = vsel %vm1908_vm5, %v1386_v41, 0.0  ;;  %v9558_v50 = vadd.f32 -1.0, %v10938_v42  ;;  %v871_v42 = vpop.f32.mrb[29].mxu0 }
 0x154   : > { %v2056_v53 = vrot.slane %v2055_v44, 4  ;;  %v2064_v54 = vadd.f32 %v2063_v39, %v2062_v26  ;;  %v2073_v16 = vadd.f32 %v2072_v57, %v2071_v48  ;;  %10943 = vpow2.f32 %v1100_v22  ;;  %915 = vst.msk [vmem:[#allocation4 + $0xe0] sm:$0xff] %vm886_vm3, %v871_v42  ;;  %v10432_v42 = vpop.f32.mrb[30].mxu0 }
 0x155   : > { %v2080_v12 = vsel %vm1908_vm5, %v1388_v5, 0.0  ;;  %v1183_v56 = vsel %vm1023_vm4, %v11327_v51, %v9558_v50  ;;  %v1059_v20 = vmin.f32 %v11466_v45, 0.0  ;;  %v11482_v28 = vunpack.c.l.b16 %v10154_v52  ;;  %v958_v5 = vld [vmem:[#allocation4 + $0x80] sm:$0xff]  ;;  %918 = vst.msk [vmem:[#allocation4 + $0xf8] sm:$0xff] %vm886_vm3, %v10432_v42 }
 0x156   : > { %v2057_v8 = vadd.f32 %v2056_v53, %v2055_v44  ;;  %v2065_v10 = vrot.slane %v2064_v54, 4  ;;  %v2074_v11 = vrot.slane %v2073_v16, 4  ;;  %v2082_v13 = vadd.f32 %v2081_v61, %v2080_v12 }
 0x157   : > { %v1423_v17 = vcombine.high %v1183_v56, %v1183_v56  ;;  %v1430_v18 = vrot.slane %v1183_v56, %v11260_v0  ;;  %v1057_v2 = vmin.f32 %v11477_v63, 0.0  ;;  %v11487_v31 = vadd.f32 %v11224_v24, %v960_v38 }
 0x158   : > { %v2058_v47 = vrot.slane %v2057_v8, 2  ;;  %v2066_v6 = vadd.f32 %v2065_v10, %v2064_v54  ;;  %v2075_v51 = vadd.f32 %v2074_v11, %v2073_v16  ;;  %v2083_v25 = vrot.slane %v2082_v13, 4  ;;  %v10940_v27 = vpop.eup %10939 }
 0x159   : > { %v1437_v29 = vrot.slane %v1423_v17, %v11260_v0  ;;  %v1438_v41 = vcombine.high %v1430_v18, %v1430_v18  ;;  %vm1021_vm6 = vcmp.gt.f32.partialorder %v11430_v59, 0.0  ;;  %v9556_v43 = vadd.f32 -1.0, %v10940_v27 }
 0x15a   : > { %v10942_v32 = vpop.eup %10941  ;;  %v2059_v33 = vadd.f32 %v2058_v47, %v2057_v8  ;;  %v2067_v35 = vrot.slane %v2066_v6, 2  ;;  %v2076_v39 = vrot.slane %v2075_v51, 2  ;;  %v2084_v57 = vadd.f32 %v2083_v25, %v2082_v13 }
 0x15b   : > { %v1106_v14 = vmul.f32 1.442695, %v1059_v20  ;;  %v1181_v26 = vsel %vm1021_vm6, %v11430_v59, %v9556_v43  ;;  %vm1026_vm7 = vcmp.gt.f32.partialorder %v11433_v60, 0.0  ;;  %v9561_v48 = vadd.f32 -1.0, %v10942_v32 }
 0x15c   : > { %v2060_v61 = vrot.slane %v2059_v33, 1  ;;  %v2068_v44 = vadd.f32 %v2067_v35, %v2066_v6  ;;  %v2077_v22 = vadd.f32 %v2076_v39, %v2075_v51  ;;  %v2085_v46 = vrot.slane %v2084_v57, 2 }
 0x15d   : > { %v1102_v50 = vmul.f32 1.442695, %v1057_v2  ;;  %v1439_v54 = vcombine.high %v1437_v29, %v1437_v29  ;;  %v1062_v16 = vmin.f32 %v11487_v31, 0.0  ;;  %v1389_v12 = vcombine.high %v1181_v26, %v1181_v26 }
 0x15e   : > { %v2069_v52 = vrot.slane %v2068_v44, 1  ;;  %v2086_v53 = vadd.f32 %v2085_v46, %v2084_v57  ;;  %v1396_v56 = vrot.slane %v1181_v26, %v11260_v0  ;;  %10945 = vpow2.f32 %v1106_v14  ;;  %v10944_v38 = vpop.eup %10943 }
 0x15f   : > { %v11496_v8 = vadd.f32 %v11224_v24, %v958_v5  ;;  %v2061_v10 = vadd.f32 %v2060_v61, %v2059_v33  ;;  %v2078_v11 = vrot.slane %v2077_v22, 1  ;;  %v2090_v59 = vsel %vm1908_vm5, %v1430_v18, 0.0 }
 0x160   : > { %v2099_v13 = vsel %vm1908_vm5, %v1438_v41, 0.0  ;;  %vm1024_vm8 = vcmp.gt.f32.partialorder %v11441_v3, 0.0  ;;  %v1403_v15 = vrot.slane %v1389_v12, %v11260_v0  ;;  %v1404_v17 = vcombine.high %v1396_v56, %v1396_v56 }
 0x161   : > { %v2089_v20 = vsel %vm1908_vm5, %v1396_v56, 0.0  ;;  %v1186_v47 = vsel %vm1026_vm7, %v11433_v60, %v9561_v48  ;;  %v2070_v24 = vadd.f32 %v2069_v52, %v2068_v44  ;;  %v2087_v6 = vrot.slane %v2086_v53, 1  ;;  %v961_v52 = vld [vmem:[#allocation4 + $0x98] sm:$0xff] }
 0x162   : > { %v2108_v51 = vsel %vm1908_vm5, %v1437_v29, 0.0  ;;  %v2117_v18 = vsel %vm1908_vm5, %v1439_v54, 0.0  ;;  %v1405_v25 = vcombine.high %v1403_v15, %v1403_v15  ;;  %v2091_v27 = vadd.f32 %v2090_v59, %v2089_v20 }
 0x163   : > { %v2098_v2 = vsel %vm1908_vm5, %v1404_v17, 0.0  ;;  %v2107_v32 = vsel %vm1908_vm5, %v1403_v15, 0.0  ;;  %v2079_v33 = vadd.f32 %v2078_v11, %v2077_v22  ;;  %v2501_v35 = vmul.f32 0.25, %v2061_v10  ;;  %v11527_v17 = vld [vmem:[%s13287_s9] ss:$0 sm:$0xff] }
 0x164   : > { %v1474_v39 = vcombine.high %v1186_v47, %v1186_v47  ;;  %v9559_v57 = vadd.f32 -1.0, %v10944_v38  ;;  %v2092_v41 = vrot.slane %v2091_v27, 4  ;;  %v2100_v43 = vadd.f32 %v2099_v13, %v2098_v2  ;;  %v874_v13 = vpop.f32.mrb[31].mxu0 }
 0x165   : > { %v2109_v14 = vadd.f32 %v2108_v51, %v2107_v32  ;;  %v2116_v60 = vsel %vm1908_vm5, %v1405_v25, 0.0  ;;  %v2088_v61 = vadd.f32 %v2087_v6, %v2086_v53  ;;  %v1112_v44 = vmul.f32 1.442695, %v1062_v16  ;;  %916 = vst.msk [vmem:[#allocation4 + $0xe8] sm:$0xff] %vm886_vm3, %v874_v13 }
 0x166   : > { %v2118_v29 = vadd.f32 %v2117_v18, %v2116_v60  ;;  %v1060_v46 = vmin.f32 %v11496_v8, 0.0  ;;  %v11513_v5 = vmul.f32 0.25, %v2070_v24  ;;  %v2093_v26 = vadd.f32 %v2092_v41, %v2091_v27 }
 0x167   : > { %v2101_v22 = vrot.slane %v2100_v43, 4  ;;  %v2110_v48 = vrot.slane %v2109_v14, 4  ;;  %v11515_v54 = vmul.f32 0.25, %v2079_v33  ;;  %v10156_v12 = vpack.c.bf16 %v2501_v35, %v2501_v35 }
 0x168   : > { %v2119_v56 = vrot.slane %v2118_v29, 4  ;;  %10947 = vpow2.f32 %v1102_v50  ;;  %v10946_v10 = vpop.eup %10945  ;;  %v2094_v11 = vrot.slane %v2093_v26, 2  ;;  %v1481_v53 = vrot.slane %v1186_v47, %v11260_v0 }
 0x169   : > { %v1488_v16 = vrot.slane %v1474_v39, %v11260_v0  ;;  %v1184_v59 = vsel %vm1024_vm8, %v11441_v3, %v9559_v57  ;;  %v11522_v38 = vmul.f32 0.25, %v2088_v61  ;;  %10949 = vpow2.f32 %v1112_v44 }
 0x16a   : > { %v2120_v15 = vadd.f32 %v2119_v56, %v2118_v29  ;;  %v11530_v50 = vadd.f32 %v11527_v17, %v961_v52  ;;  %v10157_v20 = vpack.c.bf16 %v11513_v5, %v11513_v5  ;;  %v2102_v47 = vadd.f32 %v2101_v22, %v2100_v43 }
 0x16b   : > { %v2111_v3 = vadd.f32 %v2110_v48, %v2109_v14  ;;  %v11535_v24 = vmul.f32 1.442695, %v1060_v46  ;;  %v10158_v6 = vpack.c.bf16 %v11515_v54, %v11515_v54  ;;  %v11539_v51 = vunpack.c.l.b16 %v10156_v12 }
 0x16c   : > { %v2121_v18 = vrot.slane %v2120_v15, 2  ;;  %vm2963_vm9 = vsmask.f32 256  ;;  %v1440_v25 = vcombine.high %v1184_v59, %v1184_v59  ;;  %v2095_v27 = vadd.f32 %v2094_v11, %v2093_v26 }
 0x16d   : > { %v1489_v2 = vcombine.high %v1481_v53, %v1481_v53  ;;  %v1490_v32 = vcombine.high %v1488_v16, %v1488_v16  ;;  %v1447_v33 = vrot.slane %v1184_v59, %v11260_v0  ;;  %v10159_v35 = vpack.c.bf16 %v11522_v38, %v11522_v38  ;;  %vm11559_vm12 = vmand %vm922_vm2, %vm2963_vm9 }
 0x16e   : > { %v2122_v39 = vadd.f32 %v2121_v18, %v2120_v15  ;;  %v2126_v57 = vsel %vm1908_vm5, %v1481_v53, 0.0  ;;  %v1454_v41 = vrot.slane %v1440_v25, %v11260_v0  ;;  %vm1027_vm10 = vcmp.gt.f32.partialorder %v11466_v45, 0.0 }
 0x16f   : > { %v2103_v43 = vrot.slane %v2102_v47, 2  ;;  %v2112_v14 = vrot.slane %v2111_v3, 2  ;;  %v2144_v60 = vsel %vm1908_vm5, %v1488_v16, 0.0  ;;  %v1455_v42 = vcombine.high %v1447_v33, %v1447_v33 }
 0x170   : > { %v2123_v61 = vrot.slane %v2122_v39, 1  ;;  %v1456_v29 = vcombine.high %v1454_v41, %v1454_v41  ;;  %v2125_v44 = vsel %vm1908_vm5, %v1447_v33, 0.0  ;;  %v2143_v46 = vsel %vm1908_vm5, %v1454_v41, 0.0 }
 0x171   : > { %vm1025_vm11 = vcmp.gt.f32.partialorder %v11477_v63, 0.0  ;;  %v2096_v5 = vrot.slane %v2095_v27, 1  ;;  %v2135_v26 = vsel %vm1908_vm5, %v1489_v2, 0.0  ;;  %v2153_v22 = vsel %vm1908_vm5, %v1490_v32, 0.0 }
 0x172   : > { %v2127_v48 = vadd.f32 %v2126_v57, %v2125_v44  ;;  %v10948_v52 = vpop.eup %10947  ;;  %v2124_v12 = vadd.f32 %v2123_v61, %v2122_v39  ;;  %v2134_v56 = vsel %vm1908_vm5, %v1455_v42, 0.0  ;;  %v2145_v11 = vadd.f32 %v2144_v60, %v2143_v46  ;;  %v2977_v57 = vld [vmem:[#allocation2 + $0x1c] sm:$0x1] }
 0x173   : > { %v2152_v53 = vsel %vm1908_vm5, %v1456_v29, 0.0  ;;  %v2104_v16 = vadd.f32 %v2103_v43, %v2102_v47  ;;  %v2113_v59 = vadd.f32 %v2112_v14, %v2111_v3  ;;  %v9562_v15 = vadd.f32 -1.0, %v10946_v10  ;;  %v11555_v18 = vpop.eup %10949 }
 0x174   : > { %v2128_v13 = vrot.slane %v2127_v48, 4  ;;  %v2508_v25 = vmul.f32 0.25, %v2124_v12  ;;  %v2136_v33 = vadd.f32 %v2135_v26, %v2134_v56  ;;  %v2146_v41 = vrot.slane %v2145_v11, 4 }
 0x175   : > { %v2154_v2 = vadd.f32 %v2153_v22, %v2152_v53  ;;  %v2822_v23 = vunpack.c.l.b16 %v10157_v20  ;;  %v2097_v32 = vadd.f32 %v2096_v5, %v2095_v27  ;;  %v9560_v39 = vadd.f32 -1.0, %v10948_v52 }
 0x176   : > { %v2129_v44 = vadd.f32 %v2128_v13, %v2127_v48  ;;  %v10206_v61 = vpack.c.bf16 %v2508_v25, %v2508_v25  ;;  %v2137_v42 = vrot.slane %v2136_v33, 4  ;;  %v2147_v60 = vadd.f32 %v2146_v41, %v2145_v11 }
 0x177   : > { %v2155_v46 = vrot.slane %v2154_v2, 4  ;;  %v2105_v29 = vrot.slane %v2104_v16, 1  ;;  %v2114_v47 = vrot.slane %v2113_v59, 1  ;;  %v1187_v20 = vsel %vm1027_vm10, %v11466_v45, %v9562_v15 }
 0x178   : > { %v2130_v3 = vrot.slane %v2129_v44, 2  ;;  %v2978_v27 = vsel %vm11559_vm12, %v10206_v61, %v2977_v57  ;;  %v2138_v43 = vadd.f32 %v2137_v42, %v2136_v33  ;;  %v2148_v14 = vrot.slane %v2147_v60, 2 }
 0x179   : > { %v2156_v5 = vadd.f32 %v2155_v46, %v2154_v2  ;;  %2979 = vst [vmem:[#allocation2 + $0x1c] sm:$0x1] %v2978_v27  ;;  %v1491_v22 = vcombine.high %v1187_v20, %v1187_v20  ;;  %v1498_v48 = vrot.slane %v1187_v20, %v11260_v0  ;;  %v1185_v52 = vsel %vm1025_vm11, %v11477_v63, %v9560_v39 }
 0x17a   : > { %v2131_v26 = vadd.f32 %v2130_v3, %v2129_v44  ;;  %v2139_v12 = vrot.slane %v2138_v43, 2  ;;  %v2149_v56 = vadd.f32 %v2148_v14, %v2147_v60  ;;  %v1457_v53 = vcombine.high %v1185_v52, %v1185_v52 }
 0x17b   : > { %v2157_v11 = vrot.slane %v2156_v5, 2  ;;  %v2823_v45 = vunpack.c.l.b16 %v10158_v6  ;;  %v1505_v15 = vrot.slane %v1491_v22, %v11260_v0  ;;  %v1506_v25 = vcombine.high %v1498_v48, %v1498_v48 }
 0x17c   : > { %v2132_v13 = vrot.slane %v2131_v26, 1  ;;  %v2887_v33 = vsel %vm2869_vm14, %v2822_v23, %v11539_v51  ;;  %v2140_v41 = vadd.f32 %v2139_v12, %v2138_v43  ;;  %v1464_v57 = vrot.slane %v1185_v52, %v11260_v0 }
 0x17d   : > { %v2158_v2 = vadd.f32 %v2157_v11, %v2156_v5  ;;  %v2106_v63 = vadd.f32 %v2105_v29, %v2104_v16  ;;  %v2115_v44 = vadd.f32 %v2114_v47, %v2113_v59  ;;  %v2505_v39 = vmul.f32 0.25, %v2097_v32 }
 0x17e   : > { %v2162_v61 = vsel %vm1908_vm5, %v1498_v48, 0.0  ;;  %v2141_v42 = vrot.slane %v2140_v41, 1  ;;  %v2150_v60 = vrot.slane %v2149_v56, 1  ;;  %v1507_v54 = vcombine.high %v1505_v15, %v1505_v15 }
 0x17f   : > { %v1471_v6 = vrot.slane %v1457_v53, %v11260_v0  ;;  %vm1030_vm2 = vcmp.gt.f32.partialorder %v11487_v31, 0.0  ;;  %v2133_v46 = vadd.f32 %v2132_v13, %v2131_v26  ;;  %v2171_v3 = vsel %vm1908_vm5, %v1506_v25, 0.0 }
 0x180   : > { %v1472_v23 = vcombine.high %v1464_v57, %v1464_v57  ;;  %v2161_v51 = vsel %vm1908_vm5, %v1464_v57, 0.0  ;;  %v2142_v20 = vadd.f32 %v2141_v42, %v2140_v41  ;;  %v2159_v27 = vrot.slane %v2158_v2, 1 }
 0x181   : > { %v2180_v16 = vsel %vm1908_vm5, %v1505_v15, 0.0  ;;  %v1473_v59 = vcombine.high %v1471_v6, %v1471_v6  ;;  %v2506_v32 = vmul.f32 0.25, %v2106_v63  ;;  %v2163_v29 = vadd.f32 %v2162_v61, %v2161_v51 }
 0x182   : > { %v2170_v47 = vsel %vm1908_vm5, %v1472_v23, 0.0  ;;  %v2179_v43 = vsel %vm1908_vm5, %v1471_v6, 0.0  ;;  %v2507_v14 = vmul.f32 0.25, %v2115_v44  ;;  %v2151_v5 = vadd.f32 %v2150_v60, %v2149_v56 }
 0x183   : > { %v2189_v26 = vsel %vm1908_vm5, %v1507_v54, 0.0  ;;  %v2172_v22 = vadd.f32 %v2171_v3, %v2170_v47  ;;  %v10160_v48 = vpack.c.bf16 %v2505_v39, %v2505_v39  ;;  %v2164_v52 = vrot.slane %v2163_v29, 4 }
 0x184   : > { %v2181_v12 = vadd.f32 %v2180_v16, %v2179_v43  ;;  %v2188_v11 = vsel %vm1908_vm5, %v1473_v59, 0.0  ;;  %v2160_v53 = vadd.f32 %v2159_v27, %v2158_v2  ;;  %v2509_v13 = vmul.f32 0.25, %v2133_v46  ;;  %v964_v43 = vld [vmem:[#allocation4 + $0xb0] sm:$0xff] }
 0x185   : > { %v2510_v15 = vmul.f32 0.25, %v2142_v20  ;;  %v2173_v25 = vrot.slane %v2172_v22, 4  ;;  %v2165_v41 = vadd.f32 %v2164_v52, %v2163_v29  ;;  %v2190_v63 = vadd.f32 %v2189_v26, %v2188_v11 }
 0x186   : > { %v2182_v57 = vrot.slane %v2181_v12, 4  ;;  %v9565_v61 = vadd.f32 -1.0, %v11555_v18  ;;  %v10161_v42 = vpack.c.bf16 %v2506_v32, %v2506_v32  ;;  %v2511_v44 = vmul.f32 0.25, %v2151_v5 }
 0x187   : > { %v2174_v56 = vadd.f32 %v2173_v25, %v2172_v22  ;;  %10951 = vpow2.f32 %v11535_v24  ;;  %v2166_v60 = vrot.slane %v2165_v41, 2  ;;  %v2191_v54 = vrot.slane %v2190_v63, 4 }
 0x188   : > { %v2183_v39 = vadd.f32 %v2182_v57, %v2181_v12  ;;  %v1190_v2 = vsel %vm1030_vm2, %v11487_v31, %v9565_v61  ;;  %v10162_v6 = vpack.c.bf16 %v2507_v14, %v2507_v14  ;;  %v2512_v46 = vmul.f32 0.25, %v2160_v53 }
 0x189   : > { %v10164_v3 = vpack.c.bf16 %v2509_v13, %v2509_v13  ;;  %v10165_v23 = vpack.c.bf16 %v2510_v15, %v2510_v15  ;;  %v11597_v18 = vunpack.c.l.b16 %v10159_v35  ;;  %v2175_v51 = vrot.slane %v2174_v56, 2  ;;  %v959_v35 = vld [vmem:[#allocation4 + $0x88] sm:$0xff] }
 0x18a   : > { %v2184_v20 = vrot.slane %v2183_v39, 2  ;;  %v2192_v27 = vadd.f32 %v2191_v54, %v2190_v63  ;;  %v11600_v24 = vsel %vm2871_vm15, %v2823_v45, %v2887_v33  ;;  %v11602_v16 = vunpack.c.l.b16 %v10160_v48 }
 0x18b   : > { %v10166_v59 = vpack.c.bf16 %v2511_v44, %v2511_v44  ;;  %v1542_v32 = vcombine.high %v1190_v2, %v1190_v2  ;;  %vm1028_vm13 = vcmp.gt.f32.partialorder %v11496_v8, 0.0  ;;  %v11605_v31 = vunpack.c.l.b16 %v10161_v42 }
 0x18c   : > { %v2167_v29 = vadd.f32 %v2166_v60, %v2165_v41  ;;  %v2193_v47 = vrot.slane %v2192_v27, 2  ;;  %v1549_v38 = vrot.slane %v1190_v2, %v11260_v0  ;;  %v11608_v14 = vunpack.c.l.b16 %v10162_v6 }
 0x18d   : > { %v10167_v5 = vpack.c.bf16 %v2512_v46, %v2512_v46  ;;  %v2829_v26 = vunpack.c.l.b16 %v10164_v3  ;;  %v2830_v45 = vunpack.c.l.b16 %v10165_v23  ;;  %v2176_v33 = vadd.f32 %v2175_v51, %v2174_v56  ;;  %v962_v23 = vld [vmem:[#allocation4 + $0xa0] sm:$0xff] }
 0x18e   : > { %v2185_v22 = vadd.f32 %v2184_v20, %v2183_v39  ;;  %v2194_v48 = vadd.f32 %v2193_v47, %v2192_v27  ;;  %v1063_v52 = vmin.f32 %v11530_v50, 0.0  ;;  %v11611_v12 = vunpack.c.l.b16 %v10166_v59 }
 0x18f   : > { %v1556_v11 = vrot.slane %v1542_v32, %v11260_v0  ;;  %v11615_v53 = vadd.f32 %v11527_v17, %v959_v35  ;;  %v11618_v13 = vadd.f32 %v11527_v17, %v964_v43  ;;  %v2168_v15 = vrot.slane %v2167_v29, 1  ;;  %v2983_v32 = vld [vmem:[#allocation2 + $0x24] sm:$0x1] }
 0x190   : > { %v2195_v25 = vrot.slane %v2194_v48, 1  ;;  %v1557_v41 = vcombine.high %v1549_v38, %v1549_v38  ;;  %v1114_v57 = vmul.f32 1.442695, %v1063_v52  ;;  %v11620_v61 = vunpack.c.l.b16 %v10167_v5 }
 0x191   : > { %v10952_v63 = vpop.eup %10951  ;;  %v11623_v42 = vsel %vm2869_vm14, %v2830_v45, %v2829_v26  ;;  %v2198_v44 = vsel %vm1908_vm5, %v1549_v38, 0.0  ;;  %v1061_v56 = vmin.f32 %v11615_v53, 0.0  ;;  %v2177_v60 = vrot.slane %v2176_v33, 1 }
 0x192   : > { %v2186_v39 = vrot.slane %v2185_v22, 1  ;;  %v2196_v54 = vadd.f32 %v2195_v25, %v2194_v48  ;;  %v9563_v2 = vadd.f32 -1.0, %v10952_v63  ;;  %v1558_v6 = vcombine.high %v1556_v11, %v1556_v11 }
 0x193   : > { %10953 = vpow2.f32 %v1114_v57  ;;  %v1110_v46 = vmul.f32 1.442695, %v1061_v56  ;;  %v1066_v3 = vmin.f32 %v11618_v13, 0.0  ;;  %v2169_v51 = vadd.f32 %v2168_v15, %v2167_v29  ;;  %v965_v57 = vld [vmem:[#allocation4 + $0xb8] sm:$0xff] }
 0x194   : > { %v2516_v20 = vmul.f32 0.25, %v2196_v54  ;;  %v2207_v27 = vsel %vm1908_vm5, %v1557_v41, 0.0  ;;  %v1188_v59 = vsel %vm1028_vm13, %v11496_v8, %v9563_v2  ;;  %v2216_v47 = vsel %vm1908_vm5, %v1556_v11, 0.0 }
 0x195   : > { %v1508_v38 = vcombine.high %v1188_v59, %v1188_v59  ;;  %v1515_v35 = vrot.slane %v1188_v59, %v11260_v0  ;;  %10955 = vpow2.f32 %v1110_v46  ;;  %v2178_v43 = vadd.f32 %v2177_v60, %v2176_v33 }
 0x196   : > { %v2187_v5 = vadd.f32 %v2186_v39, %v2185_v22  ;;  %v10207_v26 = vpack.c.bf16 %v2516_v20, %v2516_v20  ;;  %v11635_v45 = vadd.f32 %v11527_v17, %v962_v23  ;;  %v1120_v15 = vmul.f32 1.442695, %v1066_v3 }
 0x197   : > { %v1522_v29 = vrot.slane %v1508_v38, %v11260_v0  ;;  %v1523_v48 = vcombine.high %v1515_v35, %v1515_v35  ;;  %v2197_v52 = vsel %vm1908_vm5, %v1515_v35, 0.0  ;;  %v2513_v8 = vmul.f32 0.25, %v2169_v51 }
 0x198   : > { %v2984_v11 = vsel %vm11559_vm12, %v10207_v26, %v2983_v32  ;;  %v2225_v25 = vsel %vm1908_vm5, %v1558_v6, 0.0  ;;  %v2199_v41 = vadd.f32 %v2198_v44, %v2197_v52  ;;  %v1064_v56 = vmin.f32 %v11635_v45, 0.0 }
 0x199   : > { %2985 = vst [vmem:[#allocation2 + $0x24] sm:$0x1] %v2984_v11  ;;  %v1524_v33 = vcombine.high %v1522_v29, %v1522_v29  ;;  %v2206_v22 = vsel %vm1908_vm5, %v1523_v48, 0.0  ;;  %v2215_v63 = vsel %vm1908_vm5, %v1522_v29, 0.0  ;;  %v2514_v60 = vmul.f32 0.25, %v2178_v43 }
 0x19a   : > { %v2200_v39 = vrot.slane %v2199_v41, 4  ;;  %v2208_v54 = vadd.f32 %v2207_v27, %v2206_v22  ;;  %v2217_v2 = vadd.f32 %v2216_v47, %v2215_v63  ;;  %v2515_v46 = vmul.f32 0.25, %v2187_v5  ;;  %v963_v5 = vld [vmem:[#allocation4 + $0xa8] sm:$0xff] }
 0x19b   : > { %v2224_v3 = vsel %vm1908_vm5, %v1524_v33, 0.0  ;;  %10957 = vpow2.f32 %v1120_v15  ;;  %v11647_v6 = vadd.f32 %v11527_v17, %v965_v57  ;;  %v10168_v32 = vpack.c.bf16 %v2513_v8, %v2513_v8 }
 0x19c   : > { %v2201_v44 = vadd.f32 %v2200_v39, %v2199_v41  ;;  %v2209_v23 = vrot.slane %v2208_v54, 4  ;;  %v2218_v51 = vrot.slane %v2217_v2, 4  ;;  %v2226_v20 = vadd.f32 %v2225_v25, %v2224_v3 }
 0x19d   : > { %v10954_v59 = vpop.eup %10953  ;;  %vm1031_vm1 = vcmp.gt.f32.partialorder %v11530_v50, 0.0  ;;  %vm1029_vm4 = vcmp.gt.f32.partialorder %v11615_v53, 0.0  ;;  %v1116_v38 = vmul.f32 1.442695, %v1064_v56  ;;  %v10169_v29 = vpack.c.bf16 %v2514_v60, %v2514_v60 }
 0x19e   : > { %v2202_v27 = vrot.slane %v2201_v44, 2  ;;  %v2210_v47 = vadd.f32 %v2209_v23, %v2208_v54  ;;  %v2219_v35 = vadd.f32 %v2218_v51, %v2217_v2  ;;  %v2227_v43 = vrot.slane %v2226_v20, 4 }
 0x19f   : > { %v10956_v26 = vpop.eup %10955  ;;  %v10170_v48 = vpack.c.bf16 %v2515_v46, %v2515_v46  ;;  %v9566_v52 = vadd.f32 -1.0, %v10954_v59  ;;  %v1067_v15 = vmin.f32 %v11647_v6, 0.0  ;;  %10959 = vpow2.f32 %v1116_v38 }
 0x1a0   : > { %v2203_v11 = vadd.f32 %v2202_v27, %v2201_v44  ;;  %v2211_v25 = vrot.slane %v2210_v47, 2  ;;  %v2220_v41 = vrot.slane %v2219_v35, 2  ;;  %v2228_v8 = vadd.f32 %v2227_v43, %v2226_v20 }
 0x1a1   : > { %v1191_v57 = vsel %vm1031_vm1, %v11530_v50, %v9566_v52  ;;  %v9564_v33 = vadd.f32 -1.0, %v10956_v26  ;;  %v11656_v22 = vadd.f32 %v11527_v17, %v963_v5  ;;  %v1122_v3 = vmul.f32 1.442695, %v1067_v15 }
 0x1a2   : > { %v2204_v63 = vrot.slane %v2203_v11, 1  ;;  %v2212_v56 = vadd.f32 %v2211_v25, %v2210_v47  ;;  %v2221_v60 = vadd.f32 %v2220_v41, %v2219_v35  ;;  %v2229_v39 = vrot.slane %v2228_v8, 2 }
 0x1a3   : > { %v1559_v54 = vcombine.high %v1191_v57, %v1191_v57  ;;  %v1566_v2 = vrot.slane %v1191_v57, %v11260_v0  ;;  %v1189_v46 = vsel %vm1029_vm4, %v11615_v53, %v9564_v33  ;;  %v11665_v50 = vsel %vm2871_vm15, %v11611_v12, %v11623_v42 }
 0x1a4   : > { %v2213_v44 = vrot.slane %v2212_v56, 1  ;;  %v2230_v23 = vadd.f32 %v2229_v39, %v2228_v8  ;;  %vm1034_vm6 = vcmp.gt.f32.partialorder %v11618_v13, 0.0  ;;  %v11668_v20 = vunpack.c.l.b16 %v10168_v32 }
 0x1a5   : > { %v10958_v51 = vpop.eup %10957  ;;  %v1573_v59 = vrot.slane %v1559_v54, %v11260_v0  ;;  %v1574_v38 = vcombine.high %v1566_v2, %v1566_v2  ;;  %v1525_v27 = vcombine.high %v1189_v46, %v1189_v46  ;;  %v11671_v47 = vunpack.c.l.b16 %v10169_v29 }
 0x1a6   : > { %v11673_v53 = vunpack.c.l.b16 %v10170_v48  ;;  %v2205_v35 = vadd.f32 %v2204_v63, %v2203_v11  ;;  %v2222_v43 = vrot.slane %v2221_v60, 1  ;;  %v1532_v12 = vrot.slane %v1189_v46, %v11260_v0  ;;  %v968_v46 = vld [vmem:[#allocation4 + $0xd0] sm:$0xff] }
 0x1a7   : > { %13307 = vst [vmem:[#allocation6_spill] sm:$0xff] %v11671_v47  ;;  %v1575_v5 = vcombine.high %v1573_v59, %v1573_v59  ;;  %10961 = vpow2.f32 %v1122_v3  ;;  %v1065_v42 = vmin.f32 %v11656_v22, 0.0  ;;  %v2214_v26 = vadd.f32 %v2213_v44, %v2212_v56 }
 0x1a8   : > { %13308 = vst [vmem:[#allocation7_spill] sm:$0xff] %v11673_v53  ;;  %v2231_v52 = vrot.slane %v2230_v23, 1  ;;  %v2234_v32 = vsel %vm1908_vm5, %v1566_v2, 0.0  ;;  %v9569_v15 = vadd.f32 -1.0, %v10958_v51  ;;  %v2243_v25 = vsel %vm1908_vm5, %v1574_v38, 0.0 }
 0x1a9   : > { %v1539_v29 = vrot.slane %v1525_v27, %v11260_v0  ;;  %v1540_v41 = vcombine.high %v1532_v12, %v1532_v12  ;;  %v2233_v48 = vsel %vm1908_vm5, %v1532_v12, 0.0  ;;  %v2223_v11 = vadd.f32 %v2222_v43, %v2221_v60  ;;  %v10960_v63 = vpop.eup %10959 }
 0x1aa   : > { %v2517_v8 = vmul.f32 0.25, %v2205_v35  ;;  %v2252_v57 = vsel %vm1908_vm5, %v1573_v59, 0.0  ;;  %v2261_v33 = vsel %vm1908_vm5, %v1575_v5, 0.0  ;;  %v2235_v56 = vadd.f32 %v2234_v32, %v2233_v48 }
 0x1ab   : > { %v1541_v39 = vcombine.high %v1539_v29, %v1539_v29  ;;  %v2242_v54 = vsel %vm1908_vm5, %v1540_v41, 0.0  ;;  %v2251_v2 = vsel %vm1908_vm5, %v1539_v29, 0.0  ;;  %vm1032_vm7 = vcmp.gt.f32.partialorder %v11635_v45, 0.0 }
 0x1ac   : > { %v2232_v3 = vadd.f32 %v2231_v52, %v2230_v23  ;;  %v2518_v44 = vmul.f32 0.25, %v2214_v26  ;;  %v2244_v51 = vadd.f32 %v2243_v25, %v2242_v54  ;;  %v1118_v38 = vmul.f32 1.442695, %v1065_v42  ;;  %v10812_v23 = vld [vmem:[%s13280_s2] sm:$0xff]   ;;  %v10813_v42 = vld [vmem:[%s13280_s2 + $0x8] sm:$0xff]  }
 0x1ad   : > { %v2236_v60 = vrot.slane %v2235_v56, 4  ;;  %v2253_v27 = vadd.f32 %v2252_v57, %v2251_v2  ;;  %v2260_v59 = vsel %vm1908_vm5, %v1541_v39, 0.0  ;;  %v1194_v35 = vsel %vm1034_vm6, %v11618_v13, %v9569_v15  ;;  %10433 = vmatprep.subr.bf16.mxu1 %v10812_v23 }
 0x1ae   : > { %v2519_v43 = vmul.f32 0.25, %v2223_v11  ;;  %v2245_v5 = vrot.slane %v2244_v51, 4  ;;  %v2262_v12 = vadd.f32 %v2261_v33, %v2260_v59  ;;  %v11691_v32 = vadd.f32 %v11527_v17, %v968_v46  ;;  %10434 = vmatpush3.bf16.msra.mxu1 %v10812_v23 }
 0x1af   : > { %v10172_v26 = vpack.c.bf16 %v2517_v8, %v2517_v8  ;;  %v2237_v52 = vadd.f32 %v2236_v60, %v2235_v56  ;;  %v2254_v25 = vrot.slane %v2253_v27, 4  ;;  %v1610_v29 = vcombine.high %v1194_v35, %v1194_v35  ;;  %10435 = vmatprep.subr.bf16.mxu1 %v10813_v42 }
 0x1b0   : > { %v2246_v41 = vadd.f32 %v2245_v5, %v2244_v51  ;;  %v2263_v13 = vrot.slane %v2262_v12, 4  ;;  %v1617_v15 = vrot.slane %v1194_v35, %v11260_v0  ;;  %v9567_v48 = vadd.f32 -1.0, %v10960_v63 }
 0x1b1   : > { %v10962_v11 = vpop.eup %10961  ;;  %v2520_v57 = vmul.f32 0.25, %v2232_v3  ;;  %v10173_v33 = vpack.c.bf16 %v2518_v44, %v2518_v44  ;;  %v2238_v39 = vrot.slane %v2237_v52, 2  ;;  %v2255_v54 = vadd.f32 %v2254_v25, %v2253_v27 }
 0x1b2   : > { %vm1035_vm8 = vcmp.gt.f32.partialorder %v11647_v6, 0.0  ;;  %v10174_v2 = vpack.c.bf16 %v2519_v43, %v2519_v43  ;;  %v2247_v46 = vrot.slane %v2246_v41, 2  ;;  %v2264_v8 = vadd.f32 %v2263_v13, %v2262_v12  ;;  %10436 = vmatpush3.bf16.msra.mxu1 %v10813_v42 }
 0x1b3   : > { %10963 = vpow2.f32 %v1118_v38  ;;  %v2239_v56 = vadd.f32 %v2238_v39, %v2237_v52  ;;  %v2256_v51 = vrot.slane %v2255_v54, 2  ;;  %v1624_v60 = vrot.slane %v1610_v29, %v11260_v0 }
 0x1b4   : > { %v1625_v59 = vcombine.high %v1617_v15, %v1617_v15  ;;  %v2837_v63 = vunpack.c.l.b16 %v10172_v26  ;;  %v2248_v35 = vadd.f32 %v2247_v46, %v2246_v41  ;;  %v2265_v5 = vrot.slane %v2264_v8, 2 }
 0x1b5   : > { %v1192_v3 = vsel %vm1032_vm7, %v11635_v45, %v9567_v48  ;;  %v10175_v44 = vpack.c.bf16 %v2520_v57, %v2520_v57  ;;  %v2838_v27 = vunpack.c.l.b16 %v10173_v33  ;;  %v2257_v23 = vadd.f32 %v2256_v51, %v2255_v54 }
 0x1b6   : > { %v1576_v43 = vcombine.high %v1192_v3, %v1192_v3  ;;  %v2839_v12 = vunpack.c.l.b16 %v10174_v2  ;;  %v2270_v38 = vsel %vm1908_vm5, %v1617_v15, 0.0  ;;  %v1583_v52 = vrot.slane %v1192_v3, %v11260_v0 }
 0x1b7   : > { %v9570_v25 = vadd.f32 -1.0, %v10962_v11  ;;  %v2240_v29 = vrot.slane %v2239_v56, 1  ;;  %v1626_v13 = vcombine.high %v1624_v60, %v1624_v60  ;;  %v2279_v26 = vsel %vm1908_vm5, %v1625_v59, 0.0 }
 0x1b8   : > { %v1590_v41 = vrot.slane %v1576_v43, %v11260_v0  ;;  %v2249_v39 = vrot.slane %v2248_v35, 1  ;;  %v2266_v46 = vadd.f32 %v2265_v5, %v2264_v8  ;;  %v1591_v45 = vcombine.high %v1583_v52, %v1583_v52  ;;  %v10815_v8 = vld [vmem:[%s13280_s2 + $0x40] sm:$0xff]  }
 0x1b9   : > { %v2269_v48 = vsel %vm1908_vm5, %v1583_v52, 0.0  ;;  %v2258_v57 = vrot.slane %v2257_v23, 1  ;;  %v2288_v42 = vsel %vm1908_vm5, %v1624_v60, 0.0  ;;  %v2899_v15 = vsel %vm2869_vm14, %v2838_v27, %v2837_v63  ;;  %v10816_v60 = vld [vmem:[%s13280_s2 + $0x48] sm:$0xff]   ;;  %10481 = vmatprep.subr.bf16.mxu0 %v10815_v8 }
 0x1ba   : > { %v1592_v33 = vcombine.high %v1590_v41, %v1590_v41  ;;  %v2271_v54 = vadd.f32 %v2270_v38, %v2269_v48  ;;  %v2278_v11 = vsel %vm1908_vm5, %v1591_v45, 0.0  ;;  %v2287_v2 = vsel %vm1908_vm5, %v1590_v41, 0.0  ;;  %10482 = vmatpush3.bf16.msra.mxu0 %v10815_v8 }
 0x1bb   : > { %v1195_v51 = vsel %vm1035_vm8, %v11647_v6, %v9570_v25  ;;  %v2241_v59 = vadd.f32 %v2240_v29, %v2239_v56  ;;  %v2297_v5 = vsel %vm1908_vm5, %v1626_v13, 0.0  ;;  %v2280_v3 = vadd.f32 %v2279_v26, %v2278_v11  ;;  %10483 = vmatprep.subr.bf16.mxu0 %v10816_v60 }
 0x1bc   : > { %v2272_v63 = vrot.slane %v2271_v54, 4  ;;  %vm1033_vm9 = vcmp.gt.f32.partialorder %v11656_v22, 0.0  ;;  %v2250_v43 = vadd.f32 %v2249_v39, %v2248_v35  ;;  %v2267_v38 = vrot.slane %v2266_v46, 1 }
 0x1bd   : > { %v10964_v27 = vpop.eup %10963  ;;  %v2289_v52 = vadd.f32 %v2288_v42, %v2287_v2  ;;  %v2296_v6 = vsel %vm1908_vm5, %v1592_v33, 0.0  ;;  %v2259_v25 = vadd.f32 %v2258_v57, %v2257_v23  ;;  %v2281_v45 = vrot.slane %v2280_v3, 4 }
 0x1be   : > { %v2273_v41 = vadd.f32 %v2272_v63, %v2271_v54  ;;  %v1627_v48 = vcombine.high %v1195_v51, %v1195_v51  ;;  %v11726_v49 = vunpack.c.l.b16 %v10175_v44  ;;  %v2298_v29 = vadd.f32 %v2297_v5, %v2296_v6  ;;  %10484 = vmatpush3.bf16.msra.mxu0 %v10816_v60 }
 0x1bf   : > { %v2290_v56 = vrot.slane %v2289_v52, 4  ;;  %v1634_v13 = vrot.slane %v1195_v51, %v11260_v0  ;;  %v11730_v26 = vsel %vm2871_vm15, %v2839_v12, %v2899_v15  ;;  %v11732_v35 = vmul.f32 0.25, %v2241_v59  ;;  %v10818_v59 = vld [vmem:[%s13280_s2 + $0x10] sm:$0xff]  }
 0x1c0   : > { %v2274_v39 = vrot.slane %v2273_v41, 2  ;;  %v2282_v42 = vadd.f32 %v2281_v45, %v2280_v3  ;;  %v2268_v33 = vadd.f32 %v2267_v38, %v2266_v46  ;;  %v11734_v23 = vmul.f32 0.25, %v2250_v43  ;;  %10445 = vmatprep.subr.bf16.mxu1 %v10818_v59 }
 0x1c1   : > { %v2291_v57 = vadd.f32 %v2290_v56, %v2289_v52  ;;  %v2299_v54 = vrot.slane %v2298_v29, 4  ;;  %v11736_v11 = vmul.f32 0.25, %v2259_v25  ;;  %v1641_v8 = vrot.slane %v1627_v48, %v11260_v0 }
 0x1c2   : > { %v2275_v44 = vadd.f32 %v2274_v39, %v2273_v41  ;;  %v2283_v2 = vrot.slane %v2282_v42, 2  ;;  %v1642_v12 = vcombine.high %v1634_v13, %v1634_v13  ;;  %v9568_v15 = vadd.f32 -1.0, %v10964_v27 }
 0x1c3   : > { %v2292_v51 = vrot.slane %v2291_v57, 2  ;;  %v2300_v5 = vadd.f32 %v2299_v54, %v2298_v29  ;;  %v1070_v43 = vmin.f32 %v11691_v32, 0.0  ;;  %v2306_v6 = vsel %vm1908_vm5, %v1634_v13, 0.0 }
 0x1c4   : > { %v2276_v63 = vrot.slane %v2275_v44, 1  ;;  %v2284_v3 = vadd.f32 %v2283_v2, %v2282_v42  ;;  %v1193_v60 = vsel %vm1033_vm9, %v11656_v22, %v9568_v15  ;;  %v1643_v25 = vcombine.high %v1641_v8, %v1641_v8  ;;  %v966_v2 = vld [vmem:[#allocation4 + $0xc0] sm:$0xff] }
 0x1c5   : > { %v2293_v38 = vadd.f32 %v2292_v51, %v2291_v57  ;;  %v2301_v52 = vrot.slane %v2300_v5, 2  ;;  %v1593_v41 = vcombine.high %v1193_v60, %v1193_v60  ;;  %v1600_v45 = vrot.slane %v1193_v60, %v11260_v0 }
 0x1c6   : > { %v2285_v27 = vrot.slane %v2284_v3, 1  ;;  %v2315_v29 = vsel %vm1908_vm5, %v1642_v12, 0.0  ;;  %v1128_v39 = vmul.f32 1.442695, %v1070_v43  ;;  %v2277_v42 = vadd.f32 %v2276_v63, %v2275_v44 }
 0x1c7   : > { %v2294_v48 = vrot.slane %v2293_v38, 1  ;;  %v2302_v56 = vadd.f32 %v2301_v52, %v2300_v5  ;;  %v1607_v54 = vrot.slane %v1593_v41, %v11260_v0  ;;  %v1608_v13 = vcombine.high %v1600_v45, %v1600_v45 }
 0x1c8   : > { %v2286_v57 = vadd.f32 %v2285_v27, %v2284_v3  ;;  %v2305_v22 = vsel %vm1908_vm5, %v1600_v45, 0.0  ;;  %10965 = vpow2.f32 %v1128_v39  ;;  %v2324_v15 = vsel %vm1908_vm5, %v1641_v8, 0.0 }
 0x1c9   : > { %v2295_v51 = vadd.f32 %v2294_v48, %v2293_v38  ;;  %v2303_v19 = vrot.slane %v2302_v56, 1  ;;  %v2333_v59 = vsel %vm1908_vm5, %v1643_v25, 0.0  ;;  %v1609_v60 = vcombine.high %v1607_v54, %v1607_v54 }
 0x1ca   : > { %v2307_v5 = vadd.f32 %v2306_v6, %v2305_v22  ;;  %v2526_v52 = vmul.f32 0.25, %v2286_v57  ;;  %v2314_v12 = vsel %vm1908_vm5, %v1608_v13, 0.0  ;;  %v2323_v44 = vsel %vm1908_vm5, %v1607_v54, 0.0  ;;  %v967_v22 = vld [vmem:[#allocation4 + $0xc8] sm:$0xff] }
 0x1cb   : > { %v11758_v63 = vadd.f32 %v11527_v17, %v966_v2  ;;  %v11760_v3 = vmul.f32 0.25, %v2268_v33  ;;  %v2525_v43 = vmul.f32 0.25, %v2277_v42  ;;  %v2316_v27 = vadd.f32 %v2315_v29, %v2314_v12 }
 0x1cc   : > { %v2308_v38 = vrot.slane %v2307_v5, 4  ;;  %v2304_v41 = vadd.f32 %v2303_v19, %v2302_v56  ;;  %v2527_v45 = vmul.f32 0.25, %v2295_v51  ;;  %v2325_v8 = vadd.f32 %v2324_v15, %v2323_v44  ;;  %v969_v19 = vld [vmem:[#allocation4 + $0xd8] sm:$0xff] }
 0x1cd   : > { %13309 = vst [vmem:[#allocation8_spill] sm:$0xff] %v11760_v3  ;;  %v2332_v25 = vsel %vm1908_vm5, %v1609_v60, 0.0  ;;  %vm1038_vm10 = vcmp.gt.f32.partialorder %v11691_v32, 0.0  ;;  %v10177_v6 = vpack.c.bf16 %v11734_v23, %v11734_v23  ;;  %v2317_v39 = vrot.slane %v2316_v27, 4 }
 0x1ce   : > { %v2309_v48 = vadd.f32 %v2308_v38, %v2307_v5  ;;  %v2334_v57 = vadd.f32 %v2333_v59, %v2332_v25  ;;  %v10178_v33 = vpack.c.bf16 %v11736_v11, %v11736_v11  ;;  %v10181_v54 = vpack.c.bf16 %v2526_v52, %v2526_v52 }
 0x1cf   : > { %v2326_v42 = vrot.slane %v2325_v8, 4  ;;  %v1068_v29 = vmin.f32 %v11758_v63, 0.0  ;;  %v10180_v56 = vpack.c.bf16 %v2525_v43, %v2525_v43  ;;  %v2318_v2 = vadd.f32 %v2317_v39, %v2316_v27 }
 0x1d0   : > { %v2310_v13 = vrot.slane %v2309_v48, 2  ;;  %v2335_v51 = vrot.slane %v2334_v57, 4  ;;  %v2528_v15 = vmul.f32 0.25, %v2304_v41  ;;  %v10182_v60 = vpack.c.bf16 %v2527_v45, %v2527_v45 }
 0x1d1   : > { %v2327_v12 = vadd.f32 %v2326_v42, %v2325_v8  ;;  %v1124_v23 = vmul.f32 1.442695, %v1068_v29  ;;  %v2319_v44 = vrot.slane %v2318_v2, 2  ;;  %v11770_v38 = vadd.f32 %v11527_v17, %v969_v19 }
 0x1d2   : > { %v2311_v5 = vadd.f32 %v2310_v13, %v2309_v48  ;;  %v2336_v59 = vadd.f32 %v2335_v51, %v2334_v57  ;;  %v10966_v11 = vpop.eup %10965  ;;  %v2846_v52 = vunpack.c.l.b16 %v10181_v54  ;;  %v11773_v43 = vadd.f32 %v11527_v17, %v967_v22 }
 0x1d3   : > { %v2328_v25 = vrot.slane %v2327_v12, 2  ;;  %10967 = vpow2.f32 %v1124_v23  ;;  %v2320_v39 = vadd.f32 %v2319_v44, %v2318_v2  ;;  %v9573_v41 = vadd.f32 -1.0, %v10966_v11  ;;  %v972_v2 = vld [vmem:[#allocation4 + $0xf0] sm:$0xff] }
 0x1d4   : > { %v2312_v27 = vrot.slane %v2311_v5, 1  ;;  %v2337_v46 = vrot.slane %v2336_v59, 2  ;;  %v10183_v45 = vpack.c.bf16 %v2528_v15, %v2528_v15  ;;  %v2845_v8 = vunpack.c.l.b16 %v10180_v56 }
 0x1d5   : > { %v2329_v42 = vadd.f32 %v2328_v25, %v2327_v12  ;;  %v1071_v48 = vmin.f32 %v11770_v38, 0.0  ;;  %v2321_v29 = vrot.slane %v2320_v39, 1  ;;  %v1198_v54 = vsel %vm1038_vm10, %v11691_v32, %v9573_v41 }
 0x1d6   : > { %v2313_v57 = vadd.f32 %v2312_v27, %v2311_v5  ;;  %v2338_v19 = vadd.f32 %v2337_v46, %v2336_v59  ;;  %v1678_v51 = vcombine.high %v1198_v54, %v1198_v54  ;;  %v1685_v22 = vrot.slane %v1198_v54, %v11260_v0 }
 0x1d7   : > { %v2330_v13 = vrot.slane %v2329_v42, 1  ;;  %v1130_v23 = vmul.f32 1.442695, %v1071_v48  ;;  %v2847_v44 = vunpack.c.l.b16 %v10182_v60  ;;  %v2905_v15 = vsel %vm2869_vm14, %v2846_v52, %v2845_v8  ;;  %v970_v8 = vld [vmem:[#allocation4 + $0xe0] sm:$0xff] }
 0x1d8   : > { %v2322_v56 = vadd.f32 %v2321_v29, %v2320_v39  ;;  %v1069_v12 = vmin.f32 %v11773_v43, 0.0  ;;  %v2339_v5 = vrot.slane %v2338_v19, 1  ;;  %v2529_v25 = vmul.f32 0.25, %v2313_v57 }
 0x1d9   : > { %v2331_v11 = vadd.f32 %v2330_v13, %v2329_v42  ;;  %v1692_v46 = vrot.slane %v1678_v51, %v11260_v0  ;;  %v13310_v32 = vpack.c.bf16 %v11732_v35, %v11732_v35  ;;  %v11788_v27 = vunpack.c.l.b16 %v10177_v6  ;;  %v973_v6 = vld [vmem:[#allocation4 + $0xf8] sm:$0xff] }
 0x1da   : > { %10969 = vpow2.f32 %v1130_v23  ;;  %v11791_v60 = vadd.f32 %v11527_v17, %v972_v2  ;;  %v11793_v52 = vunpack.c.l.b16 %v10178_v33  ;;  %v2530_v39 = vmul.f32 0.25, %v2322_v56  ;;  %v971_v23 = vld [vmem:[#allocation4 + $0xe8] sm:$0xff] }
 0x1db   : > { %v11786_v59 = vunpack.c.l.b16 %v13310_v32  ;;  %13311 = vst [vmem:[#allocation9_spill] sm:$0xff] %v11788_v27  ;;  %v1693_v41 = vcombine.high %v1685_v22, %v1685_v22  ;;  %vm1036_vm11 = vcmp.gt.f32.partialorder %v11758_v63, 0.0  ;;  %v11796_v42 = vunpack.c.l.b16 %v10183_v45 }
 0x1dc   : > { %13312 = vst [vmem:[#allocation10_spill] sm:$0xff] %v11793_v52  ;;  %v11799_v48 = vsel %vm2871_vm15, %v2847_v44, %v2905_v15  ;;  %v2531_v35 = vmul.f32 0.25, %v2331_v11  ;;  %v1126_v57 = vmul.f32 1.442695, %v1069_v12  ;;  %v2340_v54 = vadd.f32 %v2339_v5, %v2338_v19  ;;  %v11018_v19 = vld [vmem:[%s13287_s9] ss:$0 sm:$0xff] }
 0x1dd   : > { %13313 = vst [vmem:[#allocation11_spill] sm:$0xff] %v11796_v42  ;;  %13314 = vst [vmem:[#allocation12_spill] sm:$0xff] %v11799_v48  ;;  %v10968_v29 = vpop.eup %10967  ;;  %v10184_v13 = vpack.c.bf16 %v2529_v25, %v2529_v25  ;;  %v1694_v51 = vcombine.high %v1692_v46, %v1692_v46  ;;  %v2342_v33 = vsel %vm1908_vm5, %v1685_v22, 0.0  ;;  %vm1039_vm2 = vcmp.gt.f32.partialorder %v11770_v38, 0.0 }
 0x1de   : > { %v9571_v2 = vadd.f32 -1.0, %v10968_v29  ;;  %10971 = vpow2.f32 %v1126_v57  ;;  %v1074_v45 = vmin.f32 %v11791_v60, 0.0  ;;  %v11805_v56 = vadd.f32 %v11527_v17, %v970_v8 }
 0x1df   : > { %v10185_v44 = vpack.c.bf16 %v2530_v39, %v2530_v39  ;;  %v2351_v15 = vsel %vm1908_vm5, %v1693_v41, 0.0  ;;  %v2360_v12 = vsel %vm1908_vm5, %v1692_v46, 0.0  ;;  %v11812_v22 = vadd.f32 %v11018_v19, %v973_v6 }
 0x1e0   : > { %v10186_v11 = vpack.c.bf16 %v2531_v35, %v2531_v35  ;;  %v1196_v5 = vsel %vm1036_vm11, %v11758_v63, %v9571_v2  ;;  %v1072_v25 = vmin.f32 %v11805_v56, 0.0  ;;  %v11818_v17 = vadd.f32 %v11018_v19, %v971_v23 }
 0x1e1   : > { %v11820_v32 = vmul.f32 0.25, %v2340_v54  ;;  %v11822_v39 = vunpack.c.l.b16 %v10184_v13  ;;  %v1644_v46 = vcombine.high %v1196_v5, %v1196_v5  ;;  %v1651_v41 = vrot.slane %v1196_v5, %v11260_v0 }
 0x1e2   : > { %v2369_v8 = vsel %vm1908_vm5, %v1694_v51, 0.0  ;;  %vm1037_vm13 = vcmp.gt.f32.partialorder %v11773_v43, 0.0  ;;  %v1136_v35 = vmul.f32 1.442695, %v1074_v45  ;;  %v1132_v57 = vmul.f32 1.442695, %v1072_v25 }
 0x1e3   : > { %13315 = vst [vmem:[#allocation13_spill] sm:$0xff] %v11820_v32  ;;  %13316 = vst [vmem:[#allocation14_spill] sm:$0xff] %v11822_v39  ;;  %v1075_v6 = vmin.f32 %v11812_v22, 0.0  ;;  %v1658_v63 = vrot.slane %v1644_v46, %v11260_v0  ;;  %v1659_v29 = vcombine.high %v1651_v41, %v1651_v41  ;;  %v2341_v23 = vsel %vm1908_vm5, %v1651_v41, 0.0 }
 0x1e4   : > { %vm920_vm1 = vcmask 257024   ;;  %v10970_v54 = vpop.eup %10969  ;;  %v11830_v13 = vunpack.c.l.b16 %v10185_v44  ;;  %v11832_v2 = vunpack.c.l.b16 %v10186_v11  ;;  %v2343_v19 = vadd.f32 %v2342_v33, %v2341_v23 }
 0x1e5   : > { %v1073_v51 = vmin.f32 %v11818_v17, 0.0  ;;  %v13319_v5 = vmov 0   ;;  %v1660_v33 = vcombine.high %v1658_v63, %v1658_v63  ;;  %v2350_v45 = vsel %vm1908_vm5, %v1659_v29, 0.0 }
 0x1e6   : > { %13317 = vst [vmem:[#allocation15_spill] sm:$0xff] %v11830_v13  ;;  %13318 = vst [vmem:[#allocation16_spill] sm:$0xff] %v11832_v2  ;;  %v2359_v44 = vsel %vm1908_vm5, %v1658_v63, 0.0  ;;  %v9574_v11 = vadd.f32 -1.0, %v10970_v54  ;;  %v2344_v25 = vrot.slane %v2343_v19, 4  ;;  %v2352_v46 = vadd.f32 %v2351_v15, %v2350_v45 }
 0x1e7   : > { %921 = vst.msk [vmem:[#allocation2] sm:$0xf] %vm920_vm1, %v13319_v5  ;;  %924 = vst.msk [vmem:[#allocation2 + $0x8] sm:$0xf] %vm920_vm1, %v13319_v5  ;;  %v2361_v41 = vadd.f32 %v2360_v12, %v2359_v44  ;;  %10973 = vpow2.f32 %v1136_v35  ;;  %v2368_v23 = vsel %vm1908_vm5, %v1660_v33, 0.0  ;;  %vm1042_vm4 = vcmp.gt.f32.partialorder %v11791_v60, 0.0 }
 0x1e8   : > { %926 = vst.msk [vmem:[#allocation2 + $0x10] sm:$0xf] %vm920_vm1, %v13319_v5  ;;  %928 = vst.msk [vmem:[#allocation2 + $0x18] sm:$0xf] %vm920_vm1, %v13319_v5  ;;  %v1199_v2 = vsel %vm1039_vm2, %v11770_v38, %v9574_v11  ;;  %10975 = vpow2.f32 %v1132_v57  ;;  %v1138_v13 = vmul.f32 1.442695, %v1075_v6  ;;  %v10972_v29 = vpop.eup %10971  ;;  %v2345_v63 = vadd.f32 %v2344_v25, %v2343_v19 }
 0x1e9   : > { %930 = vst.msk [vmem:[#allocation2 + $0x20] sm:$0xf] %vm920_vm1, %v13319_v5  ;;  %932 = vst.msk [vmem:[#allocation2 + $0x28] sm:$0xf] %vm920_vm1, %v13319_v5  ;;  %v2353_v54 = vrot.slane %v2352_v46, 4  ;;  %v2362_v32 = vrot.slane %v2361_v41, 4  ;;  %v2370_v15 = vadd.f32 %v2369_v8, %v2368_v23  ;;  %v1695_v12 = vcombine.high %v1199_v2, %v1199_v2 }
 0x1ea   : > { %934 = vst.msk [vmem:[#allocation2 + $0x30] sm:$0xf] %vm920_vm1, %v13319_v5  ;;  %936 = vst.msk [vmem:[#allocation2 + $0x38] sm:$0xf] %vm920_vm1, %v13319_v5  ;;  %v1702_v35 = vrot.slane %v1199_v2, %v11260_v0  ;;  %v9572_v33 = vadd.f32 -1.0, %v10972_v29  ;;  %v2346_v38 = vrot.slane %v2345_v63, 2  ;;  %10977 = vpow2.f32 %v1138_v13 }
 0x1eb   : > { %938 = vst.msk [vmem:[#allocation2 + $0x40] sm:$0xf] %vm920_vm1, %v13319_v5  ;;  %940 = vst.msk [vmem:[#allocation2 + $0x48] sm:$0xf] %vm920_vm1, %v13319_v5  ;;  %v11864_v5 = vld [vmem:[%s13280_s2 + $0x60] sm:$0xff]   ;;  %v2354_v57 = vadd.f32 %v2353_v54, %v2352_v46  ;;  %v2363_v6 = vadd.f32 %v2362_v32, %v2361_v41  ;;  %v2371_v44 = vrot.slane %v2370_v15, 4  ;;  %v1709_v11 = vrot.slane %v1695_v12, %v11260_v0 }
 0x1ec   : > { %13320 = vst [vmem:[#allocation17_spill] sm:$0xff] %v11864_v5  ;;  %v1134_v45 = vmul.f32 1.442695, %v1073_v51  ;;  %10505 = vmatprep.subr.bf16.mxu0 %v11864_v5  ;;  %v1710_v3 = vcombine.high %v1702_v35, %v1702_v35  ;;  %v1197_v19 = vsel %vm1037_vm13, %v11773_v43, %v9572_v33  ;;  %v2347_v8 = vadd.f32 %v2346_v38, %v2345_v63 }
 0x1ed   : > { %v2355_v25 = vrot.slane %v2354_v57, 2  ;;  %v2364_v23 = vrot.slane %v2363_v6, 2  ;;  %v2372_v2 = vadd.f32 %v2371_v44, %v2370_v15  ;;  %v1711_v29 = vcombine.high %v1709_v11, %v1709_v11 }
 0x1ee   : > { %v2378_v51 = vsel %vm1908_vm5, %v1702_v35, 0.0  ;;  %v2387_v5 = vsel %vm1908_vm5, %v1710_v3, 0.0  ;;  %v1661_v46 = vcombine.high %v1197_v19, %v1197_v19  ;;  %v2348_v32 = vrot.slane %v2347_v8, 1 }
 0x1ef   : > { %v2356_v41 = vadd.f32 %v2355_v25, %v2354_v57  ;;  %v2365_v54 = vadd.f32 %v2364_v23, %v2363_v6  ;;  %v2373_v12 = vrot.slane %v2372_v2, 2  ;;  %v2396_v39 = vsel %vm1908_vm5, %v1709_v11, 0.0 }
 0x1f0   : > { %v2405_v43 = vsel %vm1908_vm5, %v1711_v29, 0.0  ;;  %v1668_v13 = vrot.slane %v1197_v19, %v11260_v0  ;;  %v1675_v63 = vrot.slane %v1661_v46, %v11260_v0  ;;  %v2349_v33 = vadd.f32 %v2348_v32, %v2347_v8 }
 0x1f1   : > { %v10974_v15 = vpop.eup %10973  ;;  %v2357_v35 = vrot.slane %v2356_v41, 1  ;;  %v2366_v38 = vrot.slane %v2365_v54, 1  ;;  %v2374_v3 = vadd.f32 %v2373_v12, %v2372_v2  ;;  %vm1040_vm6 = vcmp.gt.f32.partialorder %v11805_v56, 0.0 }
 0x1f2   : > { %v10976_v44 = vpop.eup %10975  ;;  %v1676_v42 = vcombine.high %v1668_v13, %v1668_v13  ;;  %v1677_v48 = vcombine.high %v1675_v63, %v1675_v63  ;;  %v2377_v57 = vsel %vm1908_vm5, %v1668_v13, 0.0  ;;  %v2395_v6 = vsel %vm1908_vm5, %v1675_v63, 0.0 }
 0x1f3   : > { %v2358_v25 = vadd.f32 %v2357_v35, %v2356_v41  ;;  %v2367_v11 = vadd.f32 %v2366_v38, %v2365_v54  ;;  %v2375_v23 = vrot.slane %v2374_v3, 1  ;;  %v2533_v29 = vmul.f32 0.25, %v2349_v33 }
 0x1f4   : > { %v2379_v52 = vadd.f32 %v2378_v51, %v2377_v57  ;;  %v2386_v19 = vsel %vm1908_vm5, %v1676_v42, 0.0  ;;  %v2397_v46 = vadd.f32 %v2396_v39, %v2395_v6  ;;  %v2404_v8 = vsel %vm1908_vm5, %v1677_v48, 0.0  ;;  %v10978_v27 = vpop.eup %10977 }
 0x1f5   : > { %v2376_v32 = vadd.f32 %v2375_v23, %v2374_v3  ;;  %v2534_v53 = vmul.f32 0.25, %v2358_v25  ;;  %v2535_v2 = vmul.f32 0.25, %v2367_v11  ;;  %v9577_v12 = vadd.f32 -1.0, %v10974_v15 }
 0x1f6   : > { %v2380_v13 = vrot.slane %v2379_v52, 4  ;;  %v2388_v47 = vadd.f32 %v2387_v5, %v2386_v19  ;;  %v2398_v63 = vrot.slane %v2397_v46, 4  ;;  %v2406_v41 = vadd.f32 %v2405_v43, %v2404_v8 }
 0x1f7   : > { %v2536_v54 = vmul.f32 0.25, %v2376_v32  ;;  %v10188_v35 = vpack.c.bf16 %v2533_v29, %v2533_v29  ;;  %v10189_v33 = vpack.c.bf16 %v2534_v53, %v2534_v53  ;;  %10979 = vpow2.f32 %v1134_v45 }
 0x1f8   : > { %v2381_v51 = vadd.f32 %v2380_v13, %v2379_v52  ;;  %v2389_v42 = vrot.slane %v2388_v47, 4  ;;  %v2399_v39 = vadd.f32 %v2398_v63, %v2397_v46  ;;  %v2407_v38 = vrot.slane %v2406_v41, 4 }
 0x1f9   : > { %v10190_v48 = vpack.c.bf16 %v2535_v2, %v2535_v2  ;;  %v10191_v3 = vpack.c.bf16 %v2536_v54, %v2536_v54  ;;  %v1202_v15 = vsel %vm1042_vm4, %v11791_v60, %v9577_v12  ;;  %v13321_v57 = vrot.slane %v11408_v30, 1 }
 0x1fa   : > { %v2382_v43 = vrot.slane %v2381_v51, 2  ;;  %v2390_v6 = vadd.f32 %v2389_v42, %v2388_v47  ;;  %v2400_v25 = vrot.slane %v2399_v39, 2  ;;  %v2408_v53 = vadd.f32 %v2407_v38, %v2406_v41 }
 0x1fb   : > { %v11890_v5 = vadd.f32 %v13321_v57, %v11408_v30  ;;  %v2854_v45 = vunpack.c.l.b16 %v10189_v33  ;;  %v1746_v52 = vcombine.high %v1202_v15, %v1202_v15  ;;  %v1753_v11 = vrot.slane %v1202_v15, %v11260_v0 }
 0x1fc   : > { %v1970_v23 = vrot.slane %v11421_v34, 1  ;;  %v2853_v29 = vunpack.c.l.b16 %v10188_v35  ;;  %v2383_v19 = vadd.f32 %v2382_v43, %v2381_v51  ;;  %v2391_v46 = vrot.slane %v2390_v6, 2 }
 0x1fd   : > { %v2401_v8 = vadd.f32 %v2400_v25, %v2399_v39  ;;  %vm1043_vm7 = vcmp.gt.f32.partialorder %v11812_v22, 0.0  ;;  %v2855_v60 = vunpack.c.l.b16 %v10190_v48  ;;  %v11895_v32 = vunpack.c.l.b16 %v10191_v3 }
 0x1fe   : > { %v2409_v30 = vrot.slane %v2408_v53, 2  ;;  %v1760_v47 = vrot.slane %v1746_v52, %v11260_v0  ;;  %v2384_v2 = vrot.slane %v2383_v19, 1  ;;  %v2392_v12 = vadd.f32 %v2391_v46, %v2390_v6 }
 0x1ff   : > { %v2402_v13 = vrot.slane %v2401_v8, 1  ;;  %v9575_v63 = vadd.f32 -1.0, %v10976_v44  ;;  %v2911_v41 = vsel %vm2869_vm14, %v2854_v45, %v2853_v29  ;;  %v1761_v33 = vcombine.high %v1753_v11, %v1753_v11 }
 0x200   : > { %v2410_v54 = vadd.f32 %v2409_v30, %v2408_v53  ;;  %v2414_v35 = vsel %vm1908_vm5, %v1753_v11, 0.0  ;;  %v2385_v51 = vadd.f32 %v2384_v2, %v2383_v19  ;;  %v2393_v42 = vrot.slane %v2392_v12, 1 }
 0x201   : > { %v2403_v39 = vadd.f32 %v2402_v13, %v2401_v8  ;;  %v1200_v38 = vsel %vm1040_vm6, %v11805_v56, %v9575_v63  ;;  %v10980_v48 = vpop.eup %10979  ;;  %v1762_v15 = vcombine.high %v1760_v47, %v1760_v47  ;;  %v11905_v44 = vsel %vm2871_vm15, %v2855_v60, %v2911_v41 }
 0x202   : > { %v2411_v3 = vrot.slane %v2410_v54, 1  ;;  %v1712_v57 = vcombine.high %v1200_v38, %v1200_v38  ;;  %v1719_v43 = vrot.slane %v1200_v38, %v11260_v0  ;;  %v2394_v6 = vadd.f32 %v2393_v42, %v2392_v12 }
 0x203   : > { %v11907_v25 = vmul.f32 0.25, %v2385_v51  ;;  %v11909_v53 = vmul.f32 0.25, %v2403_v39  ;;  %vm1041_vm8 = vcmp.gt.f32.partialorder %v11818_v17, 0.0  ;;  %v9578_v11 = vadd.f32 -1.0, %v10978_v27 }
 0x204   : > { %v1726_v45 = vrot.slane %v1712_v57, %v11260_v0  ;;  %v1727_v52 = vcombine.high %v1719_v43, %v1719_v43  ;;  %v2413_v56 = vsel %vm1908_vm5, %v1719_v43, 0.0  ;;  %v2412_v29 = vadd.f32 %v2411_v3, %v2410_v54 }
 0x205   : > { %v2423_v19 = vsel %vm1908_vm5, %v1761_v33, 0.0  ;;  %v2432_v46 = vsel %vm1908_vm5, %v1760_v47, 0.0  ;;  %v2415_v8 = vadd.f32 %v2414_v35, %v2413_v56  ;;  %v2441_v60 = vsel %vm1908_vm5, %v1762_v15, 0.0 }
 0x206   : > { %v1728_v30 = vcombine.high %v1726_v45, %v1726_v45  ;;  %v2422_v2 = vsel %vm1908_vm5, %v1727_v52, 0.0  ;;  %v2431_v12 = vsel %vm1908_vm5, %v1726_v45, 0.0  ;;  %v11919_v13 = vmul.f32 0.25, %v2394_v6 }
 0x207   : > { %v2416_v41 = vrot.slane %v2415_v8, 4  ;;  %v2424_v54 = vadd.f32 %v2423_v19, %v2422_v2  ;;  %v2433_v33 = vadd.f32 %v2432_v46, %v2431_v12  ;;  %v1203_v35 = vsel %vm1043_vm7, %v11812_v22, %v9578_v11 }
 0x208   : > { %v2440_v47 = vsel %vm1908_vm5, %v1728_v30, 0.0  ;;  %v11929_v51 = vmul.f32 0.25, %v2412_v29  ;;  %v1763_v38 = vcombine.high %v1203_v35, %v1203_v35  ;;  %v1770_v57 = vrot.slane %v1203_v35, %v11260_v0 }
 0x209   : > { %v2417_v42 = vadd.f32 %v2416_v41, %v2415_v8  ;;  %v2442_v39 = vadd.f32 %v2441_v60, %v2440_v47  ;;  %v2425_v3 = vrot.slane %v2424_v54, 4  ;;  %v2434_v15 = vrot.slane %v2433_v33, 4 }
 0x20a   : > { %v9576_v43 = vadd.f32 -1.0, %v10980_v48  ;;  %v1777_v56 = vrot.slane %v1763_v38, %v11260_v0  ;;  %v1778_v22 = vcombine.high %v1770_v57, %v1770_v57  ;;  %v1971_v11 = vadd.f32 %v1970_v23, %v11421_v34 }
 0x20b   : > { %v2418_v45 = vrot.slane %v2417_v42, 2  ;;  %v2443_v52 = vrot.slane %v2442_v39, 4  ;;  %v2426_v19 = vadd.f32 %v2425_v3, %v2424_v54  ;;  %v2435_v46 = vadd.f32 %v2434_v15, %v2433_v33 }
 0x20c   : > { %v1779_v60 = vcombine.high %v1777_v56, %v1777_v56  ;;  %v2450_v30 = vsel %vm1908_vm5, %v1770_v57, 0.0  ;;  %v2468_v12 = vsel %vm1908_vm5, %v1777_v56, 0.0  ;;  %v1201_v41 = vsel %vm1041_vm8, %v11818_v17, %v9576_v43 }
 0x20d   : > { %v2419_v29 = vadd.f32 %v2418_v45, %v2417_v42  ;;  %v2444_v8 = vadd.f32 %v2443_v52, %v2442_v39  ;;  %v2427_v48 = vrot.slane %v2426_v19, 2  ;;  %v2436_v2 = vrot.slane %v2435_v46, 2 }
 0x20e   : > { %v2459_v47 = vsel %vm1908_vm5, %v1778_v22, 0.0  ;;  %v1729_v35 = vcombine.high %v1201_v41, %v1201_v41  ;;  %v2477_v23 = vsel %vm1908_vm5, %v1779_v60, 0.0  ;;  %v1736_v42 = vrot.slane %v1201_v41, %v11260_v0 }
 0x20f   : > { %v2420_v54 = vrot.slane %v2419_v29, 1  ;;  %v2445_v33 = vrot.slane %v2444_v8, 2  ;;  %v2428_v38 = vadd.f32 %v2427_v48, %v2426_v19  ;;  %v2437_v34 = vadd.f32 %v2436_v2, %v2435_v46 }
 0x210   : > { %v1743_v15 = vrot.slane %v1729_v35, %v11260_v0  ;;  %v2490_v57 = vmul.f32 0.25, %v11890_v5  ;;  %v1744_v17 = vcombine.high %v1736_v42, %v1736_v42  ;;  %v2449_v43 = vsel %vm1908_vm5, %v1736_v42, 0.0 }
 0x211   : > { %v2421_v39 = vadd.f32 %v2420_v54, %v2419_v29  ;;  %v2446_v3 = vadd.f32 %v2445_v33, %v2444_v8  ;;  %v2429_v45 = vrot.slane %v2428_v38, 1  ;;  %v2438_v52 = vrot.slane %v2437_v34, 1 }
 0x212   : > { %v1745_v27 = vcombine.high %v1743_v15, %v1743_v15  ;;  %v2451_v19 = vadd.f32 %v2450_v30, %v2449_v43  ;;  %v2458_v60 = vsel %vm1908_vm5, %v1744_v17, 0.0  ;;  %v2467_v29 = vsel %vm1908_vm5, %v1743_v15, 0.0 }
 0x213   : > { %v2447_v56 = vrot.slane %v2446_v3, 1  ;;  %v2541_v22 = vmul.f32 0.25, %v2421_v39  ;;  %v2430_v46 = vadd.f32 %v2429_v45, %v2428_v38  ;;  %v2439_v48 = vadd.f32 %v2438_v52, %v2437_v34 }
 0x214   : > { %v2452_v41 = vrot.slane %v2451_v19, 4  ;;  %v2460_v54 = vadd.f32 %v2459_v47, %v2458_v60  ;;  %vm2873_vm9 = vcmask 1044484   ;;  %v2469_v35 = vadd.f32 %v2468_v12, %v2467_v29 }
 0x215   : > { %v2448_v8 = vadd.f32 %v2447_v56, %v2446_v3  ;;  %v10196_v2 = vpack.c.bf16 %v2541_v22, %v2541_v22  ;;  %v2542_v5 = vmul.f32 0.25, %v2430_v46  ;;  %v2543_v33 = vmul.f32 0.25, %v2439_v48 }
 0x216   : > { %v2476_v42 = vsel %vm1908_vm5, %v1745_v27, 0.0  ;;  %v2453_v39 = vadd.f32 %v2452_v41, %v2451_v19  ;;  %v2461_v63 = vrot.slane %v2460_v54, 4  ;;  %vm2875_vm10 = vcmask 1045509  }
 0x217   : > { %v2544_v6 = vmul.f32 0.25, %v2448_v8  ;;  %v2491_v30 = vmul.f32 0.25, %v1971_v11  ;;  %vm2877_vm11 = vcmask 1046534   ;;  %v10197_v38 = vpack.c.bf16 %v2542_v5, %v2542_v5 }
 0x218   : > { %v10198_v34 = vpack.c.bf16 %v2543_v33, %v2543_v33  ;;  %v2470_v45 = vrot.slane %v2469_v35, 4  ;;  %v2478_v15 = vadd.f32 %v2477_v23, %v2476_v42  ;;  %v2861_v52 = vunpack.c.l.b16 %v10196_v2 }
 0x219   : > { %v10199_v3 = vpack.c.bf16 %v2544_v6, %v2544_v6  ;;  %v2454_v17 = vrot.slane %v2453_v39, 2  ;;  %v2462_v47 = vadd.f32 %v2461_v63, %v2460_v54  ;;  %v2862_v43 = vunpack.c.l.b16 %v10197_v38 }
 0x21a   : > { %v2471_v56 = vadd.f32 %v2470_v45, %v2469_v35  ;;  %v2479_v22 = vrot.slane %v2478_v15, 4  ;;  %v10145_v12 = vpack.c.bf16 %v2490_v57, %v2490_v57  ;;  %v13322_v27 = vpack.c.bf16 %v11907_v25, %v11907_v25 }
 0x21b   : > { %v2455_v46 = vadd.f32 %v2454_v17, %v2453_v39  ;;  %v2463_v11 = vrot.slane %v2462_v47, 2  ;;  %v10146_v48 = vpack.c.bf16 %v2491_v30, %v2491_v30  ;;  %v2863_v60 = vunpack.c.l.b16 %v10198_v34 }
 0x21c   : > { %v11955_v19 = vunpack.c.l.b16 %v13322_v27  ;;  %v2864_v29 = vunpack.c.l.b16 %v10199_v3  ;;  %v2472_v8 = vrot.slane %v2471_v56, 2  ;;  %v2480_v23 = vadd.f32 %v2479_v22, %v2478_v15 }
 0x21d   : > { %v2917_v6 = vsel %vm2869_vm14, %v2862_v43, %v2861_v52  ;;  %v2456_v2 = vrot.slane %v2455_v46, 1  ;;  %v2464_v63 = vadd.f32 %v2463_v11, %v2462_v47  ;;  %v13323_v41 = vpack.c.bf16 %v11349_v21, %v11349_v21 }
 0x21e   : > { %v2473_v54 = vadd.f32 %v2472_v8, %v2471_v56  ;;  %v2481_v5 = vrot.slane %v2480_v23, 2  ;;  %v2810_v25 = vunpack.c.l.b16 %v10145_v12  ;;  %v2811_v33 = vunpack.c.l.b16 %v10146_v48  ;;  %v2968_v48 = vld [vmem:[#allocation2 + $0x10] sm:$0xf] }
 0x21f   : > { %v2808_v57 = vunpack.c.l.b16 %v13323_v41  ;;  %v2457_v35 = vadd.f32 %v2456_v2, %v2455_v46  ;;  %v2465_v42 = vrot.slane %v2464_v63, 1  ;;  %v2870_v39 = vsel %vm2869_vm14, %v11405_v40, %v11389_v7 }
 0x220   : > { %vm2879_vm2 = vcmask 1047559   ;;  %v2474_v30 = vrot.slane %v2473_v54, 1  ;;  %v2482_v38 = vadd.f32 %v2481_v5, %v2480_v23  ;;  %v2872_v34 = vsel %vm2871_vm15, %v11416_v4, %v2870_v39  ;;  %v2971_v5 = vld [vmem:[#allocation2 + $0x14] sm:$0x1] }
 0x221   : > { %vm2957_vm13 = vsmask.f32 7938  ;;  %v2466_v45 = vadd.f32 %v2465_v42, %v2464_v63  ;;  %v2545_v21 = vmul.f32 0.25, %v2457_v35  ;;  %v2874_v15 = vsel %vm2873_vm9, %v2808_v57, %v2872_v34  ;;  %v3748_v42 = vld [vmem:[#allocation2 + $0x1c] sm:$0x1] }
 0x222   : > { %v2883_v3 = vsel %vm2873_vm9, %v11437_v1, %v11444_v9  ;;  %v2475_v52 = vadd.f32 %v2474_v30, %v2473_v54  ;;  %v2483_v17 = vrot.slane %v2482_v38, 1  ;;  %v2876_v7 = vsel %vm2875_vm10, %v11435_v62, %v2874_v15  ;;  %vm11981_vm4 = vmand %vm920_vm1, %vm2957_vm13  ;;  %v2959_v62 = vld [vmem:[#allocation2 + $0x8] sm:$0xf]  ;;  %v2974_v54 = vld [vmem:[#allocation2 + $0x18] sm:$0xf] }
 0x223   : > { %v2884_v40 = vsel %vm2875_vm10, %v11458_v37, %v2883_v3  ;;  %v2546_v47 = vmul.f32 0.25, %v2466_v45  ;;  %v10200_v43 = vpack.c.bf16 %v2545_v21, %v2545_v21  ;;  %v2878_v4 = vsel %vm2877_vm11, %v2810_v25, %v2876_v7  ;;  %v13329_v21 = vld [vmem:[#allocation9_spill] sm:$0xff]  ;;  %v13330_v3 = vld [vmem:[#allocation7_spill] sm:$0xff] }
 0x224   : > { %v2885_v56 = vsel %vm2877_vm11, %v11470_v58, %v2884_v40  ;;  %v2918_v22 = vsel %vm2871_vm15, %v2863_v60, %v2917_v6  ;;  %v2484_v12 = vadd.f32 %v2483_v17, %v2482_v38  ;;  %v2880_v1 = vsel %vm2879_vm2, %v2811_v33, %v2878_v4  ;;  %v13331_v17 = vld [vmem:[#allocation10_spill] sm:$0xff]  ;;  %v2986_v40 = vld [vmem:[#allocation2 + $0x28] sm:$0xf] }
 0x225   : > { %v2886_v37 = vsel %vm2879_vm2, %v11482_v28, %v2885_v56  ;;  %v11987_v27 = vmul.f32 0.25, %v2475_v52  ;;  %v10201_v46 = vpack.c.bf16 %v2546_v47, %v2546_v47  ;;  %v2923_v11 = vpack.c.b16 %v2880_v1, %v2880_v1  ;;  %v13332_v47 = vld [vmem:[#allocation12_spill] sm:$0xff] }
 0x226   : > { %v2889_v58 = vsel %vm2873_vm9, %v11597_v18, %v11600_v24  ;;  %v13326_v60 = vpack.c.bf16 %v11919_v13, %v11919_v13  ;;  %v13327_v23 = vpack.c.bf16 %v11909_v53, %v11909_v53  ;;  %v2925_v2 = vpack.c.b16 %v2886_v37, %v2886_v37  ;;  %v2965_v13 = vld [vmem:[#allocation2 + $0xc] sm:$0x1]  ;;  %v2995_v37 = vld [vmem:[#allocation2 + $0x34] sm:$0x1] }
 0x227   : > { %v2890_v28 = vsel %vm2875_vm10, %v11602_v16, %v2889_v58  ;;  %v12004_v63 = vunpack.c.l.b16 %v10200_v43  ;;  %v12007_v41 = vsel %vm2873_vm9, %v2864_v29, %v2918_v22  ;;  %v2960_v18 = vsel %vm11981_vm4, %v2923_v11, %v2959_v62  ;;  %v2989_v62 = vld [vmem:[#allocation2 + $0x2c] sm:$0x1]  ;;  %v13334_v58 = vld [vmem:[#allocation14_spill] sm:$0xff] }
 0x228   : > { %v11995_v8 = vunpack.c.l.b16 %v13326_v60  ;;  %v12000_v6 = vunpack.c.l.b16 %v13327_v23  ;;  %v2891_v24 = vsel %vm2877_vm11, %v11605_v31, %v2890_v28  ;;  %v12013_v57 = vmul.f32 0.25, %v2484_v12  ;;  %2961 = vst [vmem:[#allocation2 + $0x8] sm:$0xf] %v2960_v18  ;;  %v13335_v23 = vld [vmem:[#allocation8_spill] sm:$0xff] }
 0x229   : > { %v2892_v53 = vsel %vm2879_vm2, %v11608_v14, %v2891_v24  ;;  %v2969_v16 = vsel %vm11981_vm4, %v2925_v2, %v2968_v48  ;;  %v10204_v29 = vpack.c.bf16 %v11427_v55, %v11427_v55  ;;  %v10202_v25 = vpack.c.bf16 %v11987_v27, %v11987_v27  ;;  %v3750_v14 = vld [vmem:[#allocation2 + $0x24] sm:$0x1] }
 0x22a   : > { %v12023_v33 = vunpack.c.l.b16 %v10201_v46  ;;  %v2927_v31 = vpack.c.b16 %v2892_v53, %v2892_v53  ;;  %2970 = vst [vmem:[#allocation2 + $0x10] sm:$0xf] %v2969_v16  ;;  %v10205_v35 = vpack.c.bf16 %v11456_v36, %v11456_v36  ;;  %vm3155_vm1 = vsmask.f32 3328 }
 0x22b   : > { %v2966_v39 = vsel %vm11559_vm12, %v10204_v29, %v2965_v13  ;;  %vm3156_vm6 = vsmask.f32 7440  ;;  %v2895_v55 = vsel %vm2873_vm9, %v11620_v61, %v11665_v50  ;;  %v2901_v30 = vsel %vm2873_vm9, %v11726_v49, %v11730_v26  ;;  %v13328_v61 = vld [vmem:[#allocation6_spill] sm:$0xff] }
 0x22c   : > { %v2975_v38 = vsel %vm11981_vm4, %v2927_v31, %v2974_v54  ;;  %2967 = vst [vmem:[#allocation2 + $0xc] sm:$0x1] %v2966_v39  ;;  %v2972_v36 = vsel %vm11559_vm12, %v10205_v35, %v2971_v5  ;;  %v2896_v34 = vsel %vm2875_vm10, %v11668_v20, %v2895_v55  ;;  %v2902_v45 = vsel %vm2875_vm10, %v11786_v59, %v2901_v30  ;;  %v2980_v20 = vld [vmem:[#allocation2 + $0x20] sm:$0xf]  ;;  %v13333_v59 = vld [vmem:[#allocation11_spill] sm:$0xff]  ;;  %vm12092_vm7 = vmor %vm3155_vm1, %vm3156_vm6 }
 0x22d   : > { %2976 = vst [vmem:[#allocation2 + $0x18] sm:$0xf] %v2975_v38  ;;  %2973 = vst [vmem:[#allocation2 + $0x14] sm:$0x1] %v2972_v36  ;;  %v2897_v50 = vsel %vm2877_vm11, %v13328_v61, %v2896_v34  ;;  %v2903_v49 = vsel %vm2877_vm11, %v13329_v21, %v2902_v45  ;;  %v3797_v26 = vshll.u32 %v3748_v42, 16  ;;  %v3811_v15 = vshll.u32 %v3750_v14, 16 }
 0x22e   : > { %v2898_v52 = vsel %vm2879_vm2, %v13330_v3, %v2897_v50  ;;  %v2904_v7 = vsel %vm2879_vm2, %v13331_v17, %v2903_v49  ;;  %v2907_v43 = vsel %vm2873_vm9, %v13333_v59, %v13332_v47  ;;  %v2913_v4 = vsel %vm2873_vm9, %v11895_v32, %v11905_v44  ;;  %v13336_v32 = vld [vmem:[#allocation13_spill] sm:$0xff]  ;;  %v2992_v31 = vld [vmem:[#allocation2 + $0x30] sm:$0xf]  ;;  %v2998_v35 = vld [vmem:[#allocation2 + $0x38] sm:$0xf] }
 0x22f   : > { %v2929_v56 = vpack.c.b16 %v2898_v52, %v2898_v52  ;;  %v2931_v22 = vpack.c.b16 %v2904_v7, %v2904_v7  ;;  %v12057_v12 = vrot.slane %v3797_v26, 5  ;;  %v12059_v1 = vrot.slane %v3811_v15, 5  ;;  %v10811_v46 = vld [vmem:[#allocation2] ss:$8 sps:$4 sm:$0xff]   ;;  %v10820_v42 = vld [vmem:[%s13280_s2 + $0x18] sm:$0xff]  }
 0x230   : > { %v3743_v11 = vld [vmem:[#allocation2 + $0x8] sm:$0xf]  ;;  %v2908_v48 = vsel %vm2875_vm10, %v13334_v58, %v2907_v43  ;;  %v2914_v60 = vsel %vm2875_vm10, %v11955_v19, %v2913_v4  ;;  %v10208_v28 = vpack.c.bf16 %v13335_v23, %v13335_v23  ;;  %v10209_v44 = vpack.c.bf16 %v13336_v32, %v13336_v32  ;;  %10437 = vmatprep.mubr.msk.bf16.mxu1 %vm886_vm3, %v10811_v46  ;;  %v13337_v19 = vld [vmem:[#allocation15_spill] sm:$0xff]  ;;  %v13338_v30 = vld [vmem:[#allocation16_spill] sm:$0xff] }
 0x231   : > { %v3745_v2 = vld [vmem:[#allocation2 + $0x10] sm:$0xf]  ;;  %v3760_v18 = vshrl.u32 %v3743_v11, 16  ;;  %v3763_v24 = vshll.u32 %v3743_v11, 16  ;;  %v2981_v13 = vsel %vm11981_vm4, %v2929_v56, %v2980_v20  ;;  %v2987_v53 = vsel %vm11981_vm4, %v2931_v22, %v2986_v40  ;;  %v3139_v34 = vld [vmem:[#allocation2] sm:$0xf] }
 0x232   : > { %v3774_v16 = vshrl.u32 %v3745_v2, 16  ;;  %v3777_v54 = vshll.u32 %v3745_v2, 16  ;;  %2982 = vst [vmem:[#allocation2 + $0x20] sm:$0xf] %v2981_v13  ;;  %2988 = vst [vmem:[#allocation2 + $0x28] sm:$0xf] %v2987_v53  ;;  %v2909_v29 = vsel %vm2877_vm11, %v13337_v19, %v2908_v48  ;;  %v2915_v5 = vsel %vm2877_vm11, %v11995_v8, %v2914_v60 }
 0x233   : > { %v3744_v14 = vld [vmem:[#allocation2 + $0xc] sm:$0x1]  ;;  %v3762_v39 = vrot.slane %v3760_v18, 4  ;;  %v3765_v55 = vrot.slane %v3763_v24, 5  ;;  %v2910_v38 = vsel %vm2879_vm2, %v13338_v30, %v2909_v29  ;;  %v2916_v36 = vsel %vm2879_vm2, %v12000_v6, %v2915_v5  ;;  %v11019_v56 = vld [vmem:[%s13280_s2 + $0x10] sm:$0xff]  }
 0x234   : > { %v10814_v45 = vld [vmem:[#allocation2 + $0x10] ss:$8 sps:$4 sm:$0xff]   ;;  %v3746_v61 = vld [vmem:[#allocation2 + $0x14] sm:$0x1]  ;;  %v2933_v50 = vpack.c.b16 %v2910_v38, %v2910_v38  ;;  %v2935_v8 = vpack.c.b16 %v2916_v36, %v2916_v36  ;;  %v2990_v21 = vsel %vm11559_vm12, %v10208_v28, %v2989_v62  ;;  %v2996_v49 = vsel %vm11559_vm12, %v10209_v44, %v2995_v37  ;;  %v3140_v62 = vld [vmem:[#allocation2 + $0x4] sm:$0x1] }
 0x235   : > { %v3766_v26 = vor.u32 %v3765_v55, %v3762_v39  ;;  %v3769_v15 = vshll.u32 %v3744_v14, 16  ;;  %v3776_v3 = vrot.slane %v3774_v16, 4  ;;  %v3779_v52 = vrot.slane %v3777_v54, 5  ;;  %v3747_v17 = vld [vmem:[#allocation2 + $0x18] sm:$0xf]  ;;  %10438 = vmatmul.mubr.msk.bf16.vlgmr.msra.gmra.mrb[0].mxu1 %vm886_vm3, %v10814_v45  ;;  %v12106_v37 = vld [vmem:[%s13280_s2 + $0x20] sm:$0xff]  }
 0x236   : > { %2991 = vst [vmem:[#allocation2 + $0x2c] sm:$0x1] %v2990_v21  ;;  %2997 = vst [vmem:[#allocation2 + $0x34] sm:$0x1] %v2996_v49  ;;  %v3783_v7 = vshll.u32 %v3746_v61, 16  ;;  %v3788_v20 = vshrl.u32 %v3747_v17, 16  ;;  %v2993_v47 = vsel %vm11981_vm4, %v2933_v50, %v2992_v31  ;;  %10446 = vmatpush3.bf16.msra.mxu1 %v11019_v56  ;;  %v2999_v22 = vsel %vm11981_vm4, %v2935_v8, %v2998_v35 }
 0x237   : > { %v3791_v40 = vshll.u32 %v3747_v17, 16  ;;  %v3767_v59 = vrot.slane %v3766_v26, 4  ;;  %v3771_v43 = vrot.slane %v3769_v15, 5  ;;  %v3780_v4 = vor.u32 %v3779_v52, %v3776_v3  ;;  %2994 = vst [vmem:[#allocation2 + $0x30] sm:$0xf] %v2993_v47  ;;  %10447 = vmatprep.subr.bf16.mxu1 %v10820_v42 }
 0x238   : > { %v3785_v46 = vrot.slane %v3783_v7, 5  ;;  %v3790_v11 = vrot.slane %v3788_v20, 4  ;;  %3000 = vst [vmem:[#allocation2 + $0x38] sm:$0xf] %v2999_v22  ;;  %v3141_v48 = vld [vmem:[#allocation2 + $0x8] sm:$0xf]  ;;  %v2920_v23 = vsel %vm2875_vm10, %v12004_v63, %v12007_v41  ;;  %v10210_v54 = vpack.c.bf16 %v11929_v51, %v11929_v51 }
 0x239   : > { %v3793_v58 = vrot.slane %v3791_v40, 5  ;;  %v3159_v60 = vshrl.u32 %v3139_v34, 16  ;;  %v3772_v28 = vsel %vm12092_vm7, %v3767_v59, %v3771_v43  ;;  %v3781_v32 = vrot.slane %v3780_v4, 4  ;;  %v3001_v2 = vld [vmem:[#allocation2 + $0x3c] sm:$0x1] }
 0x23a   : > { %v3162_v44 = vshll.u32 %v3139_v34, 16  ;;  %v10817_v18 = vld [vmem:[#allocation2 + $0x20] ss:$8 sps:$4 sm:$0xff]   ;;  %v3168_v16 = vshll.u32 %v3140_v62, 16  ;;  %10448 = vmatpush3.bf16.msra.mxu1 %v10820_v42  ;;  %v3142_v63 = vld [vmem:[#allocation2 + $0xc] sm:$0x1]  ;;  %v2867_v42 = vunpack.c.l.b16 %v10202_v25  ;;  %v3002_v8 = vsel %vm11559_vm12, %v10210_v54, %v3001_v2 }
 0x23b   : > { %v3749_v24 = vld [vmem:[#allocation2 + $0x20] sm:$0xf]  ;;  %v3794_v13 = vor.u32 %v3793_v58, %v3790_v11  ;;  %v3161_v53 = vrot.slane %v3159_v60, 4  ;;  %v3786_v19 = vsel %vm12092_vm7, %v3781_v32, %v3785_v46  ;;  %10441 = vmatprep.mubr.msk.bf16.mxu1 %vm886_vm3, %v10817_v18  ;;  %v3173_v39 = vshrl.u32 %v3141_v48, 16  ;;  %v3751_v55 = vld [vmem:[#allocation2 + $0x28] sm:$0xf]  ;;  %10457 = vmatprep.subr.bf16.mxu1 %v12106_v37 }
 0x23c   : > { %v3802_v29 = vshrl.u32 %v3749_v24, 16  ;;  %v3805_v5 = vshll.u32 %v3749_v24, 16  ;;  %v3164_v41 = vrot.slane %v3162_v44, 5  ;;  %v9715_v31 = vcombine.low %v3772_v28, %v3786_v19  ;;  %3003 = vst [vmem:[#allocation2 + $0x3c] sm:$0x1] %v3002_v8  ;;  %v10825_v2 = vld [vmem:[%s13280_s2 + $0x68] sm:$0xff]  }
 0x23d   : > { %v3795_v35 = vrot.slane %v3794_v13, 4  ;;  %v3170_v14 = vrot.slane %v3168_v16, 5  ;;  %v3176_v36 = vshll.u32 %v3141_v48, 16  ;;  %v3752_v34 = vld [vmem:[#allocation2 + $0x2c] sm:$0x1]  ;;  %v3175_v45 = vrot.slane %v3173_v39, 4 }
 0x23e   : > { %v3804_v30 = vrot.slane %v3802_v29, 4  ;;  %v3807_v38 = vrot.slane %v3805_v5, 5  ;;  %v3165_v51 = vor.u32 %v3164_v41, %v3161_v53  ;;  %10485 = vmatprep.mubr.msk.bf16.mxu0 %vm886_vm3, %v9715_v31  ;;  %v3182_v61 = vshll.u32 %v3142_v63, 16  ;;  %v3753_v50 = vld [vmem:[#allocation2 + $0x30] sm:$0xf] }
 0x23f   : > { %v2921_v21 = vsel %vm2877_vm11, %v12023_v33, %v2920_v23  ;;  %v10819_v26 = vld [vmem:[#allocation2 + $0x30] ss:$8 sps:$4 sm:$0xff]   ;;  %v3178_v3 = vrot.slane %v3176_v36, 5  ;;  %v3800_v27 = vsel %vm12092_vm7, %v3795_v35, %v12057_v12  ;;  %v3754_v52 = vld [vmem:[#allocation2 + $0x34] sm:$0x1]  ;;  %v3816_v17 = vshrl.u32 %v3751_v55, 16 }
 0x240   : > { %v3808_v49 = vor.u32 %v3807_v38, %v3804_v30  ;;  %v3166_v15 = vrot.slane %v3165_v51, 4  ;;  %v3184_v25 = vrot.slane %v3182_v61, 5  ;;  %v3819_v7 = vshll.u32 %v3751_v55, 16  ;;  %10442 = vmatmul.mubr.msk.bf16.gmra.mrb[4].mxu1 %vm886_vm3, %v10819_v26  ;;  %v3143_v33 = vld [vmem:[#allocation2 + $0x10] sm:$0xf]  ;;  %v12150_v51 = vld [vmem:[%s13280_s2 + $0x80] sm:$0xff]  }
 0x241   : > { %v3179_v40 = vor.u32 %v3178_v3, %v3175_v45  ;;  %v3825_v47 = vshll.u32 %v3752_v34, 16  ;;  %v3830_v59 = vshrl.u32 %v3753_v50, 16  ;;  %v3818_v4 = vrot.slane %v3816_v17, 4  ;;  %v3144_v62 = vld [vmem:[#allocation2 + $0x14] sm:$0x1] }
 0x242   : > { %v3809_v20 = vrot.slane %v3808_v49, 4  ;;  %v3171_v43 = vsel %vm12092_vm7, %v3166_v15, %v3170_v14  ;;  %v3821_v56 = vrot.slane %v3819_v7, 5  ;;  %v3833_v22 = vshll.u32 %v3753_v50, 16  ;;  %v3146_v48 = vld [vmem:[#allocation2 + $0x1c] sm:$0x1]  ;;  %v13341_v14 = vld [vmem:[#allocation17_spill] sm:$0xff] }
 0x243   : > { %v3180_v46 = vrot.slane %v3179_v40, 4  ;;  %v3832_v11 = vrot.slane %v3830_v59, 4  ;;  %v3839_v58 = vshll.u32 %v3754_v52, 16  ;;  %v3145_v32 = vld [vmem:[#allocation2 + $0x18] sm:$0xf]  ;;  %v3187_v44 = vshrl.u32 %v3143_v33, 16 }
 0x244   : > { %v3814_v12 = vsel %vm12092_vm7, %v3809_v20, %v12059_v1  ;;  %v3822_v23 = vor.u32 %v3821_v56, %v3818_v4  ;;  %v3835_v28 = vrot.slane %v3833_v22, 5  ;;  %v3190_v24 = vshll.u32 %v3143_v33, 16  ;;  %v3147_v53 = vld [vmem:[#allocation2 + $0x20] sm:$0xf]  ;;  %v3148_v35 = vld [vmem:[#allocation2 + $0x24] sm:$0x1] }
 0x245   : > { %v9716_v60 = vcombine.low %v3800_v27, %v3814_v12  ;;  %v3185_v18 = vsel %vm12092_vm7, %v3180_v46, %v3184_v25  ;;  %v3196_v13 = vshll.u32 %v3144_v62, 16  ;;  %v12142_v1 = vsel %vm2879_vm2, %v2867_v42, %v2921_v21  ;;  %v3149_v45 = vld [vmem:[#allocation2 + $0x28] sm:$0xf]  ;;  %v3150_v49 = vld [vmem:[#allocation2 + $0x2c] sm:$0x1] }
 0x246   : > { %v9665_v16 = vcombine.low %v3171_v43, %v3185_v18  ;;  %v3823_v54 = vrot.slane %v3822_v23, 4  ;;  %v3836_v19 = vor.u32 %v3835_v28, %v3832_v11  ;;  %v3189_v29 = vrot.slane %v3187_v44, 4  ;;  %v3151_v15 = vld [vmem:[#allocation2 + $0x30] sm:$0xf]  ;;  %v3153_v59 = vld [vmem:[#allocation2 + $0x38] sm:$0xf] }
 0x247   : > { %10486 = vmatmul.mubr.msk.bf16.vlgmr.msra.gmra.mrb[32].mxu0 %vm886_vm3, %v9716_v60  ;;  %v3827_v5 = vrot.slane %v3825_v47, 5  ;;  %v3192_v63 = vrot.slane %v3190_v24, 5  ;;  %v3201_v41 = vshrl.u32 %v3145_v32, 16  ;;  %v3204_v31 = vshll.u32 %v3145_v32, 16  ;;  %v3152_v47 = vld [vmem:[#allocation2 + $0x34] sm:$0x1] }
 0x248   : > { %10506 = vmatpush3.bf16.msra.mxu0 %v13341_v14  ;;  %10449 = vmatprep.mubr.msk.bf16.mxu1 %vm886_vm3, %v9665_v16  ;;  %v3837_v39 = vrot.slane %v3836_v19, 4  ;;  %v3841_v55 = vrot.slane %v3839_v58, 5  ;;  %v3210_v30 = vshll.u32 %v3146_v48, 16  ;;  %v3215_v38 = vshrl.u32 %v3147_v53, 16  ;;  %v10822_v46 = vld [vmem:[%s13280_s2 + $0x28] sm:$0xff]  }
 0x249   : > { %10507 = vmatprep.subr.bf16.mxu0 %v10825_v2  ;;  %v3193_v36 = vor.u32 %v3192_v63, %v3189_v29  ;;  %v3203_v34 = vrot.slane %v3201_v41, 4  ;;  %v3206_v42 = vrot.slane %v3204_v31, 5  ;;  %v3218_v61 = vshll.u32 %v3147_v53, 16  ;;  %v3154_v23 = vld [vmem:[#allocation2 + $0x3c] sm:$0x1] }
 0x24a   : > { %v3828_v50 = vsel %vm12092_vm7, %v3823_v54, %v3827_v5  ;;  %v3842_v8 = vsel %vm12092_vm7, %v3837_v39, %v3841_v55  ;;  %v3198_v21 = vrot.slane %v3196_v13, 5  ;;  %v3217_v26 = vrot.slane %v3215_v38, 4  ;;  %v3400_v32 = vld [vmem:[#allocation2] sm:$0xe]  ;;  %v3401_v44 = vld [vmem:[#allocation2 + $0x4] sm:$0x1] }
 0x24b   : > { %v9717_v3 = vcombine.low %v3828_v50, %v3842_v8  ;;  %v3194_v27 = vrot.slane %v3193_v36, 4  ;;  %v3207_v25 = vor.u32 %v3206_v42, %v3203_v34  ;;  %v3220_v52 = vrot.slane %v3218_v61, 5  ;;  %v3004_v29 = vld [vmem:[#allocation2 + $0x40] sm:$0xf]  ;;  %v3403_v31 = vld [vmem:[#allocation2 + $0xc] sm:$0x1] }
 0x24c   : > { %10508 = vmatpush3.bf16.msra.mxu0 %v10825_v2  ;;  %v3212_v17 = vrot.slane %v3210_v30, 5  ;;  %v3224_v7 = vshll.u32 %v3148_v35, 16  ;;  %v3229_v20 = vshrl.u32 %v3149_v45, 16  ;;  %v3232_v40 = vshll.u32 %v3149_v45, 16  ;;  %v3755_v55 = vld [vmem:[#allocation2 + $0x38] sm:$0xf] }
 0x24d   : > { %10529 = vmatprep.subr.bf16.mxu0 %v12150_v51  ;;  %10489 = vmatprep.mubr.msk.bf16.mxu0 %vm886_vm3, %v9717_v3  ;;  %v3208_v33 = vrot.slane %v3207_v25, 4  ;;  %v3221_v43 = vor.u32 %v3220_v52, %v3217_v26  ;;  %v3238_v4 = vshll.u32 %v3150_v49, 16  ;;  %v3243_v56 = vshrl.u32 %v3151_v15, 16  ;;  %v3007_v42 = vld [vmem:[#allocation2 + $0x44] sm:$0x1]  ;;  %v12176_v45 = vld [vmem:[%s13280_s2 + $0x30] sm:$0xff]  }
 0x24e   : > { %v3231_v22 = vrot.slane %v3229_v20, 4  ;;  %v3234_v62 = vrot.slane %v3232_v40, 5  ;;  %v3246_v12 = vshll.u32 %v3151_v15, 16  ;;  %v2937_v11 = vpack.c.b16 %v12142_v1, %v12142_v1  ;;  %v3402_v1 = vld [vmem:[#allocation2 + $0x8] sm:$0xe] }
 0x24f   : > { %v3199_v58 = vsel %vm12092_vm7, %v3194_v27, %v3198_v21  ;;  %v3213_v48 = vsel %vm12092_vm7, %v3208_v33, %v3212_v17  ;;  %v3222_v60 = vrot.slane %v3221_v43, 4  ;;  %v3245_v28 = vrot.slane %v3243_v56, 4  ;;  %v3406_v9 = vld [vmem:[#allocation2 + $0x18] sm:$0xe]  ;;  %v3407_v20 = vld [vmem:[#allocation2 + $0x1c] sm:$0x1] }
 0x250   : > { %v9666_v2 = vcombine.low %v3199_v58, %v3213_v48  ;;  %v3235_v18 = vor.u32 %v3234_v62, %v3231_v22  ;;  %v3248_v24 = vrot.slane %v3246_v12, 5  ;;  %v3257_v13 = vshrl.u32 %v3153_v59, 16  ;;  %v3404_v10 = vld [vmem:[#allocation2 + $0x10] sm:$0xe]  ;;  %v3408_v56 = vld [vmem:[#allocation2 + $0x20] sm:$0xe] }
 0x251   : > { %v3226_v53 = vrot.slane %v3224_v7, 5  ;;  %v3240_v16 = vrot.slane %v3238_v4, 5  ;;  %v3252_v54 = vshll.u32 %v3152_v47, 16  ;;  %v3260_v19 = vshll.u32 %v3153_v59, 16  ;;  %v3410_v59 = vld [vmem:[#allocation2 + $0x28] sm:$0xe] }
 0x252   : > { %10450 = vmatmul.mubr.msk.bf16.vlgmr.msra.gmra.mrb[8].mxu1 %vm886_vm3, %v9666_v2  ;;  %v3236_v5 = vrot.slane %v3235_v18, 4  ;;  %v3249_v63 = vor.u32 %v3248_v24, %v3245_v28  ;;  %v3259_v41 = vrot.slane %v3257_v13, 4  ;;  %vm3432_vm8 = vcmask 1042432   ;;  %v3411_v12 = vld [vmem:[#allocation2 + $0x2c] sm:$0x1] }
 0x253   : > { %v3227_v35 = vsel %vm12092_vm7, %v3222_v60, %v3226_v53  ;;  %10458 = vmatpush3.bf16.msra.mxu1 %v12106_v37  ;;  %v3262_v14 = vrot.slane %v3260_v19, 5  ;;  %v3266_v39 = vshll.u32 %v3154_v23, 16  ;;  %vm3433_vm10 = vcmask 1046532   ;;  %v3756_v58 = vld [vmem:[#allocation2 + $0x3c] sm:$0x1] }
 0x254   : > { %v3241_v30 = vsel %vm12092_vm7, %v3236_v5, %v3240_v16  ;;  %10459 = vmatprep.subr.bf16.mxu1 %v10822_v46  ;;  %v9675_v38 = vrot.slane %v3400_v32, 9  ;;  %v3437_v36 = vrot.slane %v3401_v44, 5  ;;  %v9676_v34 = vrot.slane %v3402_v1, 9  ;;  %vm12179_vm2 = vmor %vm3432_vm8, %vm3433_vm10  ;;  %v3409_v23 = vld [vmem:[#allocation2 + $0x24] sm:$0x1] }
 0x255   : > { %v9667_v61 = vcombine.low %v3227_v35, %v3241_v30  ;;  %v3250_v50 = vrot.slane %v3249_v63, 4  ;;  %v3263_v37 = vor.u32 %v3262_v14, %v3259_v41  ;;  %v10211_v21 = vpack.c.bf16 %v12013_v57, %v12013_v57  ;;  %v3415_v30 = vld [vmem:[#allocation2 + $0x3c] sm:$0x1] }
 0x256   : > { %v3254_v49 = vrot.slane %v3252_v54, 5  ;;  %v3441_v26 = vrot.slane %v3403_v31, 5  ;;  %v3005_v15 = vsel %vm11981_vm4, %v2937_v11, %v3004_v29  ;;  %v3844_v3 = vshrl.u32 %v3755_v55, 16  ;;  %v3414_v29 = vld [vmem:[#allocation2 + $0x38] sm:$0xe] }
 0x257   : > { %10453 = vmatprep.mubr.msk.bf16.mxu1 %vm886_vm3, %v9667_v61  ;;  %v3264_v27 = vrot.slane %v3263_v37, 4  ;;  %v3268_v25 = vrot.slane %v3266_v39, 5  ;;  %10460 = vmatpush3.bf16.msra.mxu1 %v10822_v46  ;;  %3006 = vst [vmem:[#allocation2 + $0x40] sm:$0xf] %v3005_v15  ;;  %v3008_v52 = vsel %vm11559_vm12, %v10211_v21, %v3007_v42  ;;  %v3847_v17 = vshll.u32 %v3755_v55, 16  ;;  %v12218_v15 = vld [vmem:[%s13280_s2 + $0x50] sm:$0xff]  }
 0x258   : > { %v3438_v7 = vsel %vm12179_vm2, %v9675_v38, %v3437_v36  ;;  %v3442_v57 = vsel %vm12179_vm2, %v9676_v34, %v3441_v26  ;;  %3009 = vst [vmem:[#allocation2 + $0x44] sm:$0x1] %v3008_v52  ;;  %10469 = vmatprep.subr.bf16.mxu1 %v12176_v45  ;;  %v3255_v40 = vsel %vm12092_vm7, %v3250_v50, %v3254_v49  ;;  %v3846_v43 = vrot.slane %v3844_v3, 4  ;;  %v3405_v46 = vld [vmem:[#allocation2 + $0x14] sm:$0x1]  ;;  %v10829_v38 = vld [vmem:[%s13280_s2 + $0x38] sm:$0xff]  }
 0x259   : > { %v3269_v47 = vsel %vm12092_vm7, %v3264_v27, %v3268_v25  ;;  %v3849_v4 = vrot.slane %v3847_v17, 5  ;;  %v9687_v22 = vcombine.low %v3438_v7, %v3442_v57  ;;  %v9678_v62 = vrot.slane %v3406_v9, 9  ;;  %v3412_v55 = vld [vmem:[#allocation2 + $0x30] sm:$0xe]  ;;  %v3413_v50 = vld [vmem:[#allocation2 + $0x34] sm:$0x1] }
 0x25a   : > { %v9668_v33 = vcombine.low %v3255_v40, %v3269_v47  ;;  %v9680_v11 = vrot.slane %v3410_v59, 9  ;;  %v9677_v48 = vrot.slane %v3404_v10, 9  ;;  %v3449_v60 = vrot.slane %v3407_v20, 5  ;;  %v4602_v57 = vld [vmem:[#allocation2 + $0x18] sm:$0xe] }
 0x25b   : > { %v3850_v32 = vor.u32 %v3849_v4, %v3846_v43  ;;  %v9679_v44 = vrot.slane %v3408_v56, 9  ;;  %v3457_v2 = vrot.slane %v3411_v12, 5  ;;  %v3445_v53 = vrot.slane %v3405_v46, 5  ;;  %v10830_v20 = vld [vmem:[#allocation2 + $0x8] ss:$8 sps:$4 sm:$0xff]  }
 0x25c   : > { %10454 = vmatmul.mubr.msk.bf16.gmra.mrb[12].mxu1 %vm886_vm3, %v9668_v33  ;;  %v3450_v16 = vsel %vm12179_vm2, %v9678_v62, %v3449_v60  ;;  %v3453_v19 = vrot.slane %v3409_v23, 5  ;;  %v3853_v5 = vshll.u32 %v3756_v58, 16  ;;  %v9682_v61 = vrot.slane %v3414_v29, 9  ;;  %v4600_v40 = vld [vmem:[#allocation2 + $0x10] sm:$0xe]  ;;  %v10833_v12 = vld [vmem:[%s13280_s2 + $0x88] sm:$0xff]  }
 0x25d   : > { %10461 = vmatprep.mubr.msk.bf16.mxu1 %vm886_vm3, %v9687_v22  ;;  %v3458_v1 = vsel %vm12179_vm2, %v9680_v11, %v3457_v2  ;;  %v3446_v31 = vsel %vm12179_vm2, %v9677_v48, %v3445_v53  ;;  %v3851_v35 = vrot.slane %v3850_v32, 4  ;;  %v9681_v49 = vrot.slane %v3412_v55, 9  ;;  %v4603_v47 = vld [vmem:[#allocation2 + $0x1c] sm:$0x1]  ;;  %v4601_v10 = vld [vmem:[#allocation2 + $0x14] sm:$0x1] }
 0x25e   : > { %v3757_v28 = vld [vmem:[#allocation2 + $0x40] sm:$0xf]  ;;  %v9688_v14 = vcombine.low %v3446_v31, %v3450_v16  ;;  %v3454_v39 = vsel %vm12179_vm2, %v9679_v44, %v3453_v19  ;;  %v3855_v37 = vrot.slane %v3853_v5, 5  ;;  %v3465_v26 = vrot.slane %v3415_v30, 5  ;;  %v4605_v43 = vld [vmem:[#allocation2 + $0x24] sm:$0x1] }
 0x25f   : > { %v3758_v18 = vld [vmem:[#allocation2 + $0x44] sm:$0x1]  ;;  %v3858_v24 = vshrl.u32 %v3757_v28, 16  ;;  %v3861_v13 = vshll.u32 %v3757_v28, 16  ;;  %v9689_v42 = vcombine.low %v3454_v39, %v3458_v1  ;;  %v3461_v25 = vrot.slane %v3413_v50, 5  ;;  %v12274_v50 = vld [vmem:[%s13280_s2 + $0x70] sm:$0xff]  }
 0x260   : > { %v3867_v54 = vshll.u32 %v3758_v18, 16  ;;  %v3856_v3 = vsel %vm12092_vm7, %v3851_v35, %v3855_v37  ;;  %v3466_v52 = vsel %vm12179_vm2, %v9682_v61, %v3465_v26  ;;  %v9776_v59 = vrot.slane %v4602_v57, 9  ;;  %v4604_v33 = vld [vmem:[#allocation2 + $0x20] sm:$0xe]  ;;  %v12233_v4 = vld [vmem:[#allocation2 + $0x28] sm:$0xe] }
 0x261   : > { %v3860_v63 = vrot.slane %v3858_v24, 4  ;;  %v3863_v41 = vrot.slane %v3861_v13, 5  ;;  %v3462_v7 = vsel %vm12179_vm2, %v9681_v49, %v3461_v25  ;;  %v10827_v56 = vld [vmem:[#allocation2 + $0x20] ss:$8 sps:$4 sm:$0xff]   ;;  %v9775_v22 = vrot.slane %v4600_v40, 9  ;;  %v10838_v13 = vld [vmem:[%s13280_s2 + $0x58] sm:$0xff]  }
 0x262   : > { %v3869_v34 = vrot.slane %v3867_v54, 5  ;;  %v9690_v9 = vcombine.low %v3462_v7, %v3466_v52  ;;  %v4638_v62 = vrot.slane %v4603_v47, 5  ;;  %v4607_v46 = vld [vmem:[#allocation2 + $0x2c] sm:$0x1]  ;;  %v4610_v11 = vld [vmem:[#allocation2 + $0x38] sm:$0xe] }
 0x263   : > { %v3864_v36 = vor.u32 %v3863_v41, %v3860_v63  ;;  %v10828_v58 = vld [vmem:[#allocation2 + $0x30] ss:$8 sps:$4 sm:$0xff]   ;;  %v4634_v48 = vrot.slane %v4601_v10, 5  ;;  %v9777_v60 = vrot.slane %v4604_v33, 9  ;;  %v4642_v44 = vrot.slane %v4605_v43, 5 }
 0x264   : > { %10462 = vmatmul.mubr.msk.bf16.vlgmr.msra.gmra.mrb[16].mxu1 %vm886_vm3, %v9688_v14  ;;  %v12238_v23 = vld [vmem:[#allocation2 + $0x30] sm:$0xe]  ;;  %v12242_v28 = vsel %vm12179_vm2, %v9776_v59, %v4638_v62  ;;  %v10834_v32 = vld [vmem:[#allocation2 + $0x18] ss:$8 sps:$4 sm:$0xff]   ;;  %v9778_v2 = vrot.slane %v12233_v4, 9  ;;  %v4646_v16 = vrot.slane %v4607_v46, 5 }
 0x265   : > { %v3865_v21 = vrot.slane %v3864_v36, 4  ;;  %10465 = vmatprep.mubr.msk.bf16.mxu1 %vm886_vm3, %v9689_v42  ;;  %10470 = vmatpush3.bf16.msra.mxu1 %v12176_v45  ;;  %v10824_v45 = vld [vmem:[#allocation2 + $0x10] ss:$8 sps:$4 sm:$0xff]   ;;  %v12245_v18 = vld [vmem:[#allocation2 + $0x34] sm:$0x1]  ;;  %v9780_v54 = vrot.slane %v4610_v11, 9  ;;  %v4635_v29 = vsel %vm12179_vm2, %v9775_v22, %v4634_v48  ;;  %v12262_v39 = vsel %vm12179_vm2, %v9777_v60, %v4642_v44 }
 0x266   : > { %10471 = vmatprep.subr.bf16.mxu1 %v10829_v38  ;;  %v4611_v24 = vld [vmem:[#allocation2 + $0x3c] sm:$0x1]  ;;  %v10835_v53 = vld [vmem:[#allocation2 + $0x28] ss:$8 sps:$4 sm:$0xff]   ;;  %v4002_v5 = vld [vmem:[#allocation2 + $0xc] sm:$0x1]  ;;  %v9787_v14 = vcombine.low %v4635_v29, %v12242_v28 }
 0x267   : > { %v3870_v27 = vsel %vm12092_vm7, %v3865_v21, %v3869_v34  ;;  %v4001_v19 = vld [vmem:[#allocation2 + $0x8] sm:$0xe]  ;;  %v4003_v1 = vld [vmem:[#allocation2 + $0x10] sm:$0xe]  ;;  %v4004_v63 = vld [vmem:[#allocation2 + $0x14] sm:$0x1] }
 0x268   : > { %v9718_v17 = vcombine.low %v3856_v3, %v3870_v27  ;;  %v12253_v41 = vld [vmem:[#allocation2 + $0x48] sm:$0xe]  ;;  %v12255_v31 = vld [vmem:[#allocation2 + $0x4c] sm:$0x1]  ;;  %v4344_v35 = vld [vmem:[#allocation2 + $0x18] sm:$0xf] }
 0x269   : > { %10472 = vmatpush3.bf16.msra.mxu1 %v10829_v38  ;;  %v12264_v55 = vld [vmem:[#allocation2 + $0x40] sm:$0xe]  ;;  %v12266_v30 = vld [vmem:[#allocation2 + $0x44] sm:$0x1]  ;;  %v9779_v34 = vrot.slane %v12238_v23, 9  ;;  %v4650_v42 = vrot.slane %v12245_v18, 5 }
 0x26a   : > { %10490 = vmatmul.mubr.msk.bf16.gmra.mrb[36].mxu0 %vm886_vm3, %v9718_v17  ;;  %10493 = vmatprep.subr.bf16.mxu1 %v12218_v15  ;;  %v4007_v38 = vld [vmem:[#allocation2 + $0x20] sm:$0xe]  ;;  %v4008_v36 = vld [vmem:[#allocation2 + $0x24] sm:$0x1]  ;;  %v9726_v61 = vrot.slane %v4003_v1, 9  ;;  %v4654_v37 = vrot.slane %v4611_v24, 5 }
 0x26b   : > { %10509 = vmatprep.mubr.msk.bf16.mxu0 %vm886_vm3, %v10824_v45  ;;  %v4035_v21 = vrot.slane %v4002_v5, 5  ;;  %v4005_v49 = vld [vmem:[#allocation2 + $0x18] sm:$0xe]  ;;  %v4006_v26 = vld [vmem:[#allocation2 + $0x1c] sm:$0x1]  ;;  %v4373_v3 = vshrl.u32 %v4344_v35, 16 }
 0x26c   : > { %10466 = vmatmul.mubr.msk.bf16.gmra.mrb[20].mxu1 %vm886_vm3, %v9690_v9  ;;  %v4376_v27 = vshll.u32 %v4344_v35, 16  ;;  %v10831_v25 = vld [vmem:[#allocation2 + $0x40] ss:$8 sps:$4 sm:$0xff]   ;;  %v4039_v52 = vrot.slane %v4004_v63, 5  ;;  %v9781_v17 = vrot.slane %v12264_v55, 9  ;;  %v4658_v45 = vrot.slane %v12266_v30, 5 }
 0x26d   : > { %10473 = vmatprep.mubr.msk.bf16.mxu1 %vm886_vm3, %v10830_v20  ;;  %v9728_v7 = vrot.slane %v4007_v38, 9  ;;  %v4342_v57 = vld [vmem:[#allocation2 + $0x10] sm:$0xf]  ;;  %v12282_v9 = vsel %vm12179_vm2, %v9778_v2, %v4646_v16  ;;  %v9782_v20 = vrot.slane %v12253_v41, 9  ;;  %v4662_v40 = vrot.slane %v12255_v31, 5 }
 0x26e   : > { %v4009_v47 = vld [vmem:[#allocation2 + $0x28] sm:$0xe]  ;;  %v4010_v10 = vld [vmem:[#allocation2 + $0x2c] sm:$0x1]  ;;  %v4040_v33 = vsel %vm12179_vm2, %v9726_v61, %v4039_v52  ;;  %v9727_v43 = vrot.slane %v4005_v49, 9  ;;  %v4047_v4 = vrot.slane %v4008_v36, 5  ;;  %v9788_v16 = vcombine.low %v12262_v39, %v12282_v9 }
 0x26f   : > { %v4012_v22 = vld [vmem:[#allocation2 + $0x34] sm:$0x1]  ;;  %v4359_v62 = vshrl.u32 %v4342_v57, 16  ;;  %v4375_v46 = vrot.slane %v4373_v3, 4  ;;  %v4378_v11 = vrot.slane %v4376_v27, 5  ;;  %v4043_v48 = vrot.slane %v4006_v26, 5 }
 0x270   : > { %v4048_v60 = vsel %vm12179_vm2, %v9728_v7, %v4047_v4  ;;  %v9729_v23 = vrot.slane %v4009_v47, 9  ;;  %v4051_v28 = vrot.slane %v4010_v10, 5  ;;  %v4055_v18 = vrot.slane %v4012_v22, 5  ;;  %v4013_v24 = vld [vmem:[#allocation2 + $0x38] sm:$0xe] }
 0x271   : > { %v4014_v1 = vld [vmem:[#allocation2 + $0x3c] sm:$0x1]  ;;  %v4015_v29 = vld [vmem:[#allocation2 + $0x40] sm:$0xe]  ;;  %v4016_v5 = vld [vmem:[#allocation2 + $0x44] sm:$0x1]  ;;  %v4379_v36 = vor.u32 %v4378_v11, %v4375_v46  ;;  %v4659_v22 = vsel %vm12179_vm2, %v9781_v17, %v4658_v45 }
 0x272   : > { %10510 = vmatmul.mubr.msk.bf16.vlgmr.msra.gmra.mrb[40].mxu0 %vm886_vm3, %v10827_v56  ;;  %v4011_v56 = vld [vmem:[#allocation2 + $0x30] sm:$0xe]  ;;  %v4343_v35 = vld [vmem:[#allocation2 + $0x14] sm:$0x1]  ;;  %v4052_v39 = vsel %vm12179_vm2, %v9729_v23, %v4051_v28  ;;  %v4059_v49 = vrot.slane %v4014_v1, 5  ;;  %v9732_v26 = vrot.slane %v4015_v29, 9 }
 0x273   : > { %10513 = vmatprep.mubr.msk.bf16.mxu0 %vm886_vm3, %v10828_v58  ;;  %10530 = vmatpush3.bf16.msra.mxu0 %v12150_v51  ;;  %v9725_v51 = vrot.slane %v4001_v19, 9  ;;  %v10837_v58 = vld [vmem:[#allocation2 + $0x38] ss:$8 sps:$4 sm:$0xff]   ;;  %v9730_v2 = vrot.slane %v4011_v56, 9  ;;  %v4044_v19 = vsel %vm12179_vm2, %v9727_v43, %v4043_v48  ;;  %v4063_v3 = vrot.slane %v4016_v5, 5 }
 0x274   : > { %10531 = vmatprep.subr.bf16.mxu0 %v10833_v12  ;;  %10474 = vmatmul.mubr.msk.bf16.vlgmr.msra.gmra.mrb[24].mxu1 %vm886_vm3, %v10834_v32  ;;  %v4651_v32 = vsel %vm12179_vm2, %v9779_v34, %v4650_v42  ;;  %v9738_v63 = vcombine.low %v4044_v19, %v4048_v60  ;;  %v4352_v34 = vld [vmem:[#allocation2 + $0x38] sm:$0xf]  ;;  %v9731_v42 = vrot.slane %v4013_v24, 9  ;;  %v4350_v27 = vld [vmem:[#allocation2 + $0x30] sm:$0xf]  ;;  %vm4795_vm12 = vcmask 256000  }
 0x275   : > { %10477 = vmatprep.mubr.msk.bf16.mxu1 %vm886_vm3, %v10835_v53  ;;  %10494 = vmatpush3.bf16.msra.mxu1 %v12218_v15  ;;  %v12286_v15 = vsel %vm12179_vm2, %v9780_v54, %v4654_v37  ;;  %v4036_v59 = vsel %vm12179_vm2, %v9725_v51, %v4035_v21  ;;  %v4348_v53 = vld [vmem:[#allocation2 + $0x28] sm:$0xf]  ;;  %v4346_v51 = vld [vmem:[#allocation2 + $0x20] sm:$0xf]  ;;  %v4056_v21 = vsel %vm12179_vm2, %v9730_v2, %v4055_v18  ;;  %v4429_v7 = vshrl.u32 %v4352_v34, 16 }
 0x276   : > { %10495 = vmatprep.subr.bf16.mxu1 %v10838_v13  ;;  %v9737_v44 = vcombine.low %v4036_v59, %v4040_v33  ;;  %v9789_v54 = vcombine.low %v4651_v32, %v12286_v15  ;;  %v4401_v61 = vshrl.u32 %v4348_v53, 16  ;;  %v4404_v37 = vshll.u32 %v4348_v53, 16  ;;  %v10840_v59 = vld [vmem:[%s13280_s2 + $0x78] sm:$0xff]   ;;  %v4356_v11 = vld [vmem:[#allocation2 + $0x48] sm:$0xf] }
 0x277   : > { %10532 = vmatpush3.bf16.msra.mxu0 %v10833_v12  ;;  %v4362_v12 = vshll.u32 %v4342_v57, 16  ;;  %v4432_v57 = vshll.u32 %v4352_v34, 16  ;;  %v4380_v15 = vrot.slane %v4379_v36, 4  ;;  %v4387_v47 = vshrl.u32 %v4346_v51, 16  ;;  %v4354_v45 = vld [vmem:[#allocation2 + $0x40] sm:$0xf] }
 0x278   : > { %v4390_v10 = vshll.u32 %v4346_v51, 16  ;;  %v4403_v33 = vrot.slane %v4401_v61, 4  ;;  %v4406_v43 = vrot.slane %v4404_v37, 5  ;;  %v4415_v4 = vshrl.u32 %v4350_v27, 16  ;;  %v4347_v60 = vld [vmem:[#allocation2 + $0x24] sm:$0x1] }
 0x279   : > { %10496 = vmatpush3.bf16.msra.mxu1 %v10838_v13  ;;  %v4345_v13 = vld [vmem:[#allocation2 + $0x1c] sm:$0x1]  ;;  %v4364_v38 = vrot.slane %v4362_v12, 5  ;;  %v4418_v56 = vshll.u32 %v4350_v27, 16  ;;  %v9739_v12 = vcombine.low %v4052_v39, %v4056_v21  ;;  %v4060_v46 = vsel %vm12179_vm2, %v9731_v42, %v4059_v49  ;;  %v4349_v23 = vld [vmem:[#allocation2 + $0x2c] sm:$0x1] }
 0x27a   : > { %10514 = vmatmul.mubr.msk.bf16.gmra.mrb[44].mxu0 %vm886_vm3, %v10831_v25  ;;  %10517 = vmatprep.subr.bf16.mxu1 %v12274_v50  ;;  %v4368_v25 = vshll.u32 %v4343_v35, 16  ;;  %v4382_v52 = vshll.u32 %v4345_v13, 16  ;;  %v4064_v55 = vsel %vm12179_vm2, %v9732_v26, %v4063_v3  ;;  %v4434_v17 = vrot.slane %v4432_v57, 5  ;;  %v4351_v5 = vld [vmem:[#allocation2 + $0x34] sm:$0x1] }
 0x27b   : > { %10533 = vmatprep.mubr.msk.bf16.mxu0 %vm886_vm3, %v9787_v14  ;;  %v4361_v14 = vrot.slane %v4359_v62, 4  ;;  %v4663_v62 = vsel %vm12179_vm2, %v9782_v20, %v4662_v40  ;;  %v4389_v20 = vrot.slane %v4387_v47, 4  ;;  %v4392_v40 = vrot.slane %v4390_v10, 5  ;;  %v4355_v36 = vld [vmem:[#allocation2 + $0x44] sm:$0x1] }
 0x27c   : > { %10478 = vmatmul.mubr.msk.bf16.gmra.mrb[28].mxu1 %vm886_vm3, %v10837_v58  ;;  %v4384_v30 = vrot.slane %v4382_v52, 5  ;;  %v4431_v58 = vrot.slane %v4429_v7, 4  ;;  %v4370_v31 = vrot.slane %v4368_v25, 5  ;;  %v4407_v8 = vor.u32 %v4406_v43, %v4403_v33  ;;  %v4357_v21 = vld [vmem:[#allocation2 + $0x4c] sm:$0x1] }
 0x27d   : > { %10497 = vmatprep.mubr.msk.bf16.mxu1 %vm886_vm3, %v9737_v44  ;;  %v4365_v9 = vor.u32 %v4364_v38, %v4361_v14  ;;  %v4417_v28 = vrot.slane %v4415_v4, 4  ;;  %v4420_v32 = vrot.slane %v4418_v56, 5  ;;  %v4353_v44 = vld [vmem:[#allocation2 + $0x3c] sm:$0x1]  ;;  %v4443_v2 = vshrl.u32 %v4354_v45, 16 }
 0x27e   : > { %v4385_v48 = vsel %vm12092_vm7, %v4380_v15, %v4384_v30  ;;  %v4446_v18 = vshll.u32 %v4354_v45, 16  ;;  %v4457_v24 = vshrl.u32 %v4356_v11, 16  ;;  %v4460_v13 = vshll.u32 %v4356_v11, 16 }
 0x27f   : > { %v4366_v41 = vrot.slane %v4365_v9, 4  ;;  %v9790_v53 = vcombine.low %v4659_v22, %v4663_v62  ;;  %v4393_v19 = vor.u32 %v4392_v40, %v4389_v20  ;;  %v4396_v1 = vshll.u32 %v4347_v60, 16 }
 0x280   : > { %v4410_v29 = vshll.u32 %v4349_v23, 16  ;;  %v4408_v35 = vrot.slane %v4407_v8, 4  ;;  %v4421_v14 = vor.u32 %v4420_v32, %v4417_v28  ;;  %v4438_v38 = vshll.u32 %v4353_v44, 16 }
 0x281   : > { %v4445_v34 = vrot.slane %v4443_v2, 4  ;;  %v4448_v39 = vrot.slane %v4446_v18, 5  ;;  %v4459_v42 = vrot.slane %v4457_v24, 4  ;;  %v4462_v51 = vrot.slane %v4460_v13, 5 }
 0x282   : > { %10534 = vmatmul.mubr.msk.bf16.vlgmr.msra.gmra.mrb[48].mxu0 %vm886_vm3, %v9788_v16  ;;  %v4435_v16 = vor.u32 %v4434_v17, %v4431_v58  ;;  %v4424_v61 = vshll.u32 %v4351_v5, 16  ;;  %v4394_v49 = vrot.slane %v4393_v19, 4  ;;  %v4412_v26 = vrot.slane %v4410_v29, 5 }
 0x283   : > { %10537 = vmatprep.mubr.msk.bf16.mxu0 %vm886_vm3, %v9789_v54  ;;  %v4371_v54 = vsel %vm12092_vm7, %v4366_v41, %v4370_v31  ;;  %v4398_v3 = vrot.slane %v4396_v1, 5  ;;  %v4422_v27 = vrot.slane %v4421_v14, 4  ;;  %v4440_v25 = vrot.slane %v4438_v38, 5 }
 0x284   : > { %10498 = vmatmul.mubr.msk.bf16.vlgmr.msra.gmra.mrb[32].mxu1 %vm886_vm3, %v9738_v63  ;;  %v9765_v63 = vcombine.low %v4371_v54, %v4385_v48  ;;  %v4436_v37 = vrot.slane %v4435_v16, 4  ;;  %v4452_v52 = vshll.u32 %v4355_v36, 16  ;;  %v4413_v7 = vsel %vm12092_vm7, %v4408_v35, %v4412_v26 }
 0x285   : > { %10501 = vmatprep.mubr.msk.bf16.mxu1 %vm886_vm3, %v9739_v12  ;;  %10518 = vmatpush3.bf16.msra.mxu1 %v12274_v50  ;;  %v9740_v50 = vcombine.low %v4060_v46, %v4064_v55  ;;  %v4449_v57 = vor.u32 %v4448_v39, %v4445_v34  ;;  %v4463_v9 = vor.u32 %v4462_v51, %v4459_v42  ;;  %v4466_v15 = vshll.u32 %v4357_v21, 16 }
 0x286   : > { %10519 = vmatprep.subr.bf16.mxu1 %v10840_v59  ;;  %v4426_v47 = vrot.slane %v4424_v61, 5  ;;  %v4441_v10 = vsel %vm12092_vm7, %v4436_v37, %v4440_v25  ;;  %v4454_v4 = vrot.slane %v4452_v52, 5  ;;  %vm11049_vm13 = vmmov 0  }
 0x287   : > { %v4450_v22 = vrot.slane %v4449_v57, 4  ;;  %v4464_v62 = vrot.slane %v4463_v9, 4  ;;  %v4468_v12 = vrot.slane %v4466_v15, 5 }
 0x288   : > { %v4427_v43 = vsel %vm12092_vm7, %v4422_v27, %v4426_v47 }
 0x289   : > { %10520 = vmatpush3.bf16.msra.mxu1 %v10840_v59  ;;  %v4399_v59 = vsel %vm12092_vm7, %v4394_v49, %v4398_v3  ;;  %v9767_v56 = vcombine.low %v4427_v43, %v4441_v10  ;;  %v4455_v46 = vsel %vm12092_vm7, %v4450_v22, %v4454_v4  ;;  %v4469_v11 = vsel %vm12092_vm7, %v4464_v62, %v4468_v12 }
 0x28a   : > { %10538 = vmatmul.mubr.msk.bf16.gmra.mrb[52].mxu0 %vm886_vm3, %v9790_v53  ;;  %v9766_v33 = vcombine.low %v4399_v59, %v4413_v7  ;;  %v9768_v55 = vcombine.low %v4455_v46, %v4469_v11 }
 0x28c   : > { %10502 = vmatmul.mubr.msk.bf16.gmra.mrb[36].mxu1 %vm886_vm3, %v9740_v50 }
 0x28d   : > { %10521 = vmatprep.mubr.msk.bf16.mxu1 %vm886_vm3, %v9765_v63 }
 0x294   : > { %10522 = vmatmul.mubr.msk.bf16.vlgmr.msra.gmra.mrb[40].mxu1 %vm886_vm3, %v9766_v33 }
 0x295   : > { %10525 = vmatprep.mubr.msk.bf16.mxu1 %vm886_vm3, %v9767_v56 }
 0x29c   : > { %10526 = vmatmul.mubr.msk.bf16.gmra.mrb[44].mxu1 %vm886_vm3, %v9768_v55 }
 0x308   : > { %v10439_v30 = vpop.f32.mrb[0].mxu1 }
 0x309   : > { %3133 = vst.msk [vmem:[#allocation4 + $0x10] sm:$0xff] %vm886_vm3, %v10439_v30  ;;  %v3100_v58 = vpop.f32.mrb[1].mxu1 }
 0x30a   : > { %3131 = vst.msk [vmem:[#allocation4] sm:$0xff] %vm886_vm3, %v3100_v58  ;;  %v10440_v17 = vpop.f32.mrb[2].mxu1 }
 0x30b   : > { %3134 = vst.msk [vmem:[#allocation4 + $0x18] sm:$0xff] %vm886_vm3, %v10440_v17  ;;  %v3103_v45 = vpop.f32.mrb[3].mxu1 }
 0x30c   : > { %3132 = vst.msk [vmem:[#allocation4 + $0x8] sm:$0xff] %vm886_vm3, %v3103_v45 }
 0x310   : > { %v3378_v28 = vld [vmem:[#allocation4 + $0x10] sm:$0xff] }
 0x311   : > { %v3376_v2 = vld [vmem:[#allocation4] sm:$0xff] }
 0x312   : > { %v3379_v13 = vld [vmem:[#allocation4 + $0x18] sm:$0xff] }
 0x313   : > { %v10443_v41 = vpop.f32.mrb[4].mxu1  ;;  %v3377_v16 = vld [vmem:[#allocation4 + $0x8] sm:$0xff] }
 0x314   : > { %3137 = vst.msk [vmem:[#allocation4 + $0x30] sm:$0xff] %vm886_vm3, %v10443_v41  ;;  %v3116_v6 = vpop.f32.mrb[5].mxu1 }
 0x315   : > { %3135 = vst.msk [vmem:[#allocation4 + $0x20] sm:$0xff] %vm886_vm3, %v3116_v6  ;;  %v10444_v31 = vpop.f32.mrb[6].mxu1 }
 0x316   : > { %3138 = vst.msk [vmem:[#allocation4 + $0x38] sm:$0xff] %vm886_vm3, %v10444_v31  ;;  %v3119_v20 = vpop.f32.mrb[7].mxu1 }
 0x317   : > { %3136 = vst.msk [vmem:[#allocation4 + $0x28] sm:$0xff] %vm886_vm3, %v3119_v20 }
 0x31a   : > { %v12366_v40 = vpop.f32.mrb[32].mxu0 }
 0x31b   : > { %v12368_v48 = vpop.f32.mrb[33].mxu0  ;;  %v3382_v1 = vld [vmem:[#allocation4 + $0x30] sm:$0xff] }
 0x31c   : > { %v12370_v60 = vpop.f32.mrb[34].mxu0  ;;  %v3380_v63 = vld [vmem:[#allocation4 + $0x20] sm:$0xff] }
 0x31d   : > { %v12372_v23 = vpop.f32.mrb[35].mxu0  ;;  %v3383_v38 = vld [vmem:[#allocation4 + $0x38] sm:$0xff] }
 0x31e   : > { %v3381_v39 = vld [vmem:[#allocation4 + $0x28] sm:$0xff] }
 0x325   : > { %v10451_v8 = vpop.f32.mrb[8].mxu1 }
 0x326   : > { %v3386_v32 = vadd.f32 %v10451_v8, %v3378_v28  ;;  %v3345_v44 = vpop.f32.mrb[9].mxu1 }
 0x327   : > { %v3384_v18 = vadd.f32 %v3376_v2, %v3345_v44  ;;  %v10452_v24 = vpop.f32.mrb[10].mxu1 }
 0x328   : > { %3394 = vst.msk [vmem:[#allocation4 + $0x10] sm:$0xff] %vm886_vm3, %v3386_v32  ;;  %v3387_v53 = vadd.f32 %v10452_v24, %v3379_v13  ;;  %v3348_v50 = vpop.f32.mrb[11].mxu1 }
 0x329   : > { %3392 = vst.msk [vmem:[#allocation4] sm:$0xff] %vm886_vm3, %v3384_v18  ;;  %v3385_v54 = vadd.f32 %v3377_v16, %v3348_v50 }
 0x32a   : > { %3395 = vst.msk [vmem:[#allocation4 + $0x18] sm:$0xff] %vm886_vm3, %v3387_v53 }
 0x32b   : > { %3393 = vst.msk [vmem:[#allocation4 + $0x8] sm:$0xff] %vm886_vm3, %v3385_v54 }
 0x32f   : > { %v10455_v19 = vpop.f32.mrb[12].mxu1  ;;  %v3575_v61 = vld [vmem:[#allocation4 + $0x10] sm:$0xff] }
 0x330   : > { %v3390_v29 = vadd.f32 %v10455_v19, %v3382_v1  ;;  %v3361_v5 = vpop.f32.mrb[13].mxu1  ;;  %v3573_v49 = vld [vmem:[#allocation4] sm:$0xff] }
 0x331   : > { %v3388_v35 = vadd.f32 %v3380_v63, %v3361_v5  ;;  %v10456_v14 = vpop.f32.mrb[14].mxu1  ;;  %v3576_v27 = vld [vmem:[#allocation4 + $0x18] sm:$0xff] }
 0x332   : > { %3398 = vst.msk [vmem:[#allocation4 + $0x30] sm:$0xff] %vm886_vm3, %v3390_v29  ;;  %v3391_v36 = vadd.f32 %v10456_v14, %v3383_v38  ;;  %v3364_v34 = vpop.f32.mrb[15].mxu1  ;;  %v3574_v7 = vld [vmem:[#allocation4 + $0x8] sm:$0xff] }
 0x333   : > { %3396 = vst.msk [vmem:[#allocation4 + $0x20] sm:$0xff] %vm886_vm3, %v3388_v35  ;;  %v3389_v42 = vadd.f32 %v3381_v39, %v3364_v34 }
 0x334   : > { %3399 = vst.msk [vmem:[#allocation4 + $0x38] sm:$0xff] %vm886_vm3, %v3391_v36 }
 0x335   : > { %3397 = vst.msk [vmem:[#allocation4 + $0x28] sm:$0xff] %vm886_vm3, %v3389_v42 }
 0x337   : > { %v10463_v51 = vpop.f32.mrb[16].mxu1 }
 0x338   : > { %v3583_v37 = vadd.f32 %v10463_v51, %v3575_v61  ;;  %v3542_v21 = vpop.f32.mrb[17].mxu1 }
 0x339   : > { %v3581_v26 = vadd.f32 %v3573_v49, %v3542_v21  ;;  %v10464_v3 = vpop.f32.mrb[18].mxu1  ;;  %v3579_v59 = vld [vmem:[#allocation4 + $0x30] sm:$0xff] }
 0x33a   : > { %3591 = vst.msk [vmem:[#allocation4 + $0x10] sm:$0xff] %vm886_vm3, %v3583_v37  ;;  %v3584_v25 = vadd.f32 %v10464_v3, %v3576_v27  ;;  %v3545_v52 = vpop.f32.mrb[19].mxu1  ;;  %v3577_v56 = vld [vmem:[#allocation4 + $0x20] sm:$0xff] }
 0x33b   : > { %3589 = vst.msk [vmem:[#allocation4] sm:$0xff] %vm886_vm3, %v3581_v26  ;;  %v3582_v57 = vadd.f32 %v3574_v7, %v3545_v52  ;;  %v3580_v12 = vld [vmem:[#allocation4 + $0x38] sm:$0xff] }
 0x33c   : > { %3592 = vst.msk [vmem:[#allocation4 + $0x18] sm:$0xff] %vm886_vm3, %v3584_v25  ;;  %v3578_v55 = vld [vmem:[#allocation4 + $0x28] sm:$0xff] }
 0x33d   : > { %v12385_v9 = vpop.f32.mrb[36].mxu0  ;;  %3590 = vst.msk [vmem:[#allocation4 + $0x8] sm:$0xff] %vm886_vm3, %v3582_v57 }
 0x33e   : > { %v12388_v15 = vpop.f32.mrb[37].mxu0 }
 0x33f   : > { %v12390_v47 = vpop.f32.mrb[38].mxu0  ;;  %v10467_v10 = vpop.f32.mrb[20].mxu1 }
 0x340   : > { %v12392_v33 = vpop.f32.mrb[39].mxu0  ;;  %v3587_v43 = vadd.f32 %v10467_v10, %v3579_v59  ;;  %v3558_v4 = vpop.f32.mrb[21].mxu1 }
 0x341   : > { %v3585_v22 = vadd.f32 %v3577_v56, %v3558_v4  ;;  %v10468_v62 = vpop.f32.mrb[22].mxu1  ;;  %v3721_v6 = vld [vmem:[#allocation4 + $0x10] sm:$0xff] }
 0x342   : > { %3595 = vst.msk [vmem:[#allocation4 + $0x30] sm:$0xff] %vm886_vm3, %v3587_v43  ;;  %v3588_v46 = vadd.f32 %v10468_v62, %v3580_v12  ;;  %v3561_v11 = vpop.f32.mrb[23].mxu1  ;;  %v3719_v28 = vld [vmem:[#allocation4] sm:$0xff] }
 0x343   : > { %3593 = vst.msk [vmem:[#allocation4 + $0x20] sm:$0xff] %vm886_vm3, %v3585_v22  ;;  %v3586_v30 = vadd.f32 %v3578_v55, %v3561_v11  ;;  %v3722_v2 = vld [vmem:[#allocation4 + $0x18] sm:$0xff] }
 0x344   : > { %3596 = vst.msk [vmem:[#allocation4 + $0x38] sm:$0xff] %vm886_vm3, %v3588_v46  ;;  %v3720_v13 = vld [vmem:[#allocation4 + $0x8] sm:$0xff]  ;;  %v11048_v46 = vmov 0.0   ;;  %v10843_v11 = vld [vmem:[%s13281_s3 + $0x20] sm:$0xff]  }
 0x345   : > { %v12397_v58 = vpop.f32.mrb[40].mxu0  ;;  %3594 = vst.msk [vmem:[#allocation4 + $0x28] sm:$0xff] %vm886_vm3, %v3586_v30  ;;  %10541 = vmatprep.subr.bf16.mxu1 %v11048_v46  ;;  %10557 = vmatprep.subr.bf16.mxu0 %v11048_v46 }
 0x346   : > { %v12400_v17 = vpop.f32.mrb[41].mxu0  ;;  %10545 = vmatprep.mubr.msk.bf16.mxu1 %vm11049_vm13, %v11048_v46  ;;  %10558 = vmatpush3.bf16.msra.mxu0 %v10843_v11 }
 0x347   : > { %v12402_v45 = vpop.f32.mrb[42].mxu0  ;;  %v10475_v41 = vpop.f32.mrb[24].mxu1  ;;  %10559 = vmatprep.subr.bf16.mxu0 %v11048_v46  ;;  %10561 = vmatprep.mubr.msk.bf16.mxu0 %vm11049_vm13, %v11048_v46 }
 0x348   : > { %v12404_v31 = vpop.f32.mrb[43].mxu0  ;;  %v3729_v20 = vadd.f32 %v10475_v41, %v3721_v6  ;;  %v3688_v8 = vpop.f32.mrb[25].mxu1  ;;  %v13344_v6 = vmov 0  }
 0x349   : > { %v3727_v32 = vadd.f32 %v3719_v28, %v3688_v8  ;;  %v10476_v44 = vpop.f32.mrb[26].mxu1  ;;  %v3725_v1 = vld [vmem:[#allocation4 + $0x30] sm:$0xff]  ;;  %4796 = vst.msk [vmem:[#allocation3] sm:$0x7] %vm4795_vm12, %v13344_v6  ;;  %4797 = vst.msk [vmem:[#allocation3 + $0x4] sm:$0x7] %vm4795_vm12, %v13344_v6 }
 0x34a   : > { %3737 = vst.msk [vmem:[#allocation4 + $0x10] sm:$0xff] %vm886_vm3, %v3729_v20  ;;  %v3730_v18 = vadd.f32 %v10476_v44, %v3722_v2  ;;  %v3691_v24 = vpop.f32.mrb[27].mxu1  ;;  %v3723_v35 = vld [vmem:[#allocation4 + $0x20] sm:$0xff] }
 0x34b   : > { %3735 = vst.msk [vmem:[#allocation4] sm:$0xff] %vm886_vm3, %v3727_v32  ;;  %v3728_v53 = vadd.f32 %v3720_v13, %v3691_v24  ;;  %v3726_v36 = vld [vmem:[#allocation4 + $0x38] sm:$0xff] }
 0x34c   : > { %3738 = vst.msk [vmem:[#allocation4 + $0x18] sm:$0xff] %vm886_vm3, %v3730_v18  ;;  %v3724_v51 = vld [vmem:[#allocation4 + $0x28] sm:$0xff] }
 0x34d   : > { %v12409_v50 = vpop.f32.mrb[44].mxu0  ;;  %3736 = vst.msk [vmem:[#allocation4 + $0x8] sm:$0xff] %vm886_vm3, %v3728_v53 }
 0x34e   : > { %v12412_v16 = vpop.f32.mrb[45].mxu0  ;;  %4798 = vst.msk [vmem:[#allocation3 + $0x8] sm:$0x7] %vm4795_vm12, %v13344_v6  ;;  %4799 = vst.msk [vmem:[#allocation3 + $0xc] sm:$0x7] %vm4795_vm12, %v13344_v6 }
 0x34f   : > { %v12414_v54 = vpop.f32.mrb[46].mxu0  ;;  %v10479_v19 = vpop.f32.mrb[28].mxu1  ;;  %4800 = vst.msk [vmem:[#allocation3 + $0x10] sm:$0x7] %vm4795_vm12, %v13344_v6  ;;  %4801 = vst.msk [vmem:[#allocation3 + $0x14] sm:$0x7] %vm4795_vm12, %v13344_v6 }
 0x350   : > { %v12416_v29 = vpop.f32.mrb[47].mxu0  ;;  %v3733_v5 = vadd.f32 %v10479_v19, %v3725_v1  ;;  %v3704_v63 = vpop.f32.mrb[29].mxu1 }
 0x351   : > { %v3731_v14 = vadd.f32 %v3723_v35, %v3704_v63  ;;  %v10480_v38 = vpop.f32.mrb[30].mxu1  ;;  %v3979_v34 = vld [vmem:[#allocation4 + $0x10] sm:$0xff] }
 0x352   : > { %3741 = vst.msk [vmem:[#allocation4 + $0x30] sm:$0xff] %vm886_vm3, %v3733_v5  ;;  %v3734_v39 = vadd.f32 %v10480_v38, %v3726_v36  ;;  %v3707_v42 = vpop.f32.mrb[31].mxu1  ;;  %v3987_v61 = vadd.f32 %v12366_v40, %v3979_v34  ;;  %v3977_v37 = vld [vmem:[#allocation4] sm:$0xff] }
 0x353   : > { %3739 = vst.msk [vmem:[#allocation4 + $0x20] sm:$0xff] %vm886_vm3, %v3731_v14  ;;  %v3732_v21 = vadd.f32 %v3724_v51, %v3707_v42  ;;  %v3985_v49 = vadd.f32 %v3977_v37, %v12368_v48  ;;  %v3980_v26 = vld [vmem:[#allocation4 + $0x18] sm:$0xff] }
 0x354   : > { %3742 = vst.msk [vmem:[#allocation4 + $0x38] sm:$0xff] %vm886_vm3, %v3734_v39  ;;  %3995 = vst.msk [vmem:[#allocation4 + $0x10] sm:$0xff] %vm886_vm3, %v3987_v61  ;;  %v3988_v3 = vadd.f32 %v12370_v60, %v3980_v26  ;;  %v3978_v27 = vld [vmem:[#allocation4 + $0x8] sm:$0xff] }
 0x355   : > { %v12425_v25 = vpop.f32.mrb[48].mxu0  ;;  %3740 = vst.msk [vmem:[#allocation4 + $0x28] sm:$0xff] %vm886_vm3, %v3732_v21  ;;  %3993 = vst.msk [vmem:[#allocation4] sm:$0xff] %vm886_vm3, %v3985_v49  ;;  %v3986_v40 = vadd.f32 %v3978_v27, %v12372_v23  ;;  %v10841_v23 = vld [vmem:[%s13281_s3] sm:$0xff]  }
 0x356   : > { %v12430_v52 = vpop.f32.mrb[49].mxu0  ;;  %3996 = vst.msk [vmem:[#allocation4 + $0x18] sm:$0xff] %vm886_vm3, %v3988_v3  ;;  %10542 = vmatpush3.bf16.msra.mxu1 %v10841_v23 }
 0x357   : > { %v12433_v48 = vpop.f32.mrb[50].mxu0  ;;  %v10499_v7 = vpop.f32.mrb[32].mxu1  ;;  %3994 = vst.msk [vmem:[#allocation4 + $0x8] sm:$0xff] %vm886_vm3, %v3986_v40  ;;  %10543 = vmatprep.subr.bf16.mxu1 %v11048_v46 }
 0x358   : > { %v12436_v57 = vpop.f32.mrb[51].mxu0  ;;  %v4140_v60 = vpop.f32.mrb[33].mxu1 }
 0x359   : > { %v10500_v10 = vpop.f32.mrb[34].mxu1  ;;  %v3983_v59 = vld [vmem:[#allocation4 + $0x30] sm:$0xff] }
 0x35a   : > { %v4143_v43 = vpop.f32.mrb[35].mxu1  ;;  %v3991_v4 = vadd.f32 %v12385_v9, %v3983_v59  ;;  %v3981_v56 = vld [vmem:[#allocation4 + $0x20] sm:$0xff] }
 0x35b   : > { %v4173_v22 = vld [vmem:[#allocation4 + $0x10] sm:$0xff]  ;;  %v3989_v62 = vadd.f32 %v3981_v56, %v12388_v15  ;;  %v3984_v12 = vld [vmem:[#allocation4 + $0x38] sm:$0xff]  ;;  %v10842_v15 = vld [vmem:[%s13281_s3 + $0x8] sm:$0xff]  }
 0x35c   : > { %v4181_v9 = vadd.f32 %v10499_v7, %v4173_v22  ;;  %v4171_v55 = vld [vmem:[#allocation4] sm:$0xff]  ;;  %3999 = vst.msk [vmem:[#allocation4 + $0x30] sm:$0xff] %vm886_vm3, %v3991_v4  ;;  %v3992_v30 = vadd.f32 %v12390_v47, %v3984_v12  ;;  %v3982_v41 = vld [vmem:[#allocation4 + $0x28] sm:$0xff]  ;;  %10544 = vmatpush3.bf16.msra.mxu1 %v10842_v15 }
 0x35d   : > { %v12467_v47 = vpop.f32.mrb[52].mxu0  ;;  %v4179_v20 = vadd.f32 %v4171_v55, %v4140_v60  ;;  %v4174_v8 = vld [vmem:[#allocation4 + $0x18] sm:$0xff]  ;;  %3997 = vst.msk [vmem:[#allocation4 + $0x20] sm:$0xff] %vm886_vm3, %v3989_v62  ;;  %v3990_v28 = vadd.f32 %v3982_v41, %v12392_v33  ;;  %10549 = vmatprep.subr.bf16.mxu1 %v11048_v46 }
 0x35e   : > { %v12472_v32 = vpop.f32.mrb[53].mxu0  ;;  %4189 = vst.msk [vmem:[#allocation4 + $0x10] sm:$0xff] %vm886_vm3, %v4181_v9  ;;  %v4182_v44 = vadd.f32 %v10500_v10, %v4174_v8  ;;  %v4172_v2 = vld [vmem:[#allocation4 + $0x8] sm:$0xff]  ;;  %4000 = vst.msk [vmem:[#allocation4 + $0x38] sm:$0xff] %vm886_vm3, %v3992_v30 }
 0x35f   : > { %v12479_v18 = vpop.f32.mrb[54].mxu0  ;;  %4187 = vst.msk [vmem:[#allocation4] sm:$0xff] %vm886_vm3, %v4179_v20  ;;  %v4180_v33 = vadd.f32 %v4172_v2, %v4143_v43  ;;  %v10503_v24 = vpop.f32.mrb[36].mxu1  ;;  %3998 = vst.msk [vmem:[#allocation4 + $0x28] sm:$0xff] %vm886_vm3, %v3990_v28 }
 0x360   : > { %v12483_v13 = vpop.f32.mrb[55].mxu0  ;;  %4190 = vst.msk [vmem:[#allocation4 + $0x18] sm:$0xff] %vm886_vm3, %v4182_v44  ;;  %v4156_v53 = vpop.f32.mrb[37].mxu1 }
 0x361   : > { %4188 = vst.msk [vmem:[#allocation4 + $0x8] sm:$0xff] %vm886_vm3, %v4180_v33  ;;  %v10504_v19 = vpop.f32.mrb[38].mxu1 }
 0x362   : > { %v4159_v1 = vpop.f32.mrb[39].mxu1 }
 0x363   : > { %v4177_v5 = vld [vmem:[#allocation4 + $0x30] sm:$0xff] }
 0x364   : > { %v4185_v63 = vadd.f32 %v10503_v24, %v4177_v5  ;;  %v4175_v35 = vld [vmem:[#allocation4 + $0x20] sm:$0xff] }
 0x365   : > { %v4183_v14 = vadd.f32 %v4175_v35, %v4156_v53  ;;  %v4178_v38 = vld [vmem:[#allocation4 + $0x38] sm:$0xff]  ;;  %v4320_v36 = vld [vmem:[#allocation4 + $0x10] sm:$0xff] }
 0x366   : > { %4193 = vst.msk [vmem:[#allocation4 + $0x30] sm:$0xff] %vm886_vm3, %v4185_v63  ;;  %v4186_v34 = vadd.f32 %v10504_v19, %v4178_v38  ;;  %v4176_v39 = vld [vmem:[#allocation4 + $0x28] sm:$0xff]  ;;  %v4328_v42 = vadd.f32 %v12397_v58, %v4320_v36  ;;  %v4318_v51 = vld [vmem:[#allocation4] sm:$0xff] }
 0x367   : > { %4191 = vst.msk [vmem:[#allocation4 + $0x20] sm:$0xff] %vm886_vm3, %v4183_v14  ;;  %v4184_v61 = vadd.f32 %v4176_v39, %v4159_v1  ;;  %v10523_v37 = vpop.f32.mrb[40].mxu1  ;;  %v4326_v21 = vadd.f32 %v4318_v51, %v12400_v17  ;;  %v4321_v49 = vld [vmem:[#allocation4 + $0x18] sm:$0xff] }
 0x368   : > { %4194 = vst.msk [vmem:[#allocation4 + $0x38] sm:$0xff] %vm886_vm3, %v4186_v34  ;;  %4336 = vst.msk [vmem:[#allocation4 + $0x10] sm:$0xff] %vm886_vm3, %v4328_v42  ;;  %v4545_v26 = vpop.f32.mrb[41].mxu1  ;;  %v4329_v3 = vadd.f32 %v12402_v45, %v4321_v49  ;;  %v4319_v27 = vld [vmem:[#allocation4 + $0x8] sm:$0xff]  ;;  %v10847_v45 = vld [vmem:[%s13281_s3 + $0x28] sm:$0xff]  }
 0x369   : > { %4192 = vst.msk [vmem:[#allocation4 + $0x28] sm:$0xff] %vm886_vm3, %v4184_v61  ;;  %4334 = vst.msk [vmem:[#allocation4] sm:$0xff] %vm886_vm3, %v4326_v21  ;;  %v10524_v58 = vpop.f32.mrb[42].mxu1  ;;  %v4327_v40 = vadd.f32 %v4319_v27, %v12404_v31  ;;  %10560 = vmatpush3.bf16.msra.mxu0 %v10847_v45 }
 0x36a   : > { %4337 = vst.msk [vmem:[#allocation4 + $0x18] sm:$0xff] %vm886_vm3, %v4329_v3  ;;  %v4548_v7 = vpop.f32.mrb[43].mxu1  ;;  %10573 = vmatprep.subr.bf16.mxu0 %v11048_v46 }
 0x36b   : > { %4335 = vst.msk [vmem:[#allocation4 + $0x8] sm:$0xff] %vm886_vm3, %v4327_v40 }
 0x36d   : > { %v4324_v17 = vld [vmem:[#allocation4 + $0x30] sm:$0xff] }
 0x36e   : > { %v4332_v60 = vadd.f32 %v12409_v50, %v4324_v17  ;;  %v4322_v10 = vld [vmem:[#allocation4 + $0x20] sm:$0xff] }
 0x36f   : > { %v4578_v59 = vld [vmem:[#allocation4 + $0x10] sm:$0xff]  ;;  %v10527_v43 = vpop.f32.mrb[44].mxu1  ;;  %v4330_v4 = vadd.f32 %v4322_v10, %v12412_v16  ;;  %v4325_v56 = vld [vmem:[#allocation4 + $0x38] sm:$0xff] }
 0x370   : > { %v4586_v23 = vadd.f32 %v10523_v37, %v4578_v59  ;;  %v4576_v31 = vld [vmem:[#allocation4] sm:$0xff]  ;;  %4340 = vst.msk [vmem:[#allocation4 + $0x30] sm:$0xff] %vm886_vm3, %v4332_v60  ;;  %v4561_v22 = vpop.f32.mrb[45].mxu1  ;;  %v4333_v62 = vadd.f32 %v12414_v54, %v4325_v56  ;;  %v4323_v12 = vld [vmem:[#allocation4 + $0x28] sm:$0xff] }
 0x371   : > { %v4584_v50 = vadd.f32 %v4576_v31, %v4545_v26  ;;  %v4579_v11 = vld [vmem:[#allocation4 + $0x18] sm:$0xff]  ;;  %4338 = vst.msk [vmem:[#allocation4 + $0x20] sm:$0xff] %vm886_vm3, %v4330_v4  ;;  %v10528_v9 = vpop.f32.mrb[46].mxu1  ;;  %v4331_v55 = vadd.f32 %v4323_v12, %v12416_v29 }
 0x372   : > { %4594 = vst.msk [vmem:[#allocation4 + $0x10] sm:$0xff] %vm886_vm3, %v4586_v23  ;;  %v4587_v16 = vadd.f32 %v10524_v58, %v4579_v11  ;;  %v4577_v30 = vld [vmem:[#allocation4 + $0x8] sm:$0xff]  ;;  %4341 = vst.msk [vmem:[#allocation4 + $0x38] sm:$0xff] %vm886_vm3, %v4333_v62  ;;  %v4564_v41 = vpop.f32.mrb[47].mxu1 }
 0x373   : > { %4592 = vst.msk [vmem:[#allocation4] sm:$0xff] %vm886_vm3, %v4584_v50  ;;  %v4585_v54 = vadd.f32 %v4577_v30, %v4548_v7  ;;  %4339 = vst.msk [vmem:[#allocation4 + $0x28] sm:$0xff] %vm886_vm3, %v4331_v55  ;;  %v12554_v11 = vld.sshfl [vmem:[#allocation3] sm:$0x13 pattern:$0x76325410] }
 0x374   : > { %4595 = vst.msk [vmem:[#allocation4 + $0x18] sm:$0xff] %vm886_vm3, %v4587_v16  ;;  %v5426_v30 = vcombine.high %v12554_v11, %v12554_v11 }
 0x375   : > { %4593 = vst.msk [vmem:[#allocation4 + $0x8] sm:$0xff] %vm886_vm3, %v4585_v54 }
 0x377   : > { %v4582_v15 = vld [vmem:[#allocation4 + $0x30] sm:$0xff] }
 0x378   : > { %v4590_v29 = vadd.f32 %v10527_v43, %v4582_v15  ;;  %v4580_v6 = vld [vmem:[#allocation4 + $0x20] sm:$0xff]  ;;  %v5459_v15 = vshrl.u32 %v12554_v11, 16 }
 0x379   : > { %v4772_v20 = vld [vmem:[#allocation4 + $0x10] sm:$0xff]  ;;  %v4588_v8 = vadd.f32 %v4580_v6, %v4561_v22  ;;  %v4583_v28 = vld [vmem:[#allocation4 + $0x38] sm:$0xff] }
 0x37a   : > { %v4780_v44 = vadd.f32 %v12425_v25, %v4772_v20  ;;  %v4770_v2 = vld [vmem:[#allocation4] sm:$0xff]  ;;  %4598 = vst.msk [vmem:[#allocation4 + $0x30] sm:$0xff] %vm886_vm3, %v4590_v29  ;;  %v4591_v33 = vadd.f32 %v10528_v9, %v4583_v28  ;;  %v4581_v24 = vld [vmem:[#allocation4 + $0x28] sm:$0xff]  ;;  %v5462_v29 = vshll.u32 %v12554_v11, 16 }
 0x37b   : > { %v4778_v53 = vadd.f32 %v4770_v2, %v12430_v52  ;;  %v4773_v19 = vld [vmem:[#allocation4 + $0x18] sm:$0xff]  ;;  %4596 = vst.msk [vmem:[#allocation4 + $0x20] sm:$0xff] %vm886_vm3, %v4588_v8  ;;  %v4589_v1 = vadd.f32 %v4581_v24, %v4564_v41 }
 0x37c   : > { %4788 = vst.msk [vmem:[#allocation4 + $0x10] sm:$0xff] %vm886_vm3, %v4780_v44  ;;  %v4781_v5 = vadd.f32 %v12433_v48, %v4773_v19  ;;  %v4771_v63 = vld [vmem:[#allocation4 + $0x8] sm:$0xff]  ;;  %4599 = vst.msk [vmem:[#allocation4 + $0x38] sm:$0xff] %vm886_vm3, %v4591_v33  ;;  %v9797_v52 = vld [vmem:[%s13288_s10] ss:$0 sm:$0xff] }
 0x37d   : > { %4786 = vst.msk [vmem:[#allocation4] sm:$0xff] %vm886_vm3, %v4778_v53  ;;  %v4779_v25 = vadd.f32 %v4771_v63, %v12436_v57  ;;  %4597 = vst.msk [vmem:[#allocation4 + $0x28] sm:$0xff] %vm886_vm3, %v4589_v1 }
 0x37e   : > { %4789 = vst.msk [vmem:[#allocation4 + $0x18] sm:$0xff] %vm886_vm3, %v4781_v5 }
 0x37f   : > { %4787 = vst.msk [vmem:[#allocation4 + $0x8] sm:$0xff] %vm886_vm3, %v4779_v25 }
 0x381   : > { %v4776_v35 = vld [vmem:[#allocation4 + $0x30] sm:$0xff] }
 0x382   : > { %v4784_v48 = vadd.f32 %v12467_v47, %v4776_v35  ;;  %v4774_v14 = vld [vmem:[#allocation4 + $0x20] sm:$0xff] }
 0x383   : > { %v4804_v38 = vld [vmem:[#allocation4 + $0x10] sm:$0xff]  ;;  %v4782_v36 = vadd.f32 %v4774_v14, %v12472_v32  ;;  %v4777_v34 = vld [vmem:[#allocation4 + $0x38] sm:$0xff] }
 0x384   : > { %v4818_v39 = vadd.f32 %v9797_v52, %v4804_v38  ;;  %v4802_v57 = vld [vmem:[#allocation4] sm:$0xff]  ;;  %4792 = vst.msk [vmem:[#allocation4 + $0x30] sm:$0xff] %vm886_vm3, %v4784_v48  ;;  %v4785_v42 = vadd.f32 %v12479_v18, %v4777_v34  ;;  %v4775_v51 = vld [vmem:[#allocation4 + $0x28] sm:$0xff] }
 0x385   : > { %v4816_v61 = vadd.f32 %v9797_v52, %v4802_v57  ;;  %v4805_v37 = vld [vmem:[#allocation4 + $0x18] sm:$0xff]  ;;  %4790 = vst.msk [vmem:[#allocation4 + $0x20] sm:$0xff] %vm886_vm3, %v4782_v36  ;;  %v4783_v21 = vadd.f32 %v4775_v51, %v12483_v13 }
 0x386   : > { %v4834_v49 = vmin.f32 %v4818_v39, 0.0  ;;  %v4819_v47 = vadd.f32 %v9797_v52, %v4805_v37  ;;  %v4803_v26 = vld [vmem:[#allocation4 + $0x8] sm:$0xff]  ;;  %4793 = vst.msk [vmem:[#allocation4 + $0x38] sm:$0xff] %vm886_vm3, %v4785_v42  ;;  %vm4826_vm4 = vcmp.gt.f32.partialorder %v4818_v39, 0.0 }
 0x387   : > { %v4832_v32 = vmin.f32 %v4816_v61, 0.0  ;;  %v12538_v3 = vadd.f32 %v9797_v52, %v4803_v26  ;;  %4791 = vst.msk [vmem:[#allocation4 + $0x28] sm:$0xff] %vm886_vm3, %v4783_v21  ;;  %vm4824_vm1 = vcmp.gt.f32.partialorder %v4816_v61, 0.0 }
 0x388   : > { %v4844_v27 = vmul.f32 1.442695, %v4834_v49  ;;  %v4835_v58 = vmin.f32 %v4819_v47, 0.0  ;;  %vm4827_vm6 = vcmp.gt.f32.partialorder %v4819_v47, 0.0 }
 0x389   : > { %v4840_v18 = vmul.f32 1.442695, %v4832_v32  ;;  %v4833_v40 = vmin.f32 %v12538_v3, 0.0  ;;  %vm4825_vm7 = vcmp.gt.f32.partialorder %v12538_v3, 0.0 }
 0x38a   : > { %10981 = vpow2.f32 %v4844_v27  ;;  %v4846_v7 = vmul.f32 1.442695, %v4835_v58 }
 0x38b   : > { %10983 = vpow2.f32 %v4840_v18  ;;  %v4842_v17 = vmul.f32 1.442695, %v4833_v40  ;;  %v4808_v13 = vld [vmem:[#allocation4 + $0x30] sm:$0xff] }
 0x38c   : > { %10985 = vpow2.f32 %v4846_v7  ;;  %v12542_v60 = vadd.f32 %v9797_v52, %v4808_v13  ;;  %v4806_v10 = vld [vmem:[#allocation4 + $0x20] sm:$0xff] }
 0x38d   : > { %10987 = vpow2.f32 %v4842_v17  ;;  %v12544_v45 = vadd.f32 %v9797_v52, %v4806_v10  ;;  %v4809_v59 = vld [vmem:[#allocation4 + $0x38] sm:$0xff] }
 0x38e   : > { %v4838_v43 = vmin.f32 %v12542_v60, 0.0  ;;  %v12547_v4 = vadd.f32 %v9797_v52, %v4809_v59  ;;  %v4807_v56 = vld [vmem:[#allocation4 + $0x28] sm:$0xff]  ;;  %vm4830_vm8 = vcmp.gt.f32.partialorder %v12542_v60, 0.0 }
 0x38f   : > { %v4836_v23 = vmin.f32 %v12544_v45, 0.0  ;;  %v12550_v31 = vadd.f32 %v9797_v52, %v4807_v56  ;;  %vm4828_vm10 = vcmp.gt.f32.partialorder %v12544_v45, 0.0 }
 0x390   : > { %v4852_v22 = vmul.f32 1.442695, %v4838_v43  ;;  %v4839_v62 = vmin.f32 %v12547_v4, 0.0  ;;  %vm4831_vm2 = vcmp.gt.f32.partialorder %v12547_v4, 0.0 }
 0x391   : > { %v4848_v12 = vmul.f32 1.442695, %v4836_v23  ;;  %v4837_v50 = vmin.f32 %v12550_v31, 0.0 }
 0x392   : > { %10989 = vpow2.f32 %v4852_v22  ;;  %v4854_v9 = vmul.f32 1.442695, %v4839_v62 }
 0x393   : > { %v4850_v16 = vmul.f32 1.442695, %v4837_v50  ;;  %10991 = vpow2.f32 %v4848_v12 }
 0x394   : > { %v10982_v55 = vpop.eup %10981  ;;  %10993 = vpow2.f32 %v4854_v9 }
 0x395   : > { %v10984_v41 = vpop.eup %10983  ;;  %v9800_v54 = vadd.f32 -1.0, %v10982_v55  ;;  %10995 = vpow2.f32 %v4850_v16 }
 0x396   : > { %v10986_v6 = vpop.eup %10985  ;;  %v9798_v20 = vadd.f32 -1.0, %v10984_v41 }
 0x397   : > { %v10988_v8 = vpop.eup %10987  ;;  %v4866_v28 = vsel %vm4826_vm4, %v4818_v39, %v9800_v54  ;;  %v9801_v44 = vadd.f32 -1.0, %v10986_v6  ;;  %vm4829_vm4 = vcmp.gt.f32.partialorder %v12550_v31, 0.0 }
 0x398   : > { %v4914_v2 = vcombine.high %v4866_v28, %v4866_v28  ;;  %v4921_v33 = vrot.slane %v4866_v28, %v11260_v0  ;;  %v4864_v24 = vsel %vm4824_vm1, %v4816_v61, %v9798_v20  ;;  %v9799_v5 = vadd.f32 -1.0, %v10988_v8 }
 0x399   : > { %v4880_v53 = vcombine.high %v4864_v24, %v4864_v24  ;;  %v4887_v19 = vrot.slane %v4864_v24, %v11260_v0  ;;  %v4867_v1 = vsel %vm4827_vm6, %v4819_v47, %v9801_v44  ;;  %vm5310_vm1 = vsmask.f32 2306 }
 0x39a   : > { %v4928_v63 = vrot.slane %v4914_v2, %v11260_v0  ;;  %v4929_v25 = vcombine.high %v4921_v33, %v4921_v33  ;;  %v5084_v52 = vsel %vm1908_vm5, %v4921_v33, 0.0  ;;  %v4931_v35 = vcombine.high %v4867_v1, %v4867_v1 }
 0x39b   : > { %v4894_v48 = vrot.slane %v4880_v53, %v11260_v0  ;;  %v4895_v14 = vcombine.high %v4887_v19, %v4887_v19  ;;  %v5048_v38 = vsel %vm1908_vm5, %v4887_v19, 0.0  ;;  %v4938_v36 = vrot.slane %v4867_v1, %v11260_v0 }
 0x39c   : > { %v4930_v34 = vcombine.high %v4928_v63, %v4928_v63  ;;  %v5093_v39 = vsel %vm1908_vm5, %v4929_v25, 0.0  ;;  %v5102_v57 = vsel %vm1908_vm5, %v4928_v63, 0.0  ;;  %v4945_v42 = vrot.slane %v4931_v35, %v11260_v0  ;;  %v10990_v51 = vpop.eup %10989 }
 0x39d   : > { %v4896_v61 = vcombine.high %v4894_v48, %v4894_v48  ;;  %v5057_v37 = vsel %vm1908_vm5, %v4895_v14, 0.0  ;;  %v5066_v21 = vsel %vm1908_vm5, %v4894_v48, 0.0  ;;  %v4946_v49 = vcombine.high %v4938_v36, %v4938_v36  ;;  %v10992_v58 = vpop.eup %10991 }
 0x39e   : > { %v5111_v47 = vsel %vm1908_vm5, %v4930_v34, 0.0  ;;  %v4947_v26 = vcombine.high %v4945_v42, %v4945_v42  ;;  %v5085_v32 = vsel %vm1908_vm5, %v4938_v36, 0.0  ;;  %v5103_v27 = vsel %vm1908_vm5, %v4945_v42, 0.0  ;;  %v12583_v56 = vpop.eup %10993 }
 0x39f   : > { %v5075_v18 = vsel %vm1908_vm5, %v4896_v61, 0.0  ;;  %v5086_v40 = vadd.f32 %v5085_v32, %v5084_v52  ;;  %v5094_v7 = vsel %vm1908_vm5, %v4946_v49, 0.0  ;;  %v5104_v17 = vadd.f32 %v5103_v27, %v5102_v57  ;;  %v12585_v50 = vpop.eup %10995 }
 0x3a0   : > { %v5095_v13 = vadd.f32 %v5094_v7, %v5093_v39  ;;  %v5112_v10 = vsel %vm1908_vm5, %v4947_v26, 0.0  ;;  %v4865_v59 = vsel %vm4825_vm7, %v12538_v3, %v9799_v5  ;;  %v9804_v43 = vadd.f32 -1.0, %v10990_v51  ;;  %vm5640_vm7 = vmor %vm721_vm0, %vm2869_vm14 }
 0x3a1   : > { %v5087_v23 = vrot.slane %v5086_v40, 4  ;;  %v5105_v22 = vrot.slane %v5104_v17, 4  ;;  %v5113_v62 = vadd.f32 %v5112_v10, %v5111_v47  ;;  %v4897_v12 = vcombine.high %v4865_v59, %v4865_v59 }
 0x3a2   : > { %v5096_v9 = vrot.slane %v5095_v13, 4  ;;  %v4904_v55 = vrot.slane %v4865_v59, %v11260_v0  ;;  %v12591_v16 = vsel %vm4830_vm8, %v12542_v60, %v9804_v43  ;;  %v12593_v41 = vadd.f32 -1.0, %v10992_v58 }
 0x3a3   : > { %v5088_v3 = vadd.f32 %v5087_v23, %v5086_v40  ;;  %v5106_v54 = vadd.f32 %v5105_v22, %v5104_v17  ;;  %v5114_v6 = vrot.slane %v5113_v62, 4  ;;  %v4911_v20 = vrot.slane %v4897_v12, %v11260_v0 }
 0x3a4   : > { %v5097_v8 = vadd.f32 %v5096_v9, %v5095_v13  ;;  %v4912_v28 = vcombine.high %v4904_v55, %v4904_v55  ;;  %v5049_v44 = vsel %vm1908_vm5, %v4904_v55, 0.0  ;;  %v4982_v2 = vcombine.high %v12591_v16, %v12591_v16 }
 0x3a5   : > { %v5089_v33 = vrot.slane %v5088_v3, 2  ;;  %v5107_v24 = vrot.slane %v5106_v54, 2  ;;  %v5115_v53 = vadd.f32 %v5114_v6, %v5113_v62  ;;  %v4913_v19 = vcombine.high %v4911_v20, %v4911_v20 }
 0x3a6   : > { %v5098_v60 = vrot.slane %v5097_v8, 2  ;;  %v5050_v1 = vadd.f32 %v5049_v44, %v5048_v38  ;;  %v5058_v5 = vsel %vm1908_vm5, %v4912_v28, 0.0  ;;  %v5067_v63 = vsel %vm1908_vm5, %v4911_v20, 0.0 }
 0x3a7   : > { %v5090_v25 = vadd.f32 %v5089_v33, %v5088_v3  ;;  %v5108_v52 = vadd.f32 %v5107_v24, %v5106_v54  ;;  %v5116_v35 = vrot.slane %v5115_v53, 2  ;;  %v5059_v48 = vadd.f32 %v5058_v5, %v5057_v37 }
 0x3a8   : > { %v5099_v14 = vadd.f32 %v5098_v60, %v5097_v8  ;;  %v5051_v36 = vrot.slane %v5050_v1, 4  ;;  %v5068_v34 = vadd.f32 %v5067_v63, %v5066_v21  ;;  %v5076_v39 = vsel %vm1908_vm5, %v4913_v19, 0.0 }
 0x3a9   : > { %v5091_v57 = vrot.slane %v5090_v25, 1  ;;  %v5109_v42 = vrot.slane %v5108_v52, 1  ;;  %v5117_v51 = vadd.f32 %v5116_v35, %v5115_v53  ;;  %v5060_v61 = vrot.slane %v5059_v48, 4 }
 0x3aa   : > { %v5100_v49 = vrot.slane %v5099_v14, 1  ;;  %v5052_v47 = vadd.f32 %v5051_v36, %v5050_v1  ;;  %v5069_v38 = vrot.slane %v5068_v34, 4  ;;  %v5077_v26 = vadd.f32 %v5076_v39, %v5075_v18 }
 0x3ab   : > { %v5092_v32 = vadd.f32 %v5091_v57, %v5090_v25  ;;  %v5110_v27 = vadd.f32 %v5109_v42, %v5108_v52  ;;  %v5118_v58 = vrot.slane %v5117_v51, 1  ;;  %v5061_v40 = vadd.f32 %v5060_v61, %v5059_v48 }
 0x3ac   : > { %v5101_v7 = vadd.f32 %v5100_v49, %v5099_v14  ;;  %v5053_v17 = vrot.slane %v5052_v47, 2  ;;  %v5070_v37 = vadd.f32 %v5069_v38, %v5068_v34  ;;  %v5078_v13 = vrot.slane %v5077_v26, 4 }
 0x3ad   : > { %v5119_v10 = vadd.f32 %v5118_v58, %v5117_v51  ;;  %v5196_v21 = vmul.f32 0.25, %v5092_v32  ;;  %v5198_v59 = vmul.f32 0.25, %v5110_v27  ;;  %v5062_v43 = vrot.slane %v5061_v40, 2 }
 0x3ae   : > { %v5197_v23 = vmul.f32 0.25, %v5101_v7  ;;  %v5054_v22 = vadd.f32 %v5053_v17, %v5052_v47  ;;  %v5071_v62 = vrot.slane %v5070_v37, 2  ;;  %v5079_v12 = vadd.f32 %v5078_v13, %v5077_v26 }
 0x3af   : > { %v5199_v9 = vmul.f32 0.25, %v5119_v10  ;;  %v10216_v18 = vpack.c.bf16 %v5196_v21, %v5196_v21  ;;  %v10218_v55 = vpack.c.bf16 %v5198_v59, %v5198_v59  ;;  %v5063_v3 = vadd.f32 %v5062_v43, %v5061_v40 }
 0x3b0   : > { %v10217_v54 = vpack.c.bf16 %v5197_v23, %v5197_v23  ;;  %v5055_v6 = vrot.slane %v5054_v22, 1  ;;  %v5072_v20 = vadd.f32 %v5071_v62, %v5070_v37  ;;  %v5080_v8 = vrot.slane %v5079_v12, 2 }
 0x3b1   : > { %v10219_v28 = vpack.c.bf16 %v5199_v9, %v5199_v9  ;;  %v5276_v44 = vunpack.c.l.b16 %v10216_v18  ;;  %v5278_v33 = vunpack.c.l.b16 %v10218_v55  ;;  %v5064_v24 = vrot.slane %v5063_v3, 1 }
 0x3b2   : > { %v5277_v53 = vunpack.c.l.b16 %v10217_v54  ;;  %v5056_v19 = vadd.f32 %v5055_v6, %v5054_v22  ;;  %v5073_v60 = vrot.slane %v5072_v20, 1  ;;  %v5081_v1 = vadd.f32 %v5080_v8, %v5079_v12 }
 0x3b3   : > { %v5279_v5 = vunpack.c.l.b16 %v10219_v28  ;;  %v5065_v63 = vadd.f32 %v5064_v24, %v5063_v3  ;;  %v4989_v25 = vrot.slane %v12591_v16, %v11260_v0  ;;  %v4996_v52 = vrot.slane %v4982_v2, %v11260_v0 }
 0x3b4   : > { %v5291_v35 = vsel %vm2869_vm14, %v5277_v53, %v5276_v44  ;;  %v5074_v48 = vadd.f32 %v5073_v60, %v5072_v20  ;;  %v5082_v14 = vrot.slane %v5081_v1, 1  ;;  %v5192_v36 = vmul.f32 0.25, %v5056_v19 }
 0x3b5   : > { %v5193_v34 = vmul.f32 0.25, %v5065_v63  ;;  %v4997_v39 = vcombine.high %v4989_v25, %v4989_v25  ;;  %v4998_v57 = vcombine.high %v4996_v52, %v4996_v52  ;;  %v5156_v42 = vsel %vm1908_vm5, %v4989_v25, 0.0 }
 0x3b6   : > { %v5083_v51 = vadd.f32 %v5082_v14, %v5081_v1  ;;  %v5194_v61 = vmul.f32 0.25, %v5074_v48  ;;  %v10212_v49 = vpack.c.bf16 %v5192_v36, %v5192_v36  ;;  %v5174_v47 = vsel %vm1908_vm5, %v4996_v52, 0.0 }
 0x3b7   : > { %v10213_v16 = vpack.c.bf16 %v5193_v34, %v5193_v34  ;;  %v5165_v2 = vsel %vm1908_vm5, %v4997_v39, 0.0  ;;  %v5183_v38 = vsel %vm1908_vm5, %v4998_v57, 0.0  ;;  %v4868_v26 = vsel %vm4828_vm10, %v12544_v45, %v12593_v41 }
 0x3b8   : > { %v5195_v32 = vmul.f32 0.25, %v5083_v51  ;;  %v10214_v27 = vpack.c.bf16 %v5194_v61, %v5194_v61  ;;  %v5272_v58 = vunpack.c.l.b16 %v10212_v49  ;;  %v4948_v40 = vcombine.high %v4868_v26, %v4868_v26 }
 0x3b9   : > { %v5273_v7 = vunpack.c.l.b16 %v10213_v16  ;;  %v4955_v17 = vrot.slane %v4868_v26, %v11260_v0  ;;  %v9805_v37 = vadd.f32 -1.0, %v12583_v56  ;;  %v9803_v13 = vadd.f32 -1.0, %v12585_v50 }
 0x3ba   : > { %v10215_v10 = vpack.c.bf16 %v5195_v32, %v5195_v32  ;;  %v5274_v21 = vunpack.c.l.b16 %v10214_v27  ;;  %v4962_v59 = vrot.slane %v4948_v40, %v11260_v0  ;;  %v5292_v43 = vsel %vm2871_vm15, %v5278_v33, %v5291_v35 }
 0x3bb   : > { %v5288_v23 = vsel %vm2869_vm14, %v5273_v7, %v5272_v58  ;;  %v4963_v45 = vcombine.high %v4955_v17, %v4955_v17  ;;  %v5120_v41 = vsel %vm1908_vm5, %v4955_v17, 0.0  ;;  %v4871_v22 = vsel %vm4831_vm2, %v12547_v4, %v9805_v37  ;;  %vm5642_vm2 = vmor %vm5640_vm7, %vm2873_vm9 }
 0x3bc   : > { %v5275_v62 = vunpack.c.l.b16 %v10215_v10  ;;  %v4964_v12 = vcombine.high %v4962_v59, %v4962_v59  ;;  %v5138_v56 = vsel %vm1908_vm5, %v4962_v59, 0.0  ;;  %v4999_v50 = vcombine.high %v4871_v22, %v4871_v22 }
 0x3bd   : > { %v5129_v9 = vsel %vm1908_vm5, %v4963_v45, 0.0  ;;  %v5006_v18 = vrot.slane %v4871_v22, %v11260_v0  ;;  %v4869_v55 = vsel %vm4829_vm4, %v12550_v31, %v9803_v13  ;;  %v5289_v3 = vsel %vm2871_vm15, %v5274_v21, %v5288_v23 }
 0x3be   : > { %v5147_v54 = vsel %vm1908_vm5, %v4964_v12, 0.0  ;;  %v5013_v6 = vrot.slane %v4999_v50, %v11260_v0  ;;  %v4965_v4 = vcombine.high %v4869_v55, %v4869_v55  ;;  %v4972_v20 = vrot.slane %v4869_v55, %v11260_v0 }
 0x3bf   : > { %v5014_v8 = vcombine.high %v5006_v18, %v5006_v18  ;;  %v5157_v28 = vsel %vm1908_vm5, %v5006_v18, 0.0  ;;  %v12639_v44 = vsel %vm2873_vm9, %v5275_v62, %v5289_v3  ;;  %v12642_v33 = vsel %vm2873_vm9, %v5279_v5, %v5292_v43 }
 0x3c0   : > { %v5015_v24 = vcombine.high %v5013_v6, %v5013_v6  ;;  %v5158_v31 = vadd.f32 %v5157_v28, %v5156_v42  ;;  %v5175_v53 = vsel %vm1908_vm5, %v5013_v6, 0.0  ;;  %v4979_v19 = vrot.slane %v4965_v4, %v11260_v0 }
 0x3c1   : > { %v5166_v60 = vsel %vm1908_vm5, %v5014_v8, 0.0  ;;  %v5176_v1 = vadd.f32 %v5175_v53, %v5174_v47  ;;  %v4980_v63 = vcombine.high %v4972_v20, %v4972_v20  ;;  %v5121_v25 = vsel %vm1908_vm5, %v4972_v20, 0.0 }
 0x3c2   : > { %v5159_v52 = vrot.slane %v5158_v31, 4  ;;  %v5167_v35 = vadd.f32 %v5166_v60, %v5165_v2  ;;  %v5184_v48 = vsel %vm1908_vm5, %v5015_v24, 0.0  ;;  %v4981_v14 = vcombine.high %v4979_v19, %v4979_v19 }
 0x3c3   : > { %v5177_v36 = vrot.slane %v5176_v1, 4  ;;  %v5185_v5 = vadd.f32 %v5184_v48, %v5183_v38  ;;  %v5122_v34 = vadd.f32 %v5121_v25, %v5120_v41  ;;  %v5130_v39 = vsel %vm1908_vm5, %v4980_v63, 0.0 }
 0x3c4   : > { %v5160_v57 = vadd.f32 %v5159_v52, %v5158_v31  ;;  %v5168_v42 = vrot.slane %v5167_v35, 4  ;;  %v5131_v51 = vadd.f32 %v5130_v39, %v5129_v9  ;;  %v5139_v61 = vsel %vm1908_vm5, %v4979_v19, 0.0 }
 0x3c5   : > { %v5178_v49 = vadd.f32 %v5177_v36, %v5176_v1  ;;  %v5186_v47 = vrot.slane %v5185_v5, 4  ;;  %v5123_v16 = vrot.slane %v5122_v34, 4  ;;  %v5140_v26 = vadd.f32 %v5139_v61, %v5138_v56 }
 0x3c6   : > { %v5161_v32 = vrot.slane %v5160_v57, 2  ;;  %v5169_v27 = vadd.f32 %v5168_v42, %v5167_v35  ;;  %v5132_v2 = vrot.slane %v5131_v51, 4  ;;  %v5148_v58 = vsel %vm1908_vm5, %v4981_v14, 0.0  ;;  %vm12654_vm5 = vmand %vm4795_vm12, %vm5310_vm1 }
 0x3c7   : > { %v5179_v40 = vrot.slane %v5178_v49, 2  ;;  %v5187_v7 = vadd.f32 %v5186_v47, %v5185_v5  ;;  %v5124_v38 = vadd.f32 %v5123_v16, %v5122_v34  ;;  %v5141_v17 = vrot.slane %v5140_v26, 4 }
 0x3c8   : > { %v5162_v37 = vadd.f32 %v5161_v32, %v5160_v57  ;;  %v5170_v13 = vrot.slane %v5169_v27, 2  ;;  %v5133_v10 = vadd.f32 %v5132_v2, %v5131_v51  ;;  %v5149_v21 = vadd.f32 %v5148_v58, %v5147_v54  ;;  %v10893_v32 = vld [vmem:[%s13283_s5 + $0x20] sm:$0xff]  }
 0x3c9   : > { %v5180_v59 = vadd.f32 %v5179_v40, %v5178_v49  ;;  %v5188_v43 = vrot.slane %v5187_v7, 2  ;;  %v5125_v23 = vrot.slane %v5124_v38, 2  ;;  %v5142_v45 = vadd.f32 %v5141_v17, %v5140_v26 }
 0x3ca   : > { %v5163_v41 = vrot.slane %v5162_v37, 1  ;;  %v5171_v22 = vadd.f32 %v5170_v13, %v5169_v27  ;;  %v5134_v62 = vrot.slane %v5133_v10, 2  ;;  %v5150_v12 = vrot.slane %v5149_v21, 4  ;;  %v5312_v27 = vld [vmem:[#allocation3 + $0x4] sm:$0x7] }
 0x3cb   : > { %v5181_v56 = vrot.slane %v5180_v59, 1  ;;  %v5189_v50 = vadd.f32 %v5188_v43, %v5187_v7  ;;  %v5126_v9 = vadd.f32 %v5125_v23, %v5124_v38  ;;  %v5143_v18 = vrot.slane %v5142_v45, 2  ;;  %v5315_v38 = vld [vmem:[#allocation3 + $0x8] sm:$0x7] }
 0x3cc   : > { %v5164_v55 = vadd.f32 %v5163_v41, %v5162_v37  ;;  %v5172_v3 = vrot.slane %v5171_v22, 1  ;;  %v5135_v6 = vadd.f32 %v5134_v62, %v5133_v10  ;;  %v5151_v4 = vadd.f32 %v5150_v12, %v5149_v21 }
 0x3cd   : > { %v5182_v20 = vadd.f32 %v5181_v56, %v5180_v59  ;;  %v5190_v8 = vrot.slane %v5189_v50, 1  ;;  %v5127_v54 = vrot.slane %v5126_v9, 1  ;;  %v5144_v28 = vadd.f32 %v5143_v18, %v5142_v45  ;;  %v9836_v45 = vld.sshfl [vmem:[#allocation3] sm:$0x12 pattern:$0x76325410] }
 0x3ce   : > { %v5173_v24 = vadd.f32 %v5172_v3, %v5171_v22  ;;  %v5204_v31 = vmul.f32 0.25, %v5164_v55  ;;  %v5136_v53 = vrot.slane %v5135_v6, 1  ;;  %v5152_v19 = vrot.slane %v5151_v4, 2 }
 0x3cf   : > { %v5191_v60 = vadd.f32 %v5190_v8, %v5189_v50  ;;  %v5206_v1 = vmul.f32 0.25, %v5182_v20  ;;  %v5128_v63 = vadd.f32 %v5127_v54, %v5126_v9  ;;  %v5145_v25 = vrot.slane %v5144_v28, 1  ;;  %v5321_v9 = vld [vmem:[#allocation3 + $0x10] sm:$0x7]  ;;  %v5318_v20 = vld [vmem:[#allocation3 + $0xc] sm:$0x7] }
 0x3d0   : > { %v5205_v52 = vmul.f32 0.25, %v5173_v24  ;;  %v10224_v35 = vpack.c.bf16 %v5204_v31, %v5204_v31  ;;  %v5137_v48 = vadd.f32 %v5136_v53, %v5135_v6  ;;  %v5153_v14 = vadd.f32 %v5152_v19, %v5151_v4 }
 0x3d1   : > { %v5207_v36 = vmul.f32 0.25, %v5191_v60  ;;  %v10226_v5 = vpack.c.bf16 %v5206_v1, %v5206_v1  ;;  %v5146_v34 = vadd.f32 %v5145_v25, %v5144_v28  ;;  %v5200_v39 = vmul.f32 0.25, %v5128_v63 }
 0x3d2   : > { %v10225_v57 = vpack.c.bf16 %v5205_v52, %v5205_v52  ;;  %v5284_v42 = vunpack.c.l.b16 %v10224_v35  ;;  %v5154_v51 = vrot.slane %v5153_v14, 1  ;;  %v5201_v61 = vmul.f32 0.25, %v5137_v48 }
 0x3d3   : > { %v10227_v49 = vpack.c.bf16 %v5207_v36, %v5207_v36  ;;  %v5286_v47 = vunpack.c.l.b16 %v10226_v5  ;;  %v5202_v16 = vmul.f32 0.25, %v5146_v34  ;;  %v10220_v26 = vpack.c.bf16 %v5200_v39, %v5200_v39 }
 0x3d4   : > { %v5285_v2 = vunpack.c.l.b16 %v10225_v57  ;;  %v5155_v58 = vadd.f32 %v5154_v51, %v5153_v14  ;;  %v10221_v40 = vpack.c.bf16 %v5201_v61, %v5201_v61  ;;  %v5300_v7 = vpack.c.b16 %v12639_v44, %v12639_v44 }
 0x3d5   : > { %v5287_v17 = vunpack.c.l.b16 %v10227_v49  ;;  %v10222_v37 = vpack.c.bf16 %v5202_v16, %v5202_v16  ;;  %v5280_v13 = vunpack.c.l.b16 %v10220_v26  ;;  %v5301_v10 = vpack.c.b16 %v12642_v33, %v12642_v33 }
 0x3d6   : > { %v5297_v21 = vsel %vm2869_vm14, %v5285_v2, %v5284_v42  ;;  %v5203_v59 = vmul.f32 0.25, %v5155_v58  ;;  %v5281_v43 = vunpack.c.l.b16 %v10221_v40  ;;  %v5313_v23 = vsel %vm12654_vm5, %v5300_v7, %v5312_v27 }
 0x3d7   : > { %v5298_v41 = vsel %vm2871_vm15, %v5286_v47, %v5297_v21  ;;  %v5282_v22 = vunpack.c.l.b16 %v10222_v37  ;;  %5314 = vst [vmem:[#allocation3 + $0x4] sm:$0x7] %v5313_v23  ;;  %v5316_v44 = vsel %vm12654_vm5, %v5301_v10, %v5315_v38  ;;  %v5461_v62 = vrot.slane %v5459_v15, 6 }
 0x3d8   : > { %v5299_v33 = vsel %vm2873_vm9, %v5287_v17, %v5298_v41  ;;  %v10223_v12 = vpack.c.bf16 %v5203_v59, %v5203_v59  ;;  %v5294_v56 = vsel %vm2869_vm14, %v5281_v43, %v5280_v13  ;;  %5317 = vst [vmem:[#allocation3 + $0x8] sm:$0x7] %v5316_v44  ;;  %v5464_v50 = vrot.slane %v5462_v29, 7  ;;  %vm12687_vm14 = vmor %vm5642_vm2, %vm2877_vm11 }
 0x3d9   : > { %v5303_v18 = vpack.c.b16 %v5299_v33, %v5299_v33  ;;  %v5295_v55 = vsel %vm2871_vm15, %v5282_v22, %v5294_v56  ;;  %v5613_v3 = vcombine.high %v9836_v45, %v9836_v45  ;;  %vm5451_vm12 = vsmask.f32 1280 }
 0x3da   : > { %v5283_v6 = vunpack.c.l.b16 %v10223_v12  ;;  %vm5452_vm6 = vsmask.f32 3336  ;;  %v5465_v8 = vor.u32 %v5464_v50, %v5461_v62  ;;  %v5468_v29 = vshll.u32 %v5426_v30, 16  ;;  %v10846_v62 = vld [vmem:[%s13281_s3 + $0x10] sm:$0xff]  }
 0x3db   : > { %v5322_v15 = vsel %vm12654_vm5, %v5303_v18, %v5321_v9  ;;  %v9840_v28 = vrot.slane %v9836_v45, 9  ;;  %v5647_v24 = vrot.slane %v5613_v3, 7  ;;  %vm5453_vm15 = vmor %vm5451_vm12, %vm5452_vm6  ;;  %vm5454_vm8 = vsmask.f32 5392 }
 0x3dc   : > { %v5296_v4 = vsel %vm2873_vm9, %v5283_v6, %v5295_v55  ;;  %5323 = vst [vmem:[#allocation3 + $0x10] sm:$0x7] %v5322_v15  ;;  %vm5456_vm10 = vsmask.f32 7448  ;;  %vm5455_vm0 = vmor %vm5453_vm15, %vm5454_vm8  ;;  %v5466_v1 = vrot.slane %v5465_v8, 2  ;;  %v5470_v11 = vrot.slane %v5468_v29, 7 }
 0x3dd   : > { %v5302_v54 = vpack.c.b16 %v5296_v4, %v5296_v4  ;;  %vm12692_vm9 = vmor %vm5455_vm0, %vm5456_vm10  ;;  %v12698_v47 = vsel %vm12687_vm14, %v9840_v28, %v5647_v24  ;;  %vm9449_vm10 = vcmask 123904  }
 0x3de   : > { %v9837_v53 = vld.sshfl [vmem:[#allocation3 + $0x4] sm:$0x12 pattern:$0x76325410]  ;;  %v12706_v40 = vsel %vm12692_vm9, %v5466_v1, %v5470_v11 }
 0x3df   : > { %v5319_v31 = vsel %vm12654_vm5, %v5302_v54, %v5318_v20  ;;  %v9838_v19 = vld.sshfl [vmem:[#allocation3 + $0x8] sm:$0x12 pattern:$0x76325410]  ;;  %v5621_v60 = vcombine.high %v9837_v53, %v9837_v53  ;;  %v9841_v36 = vrot.slane %v9837_v53, 9 }
 0x3e0   : > { %5320 = vst [vmem:[#allocation3 + $0xc] sm:$0x7] %v5319_v31  ;;  %v11020_v30 = vld.sshfl [vmem:[#allocation3] sm:$0xf pattern:$0x76325410]  ;;  %v5629_v63 = vcombine.high %v9838_v19, %v9838_v19 }
 0x3e1   : > { %v9826_v25 = vld.sshfl [vmem:[#allocation3 + $0x4] sm:$0x13 pattern:$0x76325410]  ;;  %v5651_v35 = vrot.slane %v5621_v60, 7  ;;  %v9842_v58 = vrot.slane %v9838_v19, 9 }
 0x3e2   : > { %v9827_v48 = vld.sshfl [vmem:[#allocation3 + $0x8] sm:$0x13 pattern:$0x76325410]  ;;  %v5473_v14 = vshrl.u32 %v9826_v25, 16  ;;  %v5434_v5 = vcombine.high %v9826_v25, %v9826_v25  ;;  %v5476_v39 = vshll.u32 %v9826_v25, 16 }
 0x3e3   : > { %v5487_v57 = vshrl.u32 %v9827_v48, 16  ;;  %v5655_v42 = vrot.slane %v5629_v63, 7  ;;  %v5442_v51 = vcombine.high %v9827_v48, %v9827_v48  ;;  %v5490_v49 = vshll.u32 %v9827_v48, 16  ;;  %v10848_v31 = vld [vmem:[%s13281_s3 + $0x18] sm:$0xff]   ;;  %v10849_v60 = vld [vmem:[%s13281_s3 + $0x40] sm:$0xff]  }
 0x3e4   : > { %v5475_v61 = vrot.slane %v5473_v14, 6  ;;  %v12702_v16 = vsel %vm12687_vm14, %v9841_v36, %v5651_v35  ;;  %v5478_v26 = vrot.slane %v5476_v39, 7  ;;  %v9861_v2 = vld.sshfl [vmem:[#allocation3 + $0x10] sm:$0x13 pattern:$0x76325410] }
 0x3e5   : > { %v5489_v27 = vrot.slane %v5487_v57, 6  ;;  %v5492_v7 = vrot.slane %v5490_v49, 7  ;;  %v5482_v37 = vshll.u32 %v5434_v5, 16  ;;  %v5920_v13 = vshrl.u32 %v9861_v2, 16 }
 0x3e6   : > { %v5479_v17 = vor.u32 %v5478_v26, %v5475_v61  ;;  %v12710_v21 = vsel %vm12687_vm14, %v9842_v58, %v5655_v42  ;;  %v5666_v59 = vcombine.low %v12698_v47, %v12702_v16  ;;  %v5496_v43 = vshll.u32 %v5442_v51, 16  ;;  %v9894_v48 = vld.sshfl [vmem:[#allocation3 + $0x14] sm:$0x13 pattern:$0x76325410] }
 0x3e7   : > { %v11021_v38 = vld.sshfl [vmem:[#allocation3 + $0x8] sm:$0xf pattern:$0x76325410]  ;;  %v5876_v23 = vcombine.high %v9861_v2, %v9861_v2  ;;  %v5493_v22 = vor.u32 %v5492_v7, %v5489_v27  ;;  %v5923_v44 = vshll.u32 %v9861_v2, 16  ;;  %v5922_v3 = vrot.slane %v5920_v13, 6 }
 0x3e8   : > { %v9839_v10 = vld.sshfl [vmem:[#allocation3 + $0xc] sm:$0x12 pattern:$0x76325410]  ;;  %v5480_v12 = vrot.slane %v5479_v17, 2  ;;  %v5352_v9 = vcombine.low %v11020_v30, %v11021_v38  ;;  %v5484_v6 = vrot.slane %v5482_v37, 7  ;;  %v5674_v30 = vrot.slane %v5666_v59, %v11260_v0 }
 0x3e9   : > { %v5637_v45 = vcombine.high %v9839_v10, %v9839_v10  ;;  %v9828_v41 = vld.sshfl [vmem:[#allocation3 + $0xc] sm:$0x13 pattern:$0x76325410]  ;;  %v9843_v18 = vrot.slane %v9839_v10, 9  ;;  %v5494_v29 = vrot.slane %v5493_v22, 2 }
 0x3ea   : > { %v5450_v33 = vcombine.high %v9828_v41, %v9828_v41  ;;  %v5501_v56 = vshrl.u32 %v9828_v41, 16  ;;  %v5504_v50 = vshll.u32 %v9828_v41, 16  ;;  %10546 = vmatmul.mubr.msk.bf16.vlgmr.msra.gmra.mrb[48].mxu1 %vm886_vm3, %v5352_v9  ;;  %v5925_v54 = vrot.slane %v5923_v44, 7  ;;  %v10851_v13 = vld [vmem:[%s13281_s3 + $0x48] sm:$0xff]   ;;  %v10850_v10 = vld [vmem:[%s13281_s3 + $0x30] sm:$0xff]   ;;  %v10852_v9 = vld [vmem:[%s13281_s3 + $0x38] sm:$0xff]  }
 0x3eb   : > { %v5659_v55 = vrot.slane %v5637_v45, 7  ;;  %v5929_v28 = vshll.u32 %v5876_v23, 16  ;;  %10550 = vmatpush3.bf16.msra.mxu1 %v10846_v62  ;;  %10553 = vmatprep.mubr.msk.bf16.mxu1 %vm11049_vm13, %v11048_v46  ;;  %v5485_v53 = vsel %vm12692_vm9, %v5480_v12, %v5484_v6  ;;  %v5498_v1 = vrot.slane %v5496_v43, 7  ;;  %v10853_v12 = vld [vmem:[%s13281_s3 + $0x60] sm:$0xff]  }
 0x3ec   : > { %v5503_v15 = vrot.slane %v5501_v56, 6  ;;  %v5506_v4 = vrot.slane %v5504_v50, 7  ;;  %v5510_v20 = vshll.u32 %v5450_v33, 16  ;;  %10551 = vmatprep.subr.bf16.mxu1 %v11048_v46  ;;  %v5926_v11 = vor.u32 %v5925_v54, %v5922_v3  ;;  %v10857_v54 = vld [vmem:[%s13281_s3 + $0x68] sm:$0xff]  }
 0x3ed   : > { %v12720_v8 = vsel %vm12687_vm14, %v9843_v18, %v5659_v55  ;;  %v5499_v14 = vsel %vm12692_vm9, %v5494_v29, %v5498_v1  ;;  %v5519_v36 = vcombine.low %v12706_v40, %v5485_v53  ;;  %v5931_v39 = vrot.slane %v5929_v28, 7  ;;  %v9872_v57 = vld.sshfl [vmem:[#allocation3 + $0x10] sm:$0x12 pattern:$0x76325410]  ;;  %v10856_v28 = vld [vmem:[%s13281_s3 + $0x50] sm:$0xff]  }
 0x3ee   : > { %v5667_v24 = vcombine.low %v12710_v21, %v12720_v8  ;;  %v5507_v19 = vor.u32 %v5506_v4, %v5503_v15  ;;  %v5512_v35 = vrot.slane %v5510_v20, 7  ;;  %v5927_v5 = vrot.slane %v5926_v11, 2  ;;  %v9905_v7 = vld.sshfl [vmem:[#allocation3 + $0x14] sm:$0x12 pattern:$0x76325410] }
 0x3ef   : > { %10552 = vmatpush3.bf16.msra.mxu1 %v10848_v31  ;;  %v6333_v26 = vshrl.u32 %v9894_v48, 16  ;;  %v5938_v27 = vcombine.low %v5485_v53, %v5499_v14  ;;  %v6056_v58 = vcombine.high %v9872_v57, %v9872_v57  ;;  %v6336_v38 = vshll.u32 %v9894_v48, 16  ;;  %v11022_v23 = vld.sshfl [vmem:[#allocation3 + $0xc] sm:$0xf pattern:$0x76325410] }
 0x3f0   : > { %v12737_v63 = vrot.slane %v5667_v24, %v11260_v0  ;;  %v5508_v25 = vrot.slane %v5507_v19, 2  ;;  %10565 = vmatprep.subr.bf16.mxu1 %v11048_v46  ;;  %v12748_v49 = vsel %vm12692_vm9, %v5927_v5, %v5931_v39  ;;  %v5527_v17 = vrot.slane %v5519_v36, %v11260_v0  ;;  %v11023_v56 = vld.sshfl [vmem:[#allocation3 + $0x4] sm:$0xf pattern:$0x76325410]  ;;  %v10861_v1 = vld [vmem:[%s13281_s3 + $0x80] sm:$0xff]  }
 0x3f1   : > { %v6469_v45 = vcombine.high %v9905_v7, %v9905_v7  ;;  %v6289_v41 = vcombine.high %v9894_v48, %v9894_v48  ;;  %v5946_v22 = vrot.slane %v5938_v27, %v11260_v0  ;;  %v6071_v44 = vrot.slane %v6056_v58, 7  ;;  %v11024_v18 = vld.sshfl [vmem:[#allocation3 + $0x8] sm:$0xf pattern:$0x76325410]  ;;  %v10863_v48 = vld [vmem:[%s13281_s3 + $0x88] sm:$0xff]  }
 0x3f2   : > { %v5682_v42 = vcombine.low %v5674_v30, %v12737_v63  ;;  %v5513_v51 = vsel %vm12692_vm9, %v5508_v25, %v5512_v35  ;;  %v6335_v62 = vrot.slane %v6333_v26, 6  ;;  %v6338_v33 = vrot.slane %v6336_v38, 7  ;;  %v11025_v55 = vld.sshfl [vmem:[#allocation3 + $0x10] sm:$0xf pattern:$0x76325410] }
 0x3f3   : > { %v5520_v61 = vcombine.low %v5499_v14, %v5513_v51  ;;  %v5939_v2 = vcombine.low %v5513_v51, %v12748_v49  ;;  %v9876_v3 = vrot.slane %v9872_v57, 9  ;;  %v9909_v6 = vrot.slane %v9905_v7, 9  ;;  %v10862_v14 = vld [vmem:[%s13281_s3 + $0x70] sm:$0xff]   ;;  %v10866_v26 = vld [vmem:[%s13282_s4 + $0x8] sm:$0xff]  }
 0x3f4   : > { %10562 = vmatmul.mubr.msk.bf16.vlgmr.msra.gmra.mrb[56].mxu0 %vm886_vm3, %v5682_v42  ;;  %v6484_v15 = vrot.slane %v6469_v45, 7  ;;  %v6339_v20 = vor.u32 %v6338_v33, %v6335_v62  ;;  %v6342_v29 = vshll.u32 %v6289_v41, 16  ;;  %v5774_v24 = vcombine.low %v11023_v56, %v11022_v23  ;;  %v10864_v42 = vld [vmem:[%s13281_s3 + $0x78] sm:$0xff]  }
 0x3f5   : > { %10574 = vmatpush3.bf16.msra.mxu0 %v10849_v60  ;;  %v12754_v37 = vrot.slane %v5520_v61, %v11260_v0  ;;  %10577 = vmatprep.mubr.msk.bf16.mxu0 %vm11049_vm13, %v11048_v46  ;;  %v5953_v59 = vrot.slane %v5939_v2, %v11260_v0  ;;  %v6072_v4 = vsel %vm12687_vm14, %v9876_v3, %v6071_v44  ;;  %v10865_v61 = vld [vmem:[%s13282_s4] sm:$0xff]   ;;  %v10872_v33 = vld [vmem:[%s13282_s4 + $0x18] sm:$0xff]  }
 0x3f6   : > { %10575 = vmatprep.subr.bf16.mxu0 %v11048_v46  ;;  %v6079_v31 = vcombine.low %v12720_v8, %v6072_v4  ;;  %v12795_v53 = vsel %vm12687_vm14, %v9909_v6, %v6484_v15  ;;  %v6340_v19 = vrot.slane %v6339_v20, 2  ;;  %v6344_v60 = vrot.slane %v6342_v29, 7  ;;  %v10860_v8 = vld [vmem:[%s13281_s3 + $0x58] sm:$0xff]  }
 0x3f7   : > { %v5535_v43 = vcombine.low %v5527_v17, %v12754_v37  ;;  %v5954_v50 = vcombine.low %v5946_v22, %v5953_v59  ;;  %v6078_v11 = vcombine.low %v12702_v16, %v12710_v21  ;;  %v6187_v30 = vcombine.low %v11024_v18, %v11025_v55 }
 0x3f8   : > { %v6492_v25 = vcombine.low %v6072_v4, %v12795_v53  ;;  %v6093_v35 = vrot.slane %v6079_v31, %v11260_v0  ;;  %v12815_v16 = vsel %vm12692_vm9, %v6340_v19, %v6344_v60 }
 0x3f9   : > { %10554 = vmatmul.mubr.msk.bf16.vlgmr.msra.gmra.mrb[52].mxu1 %vm886_vm3, %v5535_v43  ;;  %10576 = vmatpush3.bf16.msra.mxu0 %v10851_v13  ;;  %v6086_v21 = vrot.slane %v6078_v11, %v11260_v0  ;;  %v6352_v39 = vcombine.low %v12748_v49, %v12815_v16  ;;  %v10870_v13 = vld [vmem:[%s13282_s4 + $0x10] sm:$0xff]  }
 0x3fa   : > { %10566 = vmatpush3.bf16.msra.mxu1 %v10850_v10  ;;  %10589 = vmatprep.subr.bf16.mxu0 %v11048_v46  ;;  %v6506_v36 = vrot.slane %v6492_v25, %v11260_v0 }
 0x3fb   : > { %10567 = vmatprep.subr.bf16.mxu1 %v11048_v46  ;;  %10569 = vmatprep.mubr.msk.bf16.mxu1 %vm11049_vm13, %v11048_v46  ;;  %v6094_v5 = vcombine.low %v6086_v21, %v6093_v35  ;;  %v6366_v51 = vrot.slane %v6352_v39, %v11260_v0 }
 0x3fc   : > { %10578 = vmatmul.mubr.msk.bf16.vlgmr.msra.gmra.mrb[60].mxu0 %vm886_vm3, %v5954_v50  ;;  %v6507_v57 = vcombine.low %v12737_v63, %v6506_v36 }
 0x3fd   : > { %10590 = vmatpush3.bf16.msra.mxu0 %v10853_v12  ;;  %10593 = vmatprep.mubr.msk.bf16.mxu0 %vm11049_vm13, %v11048_v46  ;;  %v6367_v63 = vcombine.low %v12754_v37, %v6366_v51 }
 0x3fe   : > { %10568 = vmatpush3.bf16.msra.mxu1 %v10852_v9  ;;  %10591 = vmatprep.subr.bf16.mxu0 %v11048_v46 }
 0x3ff   : > { %10581 = vmatprep.subr.bf16.mxu1 %v11048_v46 }
 0x401   : > { %10570 = vmatmul.mubr.msk.bf16.vlgmr.msra.gmra.mrb[56].mxu1 %vm886_vm3, %v5774_v24  ;;  %10592 = vmatpush3.bf16.msra.mxu0 %v10857_v54 }
 0x402   : > { %10582 = vmatpush3.bf16.msra.mxu1 %v10856_v28  ;;  %10605 = vmatprep.subr.bf16.mxu0 %v11048_v46 }
 0x403   : > { %10583 = vmatprep.subr.bf16.mxu1 %v11048_v46  ;;  %10585 = vmatprep.mubr.msk.bf16.mxu1 %vm11049_vm13, %v11048_v46 }
 0x404   : > { %10594 = vmatmul.mubr.msk.bf16.vlgmr.msra.gmra.mrb[64].mxu0 %vm886_vm3, %v6187_v30 }
 0x405   : > { %10606 = vmatpush3.bf16.msra.mxu0 %v10861_v1  ;;  %10609 = vmatprep.mubr.msk.bf16.mxu0 %vm11049_vm13, %v11048_v46 }
 0x406   : > { %10584 = vmatpush3.bf16.msra.mxu1 %v10860_v8  ;;  %10607 = vmatprep.subr.bf16.mxu0 %v11048_v46 }
 0x407   : > { %10597 = vmatprep.subr.bf16.mxu1 %v11048_v46 }
 0x409   : > { %10586 = vmatmul.mubr.msk.bf16.vlgmr.msra.gmra.mrb[60].mxu1 %vm886_vm3, %v6094_v5  ;;  %10608 = vmatpush3.bf16.msra.mxu0 %v10863_v48 }
 0x40a   : > { %10598 = vmatpush3.bf16.msra.mxu1 %v10862_v14  ;;  %10601 = vmatprep.mubr.msk.bf16.mxu1 %vm11049_vm13, %v11048_v46 }
 0x40b   : > { %10599 = vmatprep.subr.bf16.mxu1 %v11048_v46  ;;  %10621 = vmatprep.subr.bf16.mxu0 %v11048_v46 }
 0x40c   : > { %10610 = vmatmul.mubr.msk.bf16.vlgmr.msra.gmra.mrb[68].mxu0 %vm886_vm3, %v6507_v57 }
 0x40d   : > { %10625 = vmatprep.mubr.msk.bf16.mxu0 %vm11049_vm13, %v11048_v46  ;;  %10622 = vmatpush3.bf16.msra.mxu0 %v10870_v13 }
 0x40e   : > { %10600 = vmatpush3.bf16.msra.mxu1 %v10864_v42  ;;  %10623 = vmatprep.subr.bf16.mxu0 %v11048_v46 }
 0x40f   : > { %10613 = vmatprep.subr.bf16.mxu1 %v11048_v46 }
 0x411   : > { %10602 = vmatmul.mubr.msk.bf16.vlgmr.msra.gmra.mrb[64].mxu1 %vm886_vm3, %v6367_v63  ;;  %10624 = vmatpush3.bf16.msra.mxu0 %v10872_v33 }
 0x412   : > { %10617 = vmatprep.mubr.msk.bf16.mxu1 %vm11049_vm13, %v11048_v46  ;;  %10614 = vmatpush3.bf16.msra.mxu1 %v10865_v61 }
 0x413   : > { %10615 = vmatprep.subr.bf16.mxu1 %v11048_v46  ;;  %10637 = vmatprep.subr.bf16.mxu0 %v11048_v46 }
 0x416   : > { %10616 = vmatpush3.bf16.msra.mxu1 %v10866_v26 }
 0x417   : > { %10629 = vmatprep.subr.bf16.mxu1 %v11048_v46 }
 0x4bd   : > { %v5402_v49 = vpop.f32.mrb[48].mxu1 }
 0x4be   : > { %5409 = vst.msk [vmem:[#allocation4] sm:$0xff] %vm886_vm3, %v5402_v49  ;;  %v10547_v27 = vpop.f32.mrb[49].mxu1 }
 0x4bf   : > { %v5405_v2 = vpop.f32.mrb[50].mxu1 }
 0x4c0   : > { %5410 = vst.msk [vmem:[#allocation4 + $0x8] sm:$0xff] %vm886_vm3, %v5405_v2  ;;  %v10548_v58 = vpop.f32.mrb[51].mxu1 }
 0x4c5   : > { %v5592_v59 = vld [vmem:[#allocation4] sm:$0xff] }
 0x4c7   : > { %v5732_v7 = vpop.f32.mrb[56].mxu0  ;;  %v5593_v41 = vld [vmem:[#allocation4 + $0x8] sm:$0xff] }
 0x4c8   : > { %v10563_v38 = vpop.f32.mrb[57].mxu0 }
 0x4c9   : > { %v5735_v17 = vpop.f32.mrb[58].mxu0 }
 0x4ca   : > { %v10564_v37 = vpop.f32.mrb[59].mxu0 }
 0x4cc   : > { %v5585_v10 = vpop.f32.mrb[52].mxu1 }
 0x4cd   : > { %v5594_v43 = vadd.f32 %v5592_v59, %v5585_v10  ;;  %v10555_v23 = vpop.f32.mrb[53].mxu1 }
 0x4ce   : > { %v5588_v45 = vpop.f32.mrb[54].mxu1 }
 0x4cf   : > { %5596 = vst.msk [vmem:[#allocation4] sm:$0xff] %vm886_vm3, %v5594_v43  ;;  %v5595_v22 = vadd.f32 %v5593_v41, %v5588_v45  ;;  %v10556_v44 = vpop.f32.mrb[55].mxu1  ;;  %v6004_v62 = vpop.f32.mrb[60].mxu0 }
 0x4d0   : > { %v10579_v12 = vpop.f32.mrb[61].mxu0 }
 0x4d1   : > { %5597 = vst.msk [vmem:[#allocation4 + $0x8] sm:$0xff] %vm886_vm3, %v5595_v22  ;;  %v6007_v56 = vpop.f32.mrb[62].mxu0  ;;  %v9917_v22 = vld [vmem:[%s13289_s11] ss:$0 sm:$0xff] }
 0x4d2   : > { %v10580_v50 = vpop.f32.mrb[63].mxu0 }
 0x4d4   : > { %v5824_v9 = vpop.f32.mrb[56].mxu1 }
 0x4d5   : > { %v10571_v18 = vpop.f32.mrb[57].mxu1 }
 0x4d6   : > { %v5739_v55 = vld [vmem:[#allocation4] sm:$0xff]  ;;  %v5827_v3 = vpop.f32.mrb[58].mxu1 }
 0x4d7   : > { %v5741_v6 = vadd.f32 %v5739_v55, %v5732_v7  ;;  %v10572_v15 = vpop.f32.mrb[59].mxu1  ;;  %v6237_v4 = vpop.f32.mrb[64].mxu0 }
 0x4d8   : > { %v5740_v20 = vld [vmem:[#allocation4 + $0x8] sm:$0xff]  ;;  %v10595_v29 = vpop.f32.mrb[65].mxu0 }
 0x4d9   : > { %5743 = vst.msk [vmem:[#allocation4] sm:$0xff] %vm886_vm3, %v5741_v6  ;;  %v5742_v54 = vadd.f32 %v5740_v20, %v5735_v17  ;;  %v6240_v28 = vpop.f32.mrb[66].mxu0 }
 0x4da   : > { %v10596_v24 = vpop.f32.mrb[67].mxu0 }
 0x4db   : > { %5744 = vst.msk [vmem:[#allocation4 + $0x8] sm:$0xff] %vm886_vm3, %v5742_v54 }
 0x4dc   : > { %v6144_v31 = vpop.f32.mrb[60].mxu1 }
 0x4dd   : > { %v10587_v19 = vpop.f32.mrb[61].mxu1 }
 0x4de   : > { %v6147_v60 = vpop.f32.mrb[62].mxu1 }
 0x4df   : > { %v10588_v1 = vpop.f32.mrb[63].mxu1  ;;  %v6557_v11 = vpop.f32.mrb[68].mxu0 }
 0x4e0   : > { %v5831_v30 = vld [vmem:[#allocation4] sm:$0xff]  ;;  %v10611_v8 = vpop.f32.mrb[69].mxu0 }
 0x4e1   : > { %v5833_v25 = vadd.f32 %v5831_v30, %v5824_v9  ;;  %v6560_v35 = vpop.f32.mrb[70].mxu0 }
 0x4e2   : > { %v5832_v21 = vld [vmem:[#allocation4 + $0x8] sm:$0xff]  ;;  %v10612_v48 = vpop.f32.mrb[71].mxu0 }
 0x4e3   : > { %5835 = vst.msk [vmem:[#allocation4] sm:$0xff] %vm886_vm3, %v5833_v25  ;;  %v5834_v14 = vadd.f32 %v5832_v21, %v5827_v3 }
 0x4e4   : > { %v6417_v36 = vpop.f32.mrb[64].mxu1 }
 0x4e5   : > { %5836 = vst.msk [vmem:[#allocation4 + $0x8] sm:$0xff] %vm886_vm3, %v5834_v14  ;;  %v10603_v5 = vpop.f32.mrb[65].mxu1  ;;  %v6647_v14 = vld [vmem:[#allocation3 + $0x4] sm:$0x7] }
 0x4e6   : > { %v6420_v39 = vpop.f32.mrb[66].mxu1 }
 0x4e7   : > { %v10604_v57 = vpop.f32.mrb[67].mxu1 }
 0x4ea   : > { %v6011_v42 = vld [vmem:[#allocation4] sm:$0xff] }
 0x4eb   : > { %v6013_v51 = vadd.f32 %v6011_v42, %v6004_v62 }
 0x4ec   : > { %v6012_v63 = vld [vmem:[#allocation4 + $0x8] sm:$0xff] }
 0x4ed   : > { %6015 = vst.msk [vmem:[#allocation4] sm:$0xff] %vm886_vm3, %v6013_v51  ;;  %v6014_v61 = vadd.f32 %v6012_v63, %v6007_v56  ;;  %v6650_v63 = vld [vmem:[#allocation3 + $0x8] sm:$0x7] }
 0x4ef   : > { %6016 = vst.msk [vmem:[#allocation4 + $0x8] sm:$0xff] %vm886_vm3, %v6014_v61 }
 0x4f4   : > { %v6151_v49 = vld [vmem:[#allocation4] sm:$0xff] }
 0x4f5   : > { %v6153_v26 = vadd.f32 %v6151_v49, %v6144_v31 }
 0x4f6   : > { %v6152_v27 = vld [vmem:[#allocation4 + $0x8] sm:$0xff] }
 0x4f7   : > { %6155 = vst.msk [vmem:[#allocation4] sm:$0xff] %vm886_vm3, %v6153_v26  ;;  %v6154_v2 = vadd.f32 %v6152_v27, %v6147_v60  ;;  %v6653_v27 = vld [vmem:[#allocation3 + $0xc] sm:$0x7] }
 0x4f9   : > { %6156 = vst.msk [vmem:[#allocation4 + $0x8] sm:$0xff] %vm886_vm3, %v6154_v2 }
 0x4fe   : > { %v6244_v58 = vld [vmem:[#allocation4] sm:$0xff] }
 0x4ff   : > { %v6246_v7 = vadd.f32 %v6244_v58, %v6237_v4  ;;  %v6656_v58 = vld [vmem:[#allocation3 + $0x10] sm:$0x7] }
 0x500   : > { %v6245_v38 = vld [vmem:[#allocation4 + $0x8] sm:$0xff] }
 0x501   : > { %6248 = vst.msk [vmem:[#allocation4] sm:$0xff] %vm886_vm3, %v6246_v7  ;;  %v6247_v17 = vadd.f32 %v6245_v38, %v6240_v28 }
 0x503   : > { %6249 = vst.msk [vmem:[#allocation4 + $0x8] sm:$0xff] %vm886_vm3, %v6247_v17 }
 0x508   : > { %v6424_v37 = vld [vmem:[#allocation4] sm:$0xff] }
 0x509   : > { %v6426_v13 = vadd.f32 %v6424_v37, %v6417_v36 }
 0x50a   : > { %v6425_v10 = vld [vmem:[#allocation4 + $0x8] sm:$0xff] }
 0x50b   : > { %6428 = vst.msk [vmem:[#allocation4] sm:$0xff] %vm886_vm3, %v6426_v13  ;;  %v6427_v59 = vadd.f32 %v6425_v10, %v6420_v39 }
 0x50d   : > { %6429 = vst.msk [vmem:[#allocation4 + $0x8] sm:$0xff] %vm886_vm3, %v6427_v59 }
 0x512   : > { %v6564_v43 = vld [vmem:[#allocation4] sm:$0xff] }
 0x513   : > { %v6566_v23 = vadd.f32 %v6564_v43, %v6557_v11 }
 0x514   : > { %v6565_v45 = vld [vmem:[#allocation4 + $0x8] sm:$0xff] }
 0x515   : > { %6568 = vst.msk [vmem:[#allocation4] sm:$0xff] %vm886_vm3, %v6566_v23  ;;  %v6567_v41 = vadd.f32 %v6565_v45, %v6560_v35  ;;  %v10869_v23 = vld [vmem:[%s13282_s4 + $0x20] sm:$0xff]  }
 0x517   : > { %6569 = vst.msk [vmem:[#allocation4 + $0x8] sm:$0xff] %vm886_vm3, %v6567_v41 }
 0x51c   : > { %v6571_v44 = vld [vmem:[#allocation4] sm:$0xff] }
 0x51d   : > { %v6579_v62 = vadd.f32 %v9917_v22, %v6571_v44 }
 0x51e   : > { %v6572_v33 = vld [vmem:[#allocation4 + $0x8] sm:$0xff] }
 0x51f   : > { %v6583_v12 = vmin.f32 %v6579_v62, 0.0  ;;  %v6580_v56 = vadd.f32 %v9917_v22, %v6572_v33  ;;  %vm6581_vm11 = vcmp.gt.f32.partialorder %v6579_v62, 0.0 }
 0x521   : > { %v6585_v50 = vmul.f32 1.442695, %v6583_v12  ;;  %v6584_v9 = vmin.f32 %v6580_v56, 0.0  ;;  %vm6582_vm4 = vcmp.gt.f32.partialorder %v6580_v56, 0.0 }
 0x523   : > { %10997 = vpow2.f32 %v6585_v50  ;;  %v6587_v18 = vmul.f32 1.442695, %v6584_v9 }
 0x525   : > { %10999 = vpow2.f32 %v6587_v18 }
 0x52d   : > { %v10998_v55 = vpop.eup %10997 }
 0x52e   : > { %v9918_v3 = vadd.f32 -1.0, %v10998_v55 }
 0x52f   : > { %v11000_v6 = vpop.eup %10999 }
 0x530   : > { %v6591_v15 = vsel %vm6581_vm11, %v6579_v62, %v9918_v3  ;;  %v9919_v4 = vadd.f32 -1.0, %v11000_v6 }
 0x531   : > { %v6595_v20 = vcombine.high %v6591_v15, %v6591_v15  ;;  %v10228_v29 = vpack.c.bf16 %v6591_v15, %v6591_v15 }
 0x532   : > { %v6592_v54 = vsel %vm6582_vm4, %v6580_v56, %v9919_v4 }
 0x533   : > { %v10229_v28 = vpack.c.bf16 %v6595_v20, %v6595_v20  ;;  %v6616_v24 = vshrl.u32 %v10228_v29, 16  ;;  %v6596_v31 = vcombine.high %v6592_v54, %v6592_v54  ;;  %v10230_v19 = vpack.c.bf16 %v6592_v54, %v6592_v54 }
 0x534   : > { %v6619_v1 = vshll.u32 %v10228_v29, 16 }
 0x535   : > { %v6618_v60 = vrot.slane %v6616_v24, 7  ;;  %v6623_v11 = vshrl.u32 %v10229_v28, 16  ;;  %v10231_v30 = vpack.c.bf16 %v6596_v31, %v6596_v31  ;;  %v6630_v8 = vshrl.u32 %v10230_v19, 16 }
 0x536   : > { %v6626_v21 = vshll.u32 %v10229_v28, 16  ;;  %v6633_v5 = vshll.u32 %v10230_v19, 16 }
 0x537   : > { %v6621_v25 = vor.u32 %v6619_v1, %v6618_v60  ;;  %v6625_v35 = vrot.slane %v6623_v11, 7  ;;  %v6637_v48 = vshrl.u32 %v10231_v30, 16  ;;  %v6632_v36 = vrot.slane %v6630_v8, 7  ;;  %v10871_v11 = vld [vmem:[%s13282_s4 + $0x28] sm:$0xff]  }
 0x538   : > { %v6640_v51 = vshll.u32 %v10231_v30, 16 }
 0x539   : > { %v6628_v39 = vor.u32 %v6626_v21, %v6625_v35  ;;  %v6648_v57 = vsel %vm12654_vm5, %v6621_v25, %v6647_v14  ;;  %v6639_v42 = vrot.slane %v6637_v48, 7  ;;  %v6635_v61 = vor.u32 %v6633_v5, %v6632_v36 }
 0x53a   : > { %6649 = vst [vmem:[#allocation3 + $0x4] sm:$0x7] %v6648_v57 }
 0x53b   : > { %v6651_v49 = vsel %vm12654_vm5, %v6628_v39, %v6650_v63  ;;  %v6642_v26 = vor.u32 %v6640_v51, %v6639_v42  ;;  %v6654_v2 = vsel %vm12654_vm5, %v6635_v61, %v6653_v27 }
 0x53c   : > { %6652 = vst [vmem:[#allocation3 + $0x8] sm:$0x7] %v6651_v49  ;;  %6655 = vst [vmem:[#allocation3 + $0xc] sm:$0x7] %v6654_v2 }
 0x53d   : > { %v6657_v7 = vsel %vm12654_vm5, %v6642_v26, %v6656_v58  ;;  %v10873_v26 = vld [vmem:[%s13282_s4 + $0x40] sm:$0xff]  }
 0x53e   : > { %6658 = vst [vmem:[#allocation3 + $0x10] sm:$0x7] %v6657_v7 }
 0x541   : > { %v11026_v38 = vld.sshfl [vmem:[#allocation3] sm:$0xf pattern:$0x76325410] }
 0x542   : > { %v9939_v17 = vld.sshfl [vmem:[#allocation3 + $0x4] sm:$0x12 pattern:$0x76325410] }
 0x543   : > { %v9940_v37 = vld.sshfl [vmem:[#allocation3 + $0x8] sm:$0x12 pattern:$0x76325410]  ;;  %v6949_v13 = vcombine.high %v9939_v17, %v9939_v17  ;;  %v9943_v43 = vrot.slane %v9939_v17, 9 }
 0x544   : > { %v11027_v10 = vld.sshfl [vmem:[#allocation3 + $0x8] sm:$0xf pattern:$0x76325410]  ;;  %v6957_v59 = vcombine.high %v9940_v37, %v9940_v37  ;;  %v9944_v22 = vrot.slane %v9940_v37, 9 }
 0x545   : > { %v9941_v45 = vld.sshfl [vmem:[#allocation3 + $0xc] sm:$0x12 pattern:$0x76325410]  ;;  %v6972_v41 = vrot.slane %v6949_v13, 7  ;;  %v6687_v3 = vcombine.low %v11026_v38, %v11027_v10 }
 0x546   : > { %v6965_v44 = vcombine.high %v9941_v45, %v9941_v45  ;;  %v6976_v62 = vrot.slane %v6957_v59, 7  ;;  %v9945_v33 = vrot.slane %v9941_v45, 9  ;;  %v9928_v12 = vld.sshfl [vmem:[#allocation3 + $0x4] sm:$0x13 pattern:$0x76325410] }
 0x547   : > { %v12899_v56 = vsel %vm12687_vm14, %v9943_v43, %v6972_v41  ;;  %v9929_v50 = vld.sshfl [vmem:[#allocation3 + $0x8] sm:$0x13 pattern:$0x76325410]  ;;  %v6769_v9 = vcombine.high %v9928_v12, %v9928_v12  ;;  %v6801_v18 = vshrl.u32 %v9928_v12, 16  ;;  %v6804_v55 = vshll.u32 %v9928_v12, 16  ;;  %10618 = vmatmul.mubr.msk.bf16.vlgmr.msra.gmra.mrb[68].mxu1 %vm886_vm3, %v6687_v3 }
 0x548   : > { %v12903_v6 = vsel %vm12687_vm14, %v9944_v22, %v6976_v62  ;;  %v6980_v15 = vrot.slane %v6965_v44, 7  ;;  %v6987_v4 = vcombine.low %v12698_v47, %v12899_v56  ;;  %v9930_v20 = vld.sshfl [vmem:[#allocation3 + $0xc] sm:$0x13 pattern:$0x76325410]  ;;  %v6777_v29 = vcombine.high %v9929_v50, %v9929_v50  ;;  %10630 = vmatpush3.bf16.msra.mxu1 %v10869_v23  ;;  %10633 = vmatprep.mubr.msk.bf16.mxu1 %vm11049_vm13, %v11048_v46  ;;  %v10875_v22 = vld [vmem:[%s13282_s4 + $0x48] sm:$0xff]  }
 0x549   : > { %v6803_v54 = vrot.slane %v6801_v18, 6  ;;  %v6806_v28 = vrot.slane %v6804_v55, 7  ;;  %v9963_v24 = vld.sshfl [vmem:[#allocation3 + $0x10] sm:$0x13 pattern:$0x76325410]  ;;  %v6785_v19 = vcombine.high %v9930_v20, %v9930_v20  ;;  %10631 = vmatprep.subr.bf16.mxu1 %v11048_v46 }
 0x54a   : > { %v12910_v31 = vsel %vm12687_vm14, %v9945_v33, %v6980_v15  ;;  %v6810_v60 = vshll.u32 %v6769_v9, 16  ;;  %v6815_v1 = vshrl.u32 %v9929_v50, 16  ;;  %v6995_v30 = vrot.slane %v6987_v4, %v11260_v0  ;;  %v9974_v44 = vld.sshfl [vmem:[#allocation3 + $0x10] sm:$0x12 pattern:$0x76325410] }
 0x54b   : > { %v6988_v47 = vcombine.low %v12903_v6, %v12910_v31  ;;  %v6807_v8 = vor.u32 %v6806_v28, %v6803_v54  ;;  %v6818_v25 = vshll.u32 %v9929_v50, 16  ;;  %v6824_v21 = vshll.u32 %v6777_v29, 16  ;;  %v10874_v15 = vld [vmem:[%s13282_s4 + $0x30] sm:$0xff]  }
 0x54c   : > { %v6817_v35 = vrot.slane %v6815_v1, 6  ;;  %v6829_v48 = vshrl.u32 %v9930_v20, 16  ;;  %v6832_v14 = vshll.u32 %v9930_v20, 16  ;;  %v6812_v39 = vrot.slane %v6810_v60, 7  ;;  %10632 = vmatpush3.bf16.msra.mxu1 %v10871_v11  ;;  %v10876_v1 = vld [vmem:[%s13282_s4 + $0x38] sm:$0xff]   ;;  %v10879_v11 = vld [vmem:[%s13282_s4 + $0x60] sm:$0xff]  }
 0x54d   : > { %v12922_v36 = vrot.slane %v6988_v47, %v11260_v0  ;;  %v6808_v5 = vrot.slane %v6807_v8, 2  ;;  %v6820_v57 = vrot.slane %v6818_v25, 7  ;;  %v6838_v63 = vshll.u32 %v6785_v19, 16  ;;  %10645 = vmatprep.subr.bf16.mxu1 %v11048_v46 }
 0x54e   : > { %v6831_v42 = vrot.slane %v6829_v48, 6  ;;  %v6834_v51 = vrot.slane %v6832_v14, 7  ;;  %v7197_v61 = vcombine.high %v9963_v24, %v9963_v24  ;;  %v7241_v27 = vshrl.u32 %v9963_v24, 16  ;;  %v10881_v48 = vld [vmem:[%s13282_s4 + $0x68] sm:$0xff]  }
 0x54f   : > { %v6821_v49 = vor.u32 %v6820_v57, %v6817_v35  ;;  %v7003_v2 = vcombine.low %v6995_v30, %v12922_v36  ;;  %v6813_v58 = vsel %vm12692_vm9, %v6808_v5, %v6812_v39  ;;  %v7244_v38 = vshll.u32 %v9963_v24, 16  ;;  %v11028_v54 = vld.sshfl [vmem:[#allocation3 + $0xc] sm:$0xf pattern:$0x76325410] }
 0x550   : > { %v6835_v7 = vor.u32 %v6834_v51, %v6831_v42  ;;  %v6826_v37 = vrot.slane %v6824_v21, 7  ;;  %v7243_v13 = vrot.slane %v7241_v27, 6  ;;  %v6840_v59 = vrot.slane %v6838_v63, 7  ;;  %v10880_v21 = vld [vmem:[%s13282_s4 + $0x50] sm:$0xff]   ;;  %v10882_v57 = vld [vmem:[%s13282_s4 + $0x58] sm:$0xff]   ;;  %v10885_v42 = vld [vmem:[%s13282_s4 + $0x80] sm:$0xff]  }
 0x551   : > { %v6822_v17 = vrot.slane %v6821_v49, 2  ;;  %10634 = vmatmul.mubr.msk.bf16.vlgmr.msra.gmra.mrb[72].mxu1 %vm886_vm3, %v7003_v2  ;;  %v7246_v43 = vrot.slane %v7244_v38, 7  ;;  %v7250_v23 = vshll.u32 %v7197_v61, 16  ;;  %v6847_v41 = vcombine.low %v12706_v40, %v6813_v58  ;;  %v10886_v63 = vld [vmem:[%s13282_s4 + $0x70] sm:$0xff]   ;;  %v10887_v61 = vld [vmem:[%s13282_s4 + $0x88] sm:$0xff]   ;;  %v10888_v27 = vld [vmem:[%s13282_s4 + $0x78] sm:$0xff]  }
 0x552   : > { %v6836_v10 = vrot.slane %v6835_v7, 2  ;;  %10646 = vmatpush3.bf16.msra.mxu1 %v10873_v26  ;;  %10649 = vmatprep.mubr.msk.bf16.mxu1 %vm11049_vm13, %v11048_v46  ;;  %v7377_v18 = vcombine.high %v9974_v44, %v9974_v44  ;;  %v11029_v60 = vld.sshfl [vmem:[#allocation3 + $0x4] sm:$0xf pattern:$0x76325410]  ;;  %v9978_v47 = vrot.slane %v9974_v44, 9  ;;  %v7399_v39 = vcombine.low %v12899_v56, %v12903_v6 }
 0x553   : > { %v6827_v45 = vsel %vm12692_vm9, %v6822_v17, %v6826_v37  ;;  %10647 = vmatprep.subr.bf16.mxu1 %v11048_v46  ;;  %v7247_v33 = vor.u32 %v7246_v43, %v7243_v13  ;;  %v7252_v9 = vrot.slane %v7250_v23, 7  ;;  %v6855_v40 = vrot.slane %v6847_v41, %v11260_v0  ;;  %v11030_v8 = vld.sshfl [vmem:[#allocation3 + $0x10] sm:$0xf pattern:$0x76325410]  ;;  %v10890_v13 = vld [vmem:[%s13283_s5 + $0x8] sm:$0xff]  }
 0x554   : > { %v6841_v62 = vsel %vm12692_vm9, %v6836_v10, %v6840_v59  ;;  %v7259_v3 = vcombine.low %v6813_v58, %v6827_v45  ;;  %v7392_v28 = vrot.slane %v7377_v18, 7  ;;  %v11031_v35 = vld.sshfl [vmem:[#allocation3 + $0x8] sm:$0xf pattern:$0x76325410]  ;;  %v7095_v14 = vcombine.low %v11029_v60, %v11028_v54  ;;  %v10889_v37 = vld [vmem:[%s13283_s5] sm:$0xff]  }
 0x555   : > { %v6848_v12 = vcombine.low %v6827_v45, %v6841_v62  ;;  %v7248_v50 = vrot.slane %v7247_v33, 2  ;;  %v7407_v6 = vrot.slane %v7399_v39, %v11260_v0  ;;  %v10894_v45 = vld [vmem:[%s13283_s5 + $0x10] sm:$0xff]   ;;  %v10896_v18 = vld [vmem:[%s13283_s5 + $0x18] sm:$0xff]  }
 0x556   : > { %10648 = vmatpush3.bf16.msra.mxu1 %v10875_v22  ;;  %v7267_v24 = vrot.slane %v7259_v3, %v11260_v0  ;;  %v7393_v25 = vsel %vm12687_vm14, %v9978_v47, %v7392_v28 }
 0x557   : > { %v12945_v55 = vrot.slane %v6848_v12, %v11260_v0  ;;  %v7253_v4 = vsel %vm12692_vm9, %v7248_v50, %v7252_v9  ;;  %10661 = vmatprep.subr.bf16.mxu1 %v11048_v46  ;;  %v7400_v5 = vcombine.low %v12910_v31, %v7393_v25  ;;  %v7507_v31 = vcombine.low %v11031_v35, %v11030_v8 }
 0x558   : > { %v7260_v29 = vcombine.low %v6841_v62, %v7253_v4  ;;  %v7812_v56 = vcombine.low %v7393_v25, %v12795_v53  ;;  %v7672_v26 = vcombine.low %v7253_v4, %v12815_v16 }
 0x559   : > { %v6863_v20 = vcombine.low %v6855_v40, %v12945_v55  ;;  %v7414_v51 = vrot.slane %v7400_v5, %v11260_v0 }
 0x55a   : > { %v7274_v19 = vrot.slane %v7260_v29, %v11260_v0  ;;  %v7826_v53 = vrot.slane %v7812_v56, %v11260_v0  ;;  %v7686_v16 = vrot.slane %v7672_v26, %v11260_v0 }
 0x55b   : > { %10626 = vmatmul.mubr.msk.bf16.vlgmr.msra.gmra.mrb[72].mxu0 %vm886_vm3, %v6863_v20  ;;  %v7415_v49 = vcombine.low %v7407_v6, %v7414_v51 }
 0x55c   : > { %10638 = vmatpush3.bf16.msra.mxu0 %v10874_v15  ;;  %10641 = vmatprep.mubr.msk.bf16.mxu0 %vm11049_vm13, %v11048_v46  ;;  %v7275_v30 = vcombine.low %v7267_v24, %v7274_v19  ;;  %v7827_v2 = vcombine.low %v12922_v36, %v7826_v53  ;;  %v7687_v58 = vcombine.low %v12945_v55, %v7686_v16 }
 0x55d   : > { %10639 = vmatprep.subr.bf16.mxu0 %v11048_v46 }
 0x55e   : > { %10650 = vmatmul.mubr.msk.bf16.vlgmr.msra.gmra.mrb[76].mxu1 %vm886_vm3, %v7275_v30 }
 0x55f   : > { %10662 = vmatpush3.bf16.msra.mxu1 %v10879_v11  ;;  %10665 = vmatprep.mubr.msk.bf16.mxu1 %vm11049_vm13, %v11048_v46 }
 0x560   : > { %10640 = vmatpush3.bf16.msra.mxu0 %v10876_v1  ;;  %10663 = vmatprep.subr.bf16.mxu1 %v11048_v46 }
 0x561   : > { %10653 = vmatprep.subr.bf16.mxu0 %v11048_v46 }
 0x563   : > { %10642 = vmatmul.mubr.msk.bf16.vlgmr.msra.gmra.mrb[76].mxu0 %vm886_vm3, %v7095_v14  ;;  %10664 = vmatpush3.bf16.msra.mxu1 %v10881_v48 }
 0x564   : > { %10654 = vmatpush3.bf16.msra.mxu0 %v10880_v21  ;;  %10657 = vmatprep.mubr.msk.bf16.mxu0 %vm11049_vm13, %v11048_v46 }
 0x565   : > { %10655 = vmatprep.subr.bf16.mxu0 %v11048_v46  ;;  %10677 = vmatprep.subr.bf16.mxu1 %v11048_v46 }
 0x566   : > { %10666 = vmatmul.mubr.msk.bf16.vlgmr.msra.gmra.mrb[80].mxu1 %vm886_vm3, %v7507_v31 }
 0x567   : > { %10678 = vmatpush3.bf16.msra.mxu1 %v10885_v42  ;;  %10681 = vmatprep.mubr.msk.bf16.mxu1 %vm11049_vm13, %v11048_v46 }
 0x568   : > { %10656 = vmatpush3.bf16.msra.mxu0 %v10882_v57  ;;  %10679 = vmatprep.subr.bf16.mxu1 %v11048_v46 }
 0x569   : > { %10669 = vmatprep.subr.bf16.mxu0 %v11048_v46 }
 0x56b   : > { %10658 = vmatmul.mubr.msk.bf16.vlgmr.msra.gmra.mrb[80].mxu0 %vm886_vm3, %v7415_v49  ;;  %10680 = vmatpush3.bf16.msra.mxu1 %v10887_v61 }
 0x56c   : > { %10670 = vmatpush3.bf16.msra.mxu0 %v10886_v63  ;;  %10673 = vmatprep.mubr.msk.bf16.mxu0 %vm11049_vm13, %v11048_v46 }
 0x56d   : > { %10671 = vmatprep.subr.bf16.mxu0 %v11048_v46  ;;  %10693 = vmatprep.subr.bf16.mxu1 %v11048_v46 }
 0x56e   : > { %10682 = vmatmul.mubr.msk.bf16.vlgmr.msra.gmra.mrb[84].mxu1 %vm886_vm3, %v7827_v2 }
 0x56f   : > { %10697 = vmatprep.mubr.msk.bf16.mxu1 %vm11049_vm13, %v11048_v46  ;;  %10694 = vmatpush3.bf16.msra.mxu1 %v10894_v45 }
 0x570   : > { %10672 = vmatpush3.bf16.msra.mxu0 %v10888_v27  ;;  %10695 = vmatprep.subr.bf16.mxu1 %v11048_v46 }
 0x571   : > { %10685 = vmatprep.subr.bf16.mxu0 %v11048_v46 }
 0x573   : > { %10674 = vmatmul.mubr.msk.bf16.vlgmr.msra.gmra.mrb[84].mxu0 %vm886_vm3, %v7687_v58  ;;  %10696 = vmatpush3.bf16.msra.mxu1 %v10896_v18 }
 0x574   : > { %10689 = vmatprep.mubr.msk.bf16.mxu0 %vm11049_vm13, %v11048_v46  ;;  %10686 = vmatpush3.bf16.msra.mxu0 %v10889_v37 }
 0x575   : > { %10687 = vmatprep.subr.bf16.mxu0 %v11048_v46  ;;  %10709 = vmatprep.subr.bf16.mxu1 %v11048_v46 }
 0x578   : > { %10688 = vmatpush3.bf16.msra.mxu0 %v10890_v13 }
 0x579   : > { %10701 = vmatprep.subr.bf16.mxu0 %v11048_v46 }
 0x61a   : > { %v6737_v36 = vpop.f32.mrb[68].mxu1 }
 0x61b   : > { %6744 = vst.msk [vmem:[#allocation4] sm:$0xff] %vm886_vm3, %v6737_v36  ;;  %v10619_v7 = vpop.f32.mrb[69].mxu1 }
 0x61c   : > { %v6740_v38 = vpop.f32.mrb[70].mxu1 }
 0x61d   : > { %6745 = vst.msk [vmem:[#allocation4 + $0x8] sm:$0xff] %vm886_vm3, %v6740_v38  ;;  %v10620_v17 = vpop.f32.mrb[71].mxu1 }
 0x622   : > { %v6920_v22 = vld [vmem:[#allocation4] sm:$0xff] }
 0x624   : > { %v7053_v10 = vpop.f32.mrb[72].mxu1  ;;  %v6921_v12 = vld [vmem:[#allocation4 + $0x8] sm:$0xff] }
 0x625   : > { %v10635_v59 = vpop.f32.mrb[73].mxu1 }
 0x626   : > { %v7056_v43 = vpop.f32.mrb[74].mxu1 }
 0x627   : > { %v10636_v23 = vpop.f32.mrb[75].mxu1 }
 0x62e   : > { %v6913_v41 = vpop.f32.mrb[72].mxu0 }
 0x62f   : > { %v6922_v44 = vadd.f32 %v6920_v22, %v6913_v41  ;;  %v10627_v62 = vpop.f32.mrb[73].mxu0 }
 0x630   : > { %v6916_v33 = vpop.f32.mrb[74].mxu0 }
 0x631   : > { %6924 = vst.msk [vmem:[#allocation4] sm:$0xff] %vm886_vm3, %v6922_v44  ;;  %v6923_v50 = vadd.f32 %v6921_v12, %v6916_v33  ;;  %v10628_v9 = vpop.f32.mrb[75].mxu0  ;;  %v7325_v40 = vpop.f32.mrb[76].mxu1  ;;  %v10019_v44 = vld [vmem:[%s13290_s12] ss:$0 sm:$0xff] }
 0x632   : > { %v10651_v55 = vpop.f32.mrb[77].mxu1 }
 0x633   : > { %6925 = vst.msk [vmem:[#allocation4 + $0x8] sm:$0xff] %vm886_vm3, %v6923_v50  ;;  %v7328_v3 = vpop.f32.mrb[78].mxu1 }
 0x634   : > { %v10652_v15 = vpop.f32.mrb[79].mxu1 }
 0x636   : > { %v7145_v4 = vpop.f32.mrb[76].mxu0 }
 0x637   : > { %v10643_v20 = vpop.f32.mrb[77].mxu0 }
 0x638   : > { %v7060_v29 = vld [vmem:[#allocation4] sm:$0xff]  ;;  %v7148_v54 = vpop.f32.mrb[78].mxu0 }
 0x639   : > { %v7062_v28 = vadd.f32 %v7060_v29, %v7053_v10  ;;  %v10644_v24 = vpop.f32.mrb[79].mxu0  ;;  %v7557_v60 = vpop.f32.mrb[80].mxu1 }
 0x63a   : > { %v7061_v19 = vld [vmem:[#allocation4 + $0x8] sm:$0xff]  ;;  %v10667_v11 = vpop.f32.mrb[81].mxu1 }
 0x63b   : > { %7064 = vst.msk [vmem:[#allocation4] sm:$0xff] %vm886_vm3, %v7062_v28  ;;  %v7063_v1 = vadd.f32 %v7061_v19, %v7056_v43  ;;  %v7560_v47 = vpop.f32.mrb[82].mxu1 }
 0x63c   : > { %v10668_v30 = vpop.f32.mrb[83].mxu1 }
 0x63d   : > { %7065 = vst.msk [vmem:[#allocation4 + $0x8] sm:$0xff] %vm886_vm3, %v7063_v1 }
 0x63e   : > { %v7465_v8 = vpop.f32.mrb[80].mxu0 }
 0x63f   : > { %v10659_v25 = vpop.f32.mrb[81].mxu0 }
 0x640   : > { %v7468_v35 = vpop.f32.mrb[82].mxu0 }
 0x641   : > { %v10660_v21 = vpop.f32.mrb[83].mxu0  ;;  %v7877_v14 = vpop.f32.mrb[84].mxu1 }
 0x642   : > { %v7152_v48 = vld [vmem:[#allocation4] sm:$0xff]  ;;  %v10683_v39 = vpop.f32.mrb[85].mxu1 }
 0x643   : > { %v7154_v5 = vadd.f32 %v7152_v48, %v7145_v4  ;;  %v7880_v42 = vpop.f32.mrb[86].mxu1 }
 0x644   : > { %v7153_v57 = vld [vmem:[#allocation4 + $0x8] sm:$0xff]  ;;  %v10684_v51 = vpop.f32.mrb[87].mxu1 }
 0x645   : > { %7156 = vst.msk [vmem:[#allocation4] sm:$0xff] %vm886_vm3, %v7154_v5  ;;  %v7155_v31 = vadd.f32 %v7153_v57, %v7148_v54  ;;  %v7967_v57 = vld [vmem:[#allocation3 + $0x4] sm:$0x7] }
 0x646   : > { %v7737_v56 = vpop.f32.mrb[84].mxu0 }
 0x647   : > { %7157 = vst.msk [vmem:[#allocation4 + $0x8] sm:$0xff] %vm886_vm3, %v7155_v31  ;;  %v10675_v6 = vpop.f32.mrb[85].mxu0 }
 0x648   : > { %v7740_v63 = vpop.f32.mrb[86].mxu0 }
 0x649   : > { %v10676_v61 = vpop.f32.mrb[87].mxu0 }
 0x64c   : > { %v7332_v49 = vld [vmem:[#allocation4] sm:$0xff] }
 0x64d   : > { %v7334_v53 = vadd.f32 %v7332_v49, %v7325_v40 }
 0x64e   : > { %v7333_v26 = vld [vmem:[#allocation4 + $0x8] sm:$0xff] }
 0x64f   : > { %7336 = vst.msk [vmem:[#allocation4] sm:$0xff] %vm886_vm3, %v7334_v53  ;;  %v7335_v27 = vadd.f32 %v7333_v26, %v7328_v3  ;;  %v10040_v53 = vld.sshfl [vmem:[#allocation3] sm:$0x12 pattern:$0x76325410] }
 0x650   : > { %v7970_v26 = vld [vmem:[#allocation3 + $0x8] sm:$0x7] }
 0x651   : > { %7337 = vst.msk [vmem:[#allocation4 + $0x8] sm:$0xff] %vm886_vm3, %v7335_v27 }
 0x656   : > { %v7472_v2 = vld [vmem:[#allocation4] sm:$0xff] }
 0x657   : > { %v7474_v16 = vadd.f32 %v7472_v2, %v7465_v8 }
 0x658   : > { %v7473_v58 = vld [vmem:[#allocation4 + $0x8] sm:$0xff] }
 0x659   : > { %7476 = vst.msk [vmem:[#allocation4] sm:$0xff] %vm886_vm3, %v7474_v16  ;;  %v7475_v36 = vadd.f32 %v7473_v58, %v7468_v35 }
 0x65b   : > { %7477 = vst.msk [vmem:[#allocation4 + $0x8] sm:$0xff] %vm886_vm3, %v7475_v36  ;;  %v7973_v36 = vld [vmem:[#allocation3 + $0xc] sm:$0x7] }
 0x660   : > { %v7564_v7 = vld [vmem:[#allocation4] sm:$0xff] }
 0x661   : > { %v7566_v38 = vadd.f32 %v7564_v7, %v7557_v60 }
 0x662   : > { %v7565_v17 = vld [vmem:[#allocation4 + $0x8] sm:$0xff] }
 0x663   : > { %7568 = vst.msk [vmem:[#allocation4] sm:$0xff] %vm886_vm3, %v7566_v38  ;;  %v7567_v37 = vadd.f32 %v7565_v17, %v7560_v47  ;;  %v10029_v47 = vld.sshfl [vmem:[#allocation3] sm:$0x13 pattern:$0x76325410]  ;;  %v8261_v17 = vcombine.high %v10040_v53, %v10040_v53 }
 0x664   : > { %v8107_v51 = vshrl.u32 %v10029_v47, 16  ;;  %v8081_v2 = vcombine.high %v10029_v47, %v10029_v47  ;;  %v7976_v38 = vld [vmem:[#allocation3 + $0x10] sm:$0x7] }
 0x665   : > { %7569 = vst.msk [vmem:[#allocation4 + $0x8] sm:$0xff] %vm886_vm3, %v7567_v37 }
 0x666   : > { %v8109_v37 = vrot.slane %v8107_v51, 6 }
 0x66a   : > { %v7744_v13 = vld [vmem:[#allocation4] sm:$0xff] }
 0x66b   : > { %v7746_v10 = vadd.f32 %v7744_v13, %v7737_v56  ;;  %v8110_v56 = vshll.u32 %v10029_v47, 16 }
 0x66c   : > { %v7745_v59 = vld [vmem:[#allocation4 + $0x8] sm:$0xff] }
 0x66d   : > { %7748 = vst.msk [vmem:[#allocation4] sm:$0xff] %vm886_vm3, %v7746_v10  ;;  %v7747_v43 = vadd.f32 %v7745_v59, %v7740_v63  ;;  %v8112_v13 = vrot.slane %v8110_v56, 7  ;;  %v13072_v59 = vshll.u32 %v8081_v2, 16 }
 0x66f   : > { %7749 = vst.msk [vmem:[#allocation4 + $0x8] sm:$0xff] %vm886_vm3, %v7747_v43  ;;  %v10044_v43 = vrot.slane %v10040_v53, 9 }
 0x674   : > { %v7884_v23 = vld [vmem:[#allocation4] sm:$0xff] }
 0x675   : > { %v7886_v45 = vadd.f32 %v7884_v23, %v7877_v14  ;;  %v8288_v23 = vrot.slane %v8261_v17, 7 }
 0x676   : > { %v7885_v41 = vld [vmem:[#allocation4 + $0x8] sm:$0xff] }
 0x677   : > { %7888 = vst.msk [vmem:[#allocation4] sm:$0xff] %vm886_vm3, %v7886_v45  ;;  %v7887_v22 = vadd.f32 %v7885_v41, %v7880_v42  ;;  %v8113_v45 = vor.u32 %v8112_v13, %v8109_v37 }
 0x679   : > { %7889 = vst.msk [vmem:[#allocation4 + $0x8] sm:$0xff] %vm886_vm3, %v7887_v22 }
 0x67e   : > { %v7891_v62 = vld [vmem:[#allocation4] sm:$0xff] }
 0x67f   : > { %v7899_v33 = vadd.f32 %v10019_v44, %v7891_v62 }
 0x680   : > { %v7892_v12 = vld [vmem:[#allocation4 + $0x8] sm:$0xff] }
 0x681   : > { %v7903_v50 = vmin.f32 %v7899_v33, 0.0  ;;  %v7900_v9 = vadd.f32 %v10019_v44, %v7892_v12  ;;  %vm7901_vm1 = vcmp.gt.f32.partialorder %v7899_v33, 0.0  ;;  %v8118_v44 = vrot.slane %v13072_v59, 7 }
 0x683   : > { %v7905_v18 = vmul.f32 1.442695, %v7903_v50  ;;  %v7904_v40 = vmin.f32 %v7900_v9, 0.0  ;;  %vm7902_vm12 = vcmp.gt.f32.partialorder %v7900_v9, 0.0 }
 0x685   : > { %11001 = vpow2.f32 %v7905_v18  ;;  %v7907_v55 = vmul.f32 1.442695, %v7904_v40  ;;  %v8114_v18 = vrot.slane %v8113_v45, 2 }
 0x687   : > { %11003 = vpow2.f32 %v7907_v55  ;;  %v8289_v55 = vsel %vm12687_vm14, %v10044_v43, %v8288_v23  ;;  %v8119_v37 = vsel %vm12692_vm9, %v8114_v18, %v8118_v44 }
 0x68f   : > { %v11002_v3 = vpop.eup %11001 }
 0x690   : > { %v10020_v15 = vadd.f32 -1.0, %v11002_v3 }
 0x691   : > { %v11004_v4 = vpop.eup %11003 }
 0x692   : > { %v7911_v20 = vsel %vm7901_vm1, %v7899_v33, %v10020_v15  ;;  %v10021_v29 = vadd.f32 -1.0, %v11004_v4 }
 0x693   : > { %v7915_v54 = vcombine.high %v7911_v20, %v7911_v20  ;;  %v10232_v28 = vpack.c.bf16 %v7911_v20, %v7911_v20 }
 0x694   : > { %v7912_v24 = vsel %vm7902_vm12, %v7900_v9, %v10021_v29 }
 0x695   : > { %v10233_v19 = vpack.c.bf16 %v7915_v54, %v7915_v54  ;;  %v7936_v60 = vshrl.u32 %v10232_v28, 16  ;;  %v7916_v1 = vcombine.high %v7912_v24, %v7912_v24  ;;  %v10234_v11 = vpack.c.bf16 %v7912_v24, %v7912_v24 }
 0x696   : > { %v7939_v8 = vshll.u32 %v10232_v28, 16 }
 0x697   : > { %v7938_v30 = vrot.slane %v7936_v60, 7  ;;  %v7943_v25 = vshrl.u32 %v10233_v19, 16  ;;  %v10235_v35 = vpack.c.bf16 %v7916_v1, %v7916_v1  ;;  %v7950_v21 = vshrl.u32 %v10234_v11, 16 }
 0x698   : > { %v7946_v5 = vshll.u32 %v10233_v19, 16  ;;  %v7953_v31 = vshll.u32 %v10234_v11, 16 }
 0x699   : > { %v7941_v48 = vor.u32 %v7939_v8, %v7938_v30  ;;  %v7945_v14 = vrot.slane %v7943_v25, 7  ;;  %v7957_v39 = vshrl.u32 %v10235_v35, 16  ;;  %v7952_v42 = vrot.slane %v7950_v21, 7 }
 0x69a   : > { %v7960_v49 = vshll.u32 %v10235_v35, 16 }
 0x69b   : > { %v7948_v6 = vor.u32 %v7946_v5, %v7945_v14  ;;  %v7968_v63 = vsel %vm12654_vm5, %v7941_v48, %v7967_v57  ;;  %v7959_v61 = vrot.slane %v7957_v39, 7  ;;  %v7955_v27 = vor.u32 %v7953_v31, %v7952_v42  ;;  %v10895_v31 = vld [vmem:[%s13283_s5 + $0x28] sm:$0xff]  }
 0x69c   : > { %7969 = vst [vmem:[#allocation3 + $0x4] sm:$0x7] %v7968_v63 }
 0x69d   : > { %v7971_v16 = vsel %vm12654_vm5, %v7948_v6, %v7970_v26  ;;  %v7962_v58 = vor.u32 %v7960_v49, %v7959_v61  ;;  %v7974_v7 = vsel %vm12654_vm5, %v7955_v27, %v7973_v36 }
 0x69e   : > { %7972 = vst [vmem:[#allocation3 + $0x8] sm:$0x7] %v7971_v16  ;;  %7975 = vst [vmem:[#allocation3 + $0xc] sm:$0x7] %v7974_v7 }
 0x69f   : > { %v7977_v10 = vsel %vm12654_vm5, %v7962_v58, %v7976_v38 }
 0x6a0   : > { %7978 = vst [vmem:[#allocation3 + $0x10] sm:$0x7] %v7977_v10  ;;  %v10897_v10 = vld [vmem:[%s13283_s5 + $0x40] sm:$0xff]  }
 0x6a3   : > { %v11032_v41 = vld.sshfl [vmem:[#allocation3] sm:$0xf pattern:$0x76325410] }
 0x6a4   : > { %v10041_v22 = vld.sshfl [vmem:[#allocation3 + $0x4] sm:$0x12 pattern:$0x76325410] }
 0x6a5   : > { %v10042_v62 = vld.sshfl [vmem:[#allocation3 + $0x8] sm:$0x12 pattern:$0x76325410]  ;;  %v8269_v33 = vcombine.high %v10041_v22, %v10041_v22  ;;  %v10045_v9 = vrot.slane %v10041_v22, 9 }
 0x6a6   : > { %v11033_v12 = vld.sshfl [vmem:[#allocation3 + $0x8] sm:$0xf pattern:$0x76325410]  ;;  %v8277_v50 = vcombine.high %v10042_v62, %v10042_v62  ;;  %v10046_v15 = vrot.slane %v10042_v62, 9 }
 0x6a7   : > { %v10043_v40 = vld.sshfl [vmem:[#allocation3 + $0xc] sm:$0x12 pattern:$0x76325410]  ;;  %v8292_v3 = vrot.slane %v8269_v33, 7  ;;  %v8007_v11 = vcombine.low %v11032_v41, %v11033_v12 }
 0x6a8   : > { %v8285_v4 = vcombine.high %v10043_v40, %v10043_v40  ;;  %v8296_v20 = vrot.slane %v8277_v50, 7  ;;  %v10047_v29 = vrot.slane %v10043_v40, 9  ;;  %v10030_v54 = vld.sshfl [vmem:[#allocation3 + $0x4] sm:$0x13 pattern:$0x76325410] }
 0x6a9   : > { %v13082_v28 = vsel %vm12687_vm14, %v10045_v9, %v8292_v3  ;;  %v10031_v24 = vld.sshfl [vmem:[#allocation3 + $0x8] sm:$0x13 pattern:$0x76325410]  ;;  %v8089_v19 = vcombine.high %v10030_v54, %v10030_v54  ;;  %v8121_v60 = vshrl.u32 %v10030_v54, 16  ;;  %v8124_v1 = vshll.u32 %v10030_v54, 16  ;;  %10690 = vmatmul.mubr.msk.bf16.vlgmr.msra.gmra.mrb[88].mxu0 %vm886_vm3, %v8007_v11 }
 0x6aa   : > { %v13086_v47 = vsel %vm12687_vm14, %v10046_v15, %v8296_v20  ;;  %v8300_v30 = vrot.slane %v8285_v4, 7  ;;  %v8307_v8 = vcombine.low %v8289_v55, %v13082_v28  ;;  %v10032_v25 = vld.sshfl [vmem:[#allocation3 + $0xc] sm:$0x13 pattern:$0x76325410]  ;;  %v8097_v35 = vcombine.high %v10031_v24, %v10031_v24  ;;  %10702 = vmatpush3.bf16.msra.mxu0 %v10893_v32  ;;  %10705 = vmatprep.mubr.msk.bf16.mxu0 %vm11049_vm13, %v11048_v46  ;;  %v10899_v55 = vld [vmem:[%s13283_s5 + $0x48] sm:$0xff]  }
 0x6ab   : > { %v8123_v21 = vrot.slane %v8121_v60, 6  ;;  %v8126_v48 = vrot.slane %v8124_v1, 7  ;;  %v10065_v14 = vld.sshfl [vmem:[#allocation3 + $0x10] sm:$0x13 pattern:$0x76325410]  ;;  %v8105_v39 = vcombine.high %v10032_v25, %v10032_v25  ;;  %10703 = vmatprep.subr.bf16.mxu0 %v11048_v46 }
 0x6ac   : > { %v13092_v5 = vsel %vm12687_vm14, %v10047_v29, %v8300_v30  ;;  %v8130_v57 = vshll.u32 %v8089_v19, 16  ;;  %v8135_v42 = vshrl.u32 %v10031_v24, 16  ;;  %v8315_v56 = vrot.slane %v8307_v8, %v11260_v0  ;;  %v10098_v22 = vld.sshfl [vmem:[#allocation3 + $0x14] sm:$0x13 pattern:$0x76325410] }
 0x6ad   : > { %v8308_v51 = vcombine.low %v13086_v47, %v13092_v5  ;;  %v8127_v6 = vor.u32 %v8126_v48, %v8123_v21  ;;  %v8138_v63 = vshll.u32 %v10031_v24, 16  ;;  %v8144_v49 = vshll.u32 %v8097_v35, 16  ;;  %v10076_v3 = vld.sshfl [vmem:[#allocation3 + $0x10] sm:$0x12 pattern:$0x76325410] }
 0x6ae   : > { %v8137_v61 = vrot.slane %v8135_v42, 6  ;;  %v8149_v53 = vshrl.u32 %v10032_v25, 16  ;;  %v8152_v26 = vshll.u32 %v10032_v25, 16  ;;  %v8132_v16 = vrot.slane %v8130_v57, 7  ;;  %10704 = vmatpush3.bf16.msra.mxu0 %v10895_v31  ;;  %v10898_v25 = vld [vmem:[%s13283_s5 + $0x30] sm:$0xff]  }
 0x6af   : > { %v13104_v27 = vrot.slane %v8308_v51, %v11260_v0  ;;  %v8128_v2 = vrot.slane %v8127_v6, 2  ;;  %v8140_v58 = vrot.slane %v8138_v63, 7  ;;  %v8158_v38 = vshll.u32 %v8105_v39, 16  ;;  %10717 = vmatprep.subr.bf16.mxu0 %v11048_v46 }
 0x6b0   : > { %v8151_v36 = vrot.slane %v8149_v53, 6  ;;  %v8154_v7 = vrot.slane %v8152_v26, 7  ;;  %v8517_v17 = vcombine.high %v10065_v14, %v10065_v14  ;;  %v8561_v59 = vshrl.u32 %v10065_v14, 16 }
 0x6b1   : > { %v8141_v13 = vor.u32 %v8140_v58, %v8137_v61  ;;  %v8323_v43 = vcombine.low %v8315_v56, %v13104_v27  ;;  %v8133_v23 = vsel %vm12692_vm9, %v8128_v2, %v8132_v16  ;;  %v8564_v41 = vshll.u32 %v10065_v14, 16  ;;  %v10109_v29 = vld.sshfl [vmem:[#allocation3 + $0x14] sm:$0x12 pattern:$0x76325410]  ;;  %v10900_v61 = vld [vmem:[%s13283_s5 + $0x38] sm:$0xff]  }
 0x6b2   : > { %v8155_v45 = vor.u32 %v8154_v7, %v8151_v36  ;;  %v8146_v33 = vrot.slane %v8144_v49, 7  ;;  %v8563_v12 = vrot.slane %v8561_v59, 6  ;;  %v8160_v50 = vrot.slane %v8158_v38, 7  ;;  %v10903_v49 = vld [vmem:[%s13283_s5 + $0x60] sm:$0xff]  }
 0x6b3   : > { %v8142_v62 = vrot.slane %v8141_v13, 2  ;;  %10706 = vmatmul.mubr.msk.bf16.vlgmr.msra.gmra.mrb[92].mxu0 %vm886_vm3, %v8323_v43  ;;  %v8566_v9 = vrot.slane %v8564_v41, 7  ;;  %v8570_v18 = vshll.u32 %v8517_v17, 16  ;;  %v8167_v40 = vcombine.low %v8119_v37, %v8133_v23  ;;  %v10904_v37 = vld [vmem:[%s13283_s5 + $0x50] sm:$0xff]   ;;  %v10905_v13 = vld [vmem:[%s13283_s5 + $0x68] sm:$0xff]  }
 0x6b4   : > { %v8156_v44 = vrot.slane %v8155_v45, 2  ;;  %10718 = vmatpush3.bf16.msra.mxu0 %v10897_v10  ;;  %10721 = vmatprep.mubr.msk.bf16.mxu0 %vm11049_vm13, %v11048_v46  ;;  %v8973_v54 = vshrl.u32 %v10098_v22, 16  ;;  %v8697_v60 = vcombine.high %v10076_v3, %v10076_v3  ;;  %v8976_v1 = vshll.u32 %v10098_v22, 16 }
 0x6b5   : > { %v8147_v32 = vsel %vm12692_vm9, %v8142_v62, %v8146_v33  ;;  %10719 = vmatprep.subr.bf16.mxu0 %v11048_v46  ;;  %v8567_v4 = vor.u32 %v8566_v9, %v8563_v12  ;;  %v8572_v19 = vrot.slane %v8570_v18, 7  ;;  %v8175_v11 = vrot.slane %v8167_v40, %v11260_v0  ;;  %v11034_v14 = vld.sshfl [vmem:[#allocation3 + $0xc] sm:$0xf pattern:$0x76325410]  ;;  %v10910_v12 = vld [vmem:[%s13283_s5 + $0x70] sm:$0xff]  }
 0x6b6   : > { %v8161_v15 = vsel %vm12692_vm9, %v8156_v44, %v8160_v50  ;;  %v8579_v8 = vcombine.low %v8133_v23, %v8147_v32  ;;  %v9109_v39 = vcombine.high %v10109_v29, %v10109_v29  ;;  %v8712_v57 = vrot.slane %v8697_v60, 7  ;;  %v11035_v63 = vld.sshfl [vmem:[#allocation3 + $0x4] sm:$0xf pattern:$0x76325410]  ;;  %v10911_v44 = vld [vmem:[%s13283_s5 + $0x88] sm:$0xff]  }
 0x6b7   : > { %v8168_v20 = vcombine.low %v8147_v32, %v8161_v15  ;;  %v8568_v24 = vrot.slane %v8567_v4, 2  ;;  %v8929_v42 = vcombine.high %v10098_v22, %v10098_v22  ;;  %v8975_v31 = vrot.slane %v8973_v54, 6  ;;  %v11036_v2 = vld.sshfl [vmem:[#allocation3 + $0x10] sm:$0xf pattern:$0x76325410] }
 0x6b8   : > { %10720 = vmatpush3.bf16.msra.mxu0 %v10899_v55  ;;  %v8978_v51 = vrot.slane %v8976_v1, 7  ;;  %v8587_v56 = vrot.slane %v8579_v8, %v11260_v0  ;;  %v10080_v53 = vrot.slane %v10076_v3, 9  ;;  %v10113_v16 = vrot.slane %v10109_v29, 9  ;;  %v10906_v22 = vld [vmem:[%s13283_s5 + $0x58] sm:$0xff]  }
 0x6b9   : > { %v13128_v30 = vrot.slane %v8168_v20, %v11260_v0  ;;  %v13135_v35 = vsel %vm12692_vm9, %v8568_v24, %v8572_v19  ;;  %10733 = vmatprep.subr.bf16.mxu0 %v11048_v46  ;;  %v9124_v36 = vrot.slane %v9109_v39, 7  ;;  %v8982_v38 = vshll.u32 %v8929_v42, 16  ;;  %v11037_v17 = vld.sshfl [vmem:[#allocation3 + $0x8] sm:$0xf pattern:$0x76325410] }
 0x6ba   : > { %v8580_v48 = vcombine.low %v8161_v15, %v13135_v35  ;;  %v8713_v58 = vsel %vm12687_vm14, %v10080_v53, %v8712_v57  ;;  %v8979_v7 = vor.u32 %v8978_v51, %v8975_v31  ;;  %v8415_v10 = vcombine.low %v11035_v63, %v11034_v14  ;;  %v10912_v18 = vld [vmem:[%s13283_s5 + $0x78] sm:$0xff]  }
 0x6bb   : > { %v8183_v21 = vcombine.low %v8175_v11, %v13128_v30  ;;  %v8720_v59 = vcombine.low %v13092_v5, %v8713_v58  ;;  %v9125_v43 = vsel %vm12687_vm14, %v10113_v16, %v9124_v36  ;;  %v8984_v45 = vrot.slane %v8982_v38, 7  ;;  %v10909_v5 = vld [vmem:[%s13283_s5 + $0x80] sm:$0xff]  }
 0x6bc   : > { %v8594_v6 = vrot.slane %v8580_v48, %v11260_v0  ;;  %v8980_v23 = vrot.slane %v8979_v7, 2  ;;  %v8719_v41 = vcombine.low %v13082_v28, %v13086_v47  ;;  %v8827_v52 = vcombine.low %v11037_v17, %v11036_v2 }
 0x6bd   : > { %10698 = vmatmul.mubr.msk.bf16.vlgmr.msra.gmra.mrb[88].mxu1 %vm886_vm3, %v8183_v21  ;;  %v8734_v62 = vrot.slane %v8720_v59, %v11260_v0  ;;  %v9132_v33 = vcombine.low %v8713_v58, %v9125_v43 }
 0x6be   : > { %10710 = vmatpush3.bf16.msra.mxu1 %v10898_v25  ;;  %10713 = vmatprep.mubr.msk.bf16.mxu1 %vm11049_vm13, %v11048_v46  ;;  %v8595_v26 = vcombine.low %v8587_v56, %v8594_v6  ;;  %v8985_v28 = vsel %vm12692_vm9, %v8980_v23, %v8984_v45  ;;  %v8727_v47 = vrot.slane %v8719_v41, %v11260_v0 }
 0x6bf   : > { %10711 = vmatprep.subr.bf16.mxu1 %v11048_v46  ;;  %v9146_v34 = vrot.slane %v9132_v33, %v11260_v0  ;;  %v8992_v9 = vcombine.low %v13135_v35, %v8985_v28 }
 0x6c0   : > { %10722 = vmatmul.mubr.msk.bf16.vlgmr.msra.gmra.mrb[96].mxu0 %vm886_vm3, %v8595_v26  ;;  %v8735_v50 = vcombine.low %v8727_v47, %v8734_v62 }
 0x6c1   : > { %10734 = vmatpush3.bf16.msra.mxu0 %v10903_v49  ;;  %10737 = vmatprep.mubr.msk.bf16.mxu0 %vm11049_vm13, %v11048_v46  ;;  %v9147_v32 = vcombine.low %v13104_v27, %v9146_v34  ;;  %v9006_v40 = vrot.slane %v8992_v9, %v11260_v0  ;;  %v10913_v0 = vld [vmem:[%s13284_s6] sm:$0xff]   ;;  %v10914_v27 = vld [vmem:[%s13284_s6 + $0x8] sm:$0xff]  }
 0x6c2   : > { %10712 = vmatpush3.bf16.msra.mxu1 %v10900_v61  ;;  %10735 = vmatprep.subr.bf16.mxu0 %v11048_v46 }
 0x6c3   : > { %10725 = vmatprep.subr.bf16.mxu1 %v11048_v46  ;;  %v9007_v55 = vcombine.low %v13128_v30, %v9006_v40 }
 0x6c5   : > { %10714 = vmatmul.mubr.msk.bf16.vlgmr.msra.gmra.mrb[92].mxu1 %vm886_vm3, %v8415_v10  ;;  %10736 = vmatpush3.bf16.msra.mxu0 %v10905_v13 }
 0x6c6   : > { %10726 = vmatpush3.bf16.msra.mxu1 %v10904_v37  ;;  %10729 = vmatprep.mubr.msk.bf16.mxu1 %vm11049_vm13, %v11048_v46 }
 0x6c7   : > { %10727 = vmatprep.subr.bf16.mxu1 %v11048_v46  ;;  %10749 = vmatprep.subr.bf16.mxu0 %v11048_v46 }
 0x6c8   : > { %10738 = vmatmul.mubr.msk.bf16.vlgmr.msra.gmra.mrb[100].mxu0 %vm886_vm3, %v8827_v52 }
 0x6c9   : > { %10750 = vmatpush3.bf16.msra.mxu0 %v10909_v5  ;;  %10753 = vmatprep.mubr.msk.bf16.mxu0 %vm11049_vm13, %v11048_v46 }
 0x6ca   : > { %10728 = vmatpush3.bf16.msra.mxu1 %v10906_v22  ;;  %10751 = vmatprep.subr.bf16.mxu0 %v11048_v46 }
 0x6cb   : > { %10741 = vmatprep.subr.bf16.mxu1 %v11048_v46 }
 0x6cd   : > { %10730 = vmatmul.mubr.msk.bf16.vlgmr.msra.gmra.mrb[96].mxu1 %vm886_vm3, %v8735_v50  ;;  %10752 = vmatpush3.bf16.msra.mxu0 %v10911_v44 }
 0x6ce   : > { %10742 = vmatpush3.bf16.msra.mxu1 %v10910_v12  ;;  %10745 = vmatprep.mubr.msk.bf16.mxu1 %vm11049_vm13, %v11048_v46 }
 0x6cf   : > { %10743 = vmatprep.subr.bf16.mxu1 %v11048_v46  ;;  %10765 = vmatprep.subr.bf16.mxu0 %v11048_v46 }
 0x6d0   : > { %10754 = vmatmul.mubr.msk.bf16.vlgmr.msra.gmra.mrb[104].mxu0 %vm886_vm3, %v9147_v32 }
 0x6d1   : > { %10769 = vmatprep.mubr.msk.bf16.mxu0 %vm11049_vm13, %v11048_v46 }
 0x6d2   : > { %10744 = vmatpush3.bf16.msra.mxu1 %v10912_v18 }
 0x6d3   : > { %10757 = vmatprep.subr.bf16.mxu1 %v11048_v46 }
 0x6d5   : > { %10746 = vmatmul.mubr.msk.bf16.vlgmr.msra.gmra.mrb[100].mxu1 %vm886_vm3, %v9007_v55 }
 0x6d6   : > { %10761 = vmatprep.mubr.msk.bf16.mxu1 %vm11049_vm13, %v11048_v46  ;;  %10758 = vmatpush3.bf16.msra.mxu1 %v10913_v0 }
 0x6d7   : > { %10759 = vmatprep.subr.bf16.mxu1 %v11048_v46 }
 0x6da   : > { %10760 = vmatpush3.bf16.msra.mxu1 %v10914_v27 }
 0x6db   : > { %10773 = vmatprep.subr.bf16.mxu1 %v11048_v46 }
 0x77c   : > { %v8057_v3 = vpop.f32.mrb[88].mxu0 }
 0x77d   : > { %8064 = vst.msk [vmem:[#allocation4] sm:$0xff] %vm886_vm3, %v8057_v3  ;;  %v10691_v15 = vpop.f32.mrb[89].mxu0 }
 0x77e   : > { %v8060_v4 = vpop.f32.mrb[90].mxu0 }
 0x77f   : > { %8065 = vst.msk [vmem:[#allocation4 + $0x8] sm:$0xff] %vm886_vm3, %v8060_v4  ;;  %v10692_v20 = vpop.f32.mrb[91].mxu0 }
 0x784   : > { %v8240_v1 = vld [vmem:[#allocation4] sm:$0xff] }
 0x786   : > { %v8373_v29 = vpop.f32.mrb[92].mxu0  ;;  %v8241_v25 = vld [vmem:[#allocation4 + $0x8] sm:$0xff] }
 0x787   : > { %v10707_v54 = vpop.f32.mrb[93].mxu0 }
 0x788   : > { %v8376_v24 = vpop.f32.mrb[94].mxu0  ;;  %v10121_v54 = vld [vmem:[%s13291_s13] ss:$0 sm:$0xff] }
 0x789   : > { %v10708_v19 = vpop.f32.mrb[95].mxu0 }
 0x790   : > { %v8233_v60 = vpop.f32.mrb[88].mxu1 }
 0x791   : > { %v8242_v11 = vadd.f32 %v8240_v1, %v8233_v60  ;;  %v10699_v30 = vpop.f32.mrb[89].mxu1 }
 0x792   : > { %v8236_v8 = vpop.f32.mrb[90].mxu1 }
 0x793   : > { %8244 = vst.msk [vmem:[#allocation4] sm:$0xff] %vm886_vm3, %v8242_v11  ;;  %v8243_v35 = vadd.f32 %v8241_v25, %v8236_v8  ;;  %v10700_v21 = vpop.f32.mrb[91].mxu1  ;;  %v8645_v48 = vpop.f32.mrb[96].mxu0 }
 0x794   : > { %v10723_v14 = vpop.f32.mrb[97].mxu0 }
 0x795   : > { %8245 = vst.msk [vmem:[#allocation4 + $0x8] sm:$0xff] %vm886_vm3, %v8243_v35  ;;  %v8648_v39 = vpop.f32.mrb[98].mxu0 }
 0x796   : > { %v10724_v57 = vpop.f32.mrb[99].mxu0 }
 0x798   : > { %v8465_v42 = vpop.f32.mrb[92].mxu1 }
 0x799   : > { %v10715_v31 = vpop.f32.mrb[93].mxu1 }
 0x79a   : > { %v8380_v51 = vld [vmem:[#allocation4] sm:$0xff]  ;;  %v8468_v56 = vpop.f32.mrb[94].mxu1 }
 0x79b   : > { %v8382_v6 = vadd.f32 %v8380_v51, %v8373_v29  ;;  %v10716_v63 = vpop.f32.mrb[95].mxu1  ;;  %v8877_v49 = vpop.f32.mrb[100].mxu0  ;;  %v10915_v51 = vld [vmem:[%s13285_s7] sm:$0xff]  }
 0x79c   : > { %v8381_v61 = vld [vmem:[#allocation4 + $0x8] sm:$0xff]  ;;  %v10739_v26 = vpop.f32.mrb[101].mxu0  ;;  %10766 = vmatpush3.bf16.msra.mxu0 %v10915_v51 }
 0x79d   : > { %8384 = vst.msk [vmem:[#allocation4] sm:$0xff] %vm886_vm3, %v8382_v6  ;;  %v8383_v53 = vadd.f32 %v8381_v61, %v8376_v24  ;;  %v8880_v2 = vpop.f32.mrb[102].mxu0  ;;  %10767 = vmatprep.subr.bf16.mxu0 %v11048_v46  ;;  %v10124_v6 = vld [vmem:[%s13292_s14] ss:$0 sm:$0xff] }
 0x79e   : > { %v10740_v16 = vpop.f32.mrb[103].mxu0 }
 0x79f   : > { %8385 = vst.msk [vmem:[#allocation4 + $0x8] sm:$0xff] %vm886_vm3, %v8383_v53 }
 0x7a0   : > { %v8785_v58 = vpop.f32.mrb[96].mxu1 }
 0x7a1   : > { %v10731_v36 = vpop.f32.mrb[97].mxu1 }
 0x7a2   : > { %v8788_v7 = vpop.f32.mrb[98].mxu1 }
 0x7a3   : > { %v10732_v38 = vpop.f32.mrb[99].mxu1  ;;  %v9197_v37 = vpop.f32.mrb[104].mxu0 }
 0x7a4   : > { %v8472_v17 = vld [vmem:[#allocation4] sm:$0xff]  ;;  %v10755_v10 = vpop.f32.mrb[105].mxu0 }
 0x7a5   : > { %v8474_v13 = vadd.f32 %v8472_v17, %v8465_v42  ;;  %v9200_v43 = vpop.f32.mrb[106].mxu0 }
 0x7a6   : > { %v8473_v59 = vld [vmem:[#allocation4 + $0x8] sm:$0xff]  ;;  %v10756_v45 = vpop.f32.mrb[107].mxu0 }
 0x7a7   : > { %8476 = vst.msk [vmem:[#allocation4] sm:$0xff] %vm886_vm3, %v8474_v13  ;;  %v8475_v23 = vadd.f32 %v8473_v59, %v8468_v56  ;;  %v10916_v56 = vld [vmem:[%s13285_s7 + $0x8] sm:$0xff]  }
 0x7a8   : > { %v9057_v41 = vpop.f32.mrb[100].mxu1  ;;  %10768 = vmatpush3.bf16.msra.mxu0 %v10916_v56 }
 0x7a9   : > { %8477 = vst.msk [vmem:[#allocation4 + $0x8] sm:$0xff] %vm886_vm3, %v8475_v23  ;;  %v10747_v22 = vpop.f32.mrb[101].mxu1  ;;  %v10130_v23 = vld [vmem:[%s13293_s15] ss:$0 sm:$0xff] }
 0x7aa   : > { %v9060_v5 = vpop.f32.mrb[102].mxu1 }
 0x7ab   : > { %v10748_v52 = vpop.f32.mrb[103].mxu1 }
 0x7ae   : > { %v8652_v62 = vld [vmem:[#allocation4] sm:$0xff] }
 0x7af   : > { %v8654_v33 = vadd.f32 %v8652_v62, %v8645_v48 }
 0x7b0   : > { %v8653_v28 = vld [vmem:[#allocation4 + $0x8] sm:$0xff] }
 0x7b1   : > { %8656 = vst.msk [vmem:[#allocation4] sm:$0xff] %vm886_vm3, %v8654_v33  ;;  %v8655_v47 = vadd.f32 %v8653_v28, %v8648_v39 }
 0x7b3   : > { %8657 = vst.msk [vmem:[#allocation4 + $0x8] sm:$0xff] %vm886_vm3, %v8655_v47 }
 0x7b8   : > { %v8792_v12 = vld [vmem:[#allocation4] sm:$0xff] }
 0x7b9   : > { %v8794_v44 = vadd.f32 %v8792_v12, %v8785_v58 }
 0x7ba   : > { %v8793_v50 = vld [vmem:[#allocation4 + $0x8] sm:$0xff] }
 0x7bb   : > { %8796 = vst.msk [vmem:[#allocation4] sm:$0xff] %vm886_vm3, %v8794_v44  ;;  %v8795_v34 = vadd.f32 %v8793_v50, %v8788_v7 }
 0x7bd   : > { %8797 = vst.msk [vmem:[#allocation4 + $0x8] sm:$0xff] %vm886_vm3, %v8795_v34 }
 0x7c2   : > { %v8884_v9 = vld [vmem:[#allocation4] sm:$0xff] }
 0x7c3   : > { %v8886_v18 = vadd.f32 %v8884_v9, %v8877_v49 }
 0x7c4   : > { %v8885_v32 = vld [vmem:[#allocation4 + $0x8] sm:$0xff] }
 0x7c5   : > { %8888 = vst.msk [vmem:[#allocation4] sm:$0xff] %vm886_vm3, %v8886_v18  ;;  %v8887_v40 = vadd.f32 %v8885_v32, %v8880_v2 }
 0x7c7   : > { %8889 = vst.msk [vmem:[#allocation4 + $0x8] sm:$0xff] %vm886_vm3, %v8887_v40 }
 0x7cc   : > { %v9064_v55 = vld [vmem:[#allocation4] sm:$0xff] }
 0x7cd   : > { %v9066_v0 = vadd.f32 %v9064_v55, %v9057_v41 }
 0x7ce   : > { %v9065_v27 = vld [vmem:[#allocation4 + $0x8] sm:$0xff] }
 0x7cf   : > { %9068 = vst.msk [vmem:[#allocation4] sm:$0xff] %vm886_vm3, %v9066_v0  ;;  %v9067_v3 = vadd.f32 %v9065_v27, %v9060_v5  ;;  %v9396_v0 = vld [vmem:[%s13286_s8] sm:$0x1] }
 0x7d1   : > { %9069 = vst.msk [vmem:[#allocation4 + $0x8] sm:$0xff] %vm886_vm3, %v9067_v3 }
 0x7d6   : > { %v9204_v15 = vld [vmem:[#allocation4] sm:$0xff] }
 0x7d7   : > { %v9206_v4 = vadd.f32 %v9204_v15, %v9197_v37 }
 0x7d8   : > { %v9205_v20 = vld [vmem:[#allocation4 + $0x8] sm:$0xff] }
 0x7d9   : > { %9208 = vst.msk [vmem:[#allocation4] sm:$0xff] %vm886_vm3, %v9206_v4  ;;  %v9207_v29 = vadd.f32 %v9205_v20, %v9200_v43  ;;  %v9397_v43 = vld [vmem:[%s13294_s16] sm:$0x3] }
 0x7da   : > { %9400 = vperm.xlu0 %10792, %v9397_v43  }
 0x7db   : > { %9209 = vst.msk [vmem:[#allocation4 + $0x8] sm:$0xff] %vm886_vm3, %v9207_v29 }
 0x7e0   : > { %v9211_v24 = vld [vmem:[#allocation4] sm:$0xff] }
 0x7e1   : > { %v9219_v19 = vadd.f32 %v10121_v54, %v9211_v24 }
 0x7e2   : > { %v9212_v60 = vld [vmem:[#allocation4 + $0x8] sm:$0xff] }
 0x7e3   : > { %v9223_v1 = vmin.f32 %v9219_v19, 0.0  ;;  %v9220_v11 = vadd.f32 %v10121_v54, %v9212_v60  ;;  %vm9221_vm5 = vcmp.gt.f32.partialorder %v9219_v19, 0.0 }
 0x7e5   : > { %v9225_v30 = vmul.f32 1.442695, %v9223_v1  ;;  %v9224_v8 = vmin.f32 %v9220_v11, 0.0  ;;  %vm9222_vm6 = vcmp.gt.f32.partialorder %v9220_v11, 0.0 }
 0x7e7   : > { %v9227_v25 = vmul.f32 1.442695, %v9224_v8  ;;  %11005 = vpow2.f32 %v9225_v30 }
 0x7e9   : > { %11007 = vpow2.f32 %v9227_v25 }
 0x7f1   : > { %v11006_v35 = vpop.eup %11005 }
 0x7f2   : > { %v10122_v21 = vadd.f32 -1.0, %v11006_v35 }
 0x7f3   : > { %v11008_v48 = vpop.eup %11007 }
 0x7f4   : > { %v10123_v14 = vadd.f32 -1.0, %v11008_v48  ;;  %v9231_v39 = vsel %vm9221_vm5, %v9219_v19, %v10122_v21 }
 0x7f6   : > { %v9232_v57 = vsel %vm9222_vm6, %v9220_v11, %v10123_v14 }
 0x7f7   : > { %v9233_v42 = vpack.c.bf16 %v9232_v57, %v9231_v39 }
 0x7f9   : > { %9234 = vst.msk [vmem:[#allocation5] sm:$0xff] %vm886_vm3, %v9233_v42 }
 0x800   : > { %v9235_v31 = vld [vmem:[#allocation5] sm:$0xff] }
 0x801   : > { %10762 = vmatmul.mubr.msk.bf16.vlgmr.msra.gmra.mrb[104].mxu1 %vm886_vm3, %v9235_v31 }
 0x802   : > { %10775 = vmatprep.mubr.msk.bf16.mxu1 %vm11049_vm13, %v11048_v46 }
 0x859   : > { %v9401_v27 = vpop.permute.xlu0 %9400 }
 0x8d4   : > { %v9296_v63 = vpop.f32.mrb[104].mxu1 }
 0x8d5   : > { %v9297_v61 = vadd.f32 %v10124_v6, %v9296_v63  ;;  %v10763_v49 = vpop.f32.mrb[105].mxu1 }
 0x8d6   : > { %v9299_v53 = vpop.f32.mrb[106].mxu1 }
 0x8d7   : > { %v9305_v26 = vmin.f32 %v9297_v61, 0.0  ;;  %v9300_v2 = vadd.f32 %v10124_v6, %v9299_v53  ;;  %v10764_v16 = vpop.f32.mrb[107].mxu1  ;;  %vm9303_vm13 = vcmp.gt.f32.partialorder %v9297_v61, 0.0 }
 0x8d9   : > { %v9307_v58 = vmul.f32 1.442695, %v9305_v26  ;;  %v9306_v36 = vmin.f32 %v9300_v2, 0.0  ;;  %vm9304_vm7 = vcmp.gt.f32.partialorder %v9300_v2, 0.0 }
 0x8db   : > { %11009 = vpow2.f32 %v9307_v58  ;;  %v9309_v7 = vmul.f32 1.442695, %v9306_v36 }
 0x8dd   : > { %11011 = vpow2.f32 %v9309_v7 }
 0x8e5   : > { %v11010_v38 = vpop.eup %11009 }
 0x8e6   : > { %v10128_v17 = vadd.f32 -1.0, %v11010_v38 }
 0x8e7   : > { %v11012_v46 = vpop.eup %11011 }
 0x8e8   : > { %v10129_v37 = vadd.f32 -1.0, %v11012_v46  ;;  %v9313_v13 = vsel %vm9303_vm13, %v9297_v61, %v10128_v17 }
 0x8ea   : > { %v9314_v10 = vsel %vm9304_vm7, %v9300_v2, %v10129_v37 }
 0x8eb   : > { %v9315_v59 = vpack.c.bf16 %v9314_v10, %v9313_v13 }
 0x8ed   : > { %10770 = vmatmul.mubr.msk.bf16.vlgmr.msra.gmra.mrb[108].mxu0 %vm886_vm3, %v9315_v59 }
 0x9c0   : > { %v9376_v45 = vpop.f32.mrb[108].mxu0 }
 0x9c1   : > { %v9377_v41 = vadd.f32 %v10130_v23, %v9376_v45  ;;  %v10771_v22 = vpop.f32.mrb[109].mxu0 }
 0x9c2   : > { %v9379_v5 = vpop.f32.mrb[110].mxu0 }
 0x9c3   : > { %v9385_v52 = vmin.f32 %v9377_v41, 0.0  ;;  %v9380_v62 = vadd.f32 %v10130_v23, %v9379_v5  ;;  %v10772_v33 = vpop.f32.mrb[111].mxu0  ;;  %vm9383_vm15 = vcmp.gt.f32.partialorder %v9377_v41, 0.0 }
 0x9c5   : > { %v9387_v28 = vmul.f32 1.442695, %v9385_v52  ;;  %v9386_v47 = vmin.f32 %v9380_v62, 0.0  ;;  %vm9384_vm8 = vcmp.gt.f32.partialorder %v9380_v62, 0.0 }
 0x9c7   : > { %11013 = vpow2.f32 %v9387_v28  ;;  %v9389_v12 = vmul.f32 1.442695, %v9386_v47 }
 0x9c9   : > { %11015 = vpow2.f32 %v9389_v12 }
 0x9d1   : > { %v11014_v44 = vpop.eup %11013 }
 0x9d2   : > { %v10134_v50 = vadd.f32 -1.0, %v11014_v44 }
 0x9d3   : > { %v11016_v34 = vpop.eup %11015 }
 0x9d4   : > { %v10135_v9 = vadd.f32 -1.0, %v11016_v34  ;;  %v9393_v18 = vsel %vm9383_vm15, %v9377_v41, %v10134_v50 }
 0x9d6   : > { %v9394_v32 = vsel %vm9384_vm8, %v9380_v62, %v10135_v9 }
 0x9d7   : > { %v9395_v40 = vpack.c.bf16 %v9394_v32, %v9393_v18 }
 0x9d9   : > { %v9407_v55 = vsel %vm886_vm3, %v9395_v40, 0 }
 0x9da   : > { %10774 = vmatpush3.bf16.xpose.msra.mxu1 %v9407_v55 }
 0x9e1   : > { %10776 = vmatmul.mubr.msk.bf16.vlgmr.msra.gmra.mrb[108].mxu1 %vm886_vm3, %v9396_v0 }
 0xab4   : > { %v9443_v3 = vpop.f32.mrb[108].mxu1 }
 0xab5   : > { %v9444_v15 = vadd.f32 %v9443_v3, %v9401_v27  ;;  %v10777_v4 = vpop.f32.mrb[109].mxu1 }
 0xab6   : > { %v9446_v20 = vpop.f32.mrb[110].mxu1 }
 0xab7   : > { %9450 = vst.msk [vmem:[%s546_s20] sm:$0x3] %vm9449_vm10, %v9444_v15  ;;  %v10778_v29 = vpop.f32.mrb[111].mxu1 }
 0xab8 PF: > { %s27_s24 = sadd.s32 1, %s11044_s24  }
 0xab9   : > { %p24_p4 = scmp.ge.s32.totalorder %s27_s24, 4  }
 0xabb   :  { %26 = sbr.rel (!%p24_p4) target bundleno = 3 (0x3), region = 154 }

</bundles_post_ra>
